<compile_context>
chip_gen: v7x
topology: tpu7x:2x2x1
jax: 0.10.0
libtpu: 0.0.40
codegen_flags: <defaults>
</compile_context>

<pallas_src>
import functools

import jax
import jax.numpy as jnp
from jax.experimental import pallas as pl
from jax.experimental.pallas import tpu as pltpu

VMEM = pltpu.MemorySpace.VMEM
BN_EPS = 1e-5
BASIC_BLOCK_EXPANSION = 1
LANE = 128                      # lane-dense channel padding target


def _round_up(x, m):
    return ((x + m - 1) // m) * m


@functools.lru_cache(maxsize=None)
def _budget():
    """Generation-aware tile ceilings / VMEM budget.

    128 MiB parts (v5e/v6e) get big tiles + 96 MiB scoped VMEM; 64 MiB parts
    (v7x) stay at tm/tk=512 and 48 MiB so double-buffered tiles never OOM.
    """
    vmem_bytes = 64 * 1024 * 1024
    try:
        vmem_bytes = int(getattr(pltpu.get_tpu_info(), "vmem_capacity_bytes",
                                 vmem_bytes))
    except Exception:
        pass
    if vmem_bytes >= 100 * 1024 * 1024:          # v5e / v6e (128 MiB VMEM)
        return {"tm": 1024, "tn": 512, "tk": 1024, "vmem": 96 * 1024 * 1024}
    return {"tm": 512, "tn": 512, "tk": 512, "vmem": 48 * 1024 * 1024}


def _pick_tile(size, max_tile, base=LANE):
    """Largest multiple of `base` <= max_tile dividing `size` (size % base == 0)."""
    if size <= max_tile:
        return size
    t = (max_tile // base) * base
    while t > base:
        if size % t == 0:
            return t
        t -= base
    return base


def _m_tile(m, tm_max):
    if m <= tm_max:
        mp = _round_up(m, 8)
        return mp, mp
    mp = _round_up(m, tm_max)
    return mp, tm_max


# ----------------------------- Pallas kernels ------------------------------

def matmul_stats_kernel(x_ref, w_ref, y_ref, stats_ref, acc_ref):
    # grid = (i: M tiles [parallel], j: Cout tiles [parallel], k: K tiles).
    # Per-(i, j) partial BN statistics are written at the last K step; the
    # reduction over M tiles happens in the apply pass, so both i and j can be
    # split across TensorCores (v7x megacore).
    k = pl.program_id(2)
    nk = pl.num_programs(2)

    prod = jnp.dot(x_ref[...], w_ref[...], preferred_element_type=jnp.float32)

    @pl.when(k == 0)
    def _():
        acc_ref[...] = prod

    @pl.when(k > 0)
    def _():
        acc_ref[...] += prod

    @pl.when(k == nk - 1)
    def _():
        acc = acc_ref[...]
        y_ref[...] = acc.astype(y_ref.dtype)
        col_sum = jnp.sum(acc, axis=0, keepdims=True)         # (1, tn)
        col_sq = jnp.sum(acc * acc, axis=0, keepdims=True)    # (1, tn)
        stats_ref[...] = jnp.concatenate([col_sum, col_sq], axis=0)[None]


def bn_apply_kernel(*refs, count, eps, relu, has_residual):
    if has_residual:
        y_ref, stats_ref, g_ref, b_ref, r_ref, o_ref = refs
    else:
        y_ref, stats_ref, g_ref, b_ref, o_ref = refs
        r_ref = None
    inv = 1.0 / count
    tot = jnp.sum(stats_ref[...], axis=0)        # reduce M-tile partials -> (2, tn)
    mean = tot[0:1, :] * inv
    var = jnp.maximum(tot[1:2, :] * inv - mean * mean, 0.0)
    scale = g_ref[...] * jax.lax.rsqrt(var + eps)
    shift = b_ref[...] - mean * scale
    y = y_ref[...].astype(jnp.float32) * scale + shift
    if has_residual:
        y = y + r_ref[...].astype(jnp.float32)
    if relu:
        y = jnp.maximum(y, 0.0)
    o_ref[...] = y.astype(o_ref.dtype)


def maxpool_kernel(*refs):
    o_ref = refs[-1]
    acc = refs[0][...]
    for r in refs[1:-1]:
        acc = jnp.maximum(acc, r[...])
    o_ref[...] = acc


def avgpool_kernel(x_ref, o_ref, *, inv_count):
    @pl.when(pl.program_id(1) == 0)
    def _():
        o_ref[...] = jnp.zeros_like(o_ref)
    o_ref[...] += jnp.sum(x_ref[...].astype(jnp.float32), axis=1)

    @pl.when(pl.program_id(1) == pl.num_programs(1) - 1)
    def _():
        o_ref[...] = o_ref[...] * inv_count


def linear_kernel(x_ref, w_ref, b_ref, o_ref):
    o_ref[...] = (jnp.dot(x_ref[...], w_ref[...],
                          preferred_element_type=jnp.float32) + b_ref[...])


# ------------------------------ JAX wrappers --------------------------------

def im2col(x, kh, kw, stride, padding):
    # x: (N, H, W, C) -> patches (N*Ho*Wo, kh*kw*C), layout (kh, kw, C).
    if padding:
        x = jnp.pad(x, ((0, 0), (padding, padding), (padding, padding), (0, 0)))
    n, h, w, c = x.shape
    ho = (h - kh) // stride + 1
    wo = (w - kw) // stride + 1
    cols = []
    for di in range(kh):
        for dj in range(kw):
            cols.append(jax.lax.slice(
                x, (0, di, dj, 0),
                (n, di + stride * (ho - 1) + 1, dj + stride * (wo - 1) + 1, c),
                (1, stride, stride, 1)))
    patches = jnp.concatenate(cols, axis=-1)
    return patches.reshape(n * ho * wo, kh * kw * c), (n, ho, wo)


def conv_bn(x, w, gamma, beta, *, stride, padding, relu, residual=None):
    """Fused conv -> BatchNorm(batch stats) [-> +residual] [-> ReLU].

    x: (N, H, W, C) NHWC (possibly lane-padded channels).
    Returns (N, Ho, Wo, round_up(Cout, 128)) bf16 with zero-padded channels.
    """
    cout, cin, kh, kw = w.shape
    bud = _budget()

    # Drop lane-padding channels BEFORE building patches: K holds true Cin only
    # (no zero-padded MXU work / patch bytes for the 64-channel stage).
    x = x[..., :cin].astype(jnp.bfloat16)
    # TODO(synk): a direct halo-windowed conv kernel (taps gathered in-VMEM)
    # would avoid materializing the kh*kw-fold im2col patch matrix in HBM.
    patches, (n, ho, wo) = im2col(x, kh, kw, stride, padding)
    m, k_dim = patches.shape

    np_ = _round_up(cout, LANE)             # lane-dense Cout (>= 128)
    kp = _round_up(k_dim, LANE)             # K padded once to a 128 multiple
    mp, tm = _m_tile(m, bud["tm"])
    tn = _pick_tile(np_, bud["tn"])         # tn == np_ for every ResNet stage
    tk = _pick_tile(kp, bud["tk"])
    ni, nj, nk = mp // tm, np_ // tn, kp // tk

    patches = jnp.pad(patches, ((0, mp - m), (0, kp - k_dim)))
    wmat = jnp.transpose(w, (2, 3, 1, 0)).reshape(k_dim, cout)
    wmat = jnp.pad(wmat, ((0, kp - k_dim), (0, np_ - cout))).astype(jnp.bfloat16)
    g2 = jnp.pad(gamma, (0, np_ - cout)).reshape(1, np_).astype(jnp.float32)
    b2 = jnp.pad(beta, (0, np_ - cout)).reshape(1, np_).astype(jnp.float32)

    # ---- pass 1: tiled matmul (f32 acc) + per-M-tile partial BN stats ----
    y, stats = pl.pallas_call(
        matmul_stats_kernel,
        out_shape=(jax.ShapeDtypeStruct((mp, np_), jnp.bfloat16),
                   jax.ShapeDtypeStruct((ni, 2, np_), jnp.float32)),
        grid_spec=pltpu.PrefetchScalarGridSpec(
            num_scalar_prefetch=0,
            grid=(ni, nj, nk),
            in_specs=[pl.BlockSpec((tm, tk), lambda i, j, k: (i, k)),
                      pl.BlockSpec((tk, tn), lambda i, j, k: (k, j))],
            out_specs=[pl.BlockSpec((tm, tn), lambda i, j, k: (i, j)),
                       pl.BlockSpec((1, 2, tn), lambda i, j, k: (i, 0, j))],
            scratch_shapes=[pltpu.VMEM((tm, tn), jnp.float32)]),
        compiler_params=pltpu.CompilerParams(
            dimension_semantics=("parallel", "parallel", "arbitrary"),
            vmem_limit_bytes=bud["vmem"]),
    )(patches, wmat)

    # ---- pass 2: reduce stats partials + BN apply (+ residual) (+ ReLU) ----
    # j (Cout tiles) is the OUTER grid axis so the stats/gamma/beta blocks keep
    # the same block index across the inner M sweep (no re-fetch).
    has_res = residual is not None
    args = [y, stats, g2, b2]
    in_specs = [pl.BlockSpec((tm, tn), lambda j, i: (i, j)),
                pl.BlockSpec((ni, 2, tn), lambda j, i: (0, 0, j)),
                pl.BlockSpec((1, tn), lambda j, i: (0, j)),
                pl.BlockSpec((1, tn), lambda j, i: (0, j))]
    if has_res:
        r2 = residual.reshape(m, np_).astype(jnp.bfloat16)
        r2 = jnp.pad(r2, ((0, mp - m), (0, 0)))
        args.append(r2)
        in_specs.append(pl.BlockSpec((tm, tn), lambda j, i: (i, j)))

    out = pl.pallas_call(
        functools.partial(bn_apply_kernel, count=float(m), eps=BN_EPS,
                          relu=relu, has_residual=has_res),
        out_shape=jax.ShapeDtypeStruct((mp, np_), jnp.bfloat16),
        grid=(nj, ni),
        in_specs=in_specs,
        out_specs=pl.BlockSpec((tm, tn), lambda j, i: (i, j)),
        compiler_params=pltpu.CompilerParams(
            dimension_semantics=("parallel", "parallel"),
            vmem_limit_bytes=bud["vmem"]),
    )(*args)

    return out[:m].reshape(n, ho, wo, np_)


def maxpool2d(x, ksize, stride):
    # Tiled running-max over the ksize*ksize taps (bf16: half the HBM traffic
    # of the old f32 path).  Correct with lane-padded channels because the
    # input is post-ReLU (padded lanes are exactly 0, real values >= 0).
    # TODO(synk): halo-windowed in-kernel taps would avoid materializing the
    # strided tap slices in HBM.
    n, h, w, c = x.shape
    ho = (h - ksize) // stride + 1
    wo = (w - ksize) // stride + 1
    m = n * ho * wo
    bud = _budget()
    mp, tm = _m_tile(m, bud["tm"])
    taps = []
    for di in range(ksize):
        for dj in range(ksize):
            t = jax.lax.slice(
                x, (0, di, dj, 0),
                (n, di + stride * (ho - 1) + 1, dj + stride * (wo - 1) + 1, c),
                (1, stride, stride, 1)).reshape(m, c)
            taps.append(jnp.pad(t, ((0, mp - m), (0, 0))))
    out = pl.pallas_call(
        maxpool_kernel,
        out_shape=jax.ShapeDtypeStruct((mp, c), x.dtype),
        grid=(mp // tm,),
        in_specs=[pl.BlockSpec((tm, c), lambda i: (i, 0))] * (ksize * ksize),
        out_specs=pl.BlockSpec((tm, c), lambda i: (i, 0)),
        compiler_params=pltpu.CompilerParams(
            dimension_semantics=("parallel",),
            vmem_limit_bytes=bud["vmem"]),
    )(*taps)
    return out[:m].reshape(n, ho, wo, c)


def adaptive_avgpool_flatten(x):
    # (N, H, W, C) -> (N, C): tiled f32 reduction over H*W, blocked over batch
    # so large N stays within the 64 MiB v7x VMEM.
    n, h, w, c = x.shape
    hw = h * w
    bud = _budget()
    x = x.reshape(n, hw, c)
    tb = min(8, n)
    nb = _round_up(n, tb)
    t_hw = min(512, _round_up(hw, 8))
    hw_p = _round_up(hw, t_hw)
    if nb != n or hw_p != hw:
        x = jnp.pad(x, ((0, nb - n), (0, hw_p - hw), (0, 0)))
    out = pl.pallas_call(
        functools.partial(avgpool_kernel, inv_count=1.0 / hw),
        out_shape=jax.ShapeDtypeStruct((nb, c), jnp.float32),
        grid=(nb // tb, hw_p // t_hw),
        in_specs=[pl.BlockSpec((tb, t_hw, c), lambda b, i: (b, i, 0))],
        out_specs=pl.BlockSpec((tb, c), lambda b, i: (b, 0)),
        compiler_params=pltpu.CompilerParams(
            dimension_semantics=("parallel", "arbitrary"),
            vmem_limit_bytes=bud["vmem"]),
    )(x)
    return out[:n]


def linear(x, w, b):
    # Tiny fc head: whole-array VMEM blocks are fine here.
    return pl.pallas_call(
        linear_kernel,
        out_shape=jax.ShapeDtypeStruct((x.shape[0], w.shape[1]), jnp.float32),
        in_specs=[pl.BlockSpec(memory_space=VMEM)] * 3,
        out_specs=pl.BlockSpec(memory_space=VMEM),
        compiler_params=pltpu.CompilerParams(vmem_limit_bytes=_budget()["vmem"]),
    )(x.astype(jnp.bfloat16), w.astype(jnp.bfloat16),
      b.reshape(1, -1).astype(jnp.float32))


# --------------------------- parameters / model -----------------------------

def _conv_w(key, cout, cin, kh, kw):
    fan_in = cin * kh * kw
    return jax.random.normal(key, (cout, cin, kh, kw), jnp.float32) * (2.0 / fan_in) ** 0.5


def _bn(key, c):
    k1, k2 = jax.random.split(key)
    gamma = 1.0 + 0.1 * jax.random.normal(k1, (c,), jnp.float32)
    beta = 0.1 * jax.random.normal(k2, (c,), jnp.float32)
    return gamma, beta


def init_resnet_params(key, block_nums, num_classes):
    params = {}
    key, k = jax.random.split(key)
    params["conv1_w"] = _conv_w(k, 64, 3, 7, 7)          # Conv2d(3, 64, 7, stride=2)
    key, k = jax.random.split(key)
    params["bn1_g"], params["bn1_b"] = _bn(k, 64)

    in_ch = 64
    layers = []
    for layer_dim, n_blocks, stride0 in zip((64, 128, 256, 512), block_nums, (1, 2, 2, 2)):
        stage_blocks = []
        stride = stride0
        for _ in range(n_blocks):
            blk = {"stride": stride}
            key, k = jax.random.split(key)
            blk["conv1_w"] = _conv_w(k, layer_dim, in_ch, 3, 3)
            key, k = jax.random.split(key)
            blk["bn1_g"], blk["bn1_b"] = _bn(k, layer_dim)
            key, k = jax.random.split(key)
            blk["conv2_w"] = _conv_w(k, layer_dim, layer_dim, 3, 3)
            key, k = jax.random.split(key)
            blk["bn2_g"], blk["bn2_b"] = _bn(k, layer_dim)
            out_ch = layer_dim * BASIC_BLOCK_EXPANSION
            if stride != 1 or in_ch != out_ch:
                key, k = jax.random.split(key)
                blk["down_w"] = _conv_w(k, out_ch, in_ch, 1, 1)
                key, k = jax.random.split(key)
                blk["down_g"], blk["down_b"] = _bn(k, out_ch)
            stage_blocks.append(blk)
            in_ch = out_ch
            stride = 1
        layers.append(stage_blocks)
    params["layers"] = layers

    key, k1, k2 = jax.random.split(key, 3)
    params["fc_w"] = jax.random.normal(k1, (in_ch, num_classes), jnp.float32) / (in_ch ** 0.5)
    params["fc_b"] = 0.1 * jax.random.normal(k2, (num_classes,), jnp.float32)
    return params


def basic_block_forward(x, blk):
    s = blk["stride"]
    out = conv_bn(x, blk["conv1_w"], blk["bn1_g"], blk["bn1_b"],
                  stride=s, padding=1, relu=True)
    if "down_w" in blk:
        identity = conv_bn(x, blk["down_w"], blk["down_g"], blk["down_b"],
                           stride=s, padding=0, relu=False)
    else:
        identity = x
    # second conv of the block fuses BN + residual add + ReLU in its apply pass
    return conv_bn(out, blk["conv2_w"], blk["bn2_g"], blk["bn2_b"],
                   stride=1, padding=1, relu=True, residual=identity)


def resnet_forward(params, x_nchw):
    x = jnp.transpose(x_nchw, (0, 2, 3, 1))                     # NCHW -> NHWC
    x = conv_bn(x, params["conv1_w"], params["bn1_g"], params["bn1_b"],
                stride=2, padding=0, relu=True)                 # conv1 (padding=0 per spec) + bn + relu
    x = maxpool2d(x, 3, 2)                                      # MaxPool2d(3, stride=2)
    for stage in params["layers"]:                              # conv2, conv3_x, conv4_x, conv5_x
        for blk in stage:
            x = basic_block_forward(x, blk)
    x = adaptive_avgpool_flatten(x)                             # AdaptiveAvgPool2d((1,1)) + flatten
    x = x[:, :params["fc_w"].shape[0]]                          # drop lane-padding channels
    # TODO(synk): reference applies fc to (N,C,1,1) without flatten (would error in torch).
    return linear(x, params["fc_w"], params["fc_b"])            # fc


if __name__ == "__main__":
    key = jax.random.PRNGKey(0)
    key, xk, pk = jax.random.split(key, 3)
    x = jax.random.normal(xk, (2, 3, 34, 34), jnp.float32)      # NCHW, like PyTorch
    params = init_resnet_params(pk, block_nums=(1, 1, 1, 1), num_classes=10)
    fwd = jax.jit(lambda inp: resnet_forward(params, inp))      # params closed over -> strides stay static
    logits = fwd(x)
    jax.block_until_ready(logits)
    assert logits.shape == (2, 10)
    print("KERNEL_OK")
</pallas_src>

<mosaic_0001>
module attributes {stable_mosaic.version = 11 : i64} {
  func.func @matmul_stats_kernel(%arg0: i32, %arg1: i32, %arg2: i32, %arg3: memref<392x256xbf16, #tpu.memory_space<vmem>>, %arg4: memref<256x128xbf16, #tpu.memory_space<vmem>>, %arg5: memref<392x128xbf16, #tpu.memory_space<vmem>>, %arg6: memref<1x2x128xf32, #tpu.memory_space<vmem>>, %arg7: memref<392x128xf32, #tpu.memory_space<vmem>>) attributes {dimension_semantics = [#tpu.dimension_semantics<parallel>, #tpu.dimension_semantics<parallel>, #tpu.dimension_semantics<arbitrary>], iteration_bounds = array<i64: 1, 1, 1>, scalar_prefetch = 0 : i64, scratch_operands = 1 : i64, tpu.core_type = #tpu.core_type<tc>, window_params = [{transform_indices = @transform_0, window_bounds = array<i64: 392, 256>}, {transform_indices = @transform_1, window_bounds = array<i64: 256, 128>}, {transform_indices = @transform_2, window_bounds = array<i64: 392, 128>}, {transform_indices = @transform_3, window_bounds = array<i64: 1, 2, 128>}]} {
    %c0 = arith.constant 0 : index
    %c0_0 = arith.constant 0 : index
    %0 = vector.load %arg3[%c0, %c0_0] : memref<392x256xbf16, #tpu.memory_space<vmem>>, vector<392x256xbf16>
    %c0_1 = arith.constant 0 : index
    %c0_2 = arith.constant 0 : index
    %1 = vector.load %arg4[%c0_1, %c0_2] : memref<256x128xbf16, #tpu.memory_space<vmem>>, vector<256x128xbf16>
    %cst = arith.constant dense<0.000000e+00> : vector<392x128xf32>
    %2 = tpu.matmul %0, %1, %cst {dimension_numbers = #tpu.dot_dimension_numbers<[1], [0], [0], [1], [0, 0, 1, 1], [], []>} : vector<392x256xbf16>, vector<256x128xbf16>, vector<392x128xf32> -> vector<392x128xf32>
    %c0_i32 = arith.constant 0 : i32
    %3 = arith.cmpi eq, %arg2, %c0_i32 : i32
    %4 = arith.extui %3 : i1 to i32
    %c0_i32_3 = arith.constant 0 : i32
    %5 = arith.cmpi ne, %4, %c0_i32_3 : i32
    scf.if %5 {
      %c0_8 = arith.constant 0 : index
      %c0_9 = arith.constant 0 : index
      %12 = vector.load %arg7[%c0_8, %c0_9] : memref<392x128xf32, #tpu.memory_space<vmem>>, vector<392x128xf32>
      tpu.vector_store %arg7[%c0_8, %c0_9], %2 {strides = array<i32>} : memref<392x128xf32, #tpu.memory_space<vmem>>, vector<392x128xf32>,
    } else {
    }
    %c0_i32_4 = arith.constant 0 : i32
    %6 = arith.cmpi sgt, %arg2, %c0_i32_4 : i32
    %7 = arith.extui %6 : i1 to i32
    %c0_i32_5 = arith.constant 0 : i32
    %8 = arith.cmpi ne, %7, %c0_i32_5 : i32
    scf.if %8 {
      %c0_8 = arith.constant 0 : index
      %c0_9 = arith.constant 0 : index
      %12 = vector.load %arg7[%c0_8, %c0_9] : memref<392x128xf32, #tpu.memory_space<vmem>>, vector<392x128xf32>
      %13 = arith.addf %12, %2 : vector<392x128xf32>
      %c0_10 = arith.constant 0 : index
      %c0_11 = arith.constant 0 : index
      %14 = vector.load %arg7[%c0_10, %c0_11] : memref<392x128xf32, #tpu.memory_space<vmem>>, vector<392x128xf32>
      tpu.vector_store %arg7[%c0_10, %c0_11], %13 {strides = array<i32>} : memref<392x128xf32, #tpu.memory_space<vmem>>, vector<392x128xf32>,
    } else {
    }
    %c0_i32_6 = arith.constant 0 : i32
    %9 = arith.cmpi eq, %arg2, %c0_i32_6 : i32
    %10 = arith.extui %9 : i1 to i32
    %c0_i32_7 = arith.constant 0 : i32
    %11 = arith.cmpi ne, %10, %c0_i32_7 : i32
    scf.if %11 {
      %c0_8 = arith.constant 0 : index
      %c0_9 = arith.constant 0 : index
      %12 = vector.load %arg7[%c0_8, %c0_9] : memref<392x128xf32, #tpu.memory_space<vmem>>, vector<392x128xf32>
      %13 = arith.truncf %12 : vector<392x128xf32> to vector<392x128xbf16>
      %c0_10 = arith.constant 0 : index
      %c0_11 = arith.constant 0 : index
      %14 = vector.load %arg5[%c0_10, %c0_11] : memref<392x128xbf16, #tpu.memory_space<vmem>>, vector<392x128xbf16>
      tpu.vector_store %arg5[%c0_10, %c0_11], %13 {strides = array<i32>} : memref<392x128xbf16, #tpu.memory_space<vmem>>, vector<392x128xbf16>,
      %cst_12 = arith.constant dense<0.000000e+00> : vector<128xf32>
      %15 = vector.multi_reduction <add>, %12, %cst_12 [0] : vector<392x128xf32> to vector<128xf32>
      %16 = vector.shape_cast %15 : vector<128xf32> to vector<1x128xf32>
      %17 = arith.mulf %12, %12 : vector<392x128xf32>
      %cst_13 = arith.constant dense<0.000000e+00> : vector<128xf32>
      %18 = vector.multi_reduction <add>, %17, %cst_13 [0] : vector<392x128xf32> to vector<128xf32>
      %19 = vector.shape_cast %18 : vector<128xf32> to vector<1x128xf32>
      %20 = tpu.concatenate %16, %19 in 0 : vector<1x128xf32>, vector<1x128xf32> -> vector<2x128xf32>
      %21 = vector.shape_cast %20 : vector<2x128xf32> to vector<1x2x128xf32>
      %c0_14 = arith.constant 0 : index
      %c0_15 = arith.constant 0 : index
      %c0_16 = arith.constant 0 : index
      %22 = vector.load %arg6[%c0_14, %c0_15, %c0_16] : memref<1x2x128xf32, #tpu.memory_space<vmem>>, vector<1x2x128xf32>
      tpu.vector_store %arg6[%c0_14, %c0_15, %c0_16], %21 {strides = array<i32>} : memref<1x2x128xf32, #tpu.memory_space<vmem>>, vector<1x2x128xf32>,
    } else {
    }
    return
  }
  func.func @transform_0(%arg0: i32, %arg1: i32, %arg2: i32) -> (i32, i32) {
    %c0_i32 = arith.constant 0 : i32
    return %arg0, %arg2 : i32, i32
  }
  func.func @transform_1(%arg0: i32, %arg1: i32, %arg2: i32) -> (i32, i32) {
    %c0_i32 = arith.constant 0 : i32
    return %arg2, %arg1 : i32, i32
  }
  func.func @transform_2(%arg0: i32, %arg1: i32, %arg2: i32) -> (i32, i32) {
    %c0_i32 = arith.constant 0 : i32
    return %arg0, %arg1 : i32, i32
  }
  func.func @transform_3(%arg0: i32, %arg1: i32, %arg2: i32) -> (i32, i32, i32) {
    %c0_i32 = arith.constant 0 : i32
    %c0_i32_0 = arith.constant 0 : i32
    return %arg0, %c0_i32, %arg1 : i32, i32, i32
  }
}

module attributes {stable_mosaic.version = 11 : i64} {
  func.func @bn_apply_kernel(%arg0: i32, %arg1: i32, %arg2: memref<392x128xbf16, #tpu.memory_space<vmem>>, %arg3: memref<1x2x128xf32, #tpu.memory_space<vmem>>, %arg4: memref<1x128xf32, #tpu.memory_space<vmem>>, %arg5: memref<1x128xf32, #tpu.memory_space<vmem>>, %arg6: memref<392x128xbf16, #tpu.memory_space<vmem>>) attributes {dimension_semantics = [#tpu.dimension_semantics<parallel>, #tpu.dimension_semantics<parallel>], iteration_bounds = array<i64: 1, 1>, scalar_prefetch = 0 : i64, scratch_operands = 0 : i64, tpu.core_type = #tpu.core_type<tc>, window_params = [{transform_indices = @transform_0, window_bounds = array<i64: 392, 128>}, {transform_indices = @transform_1, window_bounds = array<i64: 1, 2, 128>}, {transform_indices = @transform_2, window_bounds = array<i64: 1, 128>}, {transform_indices = @transform_3, window_bounds = array<i64: 1, 128>}, {transform_indices = @transform_4, window_bounds = array<i64: 392, 128>}]} {
    %c0 = arith.constant 0 : index
    %c0_0 = arith.constant 0 : index
    %c0_1 = arith.constant 0 : index
    %0 = vector.load %arg3[%c0, %c0_0, %c0_1] : memref<1x2x128xf32, #tpu.memory_space<vmem>>, vector<1x2x128xf32>
    %cst = arith.constant dense<0.000000e+00> : vector<2x128xf32>
    %1 = vector.multi_reduction <add>, %0, %cst [0] : vector<1x2x128xf32> to vector<2x128xf32>
    %2 = vector.extract_strided_slice %1 {offsets = [0, 0], sizes = [1, 128], strides = [1, 1]} : vector<2x128xf32> to vector<1x128xf32>
    %cst_2 = arith.constant 0.00255102036 : f32
    %3 = vector.broadcast %cst_2 : f32 to vector<1x128xf32>
    %4 = arith.mulf %2, %3 : vector<1x128xf32>
    %5 = vector.extract_strided_slice %1 {offsets = [1, 0], sizes = [1, 128], strides = [1, 1]} : vector<2x128xf32> to vector<1x128xf32>
    %cst_3 = arith.constant 0.00255102036 : f32
    %6 = vector.broadcast %cst_3 : f32 to vector<1x128xf32>
    %7 = arith.mulf %5, %6 : vector<1x128xf32>
    %8 = arith.mulf %4, %4 : vector<1x128xf32>
    %9 = arith.subf %7, %8 : vector<1x128xf32>
    %cst_4 = arith.constant 0.000000e+00 : f32
    %10 = vector.broadcast %cst_4 : f32 to vector<1x128xf32>
    %11 = arith.maximumf %9, %10 : vector<1x128xf32>
    %c0_5 = arith.constant 0 : index
    %c0_6 = arith.constant 0 : index
    %12 = vector.load %arg4[%c0_5, %c0_6] : memref<1x128xf32, #tpu.memory_space<vmem>>, vector<1x128xf32>
    %cst_7 = arith.constant 9.99999974E-6 : f32
    %13 = vector.broadcast %cst_7 : f32 to vector<1x128xf32>
    %14 = arith.addf %11, %13 : vector<1x128xf32>
    %15 = math.rsqrt %14 : vector<1x128xf32>
    %16 = arith.mulf %12, %15 : vector<1x128xf32>
    %c0_8 = arith.constant 0 : index
    %c0_9 = arith.constant 0 : index
    %17 = vector.load %arg5[%c0_8, %c0_9] : memref<1x128xf32, #tpu.memory_space<vmem>>, vector<1x128xf32>
    %18 = arith.mulf %4, %16 : vector<1x128xf32>
    %19 = arith.subf %17, %18 : vector<1x128xf32>
    %c0_10 = arith.constant 0 : index
    %c0_11 = arith.constant 0 : index
    %20 = vector.load %arg2[%c0_10, %c0_11] : memref<392x128xbf16, #tpu.memory_space<vmem>>, vector<392x128xbf16>
    %21 = arith.extf %20 : vector<392x128xbf16> to vector<392x128xf32>
    %22 = vector.broadcast %16 : vector<1x128xf32> to vector<392x128xf32>
    %23 = arith.mulf %21, %22 : vector<392x128xf32>
    %24 = vector.broadcast %19 : vector<1x128xf32> to vector<392x128xf32>
    %25 = arith.addf %23, %24 : vector<392x128xf32>
    %cst_12 = arith.constant 0.000000e+00 : f32
    %26 = vector.broadcast %cst_12 : f32 to vector<392x128xf32>
    %27 = arith.maximumf %25, %26 : vector<392x128xf32>
    %28 = arith.truncf %27 : vector<392x128xf32> to vector<392x128xbf16>
    %c0_13 = arith.constant 0 : index
    %c0_14 = arith.constant 0 : index
    %29 = vector.load %arg6[%c0_13, %c0_14] : memref<392x128xbf16, #tpu.memory_space<vmem>>, vector<392x128xbf16>
    tpu.vector_store %arg6[%c0_13, %c0_14], %28 {strides = array<i32>} : memref<392x128xbf16, #tpu.memory_space<vmem>>, vector<392x128xbf16>,
    return
  }
  func.func @transform_0(%arg0: i32, %arg1: i32) -> (i32, i32) {
    %c0_i32 = arith.constant 0 : i32
    return %arg1, %arg0 : i32, i32
  }
  func.func @transform_1(%arg0: i32, %arg1: i32) -> (i32, i32, i32) {
    %c0_i32 = arith.constant 0 : i32
    %c0_i32_0 = arith.constant 0 : i32
    %c0_i32_1 = arith.constant 0 : i32
    return %c0_i32, %c0_i32_0, %arg0 : i32, i32, i32
  }
  func.func @transform_2(%arg0: i32, %arg1: i32) -> (i32, i32) {
    %c0_i32 = arith.constant 0 : i32
    %c0_i32_0 = arith.constant 0 : i32
    return %c0_i32, %arg0 : i32, i32
  }
  func.func @transform_3(%arg0: i32, %arg1: i32) -> (i32, i32) {
    %c0_i32 = arith.constant 0 : i32
    %c0_i32_0 = arith.constant 0 : i32
    return %c0_i32, %arg0 : i32, i32
  }
  func.func @transform_4(%arg0: i32, %arg1: i32) -> (i32, i32) {
    %c0_i32 = arith.constant 0 : i32
    return %arg1, %arg0 : i32, i32
  }
}

module attributes {stable_mosaic.version = 11 : i64} {
  func.func @maxpool_kernel(%arg0: i32, %arg1: memref<72x128xbf16, #tpu.memory_space<vmem>>, %arg2: memref<72x128xbf16, #tpu.memory_space<vmem>>, %arg3: memref<72x128xbf16, #tpu.memory_space<vmem>>, %arg4: memref<72x128xbf16, #tpu.memory_space<vmem>>, %arg5: memref<72x128xbf16, #tpu.memory_space<vmem>>, %arg6: memref<72x128xbf16, #tpu.memory_space<vmem>>, %arg7: memref<72x128xbf16, #tpu.memory_space<vmem>>, %arg8: memref<72x128xbf16, #tpu.memory_space<vmem>>, %arg9: memref<72x128xbf16, #tpu.memory_space<vmem>>, %arg10: memref<72x128xbf16, #tpu.memory_space<vmem>>) attributes {dimension_semantics = [#tpu.dimension_semantics<parallel>], iteration_bounds = array<i64: 1>, scalar_prefetch = 0 : i64, scratch_operands = 0 : i64, tpu.core_type = #tpu.core_type<tc>, window_params = [{transform_indices = @transform_0, window_bounds = array<i64: 72, 128>}, {transform_indices = @transform_1, window_bounds = array<i64: 72, 128>}, {transform_indices = @transform_2, window_bounds = array<i64: 72, 128>}, {transform_indices = @transform_3, window_bounds = array<i64: 72, 128>}, {transform_indices = @transform_4, window_bounds = array<i64: 72, 128>}, {transform_indices = @transform_5, window_bounds = array<i64: 72, 128>}, {transform_indices = @transform_6, window_bounds = array<i64: 72, 128>}, {transform_indices = @transform_7, window_bounds = array<i64: 72, 128>}, {transform_indices = @transform_8, window_bounds = array<i64: 72, 128>}, {transform_indices = @transform_9, window_bounds = array<i64: 72, 128>}]} {
    %c0 = arith.constant 0 : index
    %c0_0 = arith.constant 0 : index
    %0 = vector.load %arg1[%c0, %c0_0] : memref<72x128xbf16, #tpu.memory_space<vmem>>, vector<72x128xbf16>
    %c0_1 = arith.constant 0 : index
    %c0_2 = arith.constant 0 : index
    %1 = vector.load %arg2[%c0_1, %c0_2] : memref<72x128xbf16, #tpu.memory_space<vmem>>, vector<72x128xbf16>
    %2 = arith.maximumf %0, %1 : vector<72x128xbf16>
    %c0_3 = arith.constant 0 : index
    %c0_4 = arith.constant 0 : index
    %3 = vector.load %arg3[%c0_3, %c0_4] : memref<72x128xbf16, #tpu.memory_space<vmem>>, vector<72x128xbf16>
    %4 = arith.maximumf %2, %3 : vector<72x128xbf16>
    %c0_5 = arith.constant 0 : index
    %c0_6 = arith.constant 0 : index
    %5 = vector.load %arg4[%c0_5, %c0_6] : memref<72x128xbf16, #tpu.memory_space<vmem>>, vector<72x128xbf16>
    %6 = arith.maximumf %4, %5 : vector<72x128xbf16>
    %c0_7 = arith.constant 0 : index
    %c0_8 = arith.constant 0 : index
    %7 = vector.load %arg5[%c0_7, %c0_8] : memref<72x128xbf16, #tpu.memory_space<vmem>>, vector<72x128xbf16>
    %8 = arith.maximumf %6, %7 : vector<72x128xbf16>
    %c0_9 = arith.constant 0 : index
    %c0_10 = arith.constant 0 : index
    %9 = vector.load %arg6[%c0_9, %c0_10] : memref<72x128xbf16, #tpu.memory_space<vmem>>, vector<72x128xbf16>
    %10 = arith.maximumf %8, %9 : vector<72x128xbf16>
    %c0_11 = arith.constant 0 : index
    %c0_12 = arith.constant 0 : index
    %11 = vector.load %arg7[%c0_11, %c0_12] : memref<72x128xbf16, #tpu.memory_space<vmem>>, vector<72x128xbf16>
    %12 = arith.maximumf %10, %11 : vector<72x128xbf16>
    %c0_13 = arith.constant 0 : index
    %c0_14 = arith.constant 0 : index
    %13 = vector.load %arg8[%c0_13, %c0_14] : memref<72x128xbf16, #tpu.memory_space<vmem>>, vector<72x128xbf16>
    %14 = arith.maximumf %12, %13 : vector<72x128xbf16>
    %c0_15 = arith.constant 0 : index
    %c0_16 = arith.constant 0 : index
    %15 = vector.load %arg9[%c0_15, %c0_16] : memref<72x128xbf16, #tpu.memory_space<vmem>>, vector<72x128xbf16>
    %16 = arith.maximumf %14, %15 : vector<72x128xbf16>
    %c0_17 = arith.constant 0 : index
    %c0_18 = arith.constant 0 : index
    %17 = vector.load %arg10[%c0_17, %c0_18] : memref<72x128xbf16, #tpu.memory_space<vmem>>, vector<72x128xbf16>
    tpu.vector_store %arg10[%c0_17, %c0_18], %16 {strides = array<i32>} : memref<72x128xbf16, #tpu.memory_space<vmem>>, vector<72x128xbf16>,
    return
  }
  func.func @transform_0(%arg0: i32) -> (i32, i32) {
    %c0_i32 = arith.constant 0 : i32
    %c0_i32_0 = arith.constant 0 : i32
    return %arg0, %c0_i32 : i32, i32
  }
  func.func @transform_1(%arg0: i32) -> (i32, i32) {
    %c0_i32 = arith.constant 0 : i32
    %c0_i32_0 = arith.constant 0 : i32
    return %arg0, %c0_i32 : i32, i32
  }
  func.func @transform_2(%arg0: i32) -> (i32, i32) {
    %c0_i32 = arith.constant 0 : i32
    %c0_i32_0 = arith.constant 0 : i32
    return %arg0, %c0_i32 : i32, i32
  }
  func.func @transform_3(%arg0: i32) -> (i32, i32) {
    %c0_i32 = arith.constant 0 : i32
    %c0_i32_0 = arith.constant 0 : i32
    return %arg0, %c0_i32 : i32, i32
  }
  func.func @transform_4(%arg0: i32) -> (i32, i32) {
    %c0_i32 = arith.constant 0 : i32
    %c0_i32_0 = arith.constant 0 : i32
    return %arg0, %c0_i32 : i32, i32
  }
  func.func @transform_5(%arg0: i32) -> (i32, i32) {
    %c0_i32 = arith.constant 0 : i32
    %c0_i32_0 = arith.constant 0 : i32
    return %arg0, %c0_i32 : i32, i32
  }
  func.func @transform_6(%arg0: i32) -> (i32, i32) {
    %c0_i32 = arith.constant 0 : i32
    %c0_i32_0 = arith.constant 0 : i32
    return %arg0, %c0_i32 : i32, i32
  }
  func.func @transform_7(%arg0: i32) -> (i32, i32) {
    %c0_i32 = arith.constant 0 : i32
    %c0_i32_0 = arith.constant 0 : i32
    return %arg0, %c0_i32 : i32, i32
  }
  func.func @transform_8(%arg0: i32) -> (i32, i32) {
    %c0_i32 = arith.constant 0 : i32
    %c0_i32_0 = arith.constant 0 : i32
    return %arg0, %c0_i32 : i32, i32
  }
  func.func @transform_9(%arg0: i32) -> (i32, i32) {
    %c0_i32 = arith.constant 0 : i32
    %c0_i32_0 = arith.constant 0 : i32
    return %arg0, %c0_i32 : i32, i32
  }
}

module attributes {stable_mosaic.version = 11 : i64} {
  func.func @matmul_stats_kernel(%arg0: i32, %arg1: i32, %arg2: i32, %arg3: memref<72x128xbf16, #tpu.memory_space<vmem>>, %arg4: memref<128x128xbf16, #tpu.memory_space<vmem>>, %arg5: memref<72x128xbf16, #tpu.memory_space<vmem>>, %arg6: memref<1x2x128xf32, #tpu.memory_space<vmem>>, %arg7: memref<72x128xf32, #tpu.memory_space<vmem>>) attributes {dimension_semantics = [#tpu.dimension_semantics<parallel>, #tpu.dimension_semantics<parallel>, #tpu.dimension_semantics<arbitrary>], iteration_bounds = array<i64: 1, 1, 5>, scalar_prefetch = 0 : i64, scratch_operands = 1 : i64, tpu.core_type = #tpu.core_type<tc>, window_params = [{transform_indices = @transform_0, window_bounds = array<i64: 72, 128>}, {transform_indices = @transform_1, window_bounds = array<i64: 128, 128>}, {transform_indices = @transform_2, window_bounds = array<i64: 72, 128>}, {transform_indices = @transform_3, window_bounds = array<i64: 1, 2, 128>}]} {
    %c0 = arith.constant 0 : index
    %c0_0 = arith.constant 0 : index
    %0 = vector.load %arg3[%c0, %c0_0] : memref<72x128xbf16, #tpu.memory_space<vmem>>, vector<72x128xbf16>
    %c0_1 = arith.constant 0 : index
    %c0_2 = arith.constant 0 : index
    %1 = vector.load %arg4[%c0_1, %c0_2] : memref<128x128xbf16, #tpu.memory_space<vmem>>, vector<128x128xbf16>
    %cst = arith.constant dense<0.000000e+00> : vector<72x128xf32>
    %2 = tpu.matmul %0, %1, %cst {dimension_numbers = #tpu.dot_dimension_numbers<[1], [0], [0], [1], [0, 0, 1, 1], [], []>} : vector<72x128xbf16>, vector<128x128xbf16>, vector<72x128xf32> -> vector<72x128xf32>
    %c0_i32 = arith.constant 0 : i32
    %3 = arith.cmpi eq, %arg2, %c0_i32 : i32
    %4 = arith.extui %3 : i1 to i32
    %c0_i32_3 = arith.constant 0 : i32
    %5 = arith.cmpi ne, %4, %c0_i32_3 : i32
    scf.if %5 {
      %c0_7 = arith.constant 0 : index
      %c0_8 = arith.constant 0 : index
      %12 = vector.load %arg7[%c0_7, %c0_8] : memref<72x128xf32, #tpu.memory_space<vmem>>, vector<72x128xf32>
      tpu.vector_store %arg7[%c0_7, %c0_8], %2 {strides = array<i32>} : memref<72x128xf32, #tpu.memory_space<vmem>>, vector<72x128xf32>,
    } else {
    }
    %c0_i32_4 = arith.constant 0 : i32
    %6 = arith.cmpi sgt, %arg2, %c0_i32_4 : i32
    %7 = arith.extui %6 : i1 to i32
    %c0_i32_5 = arith.constant 0 : i32
    %8 = arith.cmpi ne, %7, %c0_i32_5 : i32
    scf.if %8 {
      %c0_7 = arith.constant 0 : index
      %c0_8 = arith.constant 0 : index
      %12 = vector.load %arg7[%c0_7, %c0_8] : memref<72x128xf32, #tpu.memory_space<vmem>>, vector<72x128xf32>
      %13 = arith.addf %12, %2 : vector<72x128xf32>
      %c0_9 = arith.constant 0 : index
      %c0_10 = arith.constant 0 : index
      %14 = vector.load %arg7[%c0_9, %c0_10] : memref<72x128xf32, #tpu.memory_space<vmem>>, vector<72x128xf32>
      tpu.vector_store %arg7[%c0_9, %c0_10], %13 {strides = array<i32>} : memref<72x128xf32, #tpu.memory_space<vmem>>, vector<72x128xf32>,
    } else {
    }
    %c4_i32 = arith.constant 4 : i32
    %9 = arith.cmpi eq, %arg2, %c4_i32 : i32
    %10 = arith.extui %9 : i1 to i32
    %c0_i32_6 = arith.constant 0 : i32
    %11 = arith.cmpi ne, %10, %c0_i32_6 : i32
    scf.if %11 {
      %c0_7 = arith.constant 0 : index
      %c0_8 = arith.constant 0 : index
      %12 = vector.load %arg7[%c0_7, %c0_8] : memref<72x128xf32, #tpu.memory_space<vmem>>, vector<72x128xf32>
      %13 = arith.truncf %12 : vector<72x128xf32> to vector<72x128xbf16>
      %c0_9 = arith.constant 0 : index
      %c0_10 = arith.constant 0 : index
      %14 = vector.load %arg5[%c0_9, %c0_10] : memref<72x128xbf16, #tpu.memory_space<vmem>>, vector<72x128xbf16>
      tpu.vector_store %arg5[%c0_9, %c0_10], %13 {strides = array<i32>} : memref<72x128xbf16, #tpu.memory_space<vmem>>, vector<72x128xbf16>,
      %cst_11 = arith.constant dense<0.000000e+00> : vector<128xf32>
      %15 = vector.multi_reduction <add>, %12, %cst_11 [0] : vector<72x128xf32> to vector<128xf32>
      %16 = vector.shape_cast %15 : vector<128xf32> to vector<1x128xf32>
      %17 = arith.mulf %12, %12 : vector<72x128xf32>
      %cst_12 = arith.constant dense<0.000000e+00> : vector<128xf32>
      %18 = vector.multi_reduction <add>, %17, %cst_12 [0] : vector<72x128xf32> to vector<128xf32>
      %19 = vector.shape_cast %18 : vector<128xf32> to vector<1x128xf32>
      %20 = tpu.concatenate %16, %19 in 0 : vector<1x128xf32>, vector<1x128xf32> -> vector<2x128xf32>
      %21 = vector.shape_cast %20 : vector<2x128xf32> to vector<1x2x128xf32>
      %c0_13 = arith.constant 0 : index
      %c0_14 = arith.constant 0 : index
      %c0_15 = arith.constant 0 : index
      %22 = vector.load %arg6[%c0_13, %c0_14, %c0_15] : memref<1x2x128xf32, #tpu.memory_space<vmem>>, vector<1x2x128xf32>
      tpu.vector_store %arg6[%c0_13, %c0_14, %c0_15], %21 {strides = array<i32>} : memref<1x2x128xf32, #tpu.memory_space<vmem>>, vector<1x2x128xf32>,
    } else {
    }
    return
  }
  func.func @transform_0(%arg0: i32, %arg1: i32, %arg2: i32) -> (i32, i32) {
    %c0_i32 = arith.constant 0 : i32
    return %arg0, %arg2 : i32, i32
  }
  func.func @transform_1(%arg0: i32, %arg1: i32, %arg2: i32) -> (i32, i32) {
    %c0_i32 = arith.constant 0 : i32
    return %arg2, %arg1 : i32, i32
  }
  func.func @transform_2(%arg0: i32, %arg1: i32, %arg2: i32) -> (i32, i32) {
    %c0_i32 = arith.constant 0 : i32
    return %arg0, %arg1 : i32, i32
  }
  func.func @transform_3(%arg0: i32, %arg1: i32, %arg2: i32) -> (i32, i32, i32) {
    %c0_i32 = arith.constant 0 : i32
    %c0_i32_0 = arith.constant 0 : i32
    return %arg0, %c0_i32, %arg1 : i32, i32, i32
  }
}

module attributes {stable_mosaic.version = 11 : i64} {
  func.func @bn_apply_kernel(%arg0: i32, %arg1: i32, %arg2: memref<72x128xbf16, #tpu.memory_space<vmem>>, %arg3: memref<1x2x128xf32, #tpu.memory_space<vmem>>, %arg4: memref<1x128xf32, #tpu.memory_space<vmem>>, %arg5: memref<1x128xf32, #tpu.memory_space<vmem>>, %arg6: memref<72x128xbf16, #tpu.memory_space<vmem>>) attributes {dimension_semantics = [#tpu.dimension_semantics<parallel>, #tpu.dimension_semantics<parallel>], iteration_bounds = array<i64: 1, 1>, scalar_prefetch = 0 : i64, scratch_operands = 0 : i64, tpu.core_type = #tpu.core_type<tc>, window_params = [{transform_indices = @transform_0, window_bounds = array<i64: 72, 128>}, {transform_indices = @transform_1, window_bounds = array<i64: 1, 2, 128>}, {transform_indices = @transform_2, window_bounds = array<i64: 1, 128>}, {transform_indices = @transform_3, window_bounds = array<i64: 1, 128>}, {transform_indices = @transform_4, window_bounds = array<i64: 72, 128>}]} {
    %c0 = arith.constant 0 : index
    %c0_0 = arith.constant 0 : index
    %c0_1 = arith.constant 0 : index
    %0 = vector.load %arg3[%c0, %c0_0, %c0_1] : memref<1x2x128xf32, #tpu.memory_space<vmem>>, vector<1x2x128xf32>
    %cst = arith.constant dense<0.000000e+00> : vector<2x128xf32>
    %1 = vector.multi_reduction <add>, %0, %cst [0] : vector<1x2x128xf32> to vector<2x128xf32>
    %2 = vector.extract_strided_slice %1 {offsets = [0, 0], sizes = [1, 128], strides = [1, 1]} : vector<2x128xf32> to vector<1x128xf32>
    %cst_2 = arith.constant 0.013888889 : f32
    %3 = vector.broadcast %cst_2 : f32 to vector<1x128xf32>
    %4 = arith.mulf %2, %3 : vector<1x128xf32>
    %5 = vector.extract_strided_slice %1 {offsets = [1, 0], sizes = [1, 128], strides = [1, 1]} : vector<2x128xf32> to vector<1x128xf32>
    %cst_3 = arith.constant 0.013888889 : f32
    %6 = vector.broadcast %cst_3 : f32 to vector<1x128xf32>
    %7 = arith.mulf %5, %6 : vector<1x128xf32>
    %8 = arith.mulf %4, %4 : vector<1x128xf32>
    %9 = arith.subf %7, %8 : vector<1x128xf32>
    %cst_4 = arith.constant 0.000000e+00 : f32
    %10 = vector.broadcast %cst_4 : f32 to vector<1x128xf32>
    %11 = arith.maximumf %9, %10 : vector<1x128xf32>
    %c0_5 = arith.constant 0 : index
    %c0_6 = arith.constant 0 : index
    %12 = vector.load %arg4[%c0_5, %c0_6] : memref<1x128xf32, #tpu.memory_space<vmem>>, vector<1x128xf32>
    %cst_7 = arith.constant 9.99999974E-6 : f32
    %13 = vector.broadcast %cst_7 : f32 to vector<1x128xf32>
    %14 = arith.addf %11, %13 : vector<1x128xf32>
    %15 = math.rsqrt %14 : vector<1x128xf32>
    %16 = arith.mulf %12, %15 : vector<1x128xf32>
    %c0_8 = arith.constant 0 : index
    %c0_9 = arith.constant 0 : index
    %17 = vector.load %arg5[%c0_8, %c0_9] : memref<1x128xf32, #tpu.memory_space<vmem>>, vector<1x128xf32>
    %18 = arith.mulf %4, %16 : vector<1x128xf32>
    %19 = arith.subf %17, %18 : vector<1x128xf32>
    %c0_10 = arith.constant 0 : index
    %c0_11 = arith.constant 0 : index
    %20 = vector.load %arg2[%c0_10, %c0_11] : memref<72x128xbf16, #tpu.memory_space<vmem>>, vector<72x128xbf16>
    %21 = arith.extf %20 : vector<72x128xbf16> to vector<72x128xf32>
    %22 = vector.broadcast %16 : vector<1x128xf32> to vector<72x128xf32>
    %23 = arith.mulf %21, %22 : vector<72x128xf32>
    %24 = vector.broadcast %19 : vector<1x128xf32> to vector<72x128xf32>
    %25 = arith.addf %23, %24 : vector<72x128xf32>
    %cst_12 = arith.constant 0.000000e+00 : f32
    %26 = vector.broadcast %cst_12 : f32 to vector<72x128xf32>
    %27 = arith.maximumf %25, %26 : vector<72x128xf32>
    %28 = arith.truncf %27 : vector<72x128xf32> to vector<72x128xbf16>
    %c0_13 = arith.constant 0 : index
    %c0_14 = arith.constant 0 : index
    %29 = vector.load %arg6[%c0_13, %c0_14] : memref<72x128xbf16, #tpu.memory_space<vmem>>, vector<72x128xbf16>
    tpu.vector_store %arg6[%c0_13, %c0_14], %28 {strides = array<i32>} : memref<72x128xbf16, #tpu.memory_space<vmem>>, vector<72x128xbf16>,
    return
  }
  func.func @transform_0(%arg0: i32, %arg1: i32) -> (i32, i32) {
    %c0_i32 = arith.constant 0 : i32
    return %arg1, %arg0 : i32, i32
  }
  func.func @transform_1(%arg0: i32, %arg1: i32) -> (i32, i32, i32) {
    %c0_i32 = arith.constant 0 : i32
    %c0_i32_0 = arith.constant 0 : i32
    %c0_i32_1 = arith.constant 0 : i32
    return %c0_i32, %c0_i32_0, %arg0 : i32, i32, i32
  }
  func.func @transform_2(%arg0: i32, %arg1: i32) -> (i32, i32) {
    %c0_i32 = arith.constant 0 : i32
    %c0_i32_0 = arith.constant 0 : i32
    return %c0_i32, %arg0 : i32, i32
  }
  func.func @transform_3(%arg0: i32, %arg1: i32) -> (i32, i32) {
    %c0_i32 = arith.constant 0 : i32
    %c0_i32_0 = arith.constant 0 : i32
    return %c0_i32, %arg0 : i32, i32
  }
  func.func @transform_4(%arg0: i32, %arg1: i32) -> (i32, i32) {
    %c0_i32 = arith.constant 0 : i32
    return %arg1, %arg0 : i32, i32
  }
}

module attributes {stable_mosaic.version = 11 : i64} {
  func.func @bn_apply_kernel(%arg0: i32, %arg1: i32, %arg2: memref<72x128xbf16, #tpu.memory_space<vmem>>, %arg3: memref<1x2x128xf32, #tpu.memory_space<vmem>>, %arg4: memref<1x128xf32, #tpu.memory_space<vmem>>, %arg5: memref<1x128xf32, #tpu.memory_space<vmem>>, %arg6: memref<72x128xbf16, #tpu.memory_space<vmem>>, %arg7: memref<72x128xbf16, #tpu.memory_space<vmem>>) attributes {dimension_semantics = [#tpu.dimension_semantics<parallel>, #tpu.dimension_semantics<parallel>], iteration_bounds = array<i64: 1, 1>, scalar_prefetch = 0 : i64, scratch_operands = 0 : i64, tpu.core_type = #tpu.core_type<tc>, window_params = [{transform_indices = @transform_0, window_bounds = array<i64: 72, 128>}, {transform_indices = @transform_1, window_bounds = array<i64: 1, 2, 128>}, {transform_indices = @transform_2, window_bounds = array<i64: 1, 128>}, {transform_indices = @transform_3, window_bounds = array<i64: 1, 128>}, {transform_indices = @transform_4, window_bounds = array<i64: 72, 128>}, {transform_indices = @transform_5, window_bounds = array<i64: 72, 128>}]} {
    %c0 = arith.constant 0 : index
    %c0_0 = arith.constant 0 : index
    %c0_1 = arith.constant 0 : index
    %0 = vector.load %arg3[%c0, %c0_0, %c0_1] : memref<1x2x128xf32, #tpu.memory_space<vmem>>, vector<1x2x128xf32>
    %cst = arith.constant dense<0.000000e+00> : vector<2x128xf32>
    %1 = vector.multi_reduction <add>, %0, %cst [0] : vector<1x2x128xf32> to vector<2x128xf32>
    %2 = vector.extract_strided_slice %1 {offsets = [0, 0], sizes = [1, 128], strides = [1, 1]} : vector<2x128xf32> to vector<1x128xf32>
    %cst_2 = arith.constant 0.013888889 : f32
    %3 = vector.broadcast %cst_2 : f32 to vector<1x128xf32>
    %4 = arith.mulf %2, %3 : vector<1x128xf32>
    %5 = vector.extract_strided_slice %1 {offsets = [1, 0], sizes = [1, 128], strides = [1, 1]} : vector<2x128xf32> to vector<1x128xf32>
    %cst_3 = arith.constant 0.013888889 : f32
    %6 = vector.broadcast %cst_3 : f32 to vector<1x128xf32>
    %7 = arith.mulf %5, %6 : vector<1x128xf32>
    %8 = arith.mulf %4, %4 : vector<1x128xf32>
    %9 = arith.subf %7, %8 : vector<1x128xf32>
    %cst_4 = arith.constant 0.000000e+00 : f32
    %10 = vector.broadcast %cst_4 : f32 to vector<1x128xf32>
    %11 = arith.maximumf %9, %10 : vector<1x128xf32>
    %c0_5 = arith.constant 0 : index
    %c0_6 = arith.constant 0 : index
    %12 = vector.load %arg4[%c0_5, %c0_6] : memref<1x128xf32, #tpu.memory_space<vmem>>, vector<1x128xf32>
    %cst_7 = arith.constant 9.99999974E-6 : f32
    %13 = vector.broadcast %cst_7 : f32 to vector<1x128xf32>
    %14 = arith.addf %11, %13 : vector<1x128xf32>
    %15 = math.rsqrt %14 : vector<1x128xf32>
    %16 = arith.mulf %12, %15 : vector<1x128xf32>
    %c0_8 = arith.constant 0 : index
    %c0_9 = arith.constant 0 : index
    %17 = vector.load %arg5[%c0_8, %c0_9] : memref<1x128xf32, #tpu.memory_space<vmem>>, vector<1x128xf32>
    %18 = arith.mulf %4, %16 : vector<1x128xf32>
    %19 = arith.subf %17, %18 : vector<1x128xf32>
    %c0_10 = arith.constant 0 : index
    %c0_11 = arith.constant 0 : index
    %20 = vector.load %arg2[%c0_10, %c0_11] : memref<72x128xbf16, #tpu.memory_space<vmem>>, vector<72x128xbf16>
    %21 = arith.extf %20 : vector<72x128xbf16> to vector<72x128xf32>
    %22 = vector.broadcast %16 : vector<1x128xf32> to vector<72x128xf32>
    %23 = arith.mulf %21, %22 : vector<72x128xf32>
    %24 = vector.broadcast %19 : vector<1x128xf32> to vector<72x128xf32>
    %25 = arith.addf %23, %24 : vector<72x128xf32>
    %c0_12 = arith.constant 0 : index
    %c0_13 = arith.constant 0 : index
    %26 = vector.load %arg6[%c0_12, %c0_13] : memref<72x128xbf16, #tpu.memory_space<vmem>>, vector<72x128xbf16>
    %27 = arith.extf %26 : vector<72x128xbf16> to vector<72x128xf32>
    %28 = arith.addf %25, %27 : vector<72x128xf32>
    %cst_14 = arith.constant 0.000000e+00 : f32
    %29 = vector.broadcast %cst_14 : f32 to vector<72x128xf32>
    %30 = arith.maximumf %28, %29 : vector<72x128xf32>
    %31 = arith.truncf %30 : vector<72x128xf32> to vector<72x128xbf16>
    %c0_15 = arith.constant 0 : index
    %c0_16 = arith.constant 0 : index
    %32 = vector.load %arg7[%c0_15, %c0_16] : memref<72x128xbf16, #tpu.memory_space<vmem>>, vector<72x128xbf16>
    tpu.vector_store %arg7[%c0_15, %c0_16], %31 {strides = array<i32>} : memref<72x128xbf16, #tpu.memory_space<vmem>>, vector<72x128xbf16>,
    return
  }
  func.func @transform_0(%arg0: i32, %arg1: i32) -> (i32, i32) {
    %c0_i32 = arith.constant 0 : i32
    return %arg1, %arg0 : i32, i32
  }
  func.func @transform_1(%arg0: i32, %arg1: i32) -> (i32, i32, i32) {
    %c0_i32 = arith.constant 0 : i32
    %c0_i32_0 = arith.constant 0 : i32
    %c0_i32_1 = arith.constant 0 : i32
    return %c0_i32, %c0_i32_0, %arg0 : i32, i32, i32
  }
  func.func @transform_2(%arg0: i32, %arg1: i32) -> (i32, i32) {
    %c0_i32 = arith.constant 0 : i32
    %c0_i32_0 = arith.constant 0 : i32
    return %c0_i32, %arg0 : i32, i32
  }
  func.func @transform_3(%arg0: i32, %arg1: i32) -> (i32, i32) {
    %c0_i32 = arith.constant 0 : i32
    %c0_i32_0 = arith.constant 0 : i32
    return %c0_i32, %arg0 : i32, i32
  }
  func.func @transform_4(%arg0: i32, %arg1: i32) -> (i32, i32) {
    %c0_i32 = arith.constant 0 : i32
    return %arg1, %arg0 : i32, i32
  }
  func.func @transform_5(%arg0: i32, %arg1: i32) -> (i32, i32) {
    %c0_i32 = arith.constant 0 : i32
    return %arg1, %arg0 : i32, i32
  }
}

module attributes {stable_mosaic.version = 11 : i64} {
  func.func @bn_apply_kernel(%arg0: i32, %arg1: i32, %arg2: memref<24x128xbf16, #tpu.memory_space<vmem>>, %arg3: memref<1x2x128xf32, #tpu.memory_space<vmem>>, %arg4: memref<1x128xf32, #tpu.memory_space<vmem>>, %arg5: memref<1x128xf32, #tpu.memory_space<vmem>>, %arg6: memref<24x128xbf16, #tpu.memory_space<vmem>>) attributes {dimension_semantics = [#tpu.dimension_semantics<parallel>, #tpu.dimension_semantics<parallel>], iteration_bounds = array<i64: 1, 1>, scalar_prefetch = 0 : i64, scratch_operands = 0 : i64, tpu.core_type = #tpu.core_type<tc>, window_params = [{transform_indices = @transform_0, window_bounds = array<i64: 24, 128>}, {transform_indices = @transform_1, window_bounds = array<i64: 1, 2, 128>}, {transform_indices = @transform_2, window_bounds = array<i64: 1, 128>}, {transform_indices = @transform_3, window_bounds = array<i64: 1, 128>}, {transform_indices = @transform_4, window_bounds = array<i64: 24, 128>}]} {
    %c0 = arith.constant 0 : index
    %c0_0 = arith.constant 0 : index
    %c0_1 = arith.constant 0 : index
    %0 = vector.load %arg3[%c0, %c0_0, %c0_1] : memref<1x2x128xf32, #tpu.memory_space<vmem>>, vector<1x2x128xf32>
    %cst = arith.constant dense<0.000000e+00> : vector<2x128xf32>
    %1 = vector.multi_reduction <add>, %0, %cst [0] : vector<1x2x128xf32> to vector<2x128xf32>
    %2 = vector.extract_strided_slice %1 {offsets = [0, 0], sizes = [1, 128], strides = [1, 1]} : vector<2x128xf32> to vector<1x128xf32>
    %cst_2 = arith.constant 0.055555556 : f32
    %3 = vector.broadcast %cst_2 : f32 to vector<1x128xf32>
    %4 = arith.mulf %2, %3 : vector<1x128xf32>
    %5 = vector.extract_strided_slice %1 {offsets = [1, 0], sizes = [1, 128], strides = [1, 1]} : vector<2x128xf32> to vector<1x128xf32>
    %cst_3 = arith.constant 0.055555556 : f32
    %6 = vector.broadcast %cst_3 : f32 to vector<1x128xf32>
    %7 = arith.mulf %5, %6 : vector<1x128xf32>
    %8 = arith.mulf %4, %4 : vector<1x128xf32>
    %9 = arith.subf %7, %8 : vector<1x128xf32>
    %cst_4 = arith.constant 0.000000e+00 : f32
    %10 = vector.broadcast %cst_4 : f32 to vector<1x128xf32>
    %11 = arith.maximumf %9, %10 : vector<1x128xf32>
    %c0_5 = arith.constant 0 : index
    %c0_6 = arith.constant 0 : index
    %12 = vector.load %arg4[%c0_5, %c0_6] : memref<1x128xf32, #tpu.memory_space<vmem>>, vector<1x128xf32>
    %cst_7 = arith.constant 9.99999974E-6 : f32
    %13 = vector.broadcast %cst_7 : f32 to vector<1x128xf32>
    %14 = arith.addf %11, %13 : vector<1x128xf32>
    %15 = math.rsqrt %14 : vector<1x128xf32>
    %16 = arith.mulf %12, %15 : vector<1x128xf32>
    %c0_8 = arith.constant 0 : index
    %c0_9 = arith.constant 0 : index
    %17 = vector.load %arg5[%c0_8, %c0_9] : memref<1x128xf32, #tpu.memory_space<vmem>>, vector<1x128xf32>
    %18 = arith.mulf %4, %16 : vector<1x128xf32>
    %19 = arith.subf %17, %18 : vector<1x128xf32>
    %c0_10 = arith.constant 0 : index
    %c0_11 = arith.constant 0 : index
    %20 = vector.load %arg2[%c0_10, %c0_11] : memref<24x128xbf16, #tpu.memory_space<vmem>>, vector<24x128xbf16>
    %21 = arith.extf %20 : vector<24x128xbf16> to vector<24x128xf32>
    %22 = vector.broadcast %16 : vector<1x128xf32> to vector<24x128xf32>
    %23 = arith.mulf %21, %22 : vector<24x128xf32>
    %24 = vector.broadcast %19 : vector<1x128xf32> to vector<24x128xf32>
    %25 = arith.addf %23, %24 : vector<24x128xf32>
    %26 = arith.truncf %25 : vector<24x128xf32> to vector<24x128xbf16>
    %c0_12 = arith.constant 0 : index
    %c0_13 = arith.constant 0 : index
    %27 = vector.load %arg6[%c0_12, %c0_13] : memref<24x128xbf16, #tpu.memory_space<vmem>>, vector<24x128xbf16>
    tpu.vector_store %arg6[%c0_12, %c0_13], %26 {strides = array<i32>} : memref<24x128xbf16, #tpu.memory_space<vmem>>, vector<24x128xbf16>,
    return
  }
  func.func @transform_0(%arg0: i32, %arg1: i32) -> (i32, i32) {
    %c0_i32 = arith.constant 0 : i32
    return %arg1, %arg0 : i32, i32
  }
  func.func @transform_1(%arg0: i32, %arg1: i32) -> (i32, i32, i32) {
    %c0_i32 = arith.constant 0 : i32
    %c0_i32_0 = arith.constant 0 : i32
    %c0_i32_1 = arith.constant 0 : i32
    return %c0_i32, %c0_i32_0, %arg0 : i32, i32, i32
  }
  func.func @transform_2(%arg0: i32, %arg1: i32) -> (i32, i32) {
    %c0_i32 = arith.constant 0 : i32
    %c0_i32_0 = arith.constant 0 : i32
    return %c0_i32, %arg0 : i32, i32
  }
  func.func @transform_3(%arg0: i32, %arg1: i32) -> (i32, i32) {
    %c0_i32 = arith.constant 0 : i32
    %c0_i32_0 = arith.constant 0 : i32
    return %c0_i32, %arg0 : i32, i32
  }
  func.func @transform_4(%arg0: i32, %arg1: i32) -> (i32, i32) {
    %c0_i32 = arith.constant 0 : i32
    return %arg1, %arg0 : i32, i32
  }
}

module attributes {stable_mosaic.version = 11 : i64} {
  func.func @matmul_stats_kernel(%arg0: i32, %arg1: i32, %arg2: i32, %arg3: memref<24x128xbf16, #tpu.memory_space<vmem>>, %arg4: memref<128x128xbf16, #tpu.memory_space<vmem>>, %arg5: memref<24x128xbf16, #tpu.memory_space<vmem>>, %arg6: memref<1x2x128xf32, #tpu.memory_space<vmem>>, %arg7: memref<24x128xf32, #tpu.memory_space<vmem>>) attributes {dimension_semantics = [#tpu.dimension_semantics<parallel>, #tpu.dimension_semantics<parallel>, #tpu.dimension_semantics<arbitrary>], iteration_bounds = array<i64: 1, 1, 1>, scalar_prefetch = 0 : i64, scratch_operands = 1 : i64, tpu.core_type = #tpu.core_type<tc>, window_params = [{transform_indices = @transform_0, window_bounds = array<i64: 24, 128>}, {transform_indices = @transform_1, window_bounds = array<i64: 128, 128>}, {transform_indices = @transform_2, window_bounds = array<i64: 24, 128>}, {transform_indices = @transform_3, window_bounds = array<i64: 1, 2, 128>}]} {
    %c0 = arith.constant 0 : index
    %c0_0 = arith.constant 0 : index
    %0 = vector.load %arg3[%c0, %c0_0] : memref<24x128xbf16, #tpu.memory_space<vmem>>, vector<24x128xbf16>
    %c0_1 = arith.constant 0 : index
    %c0_2 = arith.constant 0 : index
    %1 = vector.load %arg4[%c0_1, %c0_2] : memref<128x128xbf16, #tpu.memory_space<vmem>>, vector<128x128xbf16>
    %cst = arith.constant dense<0.000000e+00> : vector<24x128xf32>
    %2 = tpu.matmul %0, %1, %cst {dimension_numbers = #tpu.dot_dimension_numbers<[1], [0], [0], [1], [0, 0, 1, 1], [], []>} : vector<24x128xbf16>, vector<128x128xbf16>, vector<24x128xf32> -> vector<24x128xf32>
    %c0_i32 = arith.constant 0 : i32
    %3 = arith.cmpi eq, %arg2, %c0_i32 : i32
    %4 = arith.extui %3 : i1 to i32
    %c0_i32_3 = arith.constant 0 : i32
    %5 = arith.cmpi ne, %4, %c0_i32_3 : i32
    scf.if %5 {
      %c0_8 = arith.constant 0 : index
      %c0_9 = arith.constant 0 : index
      %12 = vector.load %arg7[%c0_8, %c0_9] : memref<24x128xf32, #tpu.memory_space<vmem>>, vector<24x128xf32>
      tpu.vector_store %arg7[%c0_8, %c0_9], %2 {strides = array<i32>} : memref<24x128xf32, #tpu.memory_space<vmem>>, vector<24x128xf32>,
    } else {
    }
    %c0_i32_4 = arith.constant 0 : i32
    %6 = arith.cmpi sgt, %arg2, %c0_i32_4 : i32
    %7 = arith.extui %6 : i1 to i32
    %c0_i32_5 = arith.constant 0 : i32
    %8 = arith.cmpi ne, %7, %c0_i32_5 : i32
    scf.if %8 {
      %c0_8 = arith.constant 0 : index
      %c0_9 = arith.constant 0 : index
      %12 = vector.load %arg7[%c0_8, %c0_9] : memref<24x128xf32, #tpu.memory_space<vmem>>, vector<24x128xf32>
      %13 = arith.addf %12, %2 : vector<24x128xf32>
      %c0_10 = arith.constant 0 : index
      %c0_11 = arith.constant 0 : index
      %14 = vector.load %arg7[%c0_10, %c0_11] : memref<24x128xf32, #tpu.memory_space<vmem>>, vector<24x128xf32>
      tpu.vector_store %arg7[%c0_10, %c0_11], %13 {strides = array<i32>} : memref<24x128xf32, #tpu.memory_space<vmem>>, vector<24x128xf32>,
    } else {
    }
    %c0_i32_6 = arith.constant 0 : i32
    %9 = arith.cmpi eq, %arg2, %c0_i32_6 : i32
    %10 = arith.extui %9 : i1 to i32
    %c0_i32_7 = arith.constant 0 : i32
    %11 = arith.cmpi ne, %10, %c0_i32_7 : i32
    scf.if %11 {
      %c0_8 = arith.constant 0 : index
      %c0_9 = arith.constant 0 : index
      %12 = vector.load %arg7[%c0_8, %c0_9] : memref<24x128xf32, #tpu.memory_space<vmem>>, vector<24x128xf32>
      %13 = arith.truncf %12 : vector<24x128xf32> to vector<24x128xbf16>
      %c0_10 = arith.constant 0 : index
      %c0_11 = arith.constant 0 : index
      %14 = vector.load %arg5[%c0_10, %c0_11] : memref<24x128xbf16, #tpu.memory_space<vmem>>, vector<24x128xbf16>
      tpu.vector_store %arg5[%c0_10, %c0_11], %13 {strides = array<i32>} : memref<24x128xbf16, #tpu.memory_space<vmem>>, vector<24x128xbf16>,
      %cst_12 = arith.constant dense<0.000000e+00> : vector<128xf32>
      %15 = vector.multi_reduction <add>, %12, %cst_12 [0] : vector<24x128xf32> to vector<128xf32>
      %16 = vector.shape_cast %15 : vector<128xf32> to vector<1x128xf32>
      %17 = arith.mulf %12, %12 : vector<24x128xf32>
      %cst_13 = arith.constant dense<0.000000e+00> : vector<128xf32>
      %18 = vector.multi_reduction <add>, %17, %cst_13 [0] : vector<24x128xf32> to vector<128xf32>
      %19 = vector.shape_cast %18 : vector<128xf32> to vector<1x128xf32>
      %20 = tpu.concatenate %16, %19 in 0 : vector<1x128xf32>, vector<1x128xf32> -> vector<2x128xf32>
      %21 = vector.shape_cast %20 : vector<2x128xf32> to vector<1x2x128xf32>
      %c0_14 = arith.constant 0 : index
      %c0_15 = arith.constant 0 : index
      %c0_16 = arith.constant 0 : index
      %22 = vector.load %arg6[%c0_14, %c0_15, %c0_16] : memref<1x2x128xf32, #tpu.memory_space<vmem>>, vector<1x2x128xf32>
      tpu.vector_store %arg6[%c0_14, %c0_15, %c0_16], %21 {strides = array<i32>} : memref<1x2x128xf32, #tpu.memory_space<vmem>>, vector<1x2x128xf32>,
    } else {
    }
    return
  }
  func.func @transform_0(%arg0: i32, %arg1: i32, %arg2: i32) -> (i32, i32) {
    %c0_i32 = arith.constant 0 : i32
    return %arg0, %arg2 : i32, i32
  }
  func.func @transform_1(%arg0: i32, %arg1: i32, %arg2: i32) -> (i32, i32) {
    %c0_i32 = arith.constant 0 : i32
    return %arg2, %arg1 : i32, i32
  }
  func.func @transform_2(%arg0: i32, %arg1: i32, %arg2: i32) -> (i32, i32) {
    %c0_i32 = arith.constant 0 : i32
    return %arg0, %arg1 : i32, i32
  }
  func.func @transform_3(%arg0: i32, %arg1: i32, %arg2: i32) -> (i32, i32, i32) {
    %c0_i32 = arith.constant 0 : i32
    %c0_i32_0 = arith.constant 0 : i32
    return %arg0, %c0_i32, %arg1 : i32, i32, i32
  }
}

module attributes {stable_mosaic.version = 11 : i64} {
  func.func @matmul_stats_kernel(%arg0: i32, %arg1: i32, %arg2: i32, %arg3: memref<24x128xbf16, #tpu.memory_space<vmem>>, %arg4: memref<128x128xbf16, #tpu.memory_space<vmem>>, %arg5: memref<24x128xbf16, #tpu.memory_space<vmem>>, %arg6: memref<1x2x128xf32, #tpu.memory_space<vmem>>, %arg7: memref<24x128xf32, #tpu.memory_space<vmem>>) attributes {dimension_semantics = [#tpu.dimension_semantics<parallel>, #tpu.dimension_semantics<parallel>, #tpu.dimension_semantics<arbitrary>], iteration_bounds = array<i64: 1, 1, 5>, scalar_prefetch = 0 : i64, scratch_operands = 1 : i64, tpu.core_type = #tpu.core_type<tc>, window_params = [{transform_indices = @transform_0, window_bounds = array<i64: 24, 128>}, {transform_indices = @transform_1, window_bounds = array<i64: 128, 128>}, {transform_indices = @transform_2, window_bounds = array<i64: 24, 128>}, {transform_indices = @transform_3, window_bounds = array<i64: 1, 2, 128>}]} {
    %c0 = arith.constant 0 : index
    %c0_0 = arith.constant 0 : index
    %0 = vector.load %arg3[%c0, %c0_0] : memref<24x128xbf16, #tpu.memory_space<vmem>>, vector<24x128xbf16>
    %c0_1 = arith.constant 0 : index
    %c0_2 = arith.constant 0 : index
    %1 = vector.load %arg4[%c0_1, %c0_2] : memref<128x128xbf16, #tpu.memory_space<vmem>>, vector<128x128xbf16>
    %cst = arith.constant dense<0.000000e+00> : vector<24x128xf32>
    %2 = tpu.matmul %0, %1, %cst {dimension_numbers = #tpu.dot_dimension_numbers<[1], [0], [0], [1], [0, 0, 1, 1], [], []>} : vector<24x128xbf16>, vector<128x128xbf16>, vector<24x128xf32> -> vector<24x128xf32>
    %c0_i32 = arith.constant 0 : i32
    %3 = arith.cmpi eq, %arg2, %c0_i32 : i32
    %4 = arith.extui %3 : i1 to i32
    %c0_i32_3 = arith.constant 0 : i32
    %5 = arith.cmpi ne, %4, %c0_i32_3 : i32
    scf.if %5 {
      %c0_7 = arith.constant 0 : index
      %c0_8 = arith.constant 0 : index
      %12 = vector.load %arg7[%c0_7, %c0_8] : memref<24x128xf32, #tpu.memory_space<vmem>>, vector<24x128xf32>
      tpu.vector_store %arg7[%c0_7, %c0_8], %2 {strides = array<i32>} : memref<24x128xf32, #tpu.memory_space<vmem>>, vector<24x128xf32>,
    } else {
    }
    %c0_i32_4 = arith.constant 0 : i32
    %6 = arith.cmpi sgt, %arg2, %c0_i32_4 : i32
    %7 = arith.extui %6 : i1 to i32
    %c0_i32_5 = arith.constant 0 : i32
    %8 = arith.cmpi ne, %7, %c0_i32_5 : i32
    scf.if %8 {
      %c0_7 = arith.constant 0 : index
      %c0_8 = arith.constant 0 : index
      %12 = vector.load %arg7[%c0_7, %c0_8] : memref<24x128xf32, #tpu.memory_space<vmem>>, vector<24x128xf32>
      %13 = arith.addf %12, %2 : vector<24x128xf32>
      %c0_9 = arith.constant 0 : index
      %c0_10 = arith.constant 0 : index
      %14 = vector.load %arg7[%c0_9, %c0_10] : memref<24x128xf32, #tpu.memory_space<vmem>>, vector<24x128xf32>
      tpu.vector_store %arg7[%c0_9, %c0_10], %13 {strides = array<i32>} : memref<24x128xf32, #tpu.memory_space<vmem>>, vector<24x128xf32>,
    } else {
    }
    %c4_i32 = arith.constant 4 : i32
    %9 = arith.cmpi eq, %arg2, %c4_i32 : i32
    %10 = arith.extui %9 : i1 to i32
    %c0_i32_6 = arith.constant 0 : i32
    %11 = arith.cmpi ne, %10, %c0_i32_6 : i32
    scf.if %11 {
      %c0_7 = arith.constant 0 : index
      %c0_8 = arith.constant 0 : index
      %12 = vector.load %arg7[%c0_7, %c0_8] : memref<24x128xf32, #tpu.memory_space<vmem>>, vector<24x128xf32>
      %13 = arith.truncf %12 : vector<24x128xf32> to vector<24x128xbf16>
      %c0_9 = arith.constant 0 : index
      %c0_10 = arith.constant 0 : index
      %14 = vector.load %arg5[%c0_9, %c0_10] : memref<24x128xbf16, #tpu.memory_space<vmem>>, vector<24x128xbf16>
      tpu.vector_store %arg5[%c0_9, %c0_10], %13 {strides = array<i32>} : memref<24x128xbf16, #tpu.memory_space<vmem>>, vector<24x128xbf16>,
      %cst_11 = arith.constant dense<0.000000e+00> : vector<128xf32>
      %15 = vector.multi_reduction <add>, %12, %cst_11 [0] : vector<24x128xf32> to vector<128xf32>
      %16 = vector.shape_cast %15 : vector<128xf32> to vector<1x128xf32>
      %17 = arith.mulf %12, %12 : vector<24x128xf32>
      %cst_12 = arith.constant dense<0.000000e+00> : vector<128xf32>
      %18 = vector.multi_reduction <add>, %17, %cst_12 [0] : vector<24x128xf32> to vector<128xf32>
      %19 = vector.shape_cast %18 : vector<128xf32> to vector<1x128xf32>
      %20 = tpu.concatenate %16, %19 in 0 : vector<1x128xf32>, vector<1x128xf32> -> vector<2x128xf32>
      %21 = vector.shape_cast %20 : vector<2x128xf32> to vector<1x2x128xf32>
      %c0_13 = arith.constant 0 : index
      %c0_14 = arith.constant 0 : index
      %c0_15 = arith.constant 0 : index
      %22 = vector.load %arg6[%c0_13, %c0_14, %c0_15] : memref<1x2x128xf32, #tpu.memory_space<vmem>>, vector<1x2x128xf32>
      tpu.vector_store %arg6[%c0_13, %c0_14, %c0_15], %21 {strides = array<i32>} : memref<1x2x128xf32, #tpu.memory_space<vmem>>, vector<1x2x128xf32>,
    } else {
    }
    return
  }
  func.func @transform_0(%arg0: i32, %arg1: i32, %arg2: i32) -> (i32, i32) {
    %c0_i32 = arith.constant 0 : i32
    return %arg0, %arg2 : i32, i32
  }
  func.func @transform_1(%arg0: i32, %arg1: i32, %arg2: i32) -> (i32, i32) {
    %c0_i32 = arith.constant 0 : i32
    return %arg2, %arg1 : i32, i32
  }
  func.func @transform_2(%arg0: i32, %arg1: i32, %arg2: i32) -> (i32, i32) {
    %c0_i32 = arith.constant 0 : i32
    return %arg0, %arg1 : i32, i32
  }
  func.func @transform_3(%arg0: i32, %arg1: i32, %arg2: i32) -> (i32, i32, i32) {
    %c0_i32 = arith.constant 0 : i32
    %c0_i32_0 = arith.constant 0 : i32
    return %arg0, %c0_i32, %arg1 : i32, i32, i32
  }
}

module attributes {stable_mosaic.version = 11 : i64} {
  func.func @bn_apply_kernel(%arg0: i32, %arg1: i32, %arg2: memref<24x128xbf16, #tpu.memory_space<vmem>>, %arg3: memref<1x2x128xf32, #tpu.memory_space<vmem>>, %arg4: memref<1x128xf32, #tpu.memory_space<vmem>>, %arg5: memref<1x128xf32, #tpu.memory_space<vmem>>, %arg6: memref<24x128xbf16, #tpu.memory_space<vmem>>) attributes {dimension_semantics = [#tpu.dimension_semantics<parallel>, #tpu.dimension_semantics<parallel>], iteration_bounds = array<i64: 1, 1>, scalar_prefetch = 0 : i64, scratch_operands = 0 : i64, tpu.core_type = #tpu.core_type<tc>, window_params = [{transform_indices = @transform_0, window_bounds = array<i64: 24, 128>}, {transform_indices = @transform_1, window_bounds = array<i64: 1, 2, 128>}, {transform_indices = @transform_2, window_bounds = array<i64: 1, 128>}, {transform_indices = @transform_3, window_bounds = array<i64: 1, 128>}, {transform_indices = @transform_4, window_bounds = array<i64: 24, 128>}]} {
    %c0 = arith.constant 0 : index
    %c0_0 = arith.constant 0 : index
    %c0_1 = arith.constant 0 : index
    %0 = vector.load %arg3[%c0, %c0_0, %c0_1] : memref<1x2x128xf32, #tpu.memory_space<vmem>>, vector<1x2x128xf32>
    %cst = arith.constant dense<0.000000e+00> : vector<2x128xf32>
    %1 = vector.multi_reduction <add>, %0, %cst [0] : vector<1x2x128xf32> to vector<2x128xf32>
    %2 = vector.extract_strided_slice %1 {offsets = [0, 0], sizes = [1, 128], strides = [1, 1]} : vector<2x128xf32> to vector<1x128xf32>
    %cst_2 = arith.constant 0.055555556 : f32
    %3 = vector.broadcast %cst_2 : f32 to vector<1x128xf32>
    %4 = arith.mulf %2, %3 : vector<1x128xf32>
    %5 = vector.extract_strided_slice %1 {offsets = [1, 0], sizes = [1, 128], strides = [1, 1]} : vector<2x128xf32> to vector<1x128xf32>
    %cst_3 = arith.constant 0.055555556 : f32
    %6 = vector.broadcast %cst_3 : f32 to vector<1x128xf32>
    %7 = arith.mulf %5, %6 : vector<1x128xf32>
    %8 = arith.mulf %4, %4 : vector<1x128xf32>
    %9 = arith.subf %7, %8 : vector<1x128xf32>
    %cst_4 = arith.constant 0.000000e+00 : f32
    %10 = vector.broadcast %cst_4 : f32 to vector<1x128xf32>
    %11 = arith.maximumf %9, %10 : vector<1x128xf32>
    %c0_5 = arith.constant 0 : index
    %c0_6 = arith.constant 0 : index
    %12 = vector.load %arg4[%c0_5, %c0_6] : memref<1x128xf32, #tpu.memory_space<vmem>>, vector<1x128xf32>
    %cst_7 = arith.constant 9.99999974E-6 : f32
    %13 = vector.broadcast %cst_7 : f32 to vector<1x128xf32>
    %14 = arith.addf %11, %13 : vector<1x128xf32>
    %15 = math.rsqrt %14 : vector<1x128xf32>
    %16 = arith.mulf %12, %15 : vector<1x128xf32>
    %c0_8 = arith.constant 0 : index
    %c0_9 = arith.constant 0 : index
    %17 = vector.load %arg5[%c0_8, %c0_9] : memref<1x128xf32, #tpu.memory_space<vmem>>, vector<1x128xf32>
    %18 = arith.mulf %4, %16 : vector<1x128xf32>
    %19 = arith.subf %17, %18 : vector<1x128xf32>
    %c0_10 = arith.constant 0 : index
    %c0_11 = arith.constant 0 : index
    %20 = vector.load %arg2[%c0_10, %c0_11] : memref<24x128xbf16, #tpu.memory_space<vmem>>, vector<24x128xbf16>
    %21 = arith.extf %20 : vector<24x128xbf16> to vector<24x128xf32>
    %22 = vector.broadcast %16 : vector<1x128xf32> to vector<24x128xf32>
    %23 = arith.mulf %21, %22 : vector<24x128xf32>
    %24 = vector.broadcast %19 : vector<1x128xf32> to vector<24x128xf32>
    %25 = arith.addf %23, %24 : vector<24x128xf32>
    %cst_12 = arith.constant 0.000000e+00 : f32
    %26 = vector.broadcast %cst_12 : f32 to vector<24x128xf32>
    %27 = arith.maximumf %25, %26 : vector<24x128xf32>
    %28 = arith.truncf %27 : vector<24x128xf32> to vector<24x128xbf16>
    %c0_13 = arith.constant 0 : index
    %c0_14 = arith.constant 0 : index
    %29 = vector.load %arg6[%c0_13, %c0_14] : memref<24x128xbf16, #tpu.memory_space<vmem>>, vector<24x128xbf16>
    tpu.vector_store %arg6[%c0_13, %c0_14], %28 {strides = array<i32>} : memref<24x128xbf16, #tpu.memory_space<vmem>>, vector<24x128xbf16>,
    return
  }
  func.func @transform_0(%arg0: i32, %arg1: i32) -> (i32, i32) {
    %c0_i32 = arith.constant 0 : i32
    return %arg1, %arg0 : i32, i32
  }
  func.func @transform_1(%arg0: i32, %arg1: i32) -> (i32, i32, i32) {
    %c0_i32 = arith.constant 0 : i32
    %c0_i32_0 = arith.constant 0 : i32
    %c0_i32_1 = arith.constant 0 : i32
    return %c0_i32, %c0_i32_0, %arg0 : i32, i32, i32
  }
  func.func @transform_2(%arg0: i32, %arg1: i32) -> (i32, i32) {
    %c0_i32 = arith.constant 0 : i32
    %c0_i32_0 = arith.constant 0 : i32
    return %c0_i32, %arg0 : i32, i32
  }
  func.func @transform_3(%arg0: i32, %arg1: i32) -> (i32, i32) {
    %c0_i32 = arith.constant 0 : i32
    %c0_i32_0 = arith.constant 0 : i32
    return %c0_i32, %arg0 : i32, i32
  }
  func.func @transform_4(%arg0: i32, %arg1: i32) -> (i32, i32) {
    %c0_i32 = arith.constant 0 : i32
    return %arg1, %arg0 : i32, i32
  }
}

module attributes {stable_mosaic.version = 11 : i64} {
  func.func @bn_apply_kernel(%arg0: i32, %arg1: i32, %arg2: memref<24x128xbf16, #tpu.memory_space<vmem>>, %arg3: memref<1x2x128xf32, #tpu.memory_space<vmem>>, %arg4: memref<1x128xf32, #tpu.memory_space<vmem>>, %arg5: memref<1x128xf32, #tpu.memory_space<vmem>>, %arg6: memref<24x128xbf16, #tpu.memory_space<vmem>>, %arg7: memref<24x128xbf16, #tpu.memory_space<vmem>>) attributes {dimension_semantics = [#tpu.dimension_semantics<parallel>, #tpu.dimension_semantics<parallel>], iteration_bounds = array<i64: 1, 1>, scalar_prefetch = 0 : i64, scratch_operands = 0 : i64, tpu.core_type = #tpu.core_type<tc>, window_params = [{transform_indices = @transform_0, window_bounds = array<i64: 24, 128>}, {transform_indices = @transform_1, window_bounds = array<i64: 1, 2, 128>}, {transform_indices = @transform_2, window_bounds = array<i64: 1, 128>}, {transform_indices = @transform_3, window_bounds = array<i64: 1, 128>}, {transform_indices = @transform_4, window_bounds = array<i64: 24, 128>}, {transform_indices = @transform_5, window_bounds = array<i64: 24, 128>}]} {
    %c0 = arith.constant 0 : index
    %c0_0 = arith.constant 0 : index
    %c0_1 = arith.constant 0 : index
    %0 = vector.load %arg3[%c0, %c0_0, %c0_1] : memref<1x2x128xf32, #tpu.memory_space<vmem>>, vector<1x2x128xf32>
    %cst = arith.constant dense<0.000000e+00> : vector<2x128xf32>
    %1 = vector.multi_reduction <add>, %0, %cst [0] : vector<1x2x128xf32> to vector<2x128xf32>
    %2 = vector.extract_strided_slice %1 {offsets = [0, 0], sizes = [1, 128], strides = [1, 1]} : vector<2x128xf32> to vector<1x128xf32>
    %cst_2 = arith.constant 0.055555556 : f32
    %3 = vector.broadcast %cst_2 : f32 to vector<1x128xf32>
    %4 = arith.mulf %2, %3 : vector<1x128xf32>
    %5 = vector.extract_strided_slice %1 {offsets = [1, 0], sizes = [1, 128], strides = [1, 1]} : vector<2x128xf32> to vector<1x128xf32>
    %cst_3 = arith.constant 0.055555556 : f32
    %6 = vector.broadcast %cst_3 : f32 to vector<1x128xf32>
    %7 = arith.mulf %5, %6 : vector<1x128xf32>
    %8 = arith.mulf %4, %4 : vector<1x128xf32>
    %9 = arith.subf %7, %8 : vector<1x128xf32>
    %cst_4 = arith.constant 0.000000e+00 : f32
    %10 = vector.broadcast %cst_4 : f32 to vector<1x128xf32>
    %11 = arith.maximumf %9, %10 : vector<1x128xf32>
    %c0_5 = arith.constant 0 : index
    %c0_6 = arith.constant 0 : index
    %12 = vector.load %arg4[%c0_5, %c0_6] : memref<1x128xf32, #tpu.memory_space<vmem>>, vector<1x128xf32>
    %cst_7 = arith.constant 9.99999974E-6 : f32
    %13 = vector.broadcast %cst_7 : f32 to vector<1x128xf32>
    %14 = arith.addf %11, %13 : vector<1x128xf32>
    %15 = math.rsqrt %14 : vector<1x128xf32>
    %16 = arith.mulf %12, %15 : vector<1x128xf32>
    %c0_8 = arith.constant 0 : index
    %c0_9 = arith.constant 0 : index
    %17 = vector.load %arg5[%c0_8, %c0_9] : memref<1x128xf32, #tpu.memory_space<vmem>>, vector<1x128xf32>
    %18 = arith.mulf %4, %16 : vector<1x128xf32>
    %19 = arith.subf %17, %18 : vector<1x128xf32>
    %c0_10 = arith.constant 0 : index
    %c0_11 = arith.constant 0 : index
    %20 = vector.load %arg2[%c0_10, %c0_11] : memref<24x128xbf16, #tpu.memory_space<vmem>>, vector<24x128xbf16>
    %21 = arith.extf %20 : vector<24x128xbf16> to vector<24x128xf32>
    %22 = vector.broadcast %16 : vector<1x128xf32> to vector<24x128xf32>
    %23 = arith.mulf %21, %22 : vector<24x128xf32>
    %24 = vector.broadcast %19 : vector<1x128xf32> to vector<24x128xf32>
    %25 = arith.addf %23, %24 : vector<24x128xf32>
    %c0_12 = arith.constant 0 : index
    %c0_13 = arith.constant 0 : index
    %26 = vector.load %arg6[%c0_12, %c0_13] : memref<24x128xbf16, #tpu.memory_space<vmem>>, vector<24x128xbf16>
    %27 = arith.extf %26 : vector<24x128xbf16> to vector<24x128xf32>
    %28 = arith.addf %25, %27 : vector<24x128xf32>
    %cst_14 = arith.constant 0.000000e+00 : f32
    %29 = vector.broadcast %cst_14 : f32 to vector<24x128xf32>
    %30 = arith.maximumf %28, %29 : vector<24x128xf32>
    %31 = arith.truncf %30 : vector<24x128xf32> to vector<24x128xbf16>
    %c0_15 = arith.constant 0 : index
    %c0_16 = arith.constant 0 : index
    %32 = vector.load %arg7[%c0_15, %c0_16] : memref<24x128xbf16, #tpu.memory_space<vmem>>, vector<24x128xbf16>
    tpu.vector_store %arg7[%c0_15, %c0_16], %31 {strides = array<i32>} : memref<24x128xbf16, #tpu.memory_space<vmem>>, vector<24x128xbf16>,
    return
  }
  func.func @transform_0(%arg0: i32, %arg1: i32) -> (i32, i32) {
    %c0_i32 = arith.constant 0 : i32
    return %arg1, %arg0 : i32, i32
  }
  func.func @transform_1(%arg0: i32, %arg1: i32) -> (i32, i32, i32) {
    %c0_i32 = arith.constant 0 : i32
    %c0_i32_0 = arith.constant 0 : i32
    %c0_i32_1 = arith.constant 0 : i32
    return %c0_i32, %c0_i32_0, %arg0 : i32, i32, i32
  }
  func.func @transform_2(%arg0: i32, %arg1: i32) -> (i32, i32) {
    %c0_i32 = arith.constant 0 : i32
    %c0_i32_0 = arith.constant 0 : i32
    return %c0_i32, %arg0 : i32, i32
  }
  func.func @transform_3(%arg0: i32, %arg1: i32) -> (i32, i32) {
    %c0_i32 = arith.constant 0 : i32
    %c0_i32_0 = arith.constant 0 : i32
    return %c0_i32, %arg0 : i32, i32
  }
  func.func @transform_4(%arg0: i32, %arg1: i32) -> (i32, i32) {
    %c0_i32 = arith.constant 0 : i32
    return %arg1, %arg0 : i32, i32
  }
  func.func @transform_5(%arg0: i32, %arg1: i32) -> (i32, i32) {
    %c0_i32 = arith.constant 0 : i32
    return %arg1, %arg0 : i32, i32
  }
}

module attributes {stable_mosaic.version = 11 : i64} {
  func.func @matmul_stats_kernel(%arg0: i32, %arg1: i32, %arg2: i32, %arg3: memref<24x384xbf16, #tpu.memory_space<vmem>>, %arg4: memref<384x128xbf16, #tpu.memory_space<vmem>>, %arg5: memref<24x128xbf16, #tpu.memory_space<vmem>>, %arg6: memref<1x2x128xf32, #tpu.memory_space<vmem>>, %arg7: memref<24x128xf32, #tpu.memory_space<vmem>>) attributes {dimension_semantics = [#tpu.dimension_semantics<parallel>, #tpu.dimension_semantics<parallel>, #tpu.dimension_semantics<arbitrary>], iteration_bounds = array<i64: 1, 1, 3>, scalar_prefetch = 0 : i64, scratch_operands = 1 : i64, tpu.core_type = #tpu.core_type<tc>, window_params = [{transform_indices = @transform_0, window_bounds = array<i64: 24, 384>}, {transform_indices = @transform_1, window_bounds = array<i64: 384, 128>}, {transform_indices = @transform_2, window_bounds = array<i64: 24, 128>}, {transform_indices = @transform_3, window_bounds = array<i64: 1, 2, 128>}]} {
    %c0 = arith.constant 0 : index
    %c0_0 = arith.constant 0 : index
    %0 = vector.load %arg3[%c0, %c0_0] : memref<24x384xbf16, #tpu.memory_space<vmem>>, vector<24x384xbf16>
    %c0_1 = arith.constant 0 : index
    %c0_2 = arith.constant 0 : index
    %1 = vector.load %arg4[%c0_1, %c0_2] : memref<384x128xbf16, #tpu.memory_space<vmem>>, vector<384x128xbf16>
    %cst = arith.constant dense<0.000000e+00> : vector<24x128xf32>
    %2 = tpu.matmul %0, %1, %cst {dimension_numbers = #tpu.dot_dimension_numbers<[1], [0], [0], [1], [0, 0, 1, 1], [], []>} : vector<24x384xbf16>, vector<384x128xbf16>, vector<24x128xf32> -> vector<24x128xf32>
    %c0_i32 = arith.constant 0 : i32
    %3 = arith.cmpi eq, %arg2, %c0_i32 : i32
    %4 = arith.extui %3 : i1 to i32
    %c0_i32_3 = arith.constant 0 : i32
    %5 = arith.cmpi ne, %4, %c0_i32_3 : i32
    scf.if %5 {
      %c0_7 = arith.constant 0 : index
      %c0_8 = arith.constant 0 : index
      %12 = vector.load %arg7[%c0_7, %c0_8] : memref<24x128xf32, #tpu.memory_space<vmem>>, vector<24x128xf32>
      tpu.vector_store %arg7[%c0_7, %c0_8], %2 {strides = array<i32>} : memref<24x128xf32, #tpu.memory_space<vmem>>, vector<24x128xf32>,
    } else {
    }
    %c0_i32_4 = arith.constant 0 : i32
    %6 = arith.cmpi sgt, %arg2, %c0_i32_4 : i32
    %7 = arith.extui %6 : i1 to i32
    %c0_i32_5 = arith.constant 0 : i32
    %8 = arith.cmpi ne, %7, %c0_i32_5 : i32
    scf.if %8 {
      %c0_7 = arith.constant 0 : index
      %c0_8 = arith.constant 0 : index
      %12 = vector.load %arg7[%c0_7, %c0_8] : memref<24x128xf32, #tpu.memory_space<vmem>>, vector<24x128xf32>
      %13 = arith.addf %12, %2 : vector<24x128xf32>
      %c0_9 = arith.constant 0 : index
      %c0_10 = arith.constant 0 : index
      %14 = vector.load %arg7[%c0_9, %c0_10] : memref<24x128xf32, #tpu.memory_space<vmem>>, vector<24x128xf32>
      tpu.vector_store %arg7[%c0_9, %c0_10], %13 {strides = array<i32>} : memref<24x128xf32, #tpu.memory_space<vmem>>, vector<24x128xf32>,
    } else {
    }
    %c2_i32 = arith.constant 2 : i32
    %9 = arith.cmpi eq, %arg2, %c2_i32 : i32
    %10 = arith.extui %9 : i1 to i32
    %c0_i32_6 = arith.constant 0 : i32
    %11 = arith.cmpi ne, %10, %c0_i32_6 : i32
    scf.if %11 {
      %c0_7 = arith.constant 0 : index
      %c0_8 = arith.constant 0 : index
      %12 = vector.load %arg7[%c0_7, %c0_8] : memref<24x128xf32, #tpu.memory_space<vmem>>, vector<24x128xf32>
      %13 = arith.truncf %12 : vector<24x128xf32> to vector<24x128xbf16>
      %c0_9 = arith.constant 0 : index
      %c0_10 = arith.constant 0 : index
      %14 = vector.load %arg5[%c0_9, %c0_10] : memref<24x128xbf16, #tpu.memory_space<vmem>>, vector<24x128xbf16>
      tpu.vector_store %arg5[%c0_9, %c0_10], %13 {strides = array<i32>} : memref<24x128xbf16, #tpu.memory_space<vmem>>, vector<24x128xbf16>,
      %cst_11 = arith.constant dense<0.000000e+00> : vector<128xf32>
      %15 = vector.multi_reduction <add>, %12, %cst_11 [0] : vector<24x128xf32> to vector<128xf32>
      %16 = vector.shape_cast %15 : vector<128xf32> to vector<1x128xf32>
      %17 = arith.mulf %12, %12 : vector<24x128xf32>
      %cst_12 = arith.constant dense<0.000000e+00> : vector<128xf32>
      %18 = vector.multi_reduction <add>, %17, %cst_12 [0] : vector<24x128xf32> to vector<128xf32>
      %19 = vector.shape_cast %18 : vector<128xf32> to vector<1x128xf32>
      %20 = tpu.concatenate %16, %19 in 0 : vector<1x128xf32>, vector<1x128xf32> -> vector<2x128xf32>
      %21 = vector.shape_cast %20 : vector<2x128xf32> to vector<1x2x128xf32>
      %c0_13 = arith.constant 0 : index
      %c0_14 = arith.constant 0 : index
      %c0_15 = arith.constant 0 : index
      %22 = vector.load %arg6[%c0_13, %c0_14, %c0_15] : memref<1x2x128xf32, #tpu.memory_space<vmem>>, vector<1x2x128xf32>
      tpu.vector_store %arg6[%c0_13, %c0_14, %c0_15], %21 {strides = array<i32>} : memref<1x2x128xf32, #tpu.memory_space<vmem>>, vector<1x2x128xf32>,
    } else {
    }
    return
  }
  func.func @transform_0(%arg0: i32, %arg1: i32, %arg2: i32) -> (i32, i32) {
    %c0_i32 = arith.constant 0 : i32
    return %arg0, %arg2 : i32, i32
  }
  func.func @transform_1(%arg0: i32, %arg1: i32, %arg2: i32) -> (i32, i32) {
    %c0_i32 = arith.constant 0 : i32
    return %arg2, %arg1 : i32, i32
  }
  func.func @transform_2(%arg0: i32, %arg1: i32, %arg2: i32) -> (i32, i32) {
    %c0_i32 = arith.constant 0 : i32
    return %arg0, %arg1 : i32, i32
  }
  func.func @transform_3(%arg0: i32, %arg1: i32, %arg2: i32) -> (i32, i32, i32) {
    %c0_i32 = arith.constant 0 : i32
    %c0_i32_0 = arith.constant 0 : i32
    return %arg0, %c0_i32, %arg1 : i32, i32, i32
  }
}

module attributes {stable_mosaic.version = 11 : i64} {
  func.func @matmul_stats_kernel(%arg0: i32, %arg1: i32, %arg2: i32, %arg3: memref<8x128xbf16, #tpu.memory_space<vmem>>, %arg4: memref<128x256xbf16, #tpu.memory_space<vmem>>, %arg5: memref<8x256xbf16, #tpu.memory_space<vmem>>, %arg6: memref<1x2x256xf32, #tpu.memory_space<vmem>>, %arg7: memref<8x256xf32, #tpu.memory_space<vmem>>) attributes {dimension_semantics = [#tpu.dimension_semantics<parallel>, #tpu.dimension_semantics<parallel>, #tpu.dimension_semantics<arbitrary>], iteration_bounds = array<i64: 1, 1, 1>, scalar_prefetch = 0 : i64, scratch_operands = 1 : i64, tpu.core_type = #tpu.core_type<tc>, window_params = [{transform_indices = @transform_0, window_bounds = array<i64: 8, 128>}, {transform_indices = @transform_1, window_bounds = array<i64: 128, 256>}, {transform_indices = @transform_2, window_bounds = array<i64: 8, 256>}, {transform_indices = @transform_3, window_bounds = array<i64: 1, 2, 256>}]} {
    %c0 = arith.constant 0 : index
    %c0_0 = arith.constant 0 : index
    %0 = vector.load %arg3[%c0, %c0_0] : memref<8x128xbf16, #tpu.memory_space<vmem>>, vector<8x128xbf16>
    %c0_1 = arith.constant 0 : index
    %c0_2 = arith.constant 0 : index
    %1 = vector.load %arg4[%c0_1, %c0_2] : memref<128x256xbf16, #tpu.memory_space<vmem>>, vector<128x256xbf16>
    %cst = arith.constant dense<0.000000e+00> : vector<8x256xf32>
    %2 = tpu.matmul %0, %1, %cst {dimension_numbers = #tpu.dot_dimension_numbers<[1], [0], [0], [1], [0, 0, 1, 1], [], []>} : vector<8x128xbf16>, vector<128x256xbf16>, vector<8x256xf32> -> vector<8x256xf32>
    %c0_i32 = arith.constant 0 : i32
    %3 = arith.cmpi eq, %arg2, %c0_i32 : i32
    %4 = arith.extui %3 : i1 to i32
    %c0_i32_3 = arith.constant 0 : i32
    %5 = arith.cmpi ne, %4, %c0_i32_3 : i32
    scf.if %5 {
      %c0_8 = arith.constant 0 : index
      %c0_9 = arith.constant 0 : index
      %12 = vector.load %arg7[%c0_8, %c0_9] : memref<8x256xf32, #tpu.memory_space<vmem>>, vector<8x256xf32>
      tpu.vector_store %arg7[%c0_8, %c0_9], %2 {strides = array<i32>} : memref<8x256xf32, #tpu.memory_space<vmem>>, vector<8x256xf32>,
    } else {
    }
    %c0_i32_4 = arith.constant 0 : i32
    %6 = arith.cmpi sgt, %arg2, %c0_i32_4 : i32
    %7 = arith.extui %6 : i1 to i32
    %c0_i32_5 = arith.constant 0 : i32
    %8 = arith.cmpi ne, %7, %c0_i32_5 : i32
    scf.if %8 {
      %c0_8 = arith.constant 0 : index
      %c0_9 = arith.constant 0 : index
      %12 = vector.load %arg7[%c0_8, %c0_9] : memref<8x256xf32, #tpu.memory_space<vmem>>, vector<8x256xf32>
      %13 = arith.addf %12, %2 : vector<8x256xf32>
      %c0_10 = arith.constant 0 : index
      %c0_11 = arith.constant 0 : index
      %14 = vector.load %arg7[%c0_10, %c0_11] : memref<8x256xf32, #tpu.memory_space<vmem>>, vector<8x256xf32>
      tpu.vector_store %arg7[%c0_10, %c0_11], %13 {strides = array<i32>} : memref<8x256xf32, #tpu.memory_space<vmem>>, vector<8x256xf32>,
    } else {
    }
    %c0_i32_6 = arith.constant 0 : i32
    %9 = arith.cmpi eq, %arg2, %c0_i32_6 : i32
    %10 = arith.extui %9 : i1 to i32
    %c0_i32_7 = arith.constant 0 : i32
    %11 = arith.cmpi ne, %10, %c0_i32_7 : i32
    scf.if %11 {
      %c0_8 = arith.constant 0 : index
      %c0_9 = arith.constant 0 : index
      %12 = vector.load %arg7[%c0_8, %c0_9] : memref<8x256xf32, #tpu.memory_space<vmem>>, vector<8x256xf32>
      %13 = arith.truncf %12 : vector<8x256xf32> to vector<8x256xbf16>
      %c0_10 = arith.constant 0 : index
      %c0_11 = arith.constant 0 : index
      %14 = vector.load %arg5[%c0_10, %c0_11] : memref<8x256xbf16, #tpu.memory_space<vmem>>, vector<8x256xbf16>
      tpu.vector_store %arg5[%c0_10, %c0_11], %13 {strides = array<i32>} : memref<8x256xbf16, #tpu.memory_space<vmem>>, vector<8x256xbf16>,
      %cst_12 = arith.constant dense<0.000000e+00> : vector<256xf32>
      %15 = vector.multi_reduction <add>, %12, %cst_12 [0] : vector<8x256xf32> to vector<256xf32>
      %16 = vector.shape_cast %15 : vector<256xf32> to vector<1x256xf32>
      %17 = arith.mulf %12, %12 : vector<8x256xf32>
      %cst_13 = arith.constant dense<0.000000e+00> : vector<256xf32>
      %18 = vector.multi_reduction <add>, %17, %cst_13 [0] : vector<8x256xf32> to vector<256xf32>
      %19 = vector.shape_cast %18 : vector<256xf32> to vector<1x256xf32>
      %20 = tpu.concatenate %16, %19 in 0 : vector<1x256xf32>, vector<1x256xf32> -> vector<2x256xf32>
      %21 = vector.shape_cast %20 : vector<2x256xf32> to vector<1x2x256xf32>
      %c0_14 = arith.constant 0 : index
      %c0_15 = arith.constant 0 : index
      %c0_16 = arith.constant 0 : index
      %22 = vector.load %arg6[%c0_14, %c0_15, %c0_16] : memref<1x2x256xf32, #tpu.memory_space<vmem>>, vector<1x2x256xf32>
      tpu.vector_store %arg6[%c0_14, %c0_15, %c0_16], %21 {strides = array<i32>} : memref<1x2x256xf32, #tpu.memory_space<vmem>>, vector<1x2x256xf32>,
    } else {
    }
    return
  }
  func.func @transform_0(%arg0: i32, %arg1: i32, %arg2: i32) -> (i32, i32) {
    %c0_i32 = arith.constant 0 : i32
    return %arg0, %arg2 : i32, i32
  }
  func.func @transform_1(%arg0: i32, %arg1: i32, %arg2: i32) -> (i32, i32) {
    %c0_i32 = arith.constant 0 : i32
    return %arg2, %arg1 : i32, i32
  }
  func.func @transform_2(%arg0: i32, %arg1: i32, %arg2: i32) -> (i32, i32) {
    %c0_i32 = arith.constant 0 : i32
    return %arg0, %arg1 : i32, i32
  }
  func.func @transform_3(%arg0: i32, %arg1: i32, %arg2: i32) -> (i32, i32, i32) {
    %c0_i32 = arith.constant 0 : i32
    %c0_i32_0 = arith.constant 0 : i32
    return %arg0, %c0_i32, %arg1 : i32, i32, i32
  }
}

module attributes {stable_mosaic.version = 11 : i64} {
  func.func @bn_apply_kernel(%arg0: i32, %arg1: i32, %arg2: memref<8x256xbf16, #tpu.memory_space<vmem>>, %arg3: memref<1x2x256xf32, #tpu.memory_space<vmem>>, %arg4: memref<1x256xf32, #tpu.memory_space<vmem>>, %arg5: memref<1x256xf32, #tpu.memory_space<vmem>>, %arg6: memref<8x256xbf16, #tpu.memory_space<vmem>>) attributes {dimension_semantics = [#tpu.dimension_semantics<parallel>, #tpu.dimension_semantics<parallel>], iteration_bounds = array<i64: 1, 1>, scalar_prefetch = 0 : i64, scratch_operands = 0 : i64, tpu.core_type = #tpu.core_type<tc>, window_params = [{transform_indices = @transform_0, window_bounds = array<i64: 8, 256>}, {transform_indices = @transform_1, window_bounds = array<i64: 1, 2, 256>}, {transform_indices = @transform_2, window_bounds = array<i64: 1, 256>}, {transform_indices = @transform_3, window_bounds = array<i64: 1, 256>}, {transform_indices = @transform_4, window_bounds = array<i64: 8, 256>}]} {
    %c0 = arith.constant 0 : index
    %c0_0 = arith.constant 0 : index
    %c0_1 = arith.constant 0 : index
    %0 = vector.load %arg3[%c0, %c0_0, %c0_1] : memref<1x2x256xf32, #tpu.memory_space<vmem>>, vector<1x2x256xf32>
    %cst = arith.constant dense<0.000000e+00> : vector<2x256xf32>
    %1 = vector.multi_reduction <add>, %0, %cst [0] : vector<1x2x256xf32> to vector<2x256xf32>
    %2 = vector.extract_strided_slice %1 {offsets = [0, 0], sizes = [1, 256], strides = [1, 1]} : vector<2x256xf32> to vector<1x256xf32>
    %cst_2 = arith.constant 1.250000e-01 : f32
    %3 = vector.broadcast %cst_2 : f32 to vector<1x256xf32>
    %4 = arith.mulf %2, %3 : vector<1x256xf32>
    %5 = vector.extract_strided_slice %1 {offsets = [1, 0], sizes = [1, 256], strides = [1, 1]} : vector<2x256xf32> to vector<1x256xf32>
    %cst_3 = arith.constant 1.250000e-01 : f32
    %6 = vector.broadcast %cst_3 : f32 to vector<1x256xf32>
    %7 = arith.mulf %5, %6 : vector<1x256xf32>
    %8 = arith.mulf %4, %4 : vector<1x256xf32>
    %9 = arith.subf %7, %8 : vector<1x256xf32>
    %cst_4 = arith.constant 0.000000e+00 : f32
    %10 = vector.broadcast %cst_4 : f32 to vector<1x256xf32>
    %11 = arith.maximumf %9, %10 : vector<1x256xf32>
    %c0_5 = arith.constant 0 : index
    %c0_6 = arith.constant 0 : index
    %12 = vector.load %arg4[%c0_5, %c0_6] : memref<1x256xf32, #tpu.memory_space<vmem>>, vector<1x256xf32>
    %cst_7 = arith.constant 9.99999974E-6 : f32
    %13 = vector.broadcast %cst_7 : f32 to vector<1x256xf32>
    %14 = arith.addf %11, %13 : vector<1x256xf32>
    %15 = math.rsqrt %14 : vector<1x256xf32>
    %16 = arith.mulf %12, %15 : vector<1x256xf32>
    %c0_8 = arith.constant 0 : index
    %c0_9 = arith.constant 0 : index
    %17 = vector.load %arg5[%c0_8, %c0_9] : memref<1x256xf32, #tpu.memory_space<vmem>>, vector<1x256xf32>
    %18 = arith.mulf %4, %16 : vector<1x256xf32>
    %19 = arith.subf %17, %18 : vector<1x256xf32>
    %c0_10 = arith.constant 0 : index
    %c0_11 = arith.constant 0 : index
    %20 = vector.load %arg2[%c0_10, %c0_11] : memref<8x256xbf16, #tpu.memory_space<vmem>>, vector<8x256xbf16>
    %21 = arith.extf %20 : vector<8x256xbf16> to vector<8x256xf32>
    %22 = vector.broadcast %16 : vector<1x256xf32> to vector<8x256xf32>
    %23 = arith.mulf %21, %22 : vector<8x256xf32>
    %24 = vector.broadcast %19 : vector<1x256xf32> to vector<8x256xf32>
    %25 = arith.addf %23, %24 : vector<8x256xf32>
    %26 = arith.truncf %25 : vector<8x256xf32> to vector<8x256xbf16>
    %c0_12 = arith.constant 0 : index
    %c0_13 = arith.constant 0 : index
    %27 = vector.load %arg6[%c0_12, %c0_13] : memref<8x256xbf16, #tpu.memory_space<vmem>>, vector<8x256xbf16>
    tpu.vector_store %arg6[%c0_12, %c0_13], %26 {strides = array<i32>} : memref<8x256xbf16, #tpu.memory_space<vmem>>, vector<8x256xbf16>,
    return
  }
  func.func @transform_0(%arg0: i32, %arg1: i32) -> (i32, i32) {
    %c0_i32 = arith.constant 0 : i32
    return %arg1, %arg0 : i32, i32
  }
  func.func @transform_1(%arg0: i32, %arg1: i32) -> (i32, i32, i32) {
    %c0_i32 = arith.constant 0 : i32
    %c0_i32_0 = arith.constant 0 : i32
    %c0_i32_1 = arith.constant 0 : i32
    return %c0_i32, %c0_i32_0, %arg0 : i32, i32, i32
  }
  func.func @transform_2(%arg0: i32, %arg1: i32) -> (i32, i32) {
    %c0_i32 = arith.constant 0 : i32
    %c0_i32_0 = arith.constant 0 : i32
    return %c0_i32, %arg0 : i32, i32
  }
  func.func @transform_3(%arg0: i32, %arg1: i32) -> (i32, i32) {
    %c0_i32 = arith.constant 0 : i32
    %c0_i32_0 = arith.constant 0 : i32
    return %c0_i32, %arg0 : i32, i32
  }
  func.func @transform_4(%arg0: i32, %arg1: i32) -> (i32, i32) {
    %c0_i32 = arith.constant 0 : i32
    return %arg1, %arg0 : i32, i32
  }
}

module attributes {stable_mosaic.version = 11 : i64} {
  func.func @matmul_stats_kernel(%arg0: i32, %arg1: i32, %arg2: i32, %arg3: memref<8x384xbf16, #tpu.memory_space<vmem>>, %arg4: memref<384x256xbf16, #tpu.memory_space<vmem>>, %arg5: memref<8x256xbf16, #tpu.memory_space<vmem>>, %arg6: memref<1x2x256xf32, #tpu.memory_space<vmem>>, %arg7: memref<8x256xf32, #tpu.memory_space<vmem>>) attributes {dimension_semantics = [#tpu.dimension_semantics<parallel>, #tpu.dimension_semantics<parallel>, #tpu.dimension_semantics<arbitrary>], iteration_bounds = array<i64: 1, 1, 3>, scalar_prefetch = 0 : i64, scratch_operands = 1 : i64, tpu.core_type = #tpu.core_type<tc>, window_params = [{transform_indices = @transform_0, window_bounds = array<i64: 8, 384>}, {transform_indices = @transform_1, window_bounds = array<i64: 384, 256>}, {transform_indices = @transform_2, window_bounds = array<i64: 8, 256>}, {transform_indices = @transform_3, window_bounds = array<i64: 1, 2, 256>}]} {
    %c0 = arith.constant 0 : index
    %c0_0 = arith.constant 0 : index
    %0 = vector.load %arg3[%c0, %c0_0] : memref<8x384xbf16, #tpu.memory_space<vmem>>, vector<8x384xbf16>
    %c0_1 = arith.constant 0 : index
    %c0_2 = arith.constant 0 : index
    %1 = vector.load %arg4[%c0_1, %c0_2] : memref<384x256xbf16, #tpu.memory_space<vmem>>, vector<384x256xbf16>
    %cst = arith.constant dense<0.000000e+00> : vector<8x256xf32>
    %2 = tpu.matmul %0, %1, %cst {dimension_numbers = #tpu.dot_dimension_numbers<[1], [0], [0], [1], [0, 0, 1, 1], [], []>} : vector<8x384xbf16>, vector<384x256xbf16>, vector<8x256xf32> -> vector<8x256xf32>
    %c0_i32 = arith.constant 0 : i32
    %3 = arith.cmpi eq, %arg2, %c0_i32 : i32
    %4 = arith.extui %3 : i1 to i32
    %c0_i32_3 = arith.constant 0 : i32
    %5 = arith.cmpi ne, %4, %c0_i32_3 : i32
    scf.if %5 {
      %c0_7 = arith.constant 0 : index
      %c0_8 = arith.constant 0 : index
      %12 = vector.load %arg7[%c0_7, %c0_8] : memref<8x256xf32, #tpu.memory_space<vmem>>, vector<8x256xf32>
      tpu.vector_store %arg7[%c0_7, %c0_8], %2 {strides = array<i32>} : memref<8x256xf32, #tpu.memory_space<vmem>>, vector<8x256xf32>,
    } else {
    }
    %c0_i32_4 = arith.constant 0 : i32
    %6 = arith.cmpi sgt, %arg2, %c0_i32_4 : i32
    %7 = arith.extui %6 : i1 to i32
    %c0_i32_5 = arith.constant 0 : i32
    %8 = arith.cmpi ne, %7, %c0_i32_5 : i32
    scf.if %8 {
      %c0_7 = arith.constant 0 : index
      %c0_8 = arith.constant 0 : index
      %12 = vector.load %arg7[%c0_7, %c0_8] : memref<8x256xf32, #tpu.memory_space<vmem>>, vector<8x256xf32>
      %13 = arith.addf %12, %2 : vector<8x256xf32>
      %c0_9 = arith.constant 0 : index
      %c0_10 = arith.constant 0 : index
      %14 = vector.load %arg7[%c0_9, %c0_10] : memref<8x256xf32, #tpu.memory_space<vmem>>, vector<8x256xf32>
      tpu.vector_store %arg7[%c0_9, %c0_10], %13 {strides = array<i32>} : memref<8x256xf32, #tpu.memory_space<vmem>>, vector<8x256xf32>,
    } else {
    }
    %c2_i32 = arith.constant 2 : i32
    %9 = arith.cmpi eq, %arg2, %c2_i32 : i32
    %10 = arith.extui %9 : i1 to i32
    %c0_i32_6 = arith.constant 0 : i32
    %11 = arith.cmpi ne, %10, %c0_i32_6 : i32
    scf.if %11 {
      %c0_7 = arith.constant 0 : index
      %c0_8 = arith.constant 0 : index
      %12 = vector.load %arg7[%c0_7, %c0_8] : memref<8x256xf32, #tpu.memory_space<vmem>>, vector<8x256xf32>
      %13 = arith.truncf %12 : vector<8x256xf32> to vector<8x256xbf16>
      %c0_9 = arith.constant 0 : index
      %c0_10 = arith.constant 0 : index
      %14 = vector.load %arg5[%c0_9, %c0_10] : memref<8x256xbf16, #tpu.memory_space<vmem>>, vector<8x256xbf16>
      tpu.vector_store %arg5[%c0_9, %c0_10], %13 {strides = array<i32>} : memref<8x256xbf16, #tpu.memory_space<vmem>>, vector<8x256xbf16>,
      %cst_11 = arith.constant dense<0.000000e+00> : vector<256xf32>
      %15 = vector.multi_reduction <add>, %12, %cst_11 [0] : vector<8x256xf32> to vector<256xf32>
      %16 = vector.shape_cast %15 : vector<256xf32> to vector<1x256xf32>
      %17 = arith.mulf %12, %12 : vector<8x256xf32>
      %cst_12 = arith.constant dense<0.000000e+00> : vector<256xf32>
      %18 = vector.multi_reduction <add>, %17, %cst_12 [0] : vector<8x256xf32> to vector<256xf32>
      %19 = vector.shape_cast %18 : vector<256xf32> to vector<1x256xf32>
      %20 = tpu.concatenate %16, %19 in 0 : vector<1x256xf32>, vector<1x256xf32> -> vector<2x256xf32>
      %21 = vector.shape_cast %20 : vector<2x256xf32> to vector<1x2x256xf32>
      %c0_13 = arith.constant 0 : index
      %c0_14 = arith.constant 0 : index
      %c0_15 = arith.constant 0 : index
      %22 = vector.load %arg6[%c0_13, %c0_14, %c0_15] : memref<1x2x256xf32, #tpu.memory_space<vmem>>, vector<1x2x256xf32>
      tpu.vector_store %arg6[%c0_13, %c0_14, %c0_15], %21 {strides = array<i32>} : memref<1x2x256xf32, #tpu.memory_space<vmem>>, vector<1x2x256xf32>,
    } else {
    }
    return
  }
  func.func @transform_0(%arg0: i32, %arg1: i32, %arg2: i32) -> (i32, i32) {
    %c0_i32 = arith.constant 0 : i32
    return %arg0, %arg2 : i32, i32
  }
  func.func @transform_1(%arg0: i32, %arg1: i32, %arg2: i32) -> (i32, i32) {
    %c0_i32 = arith.constant 0 : i32
    return %arg2, %arg1 : i32, i32
  }
  func.func @transform_2(%arg0: i32, %arg1: i32, %arg2: i32) -> (i32, i32) {
    %c0_i32 = arith.constant 0 : i32
    return %arg0, %arg1 : i32, i32
  }
  func.func @transform_3(%arg0: i32, %arg1: i32, %arg2: i32) -> (i32, i32, i32) {
    %c0_i32 = arith.constant 0 : i32
    %c0_i32_0 = arith.constant 0 : i32
    return %arg0, %c0_i32, %arg1 : i32, i32, i32
  }
}

module attributes {stable_mosaic.version = 11 : i64} {
  func.func @bn_apply_kernel(%arg0: i32, %arg1: i32, %arg2: memref<8x256xbf16, #tpu.memory_space<vmem>>, %arg3: memref<1x2x256xf32, #tpu.memory_space<vmem>>, %arg4: memref<1x256xf32, #tpu.memory_space<vmem>>, %arg5: memref<1x256xf32, #tpu.memory_space<vmem>>, %arg6: memref<8x256xbf16, #tpu.memory_space<vmem>>) attributes {dimension_semantics = [#tpu.dimension_semantics<parallel>, #tpu.dimension_semantics<parallel>], iteration_bounds = array<i64: 1, 1>, scalar_prefetch = 0 : i64, scratch_operands = 0 : i64, tpu.core_type = #tpu.core_type<tc>, window_params = [{transform_indices = @transform_0, window_bounds = array<i64: 8, 256>}, {transform_indices = @transform_1, window_bounds = array<i64: 1, 2, 256>}, {transform_indices = @transform_2, window_bounds = array<i64: 1, 256>}, {transform_indices = @transform_3, window_bounds = array<i64: 1, 256>}, {transform_indices = @transform_4, window_bounds = array<i64: 8, 256>}]} {
    %c0 = arith.constant 0 : index
    %c0_0 = arith.constant 0 : index
    %c0_1 = arith.constant 0 : index
    %0 = vector.load %arg3[%c0, %c0_0, %c0_1] : memref<1x2x256xf32, #tpu.memory_space<vmem>>, vector<1x2x256xf32>
    %cst = arith.constant dense<0.000000e+00> : vector<2x256xf32>
    %1 = vector.multi_reduction <add>, %0, %cst [0] : vector<1x2x256xf32> to vector<2x256xf32>
    %2 = vector.extract_strided_slice %1 {offsets = [0, 0], sizes = [1, 256], strides = [1, 1]} : vector<2x256xf32> to vector<1x256xf32>
    %cst_2 = arith.constant 1.250000e-01 : f32
    %3 = vector.broadcast %cst_2 : f32 to vector<1x256xf32>
    %4 = arith.mulf %2, %3 : vector<1x256xf32>
    %5 = vector.extract_strided_slice %1 {offsets = [1, 0], sizes = [1, 256], strides = [1, 1]} : vector<2x256xf32> to vector<1x256xf32>
    %cst_3 = arith.constant 1.250000e-01 : f32
    %6 = vector.broadcast %cst_3 : f32 to vector<1x256xf32>
    %7 = arith.mulf %5, %6 : vector<1x256xf32>
    %8 = arith.mulf %4, %4 : vector<1x256xf32>
    %9 = arith.subf %7, %8 : vector<1x256xf32>
    %cst_4 = arith.constant 0.000000e+00 : f32
    %10 = vector.broadcast %cst_4 : f32 to vector<1x256xf32>
    %11 = arith.maximumf %9, %10 : vector<1x256xf32>
    %c0_5 = arith.constant 0 : index
    %c0_6 = arith.constant 0 : index
    %12 = vector.load %arg4[%c0_5, %c0_6] : memref<1x256xf32, #tpu.memory_space<vmem>>, vector<1x256xf32>
    %cst_7 = arith.constant 9.99999974E-6 : f32
    %13 = vector.broadcast %cst_7 : f32 to vector<1x256xf32>
    %14 = arith.addf %11, %13 : vector<1x256xf32>
    %15 = math.rsqrt %14 : vector<1x256xf32>
    %16 = arith.mulf %12, %15 : vector<1x256xf32>
    %c0_8 = arith.constant 0 : index
    %c0_9 = arith.constant 0 : index
    %17 = vector.load %arg5[%c0_8, %c0_9] : memref<1x256xf32, #tpu.memory_space<vmem>>, vector<1x256xf32>
    %18 = arith.mulf %4, %16 : vector<1x256xf32>
    %19 = arith.subf %17, %18 : vector<1x256xf32>
    %c0_10 = arith.constant 0 : index
    %c0_11 = arith.constant 0 : index
    %20 = vector.load %arg2[%c0_10, %c0_11] : memref<8x256xbf16, #tpu.memory_space<vmem>>, vector<8x256xbf16>
    %21 = arith.extf %20 : vector<8x256xbf16> to vector<8x256xf32>
    %22 = vector.broadcast %16 : vector<1x256xf32> to vector<8x256xf32>
    %23 = arith.mulf %21, %22 : vector<8x256xf32>
    %24 = vector.broadcast %19 : vector<1x256xf32> to vector<8x256xf32>
    %25 = arith.addf %23, %24 : vector<8x256xf32>
    %cst_12 = arith.constant 0.000000e+00 : f32
    %26 = vector.broadcast %cst_12 : f32 to vector<8x256xf32>
    %27 = arith.maximumf %25, %26 : vector<8x256xf32>
    %28 = arith.truncf %27 : vector<8x256xf32> to vector<8x256xbf16>
    %c0_13 = arith.constant 0 : index
    %c0_14 = arith.constant 0 : index
    %29 = vector.load %arg6[%c0_13, %c0_14] : memref<8x256xbf16, #tpu.memory_space<vmem>>, vector<8x256xbf16>
    tpu.vector_store %arg6[%c0_13, %c0_14], %28 {strides = array<i32>} : memref<8x256xbf16, #tpu.memory_space<vmem>>, vector<8x256xbf16>,
    return
  }
  func.func @transform_0(%arg0: i32, %arg1: i32) -> (i32, i32) {
    %c0_i32 = arith.constant 0 : i32
    return %arg1, %arg0 : i32, i32
  }
  func.func @transform_1(%arg0: i32, %arg1: i32) -> (i32, i32, i32) {
    %c0_i32 = arith.constant 0 : i32
    %c0_i32_0 = arith.constant 0 : i32
    %c0_i32_1 = arith.constant 0 : i32
    return %c0_i32, %c0_i32_0, %arg0 : i32, i32, i32
  }
  func.func @transform_2(%arg0: i32, %arg1: i32) -> (i32, i32) {
    %c0_i32 = arith.constant 0 : i32
    %c0_i32_0 = arith.constant 0 : i32
    return %c0_i32, %arg0 : i32, i32
  }
  func.func @transform_3(%arg0: i32, %arg1: i32) -> (i32, i32) {
    %c0_i32 = arith.constant 0 : i32
    %c0_i32_0 = arith.constant 0 : i32
    return %c0_i32, %arg0 : i32, i32
  }
  func.func @transform_4(%arg0: i32, %arg1: i32) -> (i32, i32) {
    %c0_i32 = arith.constant 0 : i32
    return %arg1, %arg0 : i32, i32
  }
}

module attributes {stable_mosaic.version = 11 : i64} {
  func.func @bn_apply_kernel(%arg0: i32, %arg1: i32, %arg2: memref<8x256xbf16, #tpu.memory_space<vmem>>, %arg3: memref<1x2x256xf32, #tpu.memory_space<vmem>>, %arg4: memref<1x256xf32, #tpu.memory_space<vmem>>, %arg5: memref<1x256xf32, #tpu.memory_space<vmem>>, %arg6: memref<8x256xbf16, #tpu.memory_space<vmem>>, %arg7: memref<8x256xbf16, #tpu.memory_space<vmem>>) attributes {dimension_semantics = [#tpu.dimension_semantics<parallel>, #tpu.dimension_semantics<parallel>], iteration_bounds = array<i64: 1, 1>, scalar_prefetch = 0 : i64, scratch_operands = 0 : i64, tpu.core_type = #tpu.core_type<tc>, window_params = [{transform_indices = @transform_0, window_bounds = array<i64: 8, 256>}, {transform_indices = @transform_1, window_bounds = array<i64: 1, 2, 256>}, {transform_indices = @transform_2, window_bounds = array<i64: 1, 256>}, {transform_indices = @transform_3, window_bounds = array<i64: 1, 256>}, {transform_indices = @transform_4, window_bounds = array<i64: 8, 256>}, {transform_indices = @transform_5, window_bounds = array<i64: 8, 256>}]} {
    %c0 = arith.constant 0 : index
    %c0_0 = arith.constant 0 : index
    %c0_1 = arith.constant 0 : index
    %0 = vector.load %arg3[%c0, %c0_0, %c0_1] : memref<1x2x256xf32, #tpu.memory_space<vmem>>, vector<1x2x256xf32>
    %cst = arith.constant dense<0.000000e+00> : vector<2x256xf32>
    %1 = vector.multi_reduction <add>, %0, %cst [0] : vector<1x2x256xf32> to vector<2x256xf32>
    %2 = vector.extract_strided_slice %1 {offsets = [0, 0], sizes = [1, 256], strides = [1, 1]} : vector<2x256xf32> to vector<1x256xf32>
    %cst_2 = arith.constant 1.250000e-01 : f32
    %3 = vector.broadcast %cst_2 : f32 to vector<1x256xf32>
    %4 = arith.mulf %2, %3 : vector<1x256xf32>
    %5 = vector.extract_strided_slice %1 {offsets = [1, 0], sizes = [1, 256], strides = [1, 1]} : vector<2x256xf32> to vector<1x256xf32>
    %cst_3 = arith.constant 1.250000e-01 : f32
    %6 = vector.broadcast %cst_3 : f32 to vector<1x256xf32>
    %7 = arith.mulf %5, %6 : vector<1x256xf32>
    %8 = arith.mulf %4, %4 : vector<1x256xf32>
    %9 = arith.subf %7, %8 : vector<1x256xf32>
    %cst_4 = arith.constant 0.000000e+00 : f32
    %10 = vector.broadcast %cst_4 : f32 to vector<1x256xf32>
    %11 = arith.maximumf %9, %10 : vector<1x256xf32>
    %c0_5 = arith.constant 0 : index
    %c0_6 = arith.constant 0 : index
    %12 = vector.load %arg4[%c0_5, %c0_6] : memref<1x256xf32, #tpu.memory_space<vmem>>, vector<1x256xf32>
    %cst_7 = arith.constant 9.99999974E-6 : f32
    %13 = vector.broadcast %cst_7 : f32 to vector<1x256xf32>
    %14 = arith.addf %11, %13 : vector<1x256xf32>
    %15 = math.rsqrt %14 : vector<1x256xf32>
    %16 = arith.mulf %12, %15 : vector<1x256xf32>
    %c0_8 = arith.constant 0 : index
    %c0_9 = arith.constant 0 : index
    %17 = vector.load %arg5[%c0_8, %c0_9] : memref<1x256xf32, #tpu.memory_space<vmem>>, vector<1x256xf32>
    %18 = arith.mulf %4, %16 : vector<1x256xf32>
    %19 = arith.subf %17, %18 : vector<1x256xf32>
    %c0_10 = arith.constant 0 : index
    %c0_11 = arith.constant 0 : index
    %20 = vector.load %arg2[%c0_10, %c0_11] : memref<8x256xbf16, #tpu.memory_space<vmem>>, vector<8x256xbf16>
    %21 = arith.extf %20 : vector<8x256xbf16> to vector<8x256xf32>
    %22 = vector.broadcast %16 : vector<1x256xf32> to vector<8x256xf32>
    %23 = arith.mulf %21, %22 : vector<8x256xf32>
    %24 = vector.broadcast %19 : vector<1x256xf32> to vector<8x256xf32>
    %25 = arith.addf %23, %24 : vector<8x256xf32>
    %c0_12 = arith.constant 0 : index
    %c0_13 = arith.constant 0 : index
    %26 = vector.load %arg6[%c0_12, %c0_13] : memref<8x256xbf16, #tpu.memory_space<vmem>>, vector<8x256xbf16>
    %27 = arith.extf %26 : vector<8x256xbf16> to vector<8x256xf32>
    %28 = arith.addf %25, %27 : vector<8x256xf32>
    %cst_14 = arith.constant 0.000000e+00 : f32
    %29 = vector.broadcast %cst_14 : f32 to vector<8x256xf32>
    %30 = arith.maximumf %28, %29 : vector<8x256xf32>
    %31 = arith.truncf %30 : vector<8x256xf32> to vector<8x256xbf16>
    %c0_15 = arith.constant 0 : index
    %c0_16 = arith.constant 0 : index
    %32 = vector.load %arg7[%c0_15, %c0_16] : memref<8x256xbf16, #tpu.memory_space<vmem>>, vector<8x256xbf16>
    tpu.vector_store %arg7[%c0_15, %c0_16], %31 {strides = array<i32>} : memref<8x256xbf16, #tpu.memory_space<vmem>>, vector<8x256xbf16>,
    return
  }
  func.func @transform_0(%arg0: i32, %arg1: i32) -> (i32, i32) {
    %c0_i32 = arith.constant 0 : i32
    return %arg1, %arg0 : i32, i32
  }
  func.func @transform_1(%arg0: i32, %arg1: i32) -> (i32, i32, i32) {
    %c0_i32 = arith.constant 0 : i32
    %c0_i32_0 = arith.constant 0 : i32
    %c0_i32_1 = arith.constant 0 : i32
    return %c0_i32, %c0_i32_0, %arg0 : i32, i32, i32
  }
  func.func @transform_2(%arg0: i32, %arg1: i32) -> (i32, i32) {
    %c0_i32 = arith.constant 0 : i32
    %c0_i32_0 = arith.constant 0 : i32
    return %c0_i32, %arg0 : i32, i32
  }
  func.func @transform_3(%arg0: i32, %arg1: i32) -> (i32, i32) {
    %c0_i32 = arith.constant 0 : i32
    %c0_i32_0 = arith.constant 0 : i32
    return %c0_i32, %arg0 : i32, i32
  }
  func.func @transform_4(%arg0: i32, %arg1: i32) -> (i32, i32) {
    %c0_i32 = arith.constant 0 : i32
    return %arg1, %arg0 : i32, i32
  }
  func.func @transform_5(%arg0: i32, %arg1: i32) -> (i32, i32) {
    %c0_i32 = arith.constant 0 : i32
    return %arg1, %arg0 : i32, i32
  }
}

module attributes {stable_mosaic.version = 11 : i64} {
  func.func @matmul_stats_kernel(%arg0: i32, %arg1: i32, %arg2: i32, %arg3: memref<8x384xbf16, #tpu.memory_space<vmem>>, %arg4: memref<384x256xbf16, #tpu.memory_space<vmem>>, %arg5: memref<8x256xbf16, #tpu.memory_space<vmem>>, %arg6: memref<1x2x256xf32, #tpu.memory_space<vmem>>, %arg7: memref<8x256xf32, #tpu.memory_space<vmem>>) attributes {dimension_semantics = [#tpu.dimension_semantics<parallel>, #tpu.dimension_semantics<parallel>, #tpu.dimension_semantics<arbitrary>], iteration_bounds = array<i64: 1, 1, 6>, scalar_prefetch = 0 : i64, scratch_operands = 1 : i64, tpu.core_type = #tpu.core_type<tc>, window_params = [{transform_indices = @transform_0, window_bounds = array<i64: 8, 384>}, {transform_indices = @transform_1, window_bounds = array<i64: 384, 256>}, {transform_indices = @transform_2, window_bounds = array<i64: 8, 256>}, {transform_indices = @transform_3, window_bounds = array<i64: 1, 2, 256>}]} {
    %c0 = arith.constant 0 : index
    %c0_0 = arith.constant 0 : index
    %0 = vector.load %arg3[%c0, %c0_0] : memref<8x384xbf16, #tpu.memory_space<vmem>>, vector<8x384xbf16>
    %c0_1 = arith.constant 0 : index
    %c0_2 = arith.constant 0 : index
    %1 = vector.load %arg4[%c0_1, %c0_2] : memref<384x256xbf16, #tpu.memory_space<vmem>>, vector<384x256xbf16>
    %cst = arith.constant dense<0.000000e+00> : vector<8x256xf32>
    %2 = tpu.matmul %0, %1, %cst {dimension_numbers = #tpu.dot_dimension_numbers<[1], [0], [0], [1], [0, 0, 1, 1], [], []>} : vector<8x384xbf16>, vector<384x256xbf16>, vector<8x256xf32> -> vector<8x256xf32>
    %c0_i32 = arith.constant 0 : i32
    %3 = arith.cmpi eq, %arg2, %c0_i32 : i32
    %4 = arith.extui %3 : i1 to i32
    %c0_i32_3 = arith.constant 0 : i32
    %5 = arith.cmpi ne, %4, %c0_i32_3 : i32
    scf.if %5 {
      %c0_7 = arith.constant 0 : index
      %c0_8 = arith.constant 0 : index
      %12 = vector.load %arg7[%c0_7, %c0_8] : memref<8x256xf32, #tpu.memory_space<vmem>>, vector<8x256xf32>
      tpu.vector_store %arg7[%c0_7, %c0_8], %2 {strides = array<i32>} : memref<8x256xf32, #tpu.memory_space<vmem>>, vector<8x256xf32>,
    } else {
    }
    %c0_i32_4 = arith.constant 0 : i32
    %6 = arith.cmpi sgt, %arg2, %c0_i32_4 : i32
    %7 = arith.extui %6 : i1 to i32
    %c0_i32_5 = arith.constant 0 : i32
    %8 = arith.cmpi ne, %7, %c0_i32_5 : i32
    scf.if %8 {
      %c0_7 = arith.constant 0 : index
      %c0_8 = arith.constant 0 : index
      %12 = vector.load %arg7[%c0_7, %c0_8] : memref<8x256xf32, #tpu.memory_space<vmem>>, vector<8x256xf32>
      %13 = arith.addf %12, %2 : vector<8x256xf32>
      %c0_9 = arith.constant 0 : index
      %c0_10 = arith.constant 0 : index
      %14 = vector.load %arg7[%c0_9, %c0_10] : memref<8x256xf32, #tpu.memory_space<vmem>>, vector<8x256xf32>
      tpu.vector_store %arg7[%c0_9, %c0_10], %13 {strides = array<i32>} : memref<8x256xf32, #tpu.memory_space<vmem>>, vector<8x256xf32>,
    } else {
    }
    %c5_i32 = arith.constant 5 : i32
    %9 = arith.cmpi eq, %arg2, %c5_i32 : i32
    %10 = arith.extui %9 : i1 to i32
    %c0_i32_6 = arith.constant 0 : i32
    %11 = arith.cmpi ne, %10, %c0_i32_6 : i32
    scf.if %11 {
      %c0_7 = arith.constant 0 : index
      %c0_8 = arith.constant 0 : index
      %12 = vector.load %arg7[%c0_7, %c0_8] : memref<8x256xf32, #tpu.memory_space<vmem>>, vector<8x256xf32>
      %13 = arith.truncf %12 : vector<8x256xf32> to vector<8x256xbf16>
      %c0_9 = arith.constant 0 : index
      %c0_10 = arith.constant 0 : index
      %14 = vector.load %arg5[%c0_9, %c0_10] : memref<8x256xbf16, #tpu.memory_space<vmem>>, vector<8x256xbf16>
      tpu.vector_store %arg5[%c0_9, %c0_10], %13 {strides = array<i32>} : memref<8x256xbf16, #tpu.memory_space<vmem>>, vector<8x256xbf16>,
      %cst_11 = arith.constant dense<0.000000e+00> : vector<256xf32>
      %15 = vector.multi_reduction <add>, %12, %cst_11 [0] : vector<8x256xf32> to vector<256xf32>
      %16 = vector.shape_cast %15 : vector<256xf32> to vector<1x256xf32>
      %17 = arith.mulf %12, %12 : vector<8x256xf32>
      %cst_12 = arith.constant dense<0.000000e+00> : vector<256xf32>
      %18 = vector.multi_reduction <add>, %17, %cst_12 [0] : vector<8x256xf32> to vector<256xf32>
      %19 = vector.shape_cast %18 : vector<256xf32> to vector<1x256xf32>
      %20 = tpu.concatenate %16, %19 in 0 : vector<1x256xf32>, vector<1x256xf32> -> vector<2x256xf32>
      %21 = vector.shape_cast %20 : vector<2x256xf32> to vector<1x2x256xf32>
      %c0_13 = arith.constant 0 : index
      %c0_14 = arith.constant 0 : index
      %c0_15 = arith.constant 0 : index
      %22 = vector.load %arg6[%c0_13, %c0_14, %c0_15] : memref<1x2x256xf32, #tpu.memory_space<vmem>>, vector<1x2x256xf32>
      tpu.vector_store %arg6[%c0_13, %c0_14, %c0_15], %21 {strides = array<i32>} : memref<1x2x256xf32, #tpu.memory_space<vmem>>, vector<1x2x256xf32>,
    } else {
    }
    return
  }
  func.func @transform_0(%arg0: i32, %arg1: i32, %arg2: i32) -> (i32, i32) {
    %c0_i32 = arith.constant 0 : i32
    return %arg0, %arg2 : i32, i32
  }
  func.func @transform_1(%arg0: i32, %arg1: i32, %arg2: i32) -> (i32, i32) {
    %c0_i32 = arith.constant 0 : i32
    return %arg2, %arg1 : i32, i32
  }
  func.func @transform_2(%arg0: i32, %arg1: i32, %arg2: i32) -> (i32, i32) {
    %c0_i32 = arith.constant 0 : i32
    return %arg0, %arg1 : i32, i32
  }
  func.func @transform_3(%arg0: i32, %arg1: i32, %arg2: i32) -> (i32, i32, i32) {
    %c0_i32 = arith.constant 0 : i32
    %c0_i32_0 = arith.constant 0 : i32
    return %arg0, %c0_i32, %arg1 : i32, i32, i32
  }
}

module attributes {stable_mosaic.version = 11 : i64} {
  func.func @matmul_stats_kernel(%arg0: i32, %arg1: i32, %arg2: i32, %arg3: memref<8x256xbf16, #tpu.memory_space<vmem>>, %arg4: memref<256x512xbf16, #tpu.memory_space<vmem>>, %arg5: memref<8x512xbf16, #tpu.memory_space<vmem>>, %arg6: memref<1x2x512xf32, #tpu.memory_space<vmem>>, %arg7: memref<8x512xf32, #tpu.memory_space<vmem>>) attributes {dimension_semantics = [#tpu.dimension_semantics<parallel>, #tpu.dimension_semantics<parallel>, #tpu.dimension_semantics<arbitrary>], iteration_bounds = array<i64: 1, 1, 1>, scalar_prefetch = 0 : i64, scratch_operands = 1 : i64, tpu.core_type = #tpu.core_type<tc>, window_params = [{transform_indices = @transform_0, window_bounds = array<i64: 8, 256>}, {transform_indices = @transform_1, window_bounds = array<i64: 256, 512>}, {transform_indices = @transform_2, window_bounds = array<i64: 8, 512>}, {transform_indices = @transform_3, window_bounds = array<i64: 1, 2, 512>}]} {
    %c0 = arith.constant 0 : index
    %c0_0 = arith.constant 0 : index
    %0 = vector.load %arg3[%c0, %c0_0] : memref<8x256xbf16, #tpu.memory_space<vmem>>, vector<8x256xbf16>
    %c0_1 = arith.constant 0 : index
    %c0_2 = arith.constant 0 : index
    %1 = vector.load %arg4[%c0_1, %c0_2] : memref<256x512xbf16, #tpu.memory_space<vmem>>, vector<256x512xbf16>
    %cst = arith.constant dense<0.000000e+00> : vector<8x512xf32>
    %2 = tpu.matmul %0, %1, %cst {dimension_numbers = #tpu.dot_dimension_numbers<[1], [0], [0], [1], [0, 0, 1, 1], [], []>} : vector<8x256xbf16>, vector<256x512xbf16>, vector<8x512xf32> -> vector<8x512xf32>
    %c0_i32 = arith.constant 0 : i32
    %3 = arith.cmpi eq, %arg2, %c0_i32 : i32
    %4 = arith.extui %3 : i1 to i32
    %c0_i32_3 = arith.constant 0 : i32
    %5 = arith.cmpi ne, %4, %c0_i32_3 : i32
    scf.if %5 {
      %c0_8 = arith.constant 0 : index
      %c0_9 = arith.constant 0 : index
      %12 = vector.load %arg7[%c0_8, %c0_9] : memref<8x512xf32, #tpu.memory_space<vmem>>, vector<8x512xf32>
      tpu.vector_store %arg7[%c0_8, %c0_9], %2 {strides = array<i32>} : memref<8x512xf32, #tpu.memory_space<vmem>>, vector<8x512xf32>,
    } else {
    }
    %c0_i32_4 = arith.constant 0 : i32
    %6 = arith.cmpi sgt, %arg2, %c0_i32_4 : i32
    %7 = arith.extui %6 : i1 to i32
    %c0_i32_5 = arith.constant 0 : i32
    %8 = arith.cmpi ne, %7, %c0_i32_5 : i32
    scf.if %8 {
      %c0_8 = arith.constant 0 : index
      %c0_9 = arith.constant 0 : index
      %12 = vector.load %arg7[%c0_8, %c0_9] : memref<8x512xf32, #tpu.memory_space<vmem>>, vector<8x512xf32>
      %13 = arith.addf %12, %2 : vector<8x512xf32>
      %c0_10 = arith.constant 0 : index
      %c0_11 = arith.constant 0 : index
      %14 = vector.load %arg7[%c0_10, %c0_11] : memref<8x512xf32, #tpu.memory_space<vmem>>, vector<8x512xf32>
      tpu.vector_store %arg7[%c0_10, %c0_11], %13 {strides = array<i32>} : memref<8x512xf32, #tpu.memory_space<vmem>>, vector<8x512xf32>,
    } else {
    }
    %c0_i32_6 = arith.constant 0 : i32
    %9 = arith.cmpi eq, %arg2, %c0_i32_6 : i32
    %10 = arith.extui %9 : i1 to i32
    %c0_i32_7 = arith.constant 0 : i32
    %11 = arith.cmpi ne, %10, %c0_i32_7 : i32
    scf.if %11 {
      %c0_8 = arith.constant 0 : index
      %c0_9 = arith.constant 0 : index
      %12 = vector.load %arg7[%c0_8, %c0_9] : memref<8x512xf32, #tpu.memory_space<vmem>>, vector<8x512xf32>
      %13 = arith.truncf %12 : vector<8x512xf32> to vector<8x512xbf16>
      %c0_10 = arith.constant 0 : index
      %c0_11 = arith.constant 0 : index
      %14 = vector.load %arg5[%c0_10, %c0_11] : memref<8x512xbf16, #tpu.memory_space<vmem>>, vector<8x512xbf16>
      tpu.vector_store %arg5[%c0_10, %c0_11], %13 {strides = array<i32>} : memref<8x512xbf16, #tpu.memory_space<vmem>>, vector<8x512xbf16>,
      %cst_12 = arith.constant dense<0.000000e+00> : vector<512xf32>
      %15 = vector.multi_reduction <add>, %12, %cst_12 [0] : vector<8x512xf32> to vector<512xf32>
      %16 = vector.shape_cast %15 : vector<512xf32> to vector<1x512xf32>
      %17 = arith.mulf %12, %12 : vector<8x512xf32>
      %cst_13 = arith.constant dense<0.000000e+00> : vector<512xf32>
      %18 = vector.multi_reduction <add>, %17, %cst_13 [0] : vector<8x512xf32> to vector<512xf32>
      %19 = vector.shape_cast %18 : vector<512xf32> to vector<1x512xf32>
      %20 = tpu.concatenate %16, %19 in 0 : vector<1x512xf32>, vector<1x512xf32> -> vector<2x512xf32>
      %21 = vector.shape_cast %20 : vector<2x512xf32> to vector<1x2x512xf32>
      %c0_14 = arith.constant 0 : index
      %c0_15 = arith.constant 0 : index
      %c0_16 = arith.constant 0 : index
      %22 = vector.load %arg6[%c0_14, %c0_15, %c0_16] : memref<1x2x512xf32, #tpu.memory_space<vmem>>, vector<1x2x512xf32>
      tpu.vector_store %arg6[%c0_14, %c0_15, %c0_16], %21 {strides = array<i32>} : memref<1x2x512xf32, #tpu.memory_space<vmem>>, vector<1x2x512xf32>,
    } else {
    }
    return
  }
  func.func @transform_0(%arg0: i32, %arg1: i32, %arg2: i32) -> (i32, i32) {
    %c0_i32 = arith.constant 0 : i32
    return %arg0, %arg2 : i32, i32
  }
  func.func @transform_1(%arg0: i32, %arg1: i32, %arg2: i32) -> (i32, i32) {
    %c0_i32 = arith.constant 0 : i32
    return %arg2, %arg1 : i32, i32
  }
  func.func @transform_2(%arg0: i32, %arg1: i32, %arg2: i32) -> (i32, i32) {
    %c0_i32 = arith.constant 0 : i32
    return %arg0, %arg1 : i32, i32
  }
  func.func @transform_3(%arg0: i32, %arg1: i32, %arg2: i32) -> (i32, i32, i32) {
    %c0_i32 = arith.constant 0 : i32
    %c0_i32_0 = arith.constant 0 : i32
    return %arg0, %c0_i32, %arg1 : i32, i32, i32
  }
}

module attributes {stable_mosaic.version = 11 : i64} {
  func.func @bn_apply_kernel(%arg0: i32, %arg1: i32, %arg2: memref<8x512xbf16, #tpu.memory_space<vmem>>, %arg3: memref<1x2x512xf32, #tpu.memory_space<vmem>>, %arg4: memref<1x512xf32, #tpu.memory_space<vmem>>, %arg5: memref<1x512xf32, #tpu.memory_space<vmem>>, %arg6: memref<8x512xbf16, #tpu.memory_space<vmem>>) attributes {dimension_semantics = [#tpu.dimension_semantics<parallel>, #tpu.dimension_semantics<parallel>], iteration_bounds = array<i64: 1, 1>, scalar_prefetch = 0 : i64, scratch_operands = 0 : i64, tpu.core_type = #tpu.core_type<tc>, window_params = [{transform_indices = @transform_0, window_bounds = array<i64: 8, 512>}, {transform_indices = @transform_1, window_bounds = array<i64: 1, 2, 512>}, {transform_indices = @transform_2, window_bounds = array<i64: 1, 512>}, {transform_indices = @transform_3, window_bounds = array<i64: 1, 512>}, {transform_indices = @transform_4, window_bounds = array<i64: 8, 512>}]} {
    %c0 = arith.constant 0 : index
    %c0_0 = arith.constant 0 : index
    %c0_1 = arith.constant 0 : index
    %0 = vector.load %arg3[%c0, %c0_0, %c0_1] : memref<1x2x512xf32, #tpu.memory_space<vmem>>, vector<1x2x512xf32>
    %cst = arith.constant dense<0.000000e+00> : vector<2x512xf32>
    %1 = vector.multi_reduction <add>, %0, %cst [0] : vector<1x2x512xf32> to vector<2x512xf32>
    %2 = vector.extract_strided_slice %1 {offsets = [0, 0], sizes = [1, 512], strides = [1, 1]} : vector<2x512xf32> to vector<1x512xf32>
    %cst_2 = arith.constant 5.000000e-01 : f32
    %3 = vector.broadcast %cst_2 : f32 to vector<1x512xf32>
    %4 = arith.mulf %2, %3 : vector<1x512xf32>
    %5 = vector.extract_strided_slice %1 {offsets = [1, 0], sizes = [1, 512], strides = [1, 1]} : vector<2x512xf32> to vector<1x512xf32>
    %cst_3 = arith.constant 5.000000e-01 : f32
    %6 = vector.broadcast %cst_3 : f32 to vector<1x512xf32>
    %7 = arith.mulf %5, %6 : vector<1x512xf32>
    %8 = arith.mulf %4, %4 : vector<1x512xf32>
    %9 = arith.subf %7, %8 : vector<1x512xf32>
    %cst_4 = arith.constant 0.000000e+00 : f32
    %10 = vector.broadcast %cst_4 : f32 to vector<1x512xf32>
    %11 = arith.maximumf %9, %10 : vector<1x512xf32>
    %c0_5 = arith.constant 0 : index
    %c0_6 = arith.constant 0 : index
    %12 = vector.load %arg4[%c0_5, %c0_6] : memref<1x512xf32, #tpu.memory_space<vmem>>, vector<1x512xf32>
    %cst_7 = arith.constant 9.99999974E-6 : f32
    %13 = vector.broadcast %cst_7 : f32 to vector<1x512xf32>
    %14 = arith.addf %11, %13 : vector<1x512xf32>
    %15 = math.rsqrt %14 : vector<1x512xf32>
    %16 = arith.mulf %12, %15 : vector<1x512xf32>
    %c0_8 = arith.constant 0 : index
    %c0_9 = arith.constant 0 : index
    %17 = vector.load %arg5[%c0_8, %c0_9] : memref<1x512xf32, #tpu.memory_space<vmem>>, vector<1x512xf32>
    %18 = arith.mulf %4, %16 : vector<1x512xf32>
    %19 = arith.subf %17, %18 : vector<1x512xf32>
    %c0_10 = arith.constant 0 : index
    %c0_11 = arith.constant 0 : index
    %20 = vector.load %arg2[%c0_10, %c0_11] : memref<8x512xbf16, #tpu.memory_space<vmem>>, vector<8x512xbf16>
    %21 = arith.extf %20 : vector<8x512xbf16> to vector<8x512xf32>
    %22 = vector.broadcast %16 : vector<1x512xf32> to vector<8x512xf32>
    %23 = arith.mulf %21, %22 : vector<8x512xf32>
    %24 = vector.broadcast %19 : vector<1x512xf32> to vector<8x512xf32>
    %25 = arith.addf %23, %24 : vector<8x512xf32>
    %26 = arith.truncf %25 : vector<8x512xf32> to vector<8x512xbf16>
    %c0_12 = arith.constant 0 : index
    %c0_13 = arith.constant 0 : index
    %27 = vector.load %arg6[%c0_12, %c0_13] : memref<8x512xbf16, #tpu.memory_space<vmem>>, vector<8x512xbf16>
    tpu.vector_store %arg6[%c0_12, %c0_13], %26 {strides = array<i32>} : memref<8x512xbf16, #tpu.memory_space<vmem>>, vector<8x512xbf16>,
    return
  }
  func.func @transform_0(%arg0: i32, %arg1: i32) -> (i32, i32) {
    %c0_i32 = arith.constant 0 : i32
    return %arg1, %arg0 : i32, i32
  }
  func.func @transform_1(%arg0: i32, %arg1: i32) -> (i32, i32, i32) {
    %c0_i32 = arith.constant 0 : i32
    %c0_i32_0 = arith.constant 0 : i32
    %c0_i32_1 = arith.constant 0 : i32
    return %c0_i32, %c0_i32_0, %arg0 : i32, i32, i32
  }
  func.func @transform_2(%arg0: i32, %arg1: i32) -> (i32, i32) {
    %c0_i32 = arith.constant 0 : i32
    %c0_i32_0 = arith.constant 0 : i32
    return %c0_i32, %arg0 : i32, i32
  }
  func.func @transform_3(%arg0: i32, %arg1: i32) -> (i32, i32) {
    %c0_i32 = arith.constant 0 : i32
    %c0_i32_0 = arith.constant 0 : i32
    return %c0_i32, %arg0 : i32, i32
  }
  func.func @transform_4(%arg0: i32, %arg1: i32) -> (i32, i32) {
    %c0_i32 = arith.constant 0 : i32
    return %arg1, %arg0 : i32, i32
  }
}

module attributes {stable_mosaic.version = 11 : i64} {
  func.func @matmul_stats_kernel(%arg0: i32, %arg1: i32, %arg2: i32, %arg3: memref<8x384xbf16, #tpu.memory_space<vmem>>, %arg4: memref<384x512xbf16, #tpu.memory_space<vmem>>, %arg5: memref<8x512xbf16, #tpu.memory_space<vmem>>, %arg6: memref<1x2x512xf32, #tpu.memory_space<vmem>>, %arg7: memref<8x512xf32, #tpu.memory_space<vmem>>) attributes {dimension_semantics = [#tpu.dimension_semantics<parallel>, #tpu.dimension_semantics<parallel>, #tpu.dimension_semantics<arbitrary>], iteration_bounds = array<i64: 1, 1, 6>, scalar_prefetch = 0 : i64, scratch_operands = 1 : i64, tpu.core_type = #tpu.core_type<tc>, window_params = [{transform_indices = @transform_0, window_bounds = array<i64: 8, 384>}, {transform_indices = @transform_1, window_bounds = array<i64: 384, 512>}, {transform_indices = @transform_2, window_bounds = array<i64: 8, 512>}, {transform_indices = @transform_3, window_bounds = array<i64: 1, 2, 512>}]} {
    %c0 = arith.constant 0 : index
    %c0_0 = arith.constant 0 : index
    %0 = vector.load %arg3[%c0, %c0_0] : memref<8x384xbf16, #tpu.memory_space<vmem>>, vector<8x384xbf16>
    %c0_1 = arith.constant 0 : index
    %c0_2 = arith.constant 0 : index
    %1 = vector.load %arg4[%c0_1, %c0_2] : memref<384x512xbf16, #tpu.memory_space<vmem>>, vector<384x512xbf16>
    %cst = arith.constant dense<0.000000e+00> : vector<8x512xf32>
    %2 = tpu.matmul %0, %1, %cst {dimension_numbers = #tpu.dot_dimension_numbers<[1], [0], [0], [1], [0, 0, 1, 1], [], []>} : vector<8x384xbf16>, vector<384x512xbf16>, vector<8x512xf32> -> vector<8x512xf32>
    %c0_i32 = arith.constant 0 : i32
    %3 = arith.cmpi eq, %arg2, %c0_i32 : i32
    %4 = arith.extui %3 : i1 to i32
    %c0_i32_3 = arith.constant 0 : i32
    %5 = arith.cmpi ne, %4, %c0_i32_3 : i32
    scf.if %5 {
      %c0_7 = arith.constant 0 : index
      %c0_8 = arith.constant 0 : index
      %12 = vector.load %arg7[%c0_7, %c0_8] : memref<8x512xf32, #tpu.memory_space<vmem>>, vector<8x512xf32>
      tpu.vector_store %arg7[%c0_7, %c0_8], %2 {strides = array<i32>} : memref<8x512xf32, #tpu.memory_space<vmem>>, vector<8x512xf32>,
    } else {
    }
    %c0_i32_4 = arith.constant 0 : i32
    %6 = arith.cmpi sgt, %arg2, %c0_i32_4 : i32
    %7 = arith.extui %6 : i1 to i32
    %c0_i32_5 = arith.constant 0 : i32
    %8 = arith.cmpi ne, %7, %c0_i32_5 : i32
    scf.if %8 {
      %c0_7 = arith.constant 0 : index
      %c0_8 = arith.constant 0 : index
      %12 = vector.load %arg7[%c0_7, %c0_8] : memref<8x512xf32, #tpu.memory_space<vmem>>, vector<8x512xf32>
      %13 = arith.addf %12, %2 : vector<8x512xf32>
      %c0_9 = arith.constant 0 : index
      %c0_10 = arith.constant 0 : index
      %14 = vector.load %arg7[%c0_9, %c0_10] : memref<8x512xf32, #tpu.memory_space<vmem>>, vector<8x512xf32>
      tpu.vector_store %arg7[%c0_9, %c0_10], %13 {strides = array<i32>} : memref<8x512xf32, #tpu.memory_space<vmem>>, vector<8x512xf32>,
    } else {
    }
    %c5_i32 = arith.constant 5 : i32
    %9 = arith.cmpi eq, %arg2, %c5_i32 : i32
    %10 = arith.extui %9 : i1 to i32
    %c0_i32_6 = arith.constant 0 : i32
    %11 = arith.cmpi ne, %10, %c0_i32_6 : i32
    scf.if %11 {
      %c0_7 = arith.constant 0 : index
      %c0_8 = arith.constant 0 : index
      %12 = vector.load %arg7[%c0_7, %c0_8] : memref<8x512xf32, #tpu.memory_space<vmem>>, vector<8x512xf32>
      %13 = arith.truncf %12 : vector<8x512xf32> to vector<8x512xbf16>
      %c0_9 = arith.constant 0 : index
      %c0_10 = arith.constant 0 : index
      %14 = vector.load %arg5[%c0_9, %c0_10] : memref<8x512xbf16, #tpu.memory_space<vmem>>, vector<8x512xbf16>
      tpu.vector_store %arg5[%c0_9, %c0_10], %13 {strides = array<i32>} : memref<8x512xbf16, #tpu.memory_space<vmem>>, vector<8x512xbf16>,
      %cst_11 = arith.constant dense<0.000000e+00> : vector<512xf32>
      %15 = vector.multi_reduction <add>, %12, %cst_11 [0] : vector<8x512xf32> to vector<512xf32>
      %16 = vector.shape_cast %15 : vector<512xf32> to vector<1x512xf32>
      %17 = arith.mulf %12, %12 : vector<8x512xf32>
      %cst_12 = arith.constant dense<0.000000e+00> : vector<512xf32>
      %18 = vector.multi_reduction <add>, %17, %cst_12 [0] : vector<8x512xf32> to vector<512xf32>
      %19 = vector.shape_cast %18 : vector<512xf32> to vector<1x512xf32>
      %20 = tpu.concatenate %16, %19 in 0 : vector<1x512xf32>, vector<1x512xf32> -> vector<2x512xf32>
      %21 = vector.shape_cast %20 : vector<2x512xf32> to vector<1x2x512xf32>
      %c0_13 = arith.constant 0 : index
      %c0_14 = arith.constant 0 : index
      %c0_15 = arith.constant 0 : index
      %22 = vector.load %arg6[%c0_13, %c0_14, %c0_15] : memref<1x2x512xf32, #tpu.memory_space<vmem>>, vector<1x2x512xf32>
      tpu.vector_store %arg6[%c0_13, %c0_14, %c0_15], %21 {strides = array<i32>} : memref<1x2x512xf32, #tpu.memory_space<vmem>>, vector<1x2x512xf32>,
    } else {
    }
    return
  }
  func.func @transform_0(%arg0: i32, %arg1: i32, %arg2: i32) -> (i32, i32) {
    %c0_i32 = arith.constant 0 : i32
    return %arg0, %arg2 : i32, i32
  }
  func.func @transform_1(%arg0: i32, %arg1: i32, %arg2: i32) -> (i32, i32) {
    %c0_i32 = arith.constant 0 : i32
    return %arg2, %arg1 : i32, i32
  }
  func.func @transform_2(%arg0: i32, %arg1: i32, %arg2: i32) -> (i32, i32) {
    %c0_i32 = arith.constant 0 : i32
    return %arg0, %arg1 : i32, i32
  }
  func.func @transform_3(%arg0: i32, %arg1: i32, %arg2: i32) -> (i32, i32, i32) {
    %c0_i32 = arith.constant 0 : i32
    %c0_i32_0 = arith.constant 0 : i32
    return %arg0, %c0_i32, %arg1 : i32, i32, i32
  }
}

module attributes {stable_mosaic.version = 11 : i64} {
  func.func @bn_apply_kernel(%arg0: i32, %arg1: i32, %arg2: memref<8x512xbf16, #tpu.memory_space<vmem>>, %arg3: memref<1x2x512xf32, #tpu.memory_space<vmem>>, %arg4: memref<1x512xf32, #tpu.memory_space<vmem>>, %arg5: memref<1x512xf32, #tpu.memory_space<vmem>>, %arg6: memref<8x512xbf16, #tpu.memory_space<vmem>>) attributes {dimension_semantics = [#tpu.dimension_semantics<parallel>, #tpu.dimension_semantics<parallel>], iteration_bounds = array<i64: 1, 1>, scalar_prefetch = 0 : i64, scratch_operands = 0 : i64, tpu.core_type = #tpu.core_type<tc>, window_params = [{transform_indices = @transform_0, window_bounds = array<i64: 8, 512>}, {transform_indices = @transform_1, window_bounds = array<i64: 1, 2, 512>}, {transform_indices = @transform_2, window_bounds = array<i64: 1, 512>}, {transform_indices = @transform_3, window_bounds = array<i64: 1, 512>}, {transform_indices = @transform_4, window_bounds = array<i64: 8, 512>}]} {
    %c0 = arith.constant 0 : index
    %c0_0 = arith.constant 0 : index
    %c0_1 = arith.constant 0 : index
    %0 = vector.load %arg3[%c0, %c0_0, %c0_1] : memref<1x2x512xf32, #tpu.memory_space<vmem>>, vector<1x2x512xf32>
    %cst = arith.constant dense<0.000000e+00> : vector<2x512xf32>
    %1 = vector.multi_reduction <add>, %0, %cst [0] : vector<1x2x512xf32> to vector<2x512xf32>
    %2 = vector.extract_strided_slice %1 {offsets = [0, 0], sizes = [1, 512], strides = [1, 1]} : vector<2x512xf32> to vector<1x512xf32>
    %cst_2 = arith.constant 5.000000e-01 : f32
    %3 = vector.broadcast %cst_2 : f32 to vector<1x512xf32>
    %4 = arith.mulf %2, %3 : vector<1x512xf32>
    %5 = vector.extract_strided_slice %1 {offsets = [1, 0], sizes = [1, 512], strides = [1, 1]} : vector<2x512xf32> to vector<1x512xf32>
    %cst_3 = arith.constant 5.000000e-01 : f32
    %6 = vector.broadcast %cst_3 : f32 to vector<1x512xf32>
    %7 = arith.mulf %5, %6 : vector<1x512xf32>
    %8 = arith.mulf %4, %4 : vector<1x512xf32>
    %9 = arith.subf %7, %8 : vector<1x512xf32>
    %cst_4 = arith.constant 0.000000e+00 : f32
    %10 = vector.broadcast %cst_4 : f32 to vector<1x512xf32>
    %11 = arith.maximumf %9, %10 : vector<1x512xf32>
    %c0_5 = arith.constant 0 : index
    %c0_6 = arith.constant 0 : index
    %12 = vector.load %arg4[%c0_5, %c0_6] : memref<1x512xf32, #tpu.memory_space<vmem>>, vector<1x512xf32>
    %cst_7 = arith.constant 9.99999974E-6 : f32
    %13 = vector.broadcast %cst_7 : f32 to vector<1x512xf32>
    %14 = arith.addf %11, %13 : vector<1x512xf32>
    %15 = math.rsqrt %14 : vector<1x512xf32>
    %16 = arith.mulf %12, %15 : vector<1x512xf32>
    %c0_8 = arith.constant 0 : index
    %c0_9 = arith.constant 0 : index
    %17 = vector.load %arg5[%c0_8, %c0_9] : memref<1x512xf32, #tpu.memory_space<vmem>>, vector<1x512xf32>
    %18 = arith.mulf %4, %16 : vector<1x512xf32>
    %19 = arith.subf %17, %18 : vector<1x512xf32>
    %c0_10 = arith.constant 0 : index
    %c0_11 = arith.constant 0 : index
    %20 = vector.load %arg2[%c0_10, %c0_11] : memref<8x512xbf16, #tpu.memory_space<vmem>>, vector<8x512xbf16>
    %21 = arith.extf %20 : vector<8x512xbf16> to vector<8x512xf32>
    %22 = vector.broadcast %16 : vector<1x512xf32> to vector<8x512xf32>
    %23 = arith.mulf %21, %22 : vector<8x512xf32>
    %24 = vector.broadcast %19 : vector<1x512xf32> to vector<8x512xf32>
    %25 = arith.addf %23, %24 : vector<8x512xf32>
    %cst_12 = arith.constant 0.000000e+00 : f32
    %26 = vector.broadcast %cst_12 : f32 to vector<8x512xf32>
    %27 = arith.maximumf %25, %26 : vector<8x512xf32>
    %28 = arith.truncf %27 : vector<8x512xf32> to vector<8x512xbf16>
    %c0_13 = arith.constant 0 : index
    %c0_14 = arith.constant 0 : index
    %29 = vector.load %arg6[%c0_13, %c0_14] : memref<8x512xbf16, #tpu.memory_space<vmem>>, vector<8x512xbf16>
    tpu.vector_store %arg6[%c0_13, %c0_14], %28 {strides = array<i32>} : memref<8x512xbf16, #tpu.memory_space<vmem>>, vector<8x512xbf16>,
    return
  }
  func.func @transform_0(%arg0: i32, %arg1: i32) -> (i32, i32) {
    %c0_i32 = arith.constant 0 : i32
    return %arg1, %arg0 : i32, i32
  }
  func.func @transform_1(%arg0: i32, %arg1: i32) -> (i32, i32, i32) {
    %c0_i32 = arith.constant 0 : i32
    %c0_i32_0 = arith.constant 0 : i32
    %c0_i32_1 = arith.constant 0 : i32
    return %c0_i32, %c0_i32_0, %arg0 : i32, i32, i32
  }
  func.func @transform_2(%arg0: i32, %arg1: i32) -> (i32, i32) {
    %c0_i32 = arith.constant 0 : i32
    %c0_i32_0 = arith.constant 0 : i32
    return %c0_i32, %arg0 : i32, i32
  }
  func.func @transform_3(%arg0: i32, %arg1: i32) -> (i32, i32) {
    %c0_i32 = arith.constant 0 : i32
    %c0_i32_0 = arith.constant 0 : i32
    return %c0_i32, %arg0 : i32, i32
  }
  func.func @transform_4(%arg0: i32, %arg1: i32) -> (i32, i32) {
    %c0_i32 = arith.constant 0 : i32
    return %arg1, %arg0 : i32, i32
  }
}

module attributes {stable_mosaic.version = 11 : i64} {
  func.func @matmul_stats_kernel(%arg0: i32, %arg1: i32, %arg2: i32, %arg3: memref<8x512xbf16, #tpu.memory_space<vmem>>, %arg4: memref<512x512xbf16, #tpu.memory_space<vmem>>, %arg5: memref<8x512xbf16, #tpu.memory_space<vmem>>, %arg6: memref<1x2x512xf32, #tpu.memory_space<vmem>>, %arg7: memref<8x512xf32, #tpu.memory_space<vmem>>) attributes {dimension_semantics = [#tpu.dimension_semantics<parallel>, #tpu.dimension_semantics<parallel>, #tpu.dimension_semantics<arbitrary>], iteration_bounds = array<i64: 1, 1, 9>, scalar_prefetch = 0 : i64, scratch_operands = 1 : i64, tpu.core_type = #tpu.core_type<tc>, window_params = [{transform_indices = @transform_0, window_bounds = array<i64: 8, 512>}, {transform_indices = @transform_1, window_bounds = array<i64: 512, 512>}, {transform_indices = @transform_2, window_bounds = array<i64: 8, 512>}, {transform_indices = @transform_3, window_bounds = array<i64: 1, 2, 512>}]} {
    %c0 = arith.constant 0 : index
    %c0_0 = arith.constant 0 : index
    %0 = vector.load %arg3[%c0, %c0_0] : memref<8x512xbf16, #tpu.memory_space<vmem>>, vector<8x512xbf16>
    %c0_1 = arith.constant 0 : index
    %c0_2 = arith.constant 0 : index
    %1 = vector.load %arg4[%c0_1, %c0_2] : memref<512x512xbf16, #tpu.memory_space<vmem>>, vector<512x512xbf16>
    %cst = arith.constant dense<0.000000e+00> : vector<8x512xf32>
    %2 = tpu.matmul %0, %1, %cst {dimension_numbers = #tpu.dot_dimension_numbers<[1], [0], [0], [1], [0, 0, 1, 1], [], []>} : vector<8x512xbf16>, vector<512x512xbf16>, vector<8x512xf32> -> vector<8x512xf32>
    %c0_i32 = arith.constant 0 : i32
    %3 = arith.cmpi eq, %arg2, %c0_i32 : i32
    %4 = arith.extui %3 : i1 to i32
    %c0_i32_3 = arith.constant 0 : i32
    %5 = arith.cmpi ne, %4, %c0_i32_3 : i32
    scf.if %5 {
      %c0_7 = arith.constant 0 : index
      %c0_8 = arith.constant 0 : index
      %12 = vector.load %arg7[%c0_7, %c0_8] : memref<8x512xf32, #tpu.memory_space<vmem>>, vector<8x512xf32>
      tpu.vector_store %arg7[%c0_7, %c0_8], %2 {strides = array<i32>} : memref<8x512xf32, #tpu.memory_space<vmem>>, vector<8x512xf32>,
    } else {
    }
    %c0_i32_4 = arith.constant 0 : i32
    %6 = arith.cmpi sgt, %arg2, %c0_i32_4 : i32
    %7 = arith.extui %6 : i1 to i32
    %c0_i32_5 = arith.constant 0 : i32
    %8 = arith.cmpi ne, %7, %c0_i32_5 : i32
    scf.if %8 {
      %c0_7 = arith.constant 0 : index
      %c0_8 = arith.constant 0 : index
      %12 = vector.load %arg7[%c0_7, %c0_8] : memref<8x512xf32, #tpu.memory_space<vmem>>, vector<8x512xf32>
      %13 = arith.addf %12, %2 : vector<8x512xf32>
      %c0_9 = arith.constant 0 : index
      %c0_10 = arith.constant 0 : index
      %14 = vector.load %arg7[%c0_9, %c0_10] : memref<8x512xf32, #tpu.memory_space<vmem>>, vector<8x512xf32>
      tpu.vector_store %arg7[%c0_9, %c0_10], %13 {strides = array<i32>} : memref<8x512xf32, #tpu.memory_space<vmem>>, vector<8x512xf32>,
    } else {
    }
    %c8_i32 = arith.constant 8 : i32
    %9 = arith.cmpi eq, %arg2, %c8_i32 : i32
    %10 = arith.extui %9 : i1 to i32
    %c0_i32_6 = arith.constant 0 : i32
    %11 = arith.cmpi ne, %10, %c0_i32_6 : i32
    scf.if %11 {
      %c0_7 = arith.constant 0 : index
      %c0_8 = arith.constant 0 : index
      %12 = vector.load %arg7[%c0_7, %c0_8] : memref<8x512xf32, #tpu.memory_space<vmem>>, vector<8x512xf32>
      %13 = arith.truncf %12 : vector<8x512xf32> to vector<8x512xbf16>
      %c0_9 = arith.constant 0 : index
      %c0_10 = arith.constant 0 : index
      %14 = vector.load %arg5[%c0_9, %c0_10] : memref<8x512xbf16, #tpu.memory_space<vmem>>, vector<8x512xbf16>
      tpu.vector_store %arg5[%c0_9, %c0_10], %13 {strides = array<i32>} : memref<8x512xbf16, #tpu.memory_space<vmem>>, vector<8x512xbf16>,
      %cst_11 = arith.constant dense<0.000000e+00> : vector<512xf32>
      %15 = vector.multi_reduction <add>, %12, %cst_11 [0] : vector<8x512xf32> to vector<512xf32>
      %16 = vector.shape_cast %15 : vector<512xf32> to vector<1x512xf32>
      %17 = arith.mulf %12, %12 : vector<8x512xf32>
      %cst_12 = arith.constant dense<0.000000e+00> : vector<512xf32>
      %18 = vector.multi_reduction <add>, %17, %cst_12 [0] : vector<8x512xf32> to vector<512xf32>
      %19 = vector.shape_cast %18 : vector<512xf32> to vector<1x512xf32>
      %20 = tpu.concatenate %16, %19 in 0 : vector<1x512xf32>, vector<1x512xf32> -> vector<2x512xf32>
      %21 = vector.shape_cast %20 : vector<2x512xf32> to vector<1x2x512xf32>
      %c0_13 = arith.constant 0 : index
      %c0_14 = arith.constant 0 : index
      %c0_15 = arith.constant 0 : index
      %22 = vector.load %arg6[%c0_13, %c0_14, %c0_15] : memref<1x2x512xf32, #tpu.memory_space<vmem>>, vector<1x2x512xf32>
      tpu.vector_store %arg6[%c0_13, %c0_14, %c0_15], %21 {strides = array<i32>} : memref<1x2x512xf32, #tpu.memory_space<vmem>>, vector<1x2x512xf32>,
    } else {
    }
    return
  }
  func.func @transform_0(%arg0: i32, %arg1: i32, %arg2: i32) -> (i32, i32) {
    %c0_i32 = arith.constant 0 : i32
    return %arg0, %arg2 : i32, i32
  }
  func.func @transform_1(%arg0: i32, %arg1: i32, %arg2: i32) -> (i32, i32) {
    %c0_i32 = arith.constant 0 : i32
    return %arg2, %arg1 : i32, i32
  }
  func.func @transform_2(%arg0: i32, %arg1: i32, %arg2: i32) -> (i32, i32) {
    %c0_i32 = arith.constant 0 : i32
    return %arg0, %arg1 : i32, i32
  }
  func.func @transform_3(%arg0: i32, %arg1: i32, %arg2: i32) -> (i32, i32, i32) {
    %c0_i32 = arith.constant 0 : i32
    %c0_i32_0 = arith.constant 0 : i32
    return %arg0, %c0_i32, %arg1 : i32, i32, i32
  }
}

module attributes {stable_mosaic.version = 11 : i64} {
  func.func @bn_apply_kernel(%arg0: i32, %arg1: i32, %arg2: memref<8x512xbf16, #tpu.memory_space<vmem>>, %arg3: memref<1x2x512xf32, #tpu.memory_space<vmem>>, %arg4: memref<1x512xf32, #tpu.memory_space<vmem>>, %arg5: memref<1x512xf32, #tpu.memory_space<vmem>>, %arg6: memref<8x512xbf16, #tpu.memory_space<vmem>>, %arg7: memref<8x512xbf16, #tpu.memory_space<vmem>>) attributes {dimension_semantics = [#tpu.dimension_semantics<parallel>, #tpu.dimension_semantics<parallel>], iteration_bounds = array<i64: 1, 1>, scalar_prefetch = 0 : i64, scratch_operands = 0 : i64, tpu.core_type = #tpu.core_type<tc>, window_params = [{transform_indices = @transform_0, window_bounds = array<i64: 8, 512>}, {transform_indices = @transform_1, window_bounds = array<i64: 1, 2, 512>}, {transform_indices = @transform_2, window_bounds = array<i64: 1, 512>}, {transform_indices = @transform_3, window_bounds = array<i64: 1, 512>}, {transform_indices = @transform_4, window_bounds = array<i64: 8, 512>}, {transform_indices = @transform_5, window_bounds = array<i64: 8, 512>}]} {
    %c0 = arith.constant 0 : index
    %c0_0 = arith.constant 0 : index
    %c0_1 = arith.constant 0 : index
    %0 = vector.load %arg3[%c0, %c0_0, %c0_1] : memref<1x2x512xf32, #tpu.memory_space<vmem>>, vector<1x2x512xf32>
    %cst = arith.constant dense<0.000000e+00> : vector<2x512xf32>
    %1 = vector.multi_reduction <add>, %0, %cst [0] : vector<1x2x512xf32> to vector<2x512xf32>
    %2 = vector.extract_strided_slice %1 {offsets = [0, 0], sizes = [1, 512], strides = [1, 1]} : vector<2x512xf32> to vector<1x512xf32>
    %cst_2 = arith.constant 5.000000e-01 : f32
    %3 = vector.broadcast %cst_2 : f32 to vector<1x512xf32>
    %4 = arith.mulf %2, %3 : vector<1x512xf32>
    %5 = vector.extract_strided_slice %1 {offsets = [1, 0], sizes = [1, 512], strides = [1, 1]} : vector<2x512xf32> to vector<1x512xf32>
    %cst_3 = arith.constant 5.000000e-01 : f32
    %6 = vector.broadcast %cst_3 : f32 to vector<1x512xf32>
    %7 = arith.mulf %5, %6 : vector<1x512xf32>
    %8 = arith.mulf %4, %4 : vector<1x512xf32>
    %9 = arith.subf %7, %8 : vector<1x512xf32>
    %cst_4 = arith.constant 0.000000e+00 : f32
    %10 = vector.broadcast %cst_4 : f32 to vector<1x512xf32>
    %11 = arith.maximumf %9, %10 : vector<1x512xf32>
    %c0_5 = arith.constant 0 : index
    %c0_6 = arith.constant 0 : index
    %12 = vector.load %arg4[%c0_5, %c0_6] : memref<1x512xf32, #tpu.memory_space<vmem>>, vector<1x512xf32>
    %cst_7 = arith.constant 9.99999974E-6 : f32
    %13 = vector.broadcast %cst_7 : f32 to vector<1x512xf32>
    %14 = arith.addf %11, %13 : vector<1x512xf32>
    %15 = math.rsqrt %14 : vector<1x512xf32>
    %16 = arith.mulf %12, %15 : vector<1x512xf32>
    %c0_8 = arith.constant 0 : index
    %c0_9 = arith.constant 0 : index
    %17 = vector.load %arg5[%c0_8, %c0_9] : memref<1x512xf32, #tpu.memory_space<vmem>>, vector<1x512xf32>
    %18 = arith.mulf %4, %16 : vector<1x512xf32>
    %19 = arith.subf %17, %18 : vector<1x512xf32>
    %c0_10 = arith.constant 0 : index
    %c0_11 = arith.constant 0 : index
    %20 = vector.load %arg2[%c0_10, %c0_11] : memref<8x512xbf16, #tpu.memory_space<vmem>>, vector<8x512xbf16>
    %21 = arith.extf %20 : vector<8x512xbf16> to vector<8x512xf32>
    %22 = vector.broadcast %16 : vector<1x512xf32> to vector<8x512xf32>
    %23 = arith.mulf %21, %22 : vector<8x512xf32>
    %24 = vector.broadcast %19 : vector<1x512xf32> to vector<8x512xf32>
    %25 = arith.addf %23, %24 : vector<8x512xf32>
    %c0_12 = arith.constant 0 : index
    %c0_13 = arith.constant 0 : index
    %26 = vector.load %arg6[%c0_12, %c0_13] : memref<8x512xbf16, #tpu.memory_space<vmem>>, vector<8x512xbf16>
    %27 = arith.extf %26 : vector<8x512xbf16> to vector<8x512xf32>
    %28 = arith.addf %25, %27 : vector<8x512xf32>
    %cst_14 = arith.constant 0.000000e+00 : f32
    %29 = vector.broadcast %cst_14 : f32 to vector<8x512xf32>
    %30 = arith.maximumf %28, %29 : vector<8x512xf32>
    %31 = arith.truncf %30 : vector<8x512xf32> to vector<8x512xbf16>
    %c0_15 = arith.constant 0 : index
    %c0_16 = arith.constant 0 : index
    %32 = vector.load %arg7[%c0_15, %c0_16] : memref<8x512xbf16, #tpu.memory_space<vmem>>, vector<8x512xbf16>
    tpu.vector_store %arg7[%c0_15, %c0_16], %31 {strides = array<i32>} : memref<8x512xbf16, #tpu.memory_space<vmem>>, vector<8x512xbf16>,
    return
  }
  func.func @transform_0(%arg0: i32, %arg1: i32) -> (i32, i32) {
    %c0_i32 = arith.constant 0 : i32
    return %arg1, %arg0 : i32, i32
  }
  func.func @transform_1(%arg0: i32, %arg1: i32) -> (i32, i32, i32) {
    %c0_i32 = arith.constant 0 : i32
    %c0_i32_0 = arith.constant 0 : i32
    %c0_i32_1 = arith.constant 0 : i32
    return %c0_i32, %c0_i32_0, %arg0 : i32, i32, i32
  }
  func.func @transform_2(%arg0: i32, %arg1: i32) -> (i32, i32) {
    %c0_i32 = arith.constant 0 : i32
    %c0_i32_0 = arith.constant 0 : i32
    return %c0_i32, %arg0 : i32, i32
  }
  func.func @transform_3(%arg0: i32, %arg1: i32) -> (i32, i32) {
    %c0_i32 = arith.constant 0 : i32
    %c0_i32_0 = arith.constant 0 : i32
    return %c0_i32, %arg0 : i32, i32
  }
  func.func @transform_4(%arg0: i32, %arg1: i32) -> (i32, i32) {
    %c0_i32 = arith.constant 0 : i32
    return %arg1, %arg0 : i32, i32
  }
  func.func @transform_5(%arg0: i32, %arg1: i32) -> (i32, i32) {
    %c0_i32 = arith.constant 0 : i32
    return %arg1, %arg0 : i32, i32
  }
}

module attributes {stable_mosaic.version = 11 : i64} {
  func.func @avgpool_kernel(%arg0: i32, %arg1: i32, %arg2: memref<2x8x512xbf16, #tpu.memory_space<vmem>>, %arg3: memref<2x512xf32, #tpu.memory_space<vmem>>) attributes {dimension_semantics = [#tpu.dimension_semantics<parallel>, #tpu.dimension_semantics<arbitrary>], iteration_bounds = array<i64: 1, 1>, scalar_prefetch = 0 : i64, scratch_operands = 0 : i64, tpu.core_type = #tpu.core_type<tc>, window_params = [{transform_indices = @transform_0, window_bounds = array<i64: 2, 8, 512>}, {transform_indices = @transform_1, window_bounds = array<i64: 2, 512>}]} {
    %c0_i32 = arith.constant 0 : i32
    %0 = arith.cmpi eq, %arg1, %c0_i32 : i32
    %1 = arith.extui %0 : i1 to i32
    %c0_i32_0 = arith.constant 0 : i32
    %2 = arith.cmpi ne, %1, %c0_i32_0 : i32
    scf.if %2 {
      %cst_9 = arith.constant 0.000000e+00 : f32
      %12 = vector.broadcast %cst_9 : f32 to vector<2x512xf32>
      %c0_10 = arith.constant 0 : index
      %c0_11 = arith.constant 0 : index
      %13 = vector.load %arg3[%c0_10, %c0_11] : memref<2x512xf32, #tpu.memory_space<vmem>>, vector<2x512xf32>
      tpu.vector_store %arg3[%c0_10, %c0_11], %12 {strides = array<i32>} : memref<2x512xf32, #tpu.memory_space<vmem>>, vector<2x512xf32>,
    } else {
    }
    %c0 = arith.constant 0 : index
    %c0_1 = arith.constant 0 : index
    %3 = vector.load %arg3[%c0, %c0_1] : memref<2x512xf32, #tpu.memory_space<vmem>>, vector<2x512xf32>
    %c0_2 = arith.constant 0 : index
    %c0_3 = arith.constant 0 : index
    %c0_4 = arith.constant 0 : index
    %4 = vector.load %arg2[%c0_2, %c0_3, %c0_4] : memref<2x8x512xbf16, #tpu.memory_space<vmem>>, vector<2x8x512xbf16>
    %5 = arith.extf %4 : vector<2x8x512xbf16> to vector<2x8x512xf32>
    %cst = arith.constant dense<0.000000e+00> : vector<2x512xf32>
    %6 = vector.multi_reduction <add>, %5, %cst [1] : vector<2x8x512xf32> to vector<2x512xf32>
    %7 = arith.addf %3, %6 : vector<2x512xf32>
    %c0_5 = arith.constant 0 : index
    %c0_6 = arith.constant 0 : index
    %8 = vector.load %arg3[%c0_5, %c0_6] : memref<2x512xf32, #tpu.memory_space<vmem>>, vector<2x512xf32>
    tpu.vector_store %arg3[%c0_5, %c0_6], %7 {strides = array<i32>} : memref<2x512xf32, #tpu.memory_space<vmem>>, vector<2x512xf32>,
    %c0_i32_7 = arith.constant 0 : i32
    %9 = arith.cmpi eq, %arg1, %c0_i32_7 : i32
    %10 = arith.extui %9 : i1 to i32
    %c0_i32_8 = arith.constant 0 : i32
    %11 = arith.cmpi ne, %10, %c0_i32_8 : i32
    scf.if %11 {
      %c0_9 = arith.constant 0 : index
      %c0_10 = arith.constant 0 : index
      %12 = vector.load %arg3[%c0_9, %c0_10] : memref<2x512xf32, #tpu.memory_space<vmem>>, vector<2x512xf32>
      %cst_11 = arith.constant 1.000000e+00 : f32
      %13 = vector.broadcast %cst_11 : f32 to vector<2x512xf32>
      %14 = arith.mulf %12, %13 : vector<2x512xf32>
      %c0_12 = arith.constant 0 : index
      %c0_13 = arith.constant 0 : index
      %15 = vector.load %arg3[%c0_12, %c0_13] : memref<2x512xf32, #tpu.memory_space<vmem>>, vector<2x512xf32>
      tpu.vector_store %arg3[%c0_12, %c0_13], %14 {strides = array<i32>} : memref<2x512xf32, #tpu.memory_space<vmem>>, vector<2x512xf32>,
    } else {
    }
    return
  }
  func.func @transform_0(%arg0: i32, %arg1: i32) -> (i32, i32, i32) {
    %c0_i32 = arith.constant 0 : i32
    %c0_i32_0 = arith.constant 0 : i32
    return %arg0, %arg1, %c0_i32 : i32, i32, i32
  }
  func.func @transform_1(%arg0: i32, %arg1: i32) -> (i32, i32) {
    %c0_i32 = arith.constant 0 : i32
    %c0_i32_0 = arith.constant 0 : i32
    return %arg0, %c0_i32 : i32, i32
  }
}

module attributes {stable_mosaic.version = 11 : i64} {
  func.func @linear_kernel(%arg0: memref<2x512xbf16, #tpu.memory_space<vmem>>, %arg1: memref<512x10xbf16, #tpu.memory_space<vmem>>, %arg2: memref<1x10xf32, #tpu.memory_space<vmem>>, %arg3: memref<2x10xf32, #tpu.memory_space<vmem>>) attributes {dimension_semantics = [], scalar_prefetch = 0 : i64, scratch_operands = 0 : i64, tpu.core_type = #tpu.core_type<tc>} {
    %c0 = arith.constant 0 : index
    %c0_0 = arith.constant 0 : index
    %0 = vector.load %arg0[%c0, %c0_0] : memref<2x512xbf16, #tpu.memory_space<vmem>>, vector<2x512xbf16>
    %c0_1 = arith.constant 0 : index
    %c0_2 = arith.constant 0 : index
    %1 = vector.load %arg1[%c0_1, %c0_2] : memref<512x10xbf16, #tpu.memory_space<vmem>>, vector<512x10xbf16>
    %cst = arith.constant dense<0.000000e+00> : vector<2x10xf32>
    %2 = tpu.matmul %0, %1, %cst {dimension_numbers = #tpu.dot_dimension_numbers<[1], [0], [0], [1], [0, 0, 1, 1], [], []>} : vector<2x512xbf16>, vector<512x10xbf16>, vector<2x10xf32> -> vector<2x10xf32>
    %c0_3 = arith.constant 0 : index
    %c0_4 = arith.constant 0 : index
    %3 = vector.load %arg2[%c0_3, %c0_4] : memref<1x10xf32, #tpu.memory_space<vmem>>, vector<1x10xf32>
    %4 = vector.broadcast %3 : vector<1x10xf32> to vector<2x10xf32>
    %5 = arith.addf %2, %4 : vector<2x10xf32>
    %c0_5 = arith.constant 0 : index
    %c0_6 = arith.constant 0 : index
    %6 = vector.load %arg3[%c0_5, %c0_6] : memref<2x10xf32, #tpu.memory_space<vmem>>, vector<2x10xf32>
    tpu.vector_store %arg3[%c0_5, %c0_6], %5 {strides = array<i32>} : memref<2x10xf32, #tpu.memory_space<vmem>>, vector<2x10xf32>,
    return
  }
}

</mosaic_0001>

<bundles_post_ra>
// kernel: _lambda_.27
= control target key start
LH: loop header
LB: loop body
LE: loop exit
PB: predicated region body
PF: predicated region fallthrough
CT: control target
= control target key end

     0   :  { %v1770_v0 = vmov 0   ;;  %vm1329_vm0 = vcmask 1040384   ;;  %s2235_s1 = inlined_call_operand.vmem [shape: bf16[256,128], index: 1, kind: input, shape index: {}]   ;;  %s2236_s0 = inlined_call_operand.vmem [shape: bf16[392,256], index: 0, kind: input, shape index: {}]   ;;  %s2237_s2 = inlined_call_operand.vmem [shape: bf16[392,128], index: 2, kind: output, shape index: {0}]   ;;  %s2238_s3 = inlined_call_operand.vmem [shape: f32[1,2,128], index: 3, kind: output, shape index: {1}]  }
   0x1   :  { %438 = vmatprep.subr.bf16.mxu0 %v1770_v0  ;;  %v1680_v1 = vld [vmem:[%s2235_s1] sm:$0xff]   ;;  %1647 = vmatprep.subr.bf16.mxu1 %v1770_v0  ;;  %v1681_v2 = vld [vmem:[%s2235_s1 + $0x8] sm:$0xff]   ;;  %v1682_v3 = vld [vmem:[%s2235_s1 + $0x10] sm:$0xff]  }
   0x2   :  { %439 = vmatpush1.bf16.msra.mxu0 %v1680_v1  ;;  %1663 = vmatpush1.bf16.msra.mxu1 %v1680_v1  ;;  %v1683_v4 = vld [vmem:[%s2235_s1 + $0x18] sm:$0xff]   ;;  %v1684_v5 = vld [vmem:[%s2235_s1 + $0x20] sm:$0xff]   ;;  %v1685_v7 = vld [vmem:[%s2235_s1 + $0x28] sm:$0xff]  }
   0x3   :  { %440 = vmatprep.subr.bf16.mxu0 %v1770_v0  ;;  %1648 = vmatprep.subr.bf16.mxu1 %v1770_v0  ;;  %v1698_v6 = vld [vmem:[%s2236_s0 + $0x4] ss:$8 sps:$4 sm:$0xff]   ;;  %v1686_v8 = vld [vmem:[%s2235_s1 + $0x30] sm:$0xff]   ;;  %v1687_v9 = vld [vmem:[%s2235_s1 + $0x38] sm:$0xff]  }
   0x4   :  { %470 = vmatprep.mubr.bf16.mxu0 %v1698_v6  ;;  %v1719_v10 = vld [vmem:[%s2236_s0 + $0xd4] ss:$8 sps:$4 sm:$0xff]   ;;  %v1688_v11 = vld [vmem:[%s2235_s1 + $0x40] sm:$0xff]   ;;  %v1689_v12 = vld [vmem:[%s2235_s1 + $0x48] sm:$0xff]  }
   0x5   :  { %574 = vmatprep.mubr.bf16.mxu1 %v1719_v10  ;;  %v1690_v13 = vld [vmem:[%s2235_s1 + $0x50] sm:$0xff]   ;;  %v1691_v14 = vld [vmem:[%s2235_s1 + $0x58] sm:$0xff]   ;;  %v1692_v15 = vld [vmem:[%s2235_s1 + $0x60] sm:$0xff]  }
   0x6   :  { %441 = vmatpush1.bf16.msra.mxu0 %v1681_v2  ;;  %1664 = vmatpush1.bf16.msra.mxu1 %v1681_v2  ;;  %v1693_v16 = vld [vmem:[%s2235_s1 + $0x68] sm:$0xff]   ;;  %v1694_v17 = vld [vmem:[%s2235_s1 + $0x70] sm:$0xff]   ;;  %v1695_v18 = vld [vmem:[%s2235_s1 + $0x78] sm:$0xff]  }
   0x7   :  { %442 = vmatprep.subr.bf16.mxu0 %v1770_v0  ;;  %1649 = vmatprep.subr.bf16.mxu1 %v1770_v0  ;;  %v1696_v19 = vld [vmem:[%s2236_s0] ss:$8 sps:$4 sm:$0xff]   ;;  %v1717_v20 = vld [vmem:[%s2236_s0 + $0xd0] ss:$8 sps:$4 sm:$0xff]   ;;  %v1699_v21 = vld [vmem:[%s2236_s0 + $0x14] ss:$8 sps:$4 sm:$0xff]  }
   0x8   :  { %v1723_v22 = vld [vmem:[%s2236_s0 + $0xe4] ss:$8 sps:$4 sm:$0xff]   ;;  %v1701_v23 = vld [vmem:[%s2236_s0 + $0x10] ss:$8 sps:$4 sm:$0xff]   ;;  %v1725_v24 = vld [vmem:[%s2236_s0 + $0xe0] ss:$8 sps:$4 sm:$0xff]  }
   0x9   :  { %v1702_v25 = vld [vmem:[%s2236_s0 + $0x24] ss:$8 sps:$4 sm:$0xff]   ;;  %v1729_v26 = vld [vmem:[%s2236_s0 + $0xf4] ss:$8 sps:$4 sm:$0xff]   ;;  %v1704_v27 = vld [vmem:[%s2236_s0 + $0x20] ss:$8 sps:$4 sm:$0xff]  }
   0xa   :  { %443 = vmatpush1.bf16.msra.mxu0 %v1682_v3  ;;  %1665 = vmatpush1.bf16.msra.mxu1 %v1682_v3  ;;  %v1731_v28 = vld [vmem:[%s2236_s0 + $0xf0] ss:$8 sps:$4 sm:$0xff]   ;;  %v1705_v29 = vld [vmem:[%s2236_s0 + $0x34] ss:$8 sps:$4 sm:$0xff]   ;;  %v1735_v30 = vld [vmem:[%s2236_s0 + $0x104] ss:$8 sps:$4 sm:$0xff]  }
   0xb   :  { %444 = vmatprep.subr.bf16.mxu0 %v1770_v0  ;;  %1650 = vmatprep.subr.bf16.mxu1 %v1770_v0  ;;  %v1707_v31 = vld [vmem:[%s2236_s0 + $0x30] ss:$8 sps:$4 sm:$0xff]   ;;  %v1737_v32 = vld [vmem:[%s2236_s0 + $0x100] ss:$8 sps:$4 sm:$0xff]   ;;  %v1708_v33 = vld [vmem:[%s2236_s0 + $0x44] ss:$8 sps:$4 sm:$0xff]  }
   0xc   :  { %v1741_v34 = vld [vmem:[%s2236_s0 + $0x114] ss:$8 sps:$4 sm:$0xff]   ;;  %v1710_v35 = vld [vmem:[%s2236_s0 + $0x40] ss:$8 sps:$4 sm:$0xff]   ;;  %v1743_v36 = vld [vmem:[%s2236_s0 + $0x110] ss:$8 sps:$4 sm:$0xff]  }
   0xd   :  { %v1711_v37 = vld [vmem:[%s2236_s0 + $0x54] ss:$8 sps:$4 sm:$0xff]   ;;  %v1747_v38 = vld [vmem:[%s2236_s0 + $0x124] ss:$8 sps:$4 sm:$0xff]   ;;  %v1713_v39 = vld [vmem:[%s2236_s0 + $0x50] ss:$8 sps:$4 sm:$0xff]  }
   0xe   :  { %445 = vmatpush1.bf16.msra.mxu0 %v1683_v4  ;;  %1666 = vmatpush1.bf16.msra.mxu1 %v1683_v4  ;;  %v1749_v40 = vld [vmem:[%s2236_s0 + $0x120] ss:$8 sps:$4 sm:$0xff]   ;;  %v1714_v41 = vld [vmem:[%s2236_s0 + $0x64] ss:$8 sps:$4 sm:$0xff]   ;;  %v1753_v42 = vld [vmem:[%s2236_s0 + $0x134] ss:$8 sps:$4 sm:$0xff]  }
   0xf   :  { %446 = vmatprep.subr.bf16.mxu0 %v1770_v0  ;;  %1651 = vmatprep.subr.bf16.mxu1 %v1770_v0  ;;  %v1716_v43 = vld [vmem:[%s2236_s0 + $0x60] ss:$8 sps:$4 sm:$0xff]   ;;  %v1755_v44 = vld [vmem:[%s2236_s0 + $0x130] ss:$8 sps:$4 sm:$0xff]   ;;  %v1720_v45 = vld [vmem:[%s2236_s0 + $0x74] ss:$8 sps:$4 sm:$0xff]  }
  0x10   :  { %v1756_v46 = vld [vmem:[%s2236_s0 + $0x144] ss:$8 sps:$4 sm:$0xff]   ;;  %v1722_v47 = vld [vmem:[%s2236_s0 + $0x70] ss:$8 sps:$4 sm:$0xff]   ;;  %v1758_v48 = vld [vmem:[%s2236_s0 + $0x140] ss:$8 sps:$4 sm:$0xff]  }
  0x11   :  { %v1726_v49 = vld [vmem:[%s2236_s0 + $0x84] ss:$8 sps:$4 sm:$0xff]   ;;  %v1759_v50 = vld [vmem:[%s2236_s0 + $0x154] ss:$8 sps:$4 sm:$0xff]   ;;  %v1728_v51 = vld [vmem:[%s2236_s0 + $0x80] ss:$8 sps:$4 sm:$0xff]  }
  0x12   :  { %447 = vmatpush1.bf16.msra.mxu0 %v1684_v5  ;;  %1667 = vmatpush1.bf16.msra.mxu1 %v1684_v5  ;;  %v1761_v52 = vld [vmem:[%s2236_s0 + $0x150] ss:$8 sps:$4 sm:$0xff]   ;;  %v1732_v53 = vld [vmem:[%s2236_s0 + $0x94] ss:$8 sps:$4 sm:$0xff]   ;;  %v1762_v54 = vld [vmem:[%s2236_s0 + $0x164] ss:$8 sps:$4 sm:$0xff]  }
  0x13   :  { %448 = vmatprep.subr.bf16.mxu0 %v1770_v0  ;;  %1652 = vmatprep.subr.bf16.mxu1 %v1770_v0  ;;  %v1734_v55 = vld [vmem:[%s2236_s0 + $0x90] ss:$8 sps:$4 sm:$0xff]   ;;  %v1764_v56 = vld [vmem:[%s2236_s0 + $0x160] ss:$8 sps:$4 sm:$0xff]   ;;  %v1738_v57 = vld [vmem:[%s2236_s0 + $0xa4] ss:$8 sps:$4 sm:$0xff]  }
  0x14   :  { %v1765_v58 = vld [vmem:[%s2236_s0 + $0x174] ss:$8 sps:$4 sm:$0xff]   ;;  %v62_v59 = vld [vmem:[%s2236_s0 + $0x180] sm:$0xff]  ;;  %v1767_v61 = vld [vmem:[%s2236_s0 + $0x170] ss:$8 sps:$4 sm:$0xff]  }
  0x15   :  { %v1740_v60 = vld [vmem:[%s2236_s0 + $0xa0] ss:$8 sps:$4 sm:$0xff]   ;;  %v1744_v62 = vld [vmem:[%s2236_s0 + $0xb4] ss:$8 sps:$4 sm:$0xff]   ;;  %v1389_v63 = vcombine.high %v62_v59, %v62_v59  ;;  %v1388_v1 = vcombine.low %v62_v59, %v62_v59  ;;  %v1750_v2 = vld [vmem:[%s2236_s0 + $0xc4] ss:$8 sps:$4 sm:$0xff]  }
  0x16   :  { %449 = vmatpush1.bf16.msra.mxu0 %v1685_v7  ;;  %1668 = vmatpush1.bf16.msra.mxu1 %v1685_v7  ;;  %v1752_v3 = vld [vmem:[%s2236_s0 + $0xc0] ss:$8 sps:$4 sm:$0xff]  }
  0x17   :  { %450 = vmatprep.subr.bf16.mxu0 %v1770_v0  ;;  %1653 = vmatprep.subr.bf16.mxu1 %v1770_v0 }
  0x1a   :  { %451 = vmatpush1.bf16.msra.mxu0 %v1686_v8  ;;  %1669 = vmatpush1.bf16.msra.mxu1 %v1686_v8 }
  0x1b   :  { %452 = vmatprep.subr.bf16.mxu0 %v1770_v0  ;;  %1654 = vmatprep.subr.bf16.mxu1 %v1770_v0 }
  0x1e   :  { %453 = vmatpush1.bf16.msra.mxu0 %v1687_v9  ;;  %1670 = vmatpush1.bf16.msra.mxu1 %v1687_v9 }
  0x1f   :  { %454 = vmatprep.subr.bf16.mxu0 %v1770_v0  ;;  %1655 = vmatprep.subr.bf16.mxu1 %v1770_v0 }
  0x22   :  { %455 = vmatpush1.bf16.msra.mxu0 %v1688_v11  ;;  %1671 = vmatpush1.bf16.msra.mxu1 %v1688_v11 }
  0x23   :  { %456 = vmatprep.subr.bf16.mxu0 %v1770_v0  ;;  %1656 = vmatprep.subr.bf16.mxu1 %v1770_v0 }
  0x26   :  { %457 = vmatpush1.bf16.msra.mxu0 %v1689_v12  ;;  %1672 = vmatpush1.bf16.msra.mxu1 %v1689_v12 }
  0x27   :  { %458 = vmatprep.subr.bf16.mxu0 %v1770_v0  ;;  %1657 = vmatprep.subr.bf16.mxu1 %v1770_v0 }
  0x2a   :  { %459 = vmatpush1.bf16.msra.mxu0 %v1690_v13  ;;  %1673 = vmatpush1.bf16.msra.mxu1 %v1690_v13 }
  0x2b   :  { %460 = vmatprep.subr.bf16.mxu0 %v1770_v0  ;;  %1658 = vmatprep.subr.bf16.mxu1 %v1770_v0 }
  0x2e   :  { %461 = vmatpush1.bf16.msra.mxu0 %v1691_v14  ;;  %1674 = vmatpush1.bf16.msra.mxu1 %v1691_v14 }
  0x2f   :  { %462 = vmatprep.subr.bf16.mxu0 %v1770_v0  ;;  %1659 = vmatprep.subr.bf16.mxu1 %v1770_v0 }
  0x32   :  { %463 = vmatpush1.bf16.msra.mxu0 %v1692_v15  ;;  %1675 = vmatpush1.bf16.msra.mxu1 %v1692_v15 }
  0x33   :  { %464 = vmatprep.subr.bf16.mxu0 %v1770_v0  ;;  %1660 = vmatprep.subr.bf16.mxu1 %v1770_v0 }
  0x36   :  { %465 = vmatpush1.bf16.msra.mxu0 %v1693_v16  ;;  %1676 = vmatpush1.bf16.msra.mxu1 %v1693_v16 }
  0x37   :  { %466 = vmatprep.subr.bf16.mxu0 %v1770_v0  ;;  %1661 = vmatprep.subr.bf16.mxu1 %v1770_v0 }
  0x3a   :  { %467 = vmatpush1.bf16.msra.mxu0 %v1694_v17  ;;  %1677 = vmatpush1.bf16.msra.mxu1 %v1694_v17 }
  0x3b   :  { %468 = vmatprep.subr.bf16.mxu0 %v1770_v0  ;;  %1662 = vmatprep.subr.bf16.mxu1 %v1770_v0  ;;  %v1746_v0 = vld [vmem:[%s2236_s0 + $0xb0] ss:$8 sps:$4 sm:$0xff]  }
  0x3e   :  { %469 = vmatpush1.bf16.msra.mxu0 %v1695_v18  ;;  %1678 = vmatpush1.bf16.msra.mxu1 %v1695_v18 }
  0x41   :  { %471 = vmatmul.mubr.bf16.vlgmr.msra.gmra.mrb[0].mxu0 %v1696_v19  ;;  %575 = vmatmul.mubr.bf16.vlgmr.msra.gmra.mrb[0].mxu1 %v1717_v20 }
  0x42   :  { %478 = vmatprep.mubr.bf16.mxu0 %v1699_v21  ;;  %582 = vmatprep.mubr.bf16.mxu1 %v1723_v22 }
  0x49   :  { %479 = vmatmul.mubr.bf16.gmra.mrb[4].mxu0 %v1701_v23  ;;  %583 = vmatmul.mubr.bf16.gmra.mrb[4].mxu1 %v1725_v24 }
  0x4a   :  { %486 = vmatprep.mubr.bf16.mxu0 %v1702_v25  ;;  %590 = vmatprep.mubr.bf16.mxu1 %v1729_v26 }
  0x51   :  { %487 = vmatmul.mubr.bf16.gmra.mrb[8].mxu0 %v1704_v27  ;;  %591 = vmatmul.mubr.bf16.gmra.mrb[8].mxu1 %v1731_v28 }
  0x52   :  { %494 = vmatprep.mubr.bf16.mxu0 %v1705_v29  ;;  %598 = vmatprep.mubr.bf16.mxu1 %v1735_v30 }
  0x59   :  { %495 = vmatmul.mubr.bf16.gmra.mrb[12].mxu0 %v1707_v31  ;;  %599 = vmatmul.mubr.bf16.gmra.mrb[12].mxu1 %v1737_v32 }
  0x5a   :  { %502 = vmatprep.mubr.bf16.mxu0 %v1708_v33  ;;  %606 = vmatprep.mubr.bf16.mxu1 %v1741_v34 }
  0x61   :  { %503 = vmatmul.mubr.bf16.gmra.mrb[16].mxu0 %v1710_v35  ;;  %607 = vmatmul.mubr.bf16.gmra.mrb[16].mxu1 %v1743_v36 }
  0x62   :  { %510 = vmatprep.mubr.bf16.mxu0 %v1711_v37  ;;  %614 = vmatprep.mubr.bf16.mxu1 %v1747_v38 }
  0x69   :  { %511 = vmatmul.mubr.bf16.gmra.mrb[20].mxu0 %v1713_v39  ;;  %615 = vmatmul.mubr.bf16.gmra.mrb[20].mxu1 %v1749_v40 }
  0x6a   :  { %518 = vmatprep.mubr.bf16.mxu0 %v1714_v41  ;;  %622 = vmatprep.mubr.bf16.mxu1 %v1753_v42 }
  0x71   :  { %519 = vmatmul.mubr.bf16.gmra.mrb[24].mxu0 %v1716_v43  ;;  %623 = vmatmul.mubr.bf16.gmra.mrb[24].mxu1 %v1755_v44 }
  0x72   :  { %526 = vmatprep.mubr.bf16.mxu0 %v1720_v45  ;;  %630 = vmatprep.mubr.bf16.mxu1 %v1756_v46 }
  0x79   :  { %527 = vmatmul.mubr.bf16.gmra.mrb[28].mxu0 %v1722_v47  ;;  %631 = vmatmul.mubr.bf16.gmra.mrb[28].mxu1 %v1758_v48 }
  0x7a   :  { %534 = vmatprep.mubr.bf16.mxu0 %v1726_v49  ;;  %638 = vmatprep.mubr.bf16.mxu1 %v1759_v50 }
  0x81   :  { %535 = vmatmul.mubr.bf16.gmra.mrb[32].mxu0 %v1728_v51  ;;  %639 = vmatmul.mubr.bf16.gmra.mrb[32].mxu1 %v1761_v52 }
  0x82   :  { %542 = vmatprep.mubr.bf16.mxu0 %v1732_v53  ;;  %646 = vmatprep.mubr.bf16.mxu1 %v1762_v54 }
  0x89   :  { %543 = vmatmul.mubr.bf16.gmra.mrb[36].mxu0 %v1734_v55  ;;  %647 = vmatmul.mubr.bf16.gmra.mrb[36].mxu1 %v1764_v56 }
  0x8a   :  { %550 = vmatprep.mubr.bf16.mxu0 %v1738_v57  ;;  %654 = vmatprep.mubr.bf16.mxu1 %v1765_v58 }
  0x91   :  { %551 = vmatmul.mubr.bf16.gmra.mrb[40].mxu0 %v1740_v60  ;;  %655 = vmatmul.mubr.bf16.gmra.mrb[40].mxu1 %v1767_v61 }
  0x92   :  { %558 = vmatprep.mubr.bf16.mxu0 %v1744_v62  ;;  %662 = vmatprep.mubr.bf16.mxu1 %v1389_v63 }
  0x99   :  { %559 = vmatmul.mubr.bf16.gmra.mrb[44].mxu0 %v1746_v0  ;;  %663 = vmatmul.mubr.bf16.gmra.mrb[44].mxu1 %v1388_v1 }
  0x9a   :  { %566 = vmatprep.mubr.bf16.mxu0 %v1750_v2 }
  0xa1   :  { %567 = vmatmul.mubr.bf16.gmra.mrb[48].mxu0 %v1752_v3 }
 0x114   :  { %v472_v4 = vpop.f32.mrb[0].mxu0  ;;  %v2018_v5 = vpop.f32.mrb[0].mxu1 }
 0x115   :  { %v474_v6 = vpop.f32.mrb[1].mxu0  ;;  %v578_v7 = vpop.f32.mrb[1].mxu1  ;;  %v1226_v8 = vmul.f32 %v472_v4, %v472_v4 }
 0x116   :  { %v475_v9 = vpop.f32.mrb[2].mxu0  ;;  %v2020_v10 = vpop.f32.mrb[2].mxu1 }
 0x117   :  { %v1507_v11 = vpack.c.bf16 %v475_v9, %v472_v4  ;;  %v1172_v12 = vadd.f32 %v475_v9, %v472_v4  ;;  %v1227_v13 = vmul.f32 %v475_v9, %v475_v9  ;;  %v477_v14 = vpop.f32.mrb[3].mxu0  ;;  %v1572_v15 = vpack.c.bf16 %v2020_v10, %v2018_v5  ;;  %v581_v16 = vpop.f32.mrb[3].mxu1 }
 0x119   :  { %1508 = vst [vmem:[%s2237_s2] sm:$0xff] %v1507_v11   ;;  %v1275_v17 = vadd.f32 %v1227_v13, %v1226_v8  ;;  %1636 = vst [vmem:[%s2237_s2 + $0x68] sm:$0xff] %v1572_v15  }
 0x11c   :  { %v480_v18 = vpop.f32.mrb[4].mxu0  ;;  %v2030_v19 = vpop.f32.mrb[4].mxu1 }
 0x11d   :  { %v1173_v20 = vadd.f32 %v1172_v12, %v480_v18  ;;  %v1228_v21 = vmul.f32 %v480_v18, %v480_v18  ;;  %v482_v22 = vpop.f32.mrb[5].mxu0  ;;  %v586_v23 = vpop.f32.mrb[5].mxu1 }
 0x11e   :  { %v483_v24 = vpop.f32.mrb[6].mxu0  ;;  %v2032_v25 = vpop.f32.mrb[6].mxu1 }
 0x11f   :  { %v1276_v26 = vadd.f32 %v1275_v17, %v1228_v21  ;;  %v1512_v27 = vpack.c.bf16 %v483_v24, %v480_v18  ;;  %v1174_v28 = vadd.f32 %v1173_v20, %v483_v24  ;;  %v1229_v29 = vmul.f32 %v483_v24, %v483_v24  ;;  %v485_v30 = vpop.f32.mrb[7].mxu0  ;;  %v589_v31 = vpop.f32.mrb[7].mxu1 }
 0x120   :  { %v1577_v32 = vpack.c.bf16 %v2032_v25, %v2030_v19 }
 0x121   :  { %1624 = vst [vmem:[%s2237_s2 + $0x8] sm:$0xff] %v1512_v27   ;;  %v1277_v33 = vadd.f32 %v1276_v26, %v1229_v29 }
 0x122   :  { %1637 = vst [vmem:[%s2237_s2 + $0x70] sm:$0xff] %v1577_v32  }
 0x124   :  { %v488_v34 = vpop.f32.mrb[8].mxu0  ;;  %v2042_v35 = vpop.f32.mrb[8].mxu1 }
 0x125   :  { %v1175_v36 = vadd.f32 %v1174_v28, %v488_v34  ;;  %v1230_v37 = vmul.f32 %v488_v34, %v488_v34  ;;  %v490_v38 = vpop.f32.mrb[9].mxu0  ;;  %v594_v39 = vpop.f32.mrb[9].mxu1 }
 0x126   :  { %v491_v40 = vpop.f32.mrb[10].mxu0  ;;  %v2044_v41 = vpop.f32.mrb[10].mxu1 }
 0x127   :  { %v1278_v42 = vadd.f32 %v1277_v33, %v1230_v37  ;;  %v1517_v43 = vpack.c.bf16 %v491_v40, %v488_v34  ;;  %v1176_v44 = vadd.f32 %v1175_v36, %v491_v40  ;;  %v1231_v45 = vmul.f32 %v491_v40, %v491_v40  ;;  %v493_v46 = vpop.f32.mrb[11].mxu0  ;;  %v597_v47 = vpop.f32.mrb[11].mxu1 }
 0x128   :  { %v1582_v48 = vpack.c.bf16 %v2044_v41, %v2042_v35 }
 0x129   :  { %1625 = vst [vmem:[%s2237_s2 + $0x10] sm:$0xff] %v1517_v43   ;;  %v1279_v49 = vadd.f32 %v1278_v42, %v1231_v45 }
 0x12a   :  { %1638 = vst [vmem:[%s2237_s2 + $0x78] sm:$0xff] %v1582_v48  }
 0x12c   :  { %v496_v50 = vpop.f32.mrb[12].mxu0  ;;  %v2054_v51 = vpop.f32.mrb[12].mxu1 }
 0x12d   :  { %v1177_v52 = vadd.f32 %v1176_v44, %v496_v50  ;;  %v1232_v53 = vmul.f32 %v496_v50, %v496_v50  ;;  %v498_v54 = vpop.f32.mrb[13].mxu0  ;;  %v602_v55 = vpop.f32.mrb[13].mxu1 }
 0x12e   :  { %v499_v56 = vpop.f32.mrb[14].mxu0  ;;  %v2056_v57 = vpop.f32.mrb[14].mxu1 }
 0x12f   :  { %v1280_v58 = vadd.f32 %v1279_v49, %v1232_v53  ;;  %v1522_v59 = vpack.c.bf16 %v499_v56, %v496_v50  ;;  %v1178_v60 = vadd.f32 %v1177_v52, %v499_v56  ;;  %v1233_v61 = vmul.f32 %v499_v56, %v499_v56  ;;  %v501_v62 = vpop.f32.mrb[15].mxu0  ;;  %v605_v63 = vpop.f32.mrb[15].mxu1 }
 0x130   :  { %v1587_v0 = vpack.c.bf16 %v2056_v57, %v2054_v51 }
 0x131   :  { %1626 = vst [vmem:[%s2237_s2 + $0x18] sm:$0xff] %v1522_v59   ;;  %v1281_v1 = vadd.f32 %v1280_v58, %v1233_v61 }
 0x132   :  { %1639 = vst [vmem:[%s2237_s2 + $0x80] sm:$0xff] %v1587_v0  }
 0x134   :  { %v504_v2 = vpop.f32.mrb[16].mxu0  ;;  %v2066_v3 = vpop.f32.mrb[16].mxu1 }
 0x135   :  { %v1179_v4 = vadd.f32 %v1178_v60, %v504_v2  ;;  %v1234_v6 = vmul.f32 %v504_v2, %v504_v2  ;;  %v506_v7 = vpop.f32.mrb[17].mxu0  ;;  %v610_v8 = vpop.f32.mrb[17].mxu1 }
 0x136   :  { %v507_v9 = vpop.f32.mrb[18].mxu0  ;;  %v2068_v11 = vpop.f32.mrb[18].mxu1 }
 0x137   :  { %v1282_v12 = vadd.f32 %v1281_v1, %v1234_v6  ;;  %v1527_v13 = vpack.c.bf16 %v507_v9, %v504_v2  ;;  %v1180_v14 = vadd.f32 %v1179_v4, %v507_v9  ;;  %v1235_v15 = vmul.f32 %v507_v9, %v507_v9  ;;  %v509_v16 = vpop.f32.mrb[19].mxu0  ;;  %v613_v17 = vpop.f32.mrb[19].mxu1 }
 0x138   :  { %v1592_v18 = vpack.c.bf16 %v2068_v11, %v2066_v3 }
 0x139   :  { %1627 = vst [vmem:[%s2237_s2 + $0x20] sm:$0xff] %v1527_v13   ;;  %v1283_v20 = vadd.f32 %v1282_v12, %v1235_v15 }
 0x13a   :  { %1640 = vst [vmem:[%s2237_s2 + $0x88] sm:$0xff] %v1592_v18  }
 0x13c   :  { %v512_v21 = vpop.f32.mrb[20].mxu0  ;;  %v2078_v22 = vpop.f32.mrb[20].mxu1 }
 0x13d   :  { %v1181_v23 = vadd.f32 %v1180_v14, %v512_v21  ;;  %v1236_v24 = vmul.f32 %v512_v21, %v512_v21  ;;  %v514_v26 = vpop.f32.mrb[21].mxu0  ;;  %v618_v27 = vpop.f32.mrb[21].mxu1 }
 0x13e   :  { %v515_v28 = vpop.f32.mrb[22].mxu0  ;;  %v2080_v29 = vpop.f32.mrb[22].mxu1 }
 0x13f   :  { %v1284_v30 = vadd.f32 %v1283_v20, %v1236_v24  ;;  %v1532_v31 = vpack.c.bf16 %v515_v28, %v512_v21  ;;  %v1182_v32 = vadd.f32 %v1181_v23, %v515_v28  ;;  %v1237_v33 = vmul.f32 %v515_v28, %v515_v28  ;;  %v517_v34 = vpop.f32.mrb[23].mxu0  ;;  %v621_v36 = vpop.f32.mrb[23].mxu1 }
 0x140   :  { %v1597_v37 = vpack.c.bf16 %v2080_v29, %v2078_v22 }
 0x141   :  { %1628 = vst [vmem:[%s2237_s2 + $0x28] sm:$0xff] %v1532_v31   ;;  %v1285_v38 = vadd.f32 %v1284_v30, %v1237_v33 }
 0x142   :  { %1641 = vst [vmem:[%s2237_s2 + $0x90] sm:$0xff] %v1597_v37  }
 0x144   :  { %v520_v39 = vpop.f32.mrb[24].mxu0  ;;  %v2090_v40 = vpop.f32.mrb[24].mxu1 }
 0x145   :  { %v1183_v42 = vadd.f32 %v1182_v32, %v520_v39  ;;  %v1238_v43 = vmul.f32 %v520_v39, %v520_v39  ;;  %v522_v44 = vpop.f32.mrb[25].mxu0  ;;  %v626_v45 = vpop.f32.mrb[25].mxu1 }
 0x146   :  { %v523_v46 = vpop.f32.mrb[26].mxu0  ;;  %v2092_v47 = vpop.f32.mrb[26].mxu1 }
 0x147   :  { %v1286_v48 = vadd.f32 %v1285_v38, %v1238_v43  ;;  %v1537_v49 = vpack.c.bf16 %v523_v46, %v520_v39  ;;  %v1184_v50 = vadd.f32 %v1183_v42, %v523_v46  ;;  %v1239_v52 = vmul.f32 %v523_v46, %v523_v46  ;;  %v525_v53 = vpop.f32.mrb[27].mxu0  ;;  %v629_v54 = vpop.f32.mrb[27].mxu1 }
 0x148   :  { %v1602_v55 = vpack.c.bf16 %v2092_v47, %v2090_v40 }
 0x149   :  { %1629 = vst [vmem:[%s2237_s2 + $0x30] sm:$0xff] %v1537_v49   ;;  %v1287_v56 = vadd.f32 %v1286_v48, %v1239_v52 }
 0x14a   :  { %1642 = vst [vmem:[%s2237_s2 + $0x98] sm:$0xff] %v1602_v55  }
 0x14c   :  { %v528_v58 = vpop.f32.mrb[28].mxu0  ;;  %v2102_v59 = vpop.f32.mrb[28].mxu1 }
 0x14d   :  { %v1185_v60 = vadd.f32 %v1184_v50, %v528_v58  ;;  %v1240_v61 = vmul.f32 %v528_v58, %v528_v58  ;;  %v530_v62 = vpop.f32.mrb[29].mxu0  ;;  %v634_v63 = vpop.f32.mrb[29].mxu1 }
 0x14e   :  { %v531_v0 = vpop.f32.mrb[30].mxu0  ;;  %v2104_v1 = vpop.f32.mrb[30].mxu1 }
 0x14f   :  { %v1288_v2 = vadd.f32 %v1287_v56, %v1240_v61  ;;  %v1542_v4 = vpack.c.bf16 %v531_v0, %v528_v58  ;;  %v1186_v6 = vadd.f32 %v1185_v60, %v531_v0  ;;  %v1241_v7 = vmul.f32 %v531_v0, %v531_v0  ;;  %v533_v8 = vpop.f32.mrb[31].mxu0  ;;  %v637_v9 = vpop.f32.mrb[31].mxu1 }
 0x150   :  { %v1607_v12 = vpack.c.bf16 %v2104_v1, %v2102_v59 }
 0x151   :  { %1630 = vst [vmem:[%s2237_s2 + $0x38] sm:$0xff] %v1542_v4   ;;  %v1289_v13 = vadd.f32 %v1288_v2, %v1241_v7 }
 0x152   :  { %1643 = vst [vmem:[%s2237_s2 + $0xa0] sm:$0xff] %v1607_v12  }
 0x154   :  { %v536_v14 = vpop.f32.mrb[32].mxu0  ;;  %v2114_v15 = vpop.f32.mrb[32].mxu1 }
 0x155   :  { %v1187_v16 = vadd.f32 %v1186_v6, %v536_v14  ;;  %v1242_v17 = vmul.f32 %v536_v14, %v536_v14  ;;  %v538_v18 = vpop.f32.mrb[33].mxu0  ;;  %v642_v20 = vpop.f32.mrb[33].mxu1 }
 0x156   :  { %v539_v21 = vpop.f32.mrb[34].mxu0  ;;  %v2116_v23 = vpop.f32.mrb[34].mxu1 }
 0x157   :  { %v1290_v24 = vadd.f32 %v1289_v13, %v1242_v17  ;;  %v1547_v26 = vpack.c.bf16 %v539_v21, %v536_v14  ;;  %v1188_v27 = vadd.f32 %v1187_v16, %v539_v21  ;;  %v1243_v28 = vmul.f32 %v539_v21, %v539_v21  ;;  %v541_v30 = vpop.f32.mrb[35].mxu0  ;;  %v645_v31 = vpop.f32.mrb[35].mxu1 }
 0x158   :  { %v1612_v32 = vpack.c.bf16 %v2116_v23, %v2114_v15 }
 0x159   :  { %1631 = vst [vmem:[%s2237_s2 + $0x40] sm:$0xff] %v1547_v26   ;;  %v1291_v33 = vadd.f32 %v1290_v24, %v1243_v28 }
 0x15a   :  { %1644 = vst [vmem:[%s2237_s2 + $0xa8] sm:$0xff] %v1612_v32  }
 0x15c   :  { %v544_v34 = vpop.f32.mrb[36].mxu0  ;;  %v2126_v36 = vpop.f32.mrb[36].mxu1 }
 0x15d   :  { %v1189_v37 = vadd.f32 %v1188_v27, %v544_v34  ;;  %v1244_v38 = vmul.f32 %v544_v34, %v544_v34  ;;  %v546_v39 = vpop.f32.mrb[37].mxu0  ;;  %v650_v42 = vpop.f32.mrb[37].mxu1 }
 0x15e   :  { %v547_v43 = vpop.f32.mrb[38].mxu0  ;;  %v2128_v44 = vpop.f32.mrb[38].mxu1 }
 0x15f   :  { %v1292_v45 = vadd.f32 %v1291_v33, %v1244_v38  ;;  %v1552_v46 = vpack.c.bf16 %v547_v43, %v544_v34  ;;  %v1190_v48 = vadd.f32 %v1189_v37, %v547_v43  ;;  %v1245_v49 = vmul.f32 %v547_v43, %v547_v43  ;;  %v549_v50 = vpop.f32.mrb[39].mxu0  ;;  %v653_v52 = vpop.f32.mrb[39].mxu1 }
 0x160   :  { %v1617_v53 = vpack.c.bf16 %v2128_v44, %v2126_v36 }
 0x161   :  { %1632 = vst [vmem:[%s2237_s2 + $0x48] sm:$0xff] %v1552_v46   ;;  %v1293_v54 = vadd.f32 %v1292_v45, %v1245_v49 }
 0x162   :  { %1645 = vst [vmem:[%s2237_s2 + $0xb0] sm:$0xff] %v1617_v53   ;;  %v1252_v53 = vmul.f32 %v2018_v5, %v2018_v5 }
 0x164   :  { %v552_v55 = vpop.f32.mrb[40].mxu0  ;;  %v2138_v56 = vpop.f32.mrb[40].mxu1 }
 0x165   :  { %v1191_v58 = vadd.f32 %v1190_v48, %v552_v55  ;;  %v1246_v60 = vmul.f32 %v552_v55, %v552_v55  ;;  %v554_v61 = vpop.f32.mrb[41].mxu0  ;;  %v658_v62 = vpop.f32.mrb[41].mxu1 }
 0x166   :  { %v555_v63 = vpop.f32.mrb[42].mxu0  ;;  %v2140_v0 = vpop.f32.mrb[42].mxu1  ;;  %v1254_v62 = vmul.f32 %v2030_v19, %v2030_v19 }
 0x167   :  { %v1294_v2 = vadd.f32 %v1293_v54, %v1246_v60  ;;  %v1557_v4 = vpack.c.bf16 %v555_v63, %v552_v55  ;;  %v1192_v6 = vadd.f32 %v1191_v58, %v555_v63  ;;  %v1247_v7 = vmul.f32 %v555_v63, %v555_v63  ;;  %v557_v8 = vpop.f32.mrb[43].mxu0  ;;  %v661_v9 = vpop.f32.mrb[43].mxu1 }
 0x168   :  { %v1622_v12 = vpack.c.bf16 %v2140_v0, %v2138_v56  ;;  %v1253_v58 = vmul.f32 %v2020_v10, %v2020_v10 }
 0x169   :  { %1633 = vst [vmem:[%s2237_s2 + $0x50] sm:$0xff] %v1557_v4   ;;  %v1295_v13 = vadd.f32 %v1294_v2, %v1247_v7  ;;  %v1255_v4 = vmul.f32 %v2032_v25, %v2032_v25 }
 0x16a   :  { %1646 = vst [vmem:[%s2237_s2 + $0xb8] sm:$0xff] %v1622_v12  }
 0x16c   :  { %v560_v14 = vpop.f32.mrb[44].mxu0  ;;  %v2150_v16 = vpop.f32.mrb[44].mxu1 }
 0x16d   :  { %v1193_v17 = vadd.f32 %v1192_v6, %v560_v14  ;;  %v1248_v18 = vmul.f32 %v560_v14, %v560_v14  ;;  %v562_v20 = vpop.f32.mrb[45].mxu0  ;;  %v1503_v21 = vpack.c.bf16 %v2150_v16, %v2150_v16  ;;  %v666_v24 = vpop.f32.mrb[45].mxu1 }
 0x16e   :  { %v563_v26 = vpop.f32.mrb[46].mxu0  ;;  %v667_v27 = vpop.f32.mrb[46].mxu1 }
 0x16f   :  { %v1296_v28 = vadd.f32 %v1295_v13, %v1248_v18  ;;  %v1562_v30 = vpack.c.bf16 %v563_v26, %v560_v14  ;;  %v1194_v31 = vadd.f32 %v1193_v17, %v563_v26  ;;  %v1249_v32 = vmul.f32 %v563_v26, %v563_v26  ;;  %v565_v33 = vpop.f32.mrb[47].mxu0  ;;  %1171 = vst [vmem:[%s2237_s2 + $0xc0] sm:$0xf] %v1503_v21  ;;  %v668_v34 = vpop.f32.mrb[47].mxu1 }
 0x170   :  { %v1264_v33 = vmul.f32 %v2090_v40, %v2090_v40 }
 0x171   :  { %1634 = vst [vmem:[%s2237_s2 + $0x58] sm:$0xff] %v1562_v30   ;;  %v1297_v37 = vadd.f32 %v1296_v28, %v1249_v32 }
 0x174   :  { %v568_v38 = vpop.f32.mrb[48].mxu0 }
 0x175   :  { %v1195_v39 = vadd.f32 %v1194_v31, %v568_v38  ;;  %v1250_v42 = vmul.f32 %v568_v38, %v568_v38  ;;  %v570_v43 = vpop.f32.mrb[49].mxu0 }
 0x176   :  { %v571_v45 = vpop.f32.mrb[50].mxu0 }
 0x177   :  { %v1298_v46 = vadd.f32 %v1297_v37, %v1250_v42  ;;  %v1567_v48 = vpack.c.bf16 %v571_v45, %v568_v38  ;;  %v1196_v49 = vadd.f32 %v1195_v39, %v571_v45  ;;  %v1251_v50 = vmul.f32 %v571_v45, %v571_v45  ;;  %v573_v52 = vpop.f32.mrb[51].mxu0 }
 0x178   :  { %v1265_v38 = vmul.f32 %v2092_v47, %v2092_v47  ;;  %v1266_v42 = vmul.f32 %v2102_v59, %v2102_v59  ;;  %v1267_v45 = vmul.f32 %v2104_v1, %v2104_v1 }
 0x179   :  { %1635 = vst [vmem:[%s2237_s2 + $0x60] sm:$0xff] %v1567_v48   ;;  %v1197_v54 = vadd.f32 %v1196_v49, %v2018_v5  ;;  %v1299_v55 = vadd.f32 %v1298_v46, %v1251_v50  ;;  %v1256_v5 = vmul.f32 %v2042_v35, %v2042_v35  ;;  %v1268_v48 = vmul.f32 %v2114_v15, %v2114_v15 }
 0x17a   :  { %v1269_v50 = vmul.f32 %v2116_v23, %v2116_v23 }
 0x17b   :  { %v1198_v60 = vadd.f32 %v1197_v54, %v2020_v10  ;;  %v1300_v61 = vadd.f32 %v1299_v55, %v1252_v53  ;;  %v1257_v10 = vmul.f32 %v2044_v41, %v2044_v41  ;;  %v1270_v53 = vmul.f32 %v2126_v36, %v2126_v36 }
 0x17c   :  { %v1271_v55 = vmul.f32 %v2128_v44, %v2128_v44 }
 0x17d   :  { %v1199_v63 = vadd.f32 %v1198_v60, %v2030_v19  ;;  %v1301_v2 = vadd.f32 %v1300_v61, %v1253_v58  ;;  %v1258_v19 = vmul.f32 %v2054_v51, %v2054_v51  ;;  %v1272_v60 = vmul.f32 %v2138_v56, %v2138_v56 }
 0x17f   :  { %v1200_v6 = vadd.f32 %v1199_v63, %v2032_v25  ;;  %v1302_v7 = vadd.f32 %v1301_v2, %v1254_v62  ;;  %v1259_v25 = vmul.f32 %v2056_v57, %v2056_v57  ;;  %v1273_v62 = vmul.f32 %v2140_v0, %v2140_v0 }
 0x181   :  { %v1201_v8 = vadd.f32 %v1200_v6, %v2042_v35  ;;  %v1303_v9 = vadd.f32 %v1302_v7, %v1255_v4  ;;  %v1260_v35 = vmul.f32 %v2066_v3, %v2066_v3 }
 0x183   :  { %v1202_v12 = vadd.f32 %v1201_v8, %v2044_v41  ;;  %v1304_v13 = vadd.f32 %v1303_v9, %v1256_v5  ;;  %v1261_v41 = vmul.f32 %v2068_v11, %v2068_v11 }
 0x185   :  { %v1305_v14 = vadd.f32 %v1304_v13, %v1257_v10  ;;  %v1203_v17 = vadd.f32 %v1202_v12, %v2054_v51  ;;  %v1262_v51 = vmul.f32 %v2078_v22, %v2078_v22 }
 0x187   :  { %v1204_v18 = vadd.f32 %v1203_v17, %v2056_v57  ;;  %v1306_v20 = vadd.f32 %v1305_v14, %v1258_v19  ;;  %v1263_v57 = vmul.f32 %v2080_v29, %v2080_v29 }
 0x189   :  { %v1205_v21 = vadd.f32 %v1204_v18, %v2066_v3  ;;  %v1307_v24 = vadd.f32 %v1306_v20, %v1259_v25 }
 0x18b   :  { %v1206_v26 = vadd.f32 %v1205_v21, %v2068_v11  ;;  %v1308_v27 = vadd.f32 %v1307_v24, %v1260_v35 }
 0x18d   :  { %v1207_v28 = vadd.f32 %v1206_v26, %v2078_v22  ;;  %v1309_v30 = vadd.f32 %v1308_v27, %v1261_v41 }
 0x18f   :  { %v1208_v31 = vadd.f32 %v1207_v28, %v2080_v29  ;;  %v1310_v32 = vadd.f32 %v1309_v30, %v1262_v51 }
 0x191   :  { %v1209_v3 = vadd.f32 %v1208_v31, %v2090_v40  ;;  %v1311_v34 = vadd.f32 %v1310_v32, %v1263_v57 }
 0x193   :  { %v1312_v11 = vadd.f32 %v1311_v34, %v1264_v33  ;;  %v1210_v37 = vadd.f32 %v1209_v3, %v2092_v47 }
 0x195   :  { %v1313_v22 = vadd.f32 %v1312_v11, %v1265_v38  ;;  %v1211_v39 = vadd.f32 %v1210_v37, %v2102_v59 }
 0x197   :  { %v1314_v29 = vadd.f32 %v1313_v22, %v1266_v42  ;;  %v1212_v43 = vadd.f32 %v1211_v39, %v2104_v1 }
 0x199   :  { %v1315_v40 = vadd.f32 %v1314_v29, %v1267_v45  ;;  %v1213_v46 = vadd.f32 %v1212_v43, %v2114_v15 }
 0x19b   :  { %v1316_v49 = vadd.f32 %v1315_v40, %v1268_v48  ;;  %v1214_v47 = vadd.f32 %v1213_v46, %v2116_v23 }
 0x19d   :  { %v1317_v52 = vadd.f32 %v1316_v49, %v1269_v50  ;;  %v1215_v59 = vadd.f32 %v1214_v47, %v2126_v36  ;;  %v1274_v36 = vmul.f32 %v2150_v16, %v2150_v16 }
 0x19f   :  { %v1318_v54 = vadd.f32 %v1317_v52, %v1270_v53  ;;  %v1216_v1 = vadd.f32 %v1215_v59, %v2128_v44 }
 0x1a1   :  { %v1319_v58 = vadd.f32 %v1318_v54, %v1271_v55  ;;  %v1217_v15 = vadd.f32 %v1216_v1, %v2138_v56 }
 0x1a3   :  { %v1320_v61 = vadd.f32 %v1319_v58, %v1272_v60  ;;  %v1218_v23 = vadd.f32 %v1217_v15, %v2140_v0 }
 0x1a5   :  { %v1321_v63 = vadd.f32 %v1320_v61, %v1273_v62  ;;  %v1219_v2 = vadd.f32 %v1218_v23, %v2150_v16 }
 0x1a7   :  { %v1220_v4 = vrot.slane %v1219_v2, 4  ;;  %v1322_v44 = vadd.f32 %v1321_v63, %v1274_v36 }
 0x1a9   :  { %v1221_v6 = vadd.f32 %v1220_v4, %v1219_v2  ;;  %v1323_v7 = vrot.slane %v1322_v44, 4 }
 0x1ab   :  { %v1222_v5 = vrot.slane %v1221_v6, 2  ;;  %v1324_v8 = vadd.f32 %v1323_v7, %v1322_v44 }
 0x1ad   :  { %v1223_v9 = vadd.f32 %v1222_v5, %v1221_v6  ;;  %v1325_v56 = vrot.slane %v1324_v8, 2 }
 0x1af   :  { %v1224_v10 = vrot.slane %v1223_v9, 1  ;;  %v1326_v12 = vadd.f32 %v1325_v56, %v1324_v8 }
 0x1b1   :  { %v1327_v13 = vrot.slane %v1326_v12, 1  ;;  %v1225_v19 = vadd.f32 %v1224_v10, %v1223_v9 }
 0x1b3   :  { %v1328_v0 = vadd.f32 %v1327_v13, %v1326_v12 }
 0x1b5   :  { %v1330_v14 = vsel %vm1329_vm0, %v1225_v19, %v1328_v0 }
 0x1b6   :  { %1331 = vst [vmem:[%s2238_s3] sm:$0x3] %v1330_v14 }

// kernel: _lambda_.28
= control target key start
LH: loop header
LB: loop body
LE: loop exit
PB: predicated region body
PF: predicated region fallthrough
CT: control target
= control target key end

     0   :  { %v920_v7 = vmov 1966171168   ;;  %v33_v9 = vlaneseq  ;;  %s1418_s1 = inlined_call_operand.vmem [shape: f32[1,2,128], index: 1, kind: input, shape index: {}]   ;;  %s1419_s0 = inlined_call_operand.vmem [shape: bf16[392,128], index: 0, kind: input, shape index: {}]   ;;  %s1420_s2 = inlined_call_operand.vmem [shape: f32[1,128], index: 2, kind: input, shape index: {}]   ;;  %s1421_s3 = inlined_call_operand.vmem [shape: f32[1,128], index: 3, kind: input, shape index: {}]   ;;  %s1422_s4 = inlined_call_operand.vmem [shape: bf16[392,128], index: 4, kind: output, shape index: {}]  }
   0x1   :  { %v17_v0 = vld [vmem:[%s1418_s1] sm:$0x3]  ;;  %v31_v8 = vunpack.c.l.s4 %v920_v7  ;;  %v964_v13 = vld [vmem:[%s1419_s0 + $0x8] sm:$0xff]   ;;  %v969_v14 = vld [vmem:[%s1419_s0 + $0x10] sm:$0xff]  }
   0x2   :  { %v949_v1 = vmul.f32 0.0025510204, %v17_v0  ;;  %v954_v11 = vshrl.u32 %v33_v9, 7  ;;  %v959_v12 = vld [vmem:[%s1419_s0] sm:$0xff]   ;;  %v974_v15 = vld [vmem:[%s1419_s0 + $0x18] sm:$0xff]   ;;  %v985_v18 = vld [vmem:[%s1419_s0 + $0x28] sm:$0xff]   ;;  %v661_v22 = vunpack.c.l.bf16 %v964_v13  ;;  %v662_v25 = vunpack.c.h.bf16 %v964_v13 }
   0x3   :  { %v32_v10 = vunpack.c.0.s8 %v31_v8  ;;  %v657_v16 = vunpack.c.l.bf16 %v959_v12  ;;  %v980_v17 = vld [vmem:[%s1419_s0 + $0x20] sm:$0xff]   ;;  %v658_v20 = vunpack.c.h.bf16 %v959_v12  ;;  %v994_v23 = vld [vmem:[%s1419_s0 + $0x30] sm:$0xff]   ;;  %v999_v24 = vld [vmem:[%s1419_s0 + $0x38] sm:$0xff]   ;;  %v665_v26 = vunpack.c.l.bf16 %v969_v14 }
   0x4   :  { %v20_v2 = vmul.f32 %v949_v1, %v949_v1  ;;  %v151_v21 = vsub.s32 0, %v954_v11  ;;  %v666_v27 = vunpack.c.h.bf16 %v969_v14  ;;  %v669_v28 = vunpack.c.l.bf16 %v974_v15  ;;  %v1008_v29 = vld [vmem:[%s1419_s0 + $0x40] sm:$0xff]   ;;  %v1017_v34 = vld [vmem:[%s1419_s0 + $0x48] sm:$0xff]   ;;  %v1022_v35 = vld [vmem:[%s1419_s0 + $0x50] sm:$0xff]  }
   0x5   :  { %v35_v19 = vsub.s32 %v32_v10, %v954_v11  ;;  %v670_v30 = vunpack.c.h.bf16 %v974_v15  ;;  %v673_v31 = vunpack.c.l.bf16 %v980_v17  ;;  %v674_v32 = vunpack.c.h.bf16 %v980_v17  ;;  %v1031_v41 = vld [vmem:[%s1419_s0 + $0x58] sm:$0xff]   ;;  %v1036_v42 = vld [vmem:[%s1419_s0 + $0x60] sm:$0xff]   ;;  %v1044_v47 = vld [vmem:[%s1419_s0 + $0x68] sm:$0xff]  }
   0x6   :  { %v22_v3 = vrot.slane %v20_v2, 7  ;;  %v677_v33 = vunpack.c.l.bf16 %v985_v18  ;;  %v678_v37 = vunpack.c.h.bf16 %v985_v18  ;;  %v681_v38 = vunpack.c.l.bf16 %v994_v23  ;;  %v1049_v48 = vld [vmem:[%s1419_s0 + $0x70] sm:$0xff]   ;;  %v1058_v53 = vld [vmem:[%s1419_s0 + $0x78] sm:$0xff]   ;;  %v1066_v58 = vld [vmem:[%s1419_s0 + $0x80] sm:$0xff]  }
   0x7   :  { %v682_v39 = vunpack.c.h.bf16 %v994_v23  ;;  %v685_v40 = vunpack.c.l.bf16 %v999_v24  ;;  %v686_v44 = vunpack.c.h.bf16 %v999_v24  ;;  %v689_v45 = vunpack.c.l.bf16 %v1008_v29  ;;  %v1071_v59 = vld [vmem:[%s1419_s0 + $0x88] sm:$0xff]   ;;  %v26_v60 = vld [vmem:[%s1420_s2] sm:$0x1]  ;;  %v1083_v2 = vld [vmem:[%s1419_s0 + $0x90] sm:$0xff]  }
   0x8   :  { %v24_v4 = vsub.f32 %v949_v1, %v22_v3  ;;  %v690_v46 = vunpack.c.h.bf16 %v1008_v29  ;;  %v693_v49 = vunpack.c.l.bf16 %v1017_v34  ;;  %v694_v50 = vunpack.c.h.bf16 %v1017_v34  ;;  %v1088_v3 = vld [vmem:[%s1419_s0 + $0x98] sm:$0xff]   ;;  %v1096_v8 = vld [vmem:[%s1419_s0 + $0xa0] sm:$0xff]   ;;  %v1101_v9 = vld [vmem:[%s1419_s0 + $0xa8] sm:$0xff]  }
   0x9   :  { %v697_v51 = vunpack.c.l.bf16 %v1022_v35  ;;  %v698_v52 = vunpack.c.h.bf16 %v1022_v35  ;;  %v701_v55 = vunpack.c.l.bf16 %v1031_v41  ;;  %v702_v56 = vunpack.c.h.bf16 %v1031_v41 }
   0xa   :  { %v25_v5 = vmax.f32 %v24_v4, 0.0  ;;  %v742_v63 = vunpack.c.h.bf16 %v1101_v9  ;;  %v1424_v41 = vunpack.c.h.bf16 %v1036_v42 }
   0xc   :  { %v27_v6 = vadd.f32 1e-05, %v25_v5 }
   0xe   :  { %918 = vrsqrt.f32 %v27_v6  ;;  %v741_v6 = vunpack.c.l.bf16 %v1101_v9 }
  0x18   :  { %v919_v36 = vpop.eup %918 }
  0x19   :  { %v36_v43 = vrot.slane %v919_v36, %v35_v19 }
  0x1b   :  { %v37_v54 = vcombine.high %v36_v43, %v36_v43  ;;  %v1123_v43 = vld [vmem:[%s1419_s0 + $0xc0] sm:$0xf] }
  0x1d   :  { %v44_v4 = vrot.slane %v37_v54, %v35_v19  ;;  %v1110_v54 = vld [vmem:[%s1419_s0 + $0xb0] sm:$0xff]   ;;  %v1118_v19 = vld [vmem:[%s1419_s0 + $0xb8] sm:$0xff]  }
  0x1e   :  { %v746_v61 = vunpack.c.h.bf16 %v1110_v54  ;;  %v750_v5 = vunpack.c.h.bf16 %v1118_v19 }
  0x1f   :  { %v46_v7 = vmul.f32 %v44_v4, %v26_v60  ;;  %v47_v60 = vld [vmem:[%s1421_s3] sm:$0x1] }
  0x21   :  { %v48_v36 = vmul.f32 %v46_v7, %v949_v1  ;;  %v1135_v10 = vrot.slane %v46_v7, %v151_v21 }
  0x23   :  { %v49_v57 = vsub.f32 %v47_v60, %v48_v36  ;;  %v154_v1 = vmul.f32 %v657_v16, %v1135_v10  ;;  %v155_v7 = vmul.f32 %v658_v20, %v1135_v10  ;;  %v156_v62 = vmul.f32 %v661_v22, %v1135_v10 }
  0x24   :  { %v157_v4 = vmul.f32 %v662_v25, %v1135_v10  ;;  %v158_v36 = vmul.f32 %v665_v26, %v1135_v10  ;;  %v159_v16 = vmul.f32 %v666_v27, %v1135_v10  ;;  %v160_v12 = vmul.f32 %v669_v28, %v1135_v10 }
  0x25   :  { %v1166_v20 = vrot.slane %v49_v57, %v151_v21  ;;  %v161_v13 = vmul.f32 %v670_v30, %v1135_v10  ;;  %v162_v22 = vmul.f32 %v673_v31, %v1135_v10  ;;  %v163_v14 = vmul.f32 %v674_v32, %v1135_v10 }
  0x26   :  { %v164_v25 = vmul.f32 %v677_v33, %v1135_v10  ;;  %v165_v11 = vmul.f32 %v678_v37, %v1135_v10  ;;  %v166_v15 = vmul.f32 %v681_v38, %v1135_v10  ;;  %v167_v21 = vmul.f32 %v682_v39, %v1135_v10 }
  0x27   :  { %v209_v26 = vadd.f32 %v1166_v20, %v154_v1  ;;  %v210_v17 = vadd.f32 %v1166_v20, %v155_v7  ;;  %v211_v27 = vadd.f32 %v1166_v20, %v156_v62  ;;  %v212_v28 = vadd.f32 %v1166_v20, %v157_v4 }
  0x28   :  { %v213_v30 = vadd.f32 %v1166_v20, %v158_v36  ;;  %v214_v18 = vadd.f32 %v1166_v20, %v159_v16  ;;  %v215_v31 = vadd.f32 %v1166_v20, %v160_v12  ;;  %v216_v32 = vadd.f32 %v1166_v20, %v161_v13 }
  0x29   :  { %v258_v33 = vmax.f32 %v209_v26, 0.0  ;;  %v259_v37 = vmax.f32 %v210_v17, 0.0  ;;  %v260_v23 = vmax.f32 %v211_v27, 0.0  ;;  %v261_v38 = vmax.f32 %v212_v28, 0.0 }
  0x2a   :  { %v262_v39 = vmax.f32 %v213_v30, 0.0  ;;  %v263_v57 = vmax.f32 %v214_v18, 0.0  ;;  %v264_v60 = vmax.f32 %v215_v31, 0.0  ;;  %v265_v1 = vmax.f32 %v216_v32, 0.0 }
  0x2b   :  { %v754_v7 = vpack.c.bf16 %v259_v37, %v258_v33  ;;  %v759_v62 = vpack.c.bf16 %v261_v38, %v260_v23  ;;  %v217_v4 = vadd.f32 %v1166_v20, %v162_v22  ;;  %v218_v36 = vadd.f32 %v1166_v20, %v163_v14 }
  0x2c   :  { %v764_v0 = vpack.c.bf16 %v263_v57, %v262_v39  ;;  %v769_v16 = vpack.c.bf16 %v265_v1, %v264_v60  ;;  %v219_v12 = vadd.f32 %v1166_v20, %v164_v25  ;;  %v220_v13 = vadd.f32 %v1166_v20, %v165_v11 }
  0x2d   :  { %755 = vst [vmem:[%s1422_s4] sm:$0xff] %v754_v7   ;;  %894 = vst [vmem:[%s1422_s4 + $0x8] sm:$0xff] %v759_v62   ;;  %v266_v26 = vmax.f32 %v217_v4, 0.0  ;;  %v267_v17 = vmax.f32 %v218_v36, 0.0  ;;  %v221_v22 = vadd.f32 %v1166_v20, %v166_v15  ;;  %v222_v14 = vadd.f32 %v1166_v20, %v167_v21 }
  0x2e   :  { %895 = vst [vmem:[%s1422_s4 + $0x10] sm:$0xff] %v764_v0   ;;  %896 = vst [vmem:[%s1422_s4 + $0x18] sm:$0xff] %v769_v16   ;;  %v268_v25 = vmax.f32 %v219_v12, 0.0  ;;  %v269_v11 = vmax.f32 %v220_v13, 0.0  ;;  %v168_v27 = vmul.f32 %v685_v40, %v1135_v10  ;;  %v169_v15 = vmul.f32 %v686_v44, %v1135_v10 }
  0x2f   :  { %v774_v28 = vpack.c.bf16 %v267_v17, %v266_v26  ;;  %v270_v21 = vmax.f32 %v221_v22, 0.0  ;;  %v271_v30 = vmax.f32 %v222_v14, 0.0  ;;  %v170_v0 = vmul.f32 %v689_v45, %v1135_v10 }
  0x30   :  { %v779_v18 = vpack.c.bf16 %v269_v11, %v268_v25  ;;  %v223_v31 = vadd.f32 %v1166_v20, %v168_v27  ;;  %v224_v32 = vadd.f32 %v1166_v20, %v169_v15  ;;  %v171_v40 = vmul.f32 %v690_v46, %v1135_v10 }
  0x31   :  { %897 = vst [vmem:[%s1422_s4 + $0x20] sm:$0xff] %v774_v28   ;;  %v784_v24 = vpack.c.bf16 %v271_v30, %v270_v21  ;;  %v225_v44 = vadd.f32 %v1166_v20, %v170_v0  ;;  %v172_v45 = vmul.f32 %v693_v49, %v1135_v10  ;;  %v173_v33 = vmul.f32 %v694_v50, %v1135_v10 }
  0x32   :  { %898 = vst [vmem:[%s1422_s4 + $0x28] sm:$0xff] %v779_v18   ;;  %v272_v29 = vmax.f32 %v223_v31, 0.0  ;;  %v273_v46 = vmax.f32 %v224_v32, 0.0  ;;  %v226_v37 = vadd.f32 %v1166_v20, %v171_v40  ;;  %v174_v23 = vmul.f32 %v697_v51, %v1135_v10 }
  0x33   :  { %899 = vst [vmem:[%s1422_s4 + $0x30] sm:$0xff] %v784_v24   ;;  %v274_v49 = vmax.f32 %v225_v44, 0.0  ;;  %v227_v34 = vadd.f32 %v1166_v20, %v172_v45  ;;  %v228_v50 = vadd.f32 %v1166_v20, %v173_v33  ;;  %v175_v38 = vmul.f32 %v698_v52, %v1135_v10 }
  0x34   :  { %v789_v39 = vpack.c.bf16 %v273_v46, %v272_v29  ;;  %v275_v57 = vmax.f32 %v226_v37, 0.0  ;;  %v229_v60 = vadd.f32 %v1166_v20, %v174_v23  ;;  %v176_v51 = vmul.f32 %v701_v55, %v1135_v10 }
  0x35   :  { %v276_v1 = vmax.f32 %v227_v34, 0.0  ;;  %v277_v7 = vmax.f32 %v228_v50, 0.0  ;;  %v230_v62 = vadd.f32 %v1166_v20, %v175_v38  ;;  %v177_v4 = vmul.f32 %v702_v56, %v1135_v10 }
  0x36   :  { %900 = vst [vmem:[%s1422_s4 + $0x38] sm:$0xff] %v789_v39   ;;  %v794_v35 = vpack.c.bf16 %v275_v57, %v274_v49  ;;  %v278_v52 = vmax.f32 %v229_v60, 0.0  ;;  %v231_v36 = vadd.f32 %v1166_v20, %v176_v51  ;;  %v1423_v16 = vunpack.c.l.bf16 %v1036_v42 }
  0x37   :  { %v799_v12 = vpack.c.bf16 %v277_v7, %v276_v1  ;;  %v279_v13 = vmax.f32 %v230_v62, 0.0  ;;  %v232_v26 = vadd.f32 %v1166_v20, %v177_v4  ;;  %v179_v56 = vmul.f32 %v1424_v41, %v1135_v10 }
  0x38   :  { %v178_v55 = vmul.f32 %v1423_v16, %v1135_v10  ;;  %901 = vst [vmem:[%s1422_s4 + $0x40] sm:$0xff] %v794_v35   ;;  %v280_v17 = vmax.f32 %v231_v36, 0.0  ;;  %v1425_v14 = vunpack.c.l.bf16 %v1044_v47  ;;  %v1426_v11 = vunpack.c.h.bf16 %v1044_v47 }
  0x39   :  { %902 = vst [vmem:[%s1422_s4 + $0x48] sm:$0xff] %v799_v12   ;;  %v804_v42 = vpack.c.bf16 %v279_v13, %v278_v52  ;;  %v281_v15 = vmax.f32 %v232_v26, 0.0  ;;  %v234_v28 = vadd.f32 %v1166_v20, %v179_v56  ;;  %v1427_v21 = vunpack.c.l.bf16 %v1049_v48 }
  0x3a   :  { %v233_v22 = vadd.f32 %v1166_v20, %v178_v55  ;;  %v180_v25 = vmul.f32 %v1425_v14, %v1135_v10  ;;  %v181_v27 = vmul.f32 %v1426_v11, %v1135_v10  ;;  %v1428_v47 = vunpack.c.h.bf16 %v1049_v48 }
  0x3b   :  { %v182_v30 = vmul.f32 %v1427_v21, %v1135_v10  ;;  %903 = vst [vmem:[%s1422_s4 + $0x50] sm:$0xff] %v804_v42   ;;  %v809_v40 = vpack.c.bf16 %v281_v15, %v280_v17  ;;  %v283_v24 = vmax.f32 %v234_v28, 0.0  ;;  %v1429_v45 = vunpack.c.l.bf16 %v1058_v53 }
  0x3c   :  { %v282_v0 = vmax.f32 %v233_v22, 0.0  ;;  %v235_v18 = vadd.f32 %v1166_v20, %v180_v25  ;;  %v236_v31 = vadd.f32 %v1166_v20, %v181_v27  ;;  %v183_v32 = vmul.f32 %v1428_v47, %v1135_v10 }
  0x3d   :  { %v237_v44 = vadd.f32 %v1166_v20, %v182_v30  ;;  %v184_v33 = vmul.f32 %v1429_v45, %v1135_v10  ;;  %v1430_v48 = vunpack.c.h.bf16 %v1058_v53  ;;  %904 = vst [vmem:[%s1422_s4 + $0x58] sm:$0xff] %v809_v40   ;;  %v1431_v38 = vunpack.c.l.bf16 %v1066_v58 }
  0x3e   :  { %v284_v29 = vmax.f32 %v235_v18, 0.0  ;;  %v285_v46 = vmax.f32 %v236_v31, 0.0  ;;  %v238_v37 = vadd.f32 %v1166_v20, %v183_v32  ;;  %v814_v49 = vpack.c.bf16 %v283_v24, %v282_v0 }
  0x3f   :  { %v185_v23 = vmul.f32 %v1430_v48, %v1135_v10  ;;  %v286_v34 = vmax.f32 %v237_v44, 0.0  ;;  %v239_v50 = vadd.f32 %v1166_v20, %v184_v33  ;;  %v186_v39 = vmul.f32 %v1431_v38, %v1135_v10 }
  0x40   :  { %v819_v57 = vpack.c.bf16 %v285_v46, %v284_v29  ;;  %v287_v60 = vmax.f32 %v238_v37, 0.0  ;;  %v1432_v53 = vunpack.c.h.bf16 %v1066_v58  ;;  %905 = vst [vmem:[%s1422_s4 + $0x60] sm:$0xff] %v814_v49   ;;  %v1433_v4 = vunpack.c.l.bf16 %v1071_v59 }
  0x41   :  { %v240_v51 = vadd.f32 %v1166_v20, %v185_v23  ;;  %v288_v7 = vmax.f32 %v239_v50, 0.0  ;;  %v241_v62 = vadd.f32 %v1166_v20, %v186_v39  ;;  %v1434_v52 = vunpack.c.h.bf16 %v1071_v59 }
  0x42   :  { %v187_v1 = vmul.f32 %v1432_v53, %v1135_v10  ;;  %v188_v35 = vmul.f32 %v1433_v4, %v1135_v10  ;;  %906 = vst [vmem:[%s1422_s4 + $0x68] sm:$0xff] %v819_v57   ;;  %v824_v58 = vpack.c.bf16 %v287_v60, %v286_v34  ;;  %v1435_v12 = vunpack.c.l.bf16 %v1083_v2 }
  0x43   :  { %v189_v36 = vmul.f32 %v1434_v52, %v1135_v10  ;;  %v289_v16 = vmax.f32 %v240_v51, 0.0  ;;  %v290_v26 = vmax.f32 %v241_v62, 0.0  ;;  %v1436_v59 = vunpack.c.h.bf16 %v1083_v2 }
  0x44   :  { %v242_v55 = vadd.f32 %v1166_v20, %v187_v1  ;;  %v190_v13 = vmul.f32 %v1435_v12, %v1135_v10  ;;  %v243_v41 = vadd.f32 %v1166_v20, %v188_v35  ;;  %907 = vst [vmem:[%s1422_s4 + $0x70] sm:$0xff] %v824_v58   ;;  %v1437_v11 = vunpack.c.l.bf16 %v1088_v3 }
  0x45   :  { %v244_v56 = vadd.f32 %v1166_v20, %v189_v36  ;;  %v191_v17 = vmul.f32 %v1436_v59, %v1135_v10  ;;  %v829_v22 = vpack.c.bf16 %v289_v16, %v288_v7  ;;  %v1438_v2 = vunpack.c.h.bf16 %v1088_v3 }
  0x46   :  { %v291_v14 = vmax.f32 %v242_v55, 0.0  ;;  %v245_v25 = vadd.f32 %v1166_v20, %v190_v13  ;;  %v192_v27 = vmul.f32 %v1437_v11, %v1135_v10  ;;  %v292_v42 = vmax.f32 %v243_v41, 0.0 }
  0x47   :  { %v293_v15 = vmax.f32 %v244_v56, 0.0  ;;  %v246_v28 = vadd.f32 %v1166_v20, %v191_v17  ;;  %v193_v21 = vmul.f32 %v1438_v2, %v1135_v10  ;;  %908 = vst [vmem:[%s1422_s4 + $0x78] sm:$0xff] %v829_v22   ;;  %v1439_v31 = vunpack.c.l.bf16 %v1096_v8 }
  0x48   :  { %v834_v30 = vpack.c.bf16 %v291_v14, %v290_v26  ;;  %v294_v0 = vmax.f32 %v245_v25, 0.0  ;;  %v247_v18 = vadd.f32 %v1166_v20, %v192_v27  ;;  %v1440_v3 = vunpack.c.h.bf16 %v1096_v8 }
  0x49   :  { %v194_v47 = vmul.f32 %v1439_v31, %v1135_v10  ;;  %v839_v32 = vpack.c.bf16 %v293_v15, %v292_v42  ;;  %v295_v40 = vmax.f32 %v246_v28, 0.0  ;;  %v248_v24 = vadd.f32 %v1166_v20, %v193_v21 }
  0x4a   :  { %v195_v44 = vmul.f32 %v1440_v3, %v1135_v10  ;;  %909 = vst [vmem:[%s1422_s4 + $0x80] sm:$0xff] %v834_v30   ;;  %v296_v45 = vmax.f32 %v247_v18, 0.0  ;;  %v196_v29 = vmul.f32 %v741_v6, %v1135_v10  ;;  %v197_v46 = vmul.f32 %v742_v63, %v1135_v10 }
  0x4b   :  { %v249_v33 = vadd.f32 %v1166_v20, %v194_v47  ;;  %910 = vst [vmem:[%s1422_s4 + $0x88] sm:$0xff] %v839_v32   ;;  %v844_v8 = vpack.c.bf16 %v295_v40, %v294_v0  ;;  %v297_v37 = vmax.f32 %v248_v24, 0.0  ;;  %v1441_v23 = vunpack.c.l.bf16 %v1110_v54 }
  0x4c   :  { %v250_v48 = vadd.f32 %v1166_v20, %v195_v44  ;;  %v251_v50 = vadd.f32 %v1166_v20, %v196_v29  ;;  %v252_v6 = vadd.f32 %v1166_v20, %v197_v46  ;;  %v199_v63 = vmul.f32 %v746_v61, %v1135_v10 }
  0x4d   :  { %v198_v49 = vmul.f32 %v1441_v23, %v1135_v10  ;;  %v298_v34 = vmax.f32 %v249_v33, 0.0  ;;  %911 = vst [vmem:[%s1422_s4 + $0x90] sm:$0xff] %v844_v8   ;;  %v849_v9 = vpack.c.bf16 %v297_v37, %v296_v45  ;;  %v1442_v57 = vunpack.c.l.bf16 %v1118_v19 }
  0x4e   :  { %v299_v38 = vmax.f32 %v250_v48, 0.0  ;;  %v300_v51 = vmax.f32 %v251_v50, 0.0  ;;  %v301_v53 = vmax.f32 %v252_v6, 0.0  ;;  %v254_v1 = vadd.f32 %v1166_v20, %v199_v63 }
  0x4f   :  { %v253_v39 = vadd.f32 %v1166_v20, %v198_v49  ;;  %v200_v60 = vmul.f32 %v1442_v57, %v1135_v10  ;;  %v201_v61 = vmul.f32 %v750_v5, %v1135_v10  ;;  %912 = vst [vmem:[%s1422_s4 + $0x98] sm:$0xff] %v849_v9   ;;  %v1443_v4 = vunpack.c.l.bf16 %v1123_v43 }
  0x50   :  { %v854_v54 = vpack.c.bf16 %v299_v38, %v298_v34  ;;  %v859_v52 = vpack.c.bf16 %v301_v53, %v300_v51  ;;  %v303_v36 = vmax.f32 %v254_v1, 0.0 }
  0x51   :  { %v302_v7 = vmax.f32 %v253_v39, 0.0  ;;  %v255_v62 = vadd.f32 %v1166_v20, %v200_v60  ;;  %v202_v35 = vmul.f32 %v1135_v10, %v1443_v4  ;;  %v256_v58 = vadd.f32 %v1166_v20, %v201_v61 }
  0x52   :  { %913 = vst [vmem:[%s1422_s4 + $0xa0] sm:$0xff] %v854_v54   ;;  %914 = vst [vmem:[%s1422_s4 + $0xa8] sm:$0xff] %v859_v52  }
  0x53   :  { %v304_v5 = vmax.f32 %v255_v62, 0.0  ;;  %v257_v19 = vadd.f32 %v1166_v20, %v202_v35  ;;  %v864_v16 = vpack.c.bf16 %v303_v36, %v302_v7  ;;  %v305_v55 = vmax.f32 %v256_v58, 0.0 }
  0x55   :  { %v306_v43 = vmax.f32 %v257_v19, 0.0  ;;  %915 = vst [vmem:[%s1422_s4 + $0xb0] sm:$0xff] %v864_v16   ;;  %v869_v10 = vpack.c.bf16 %v305_v55, %v304_v5 }
  0x57   :  { %v654_v12 = vpack.c.bf16 %v306_v43, %v306_v43  ;;  %916 = vst [vmem:[%s1422_s4 + $0xb8] sm:$0xff] %v869_v10  }
  0x59   :  { %552 = vst [vmem:[%s1422_s4 + $0xc0] sm:$0xf] %v654_v12 }

// kernel: _lambda_.29
= control target key start
LH: loop header
LB: loop body
LE: loop exit
PB: predicated region body
PF: predicated region fallthrough
CT: control target
= control target key end

     0   :  { %s533_s0 = inlined_call_operand.vmem [shape: bf16[72,128], index: 0, kind: input, shape index: {}]   ;;  %s534_s1 = inlined_call_operand.vmem [shape: bf16[72,128], index: 1, kind: input, shape index: {}]   ;;  %s535_s2 = inlined_call_operand.vmem [shape: bf16[72,128], index: 2, kind: input, shape index: {}]   ;;  %s536_s3 = inlined_call_operand.vmem [shape: bf16[72,128], index: 3, kind: input, shape index: {}]   ;;  %s537_s4 = inlined_call_operand.vmem [shape: bf16[72,128], index: 4, kind: input, shape index: {}]   ;;  %s538_s5 = inlined_call_operand.vmem [shape: bf16[72,128], index: 5, kind: input, shape index: {}]   ;;  %s539_s6 = inlined_call_operand.vmem [shape: bf16[72,128], index: 6, kind: input, shape index: {}]   ;;  %s540_s7 = inlined_call_operand.vmem [shape: bf16[72,128], index: 7, kind: input, shape index: {}]   ;;  %s541_s8 = inlined_call_operand.vmem [shape: bf16[72,128], index: 8, kind: input, shape index: {}]   ;;  %s542_s9 = inlined_call_operand.vmem [shape: bf16[72,128], index: 9, kind: output, shape index: {}]  }
   0x1   :  { %v32_v0 = vld [vmem:[%s533_s0] sm:$0xf]  ;;  %v33_v1 = vld [vmem:[%s533_s0 + $0x4] sm:$0xf]  ;;  %v34_v18 = vld [vmem:[%s533_s0 + $0x8] sm:$0xf] }
   0x2   :  { %v41_v2 = vld [vmem:[%s534_s1] sm:$0xf]  ;;  %v42_v3 = vld [vmem:[%s534_s1 + $0x4] sm:$0xf]  ;;  %v35_v19 = vld [vmem:[%s533_s0 + $0xc] sm:$0xf] }
   0x3   :  { %v50_v4 = vmax.bf16 %v41_v2, %v32_v0  ;;  %v59_v5 = vld [vmem:[%s535_s2] sm:$0xf]  ;;  %v60_v6 = vld [vmem:[%s535_s2 + $0x4] sm:$0xf]  ;;  %v51_v7 = vmax.bf16 %v42_v3, %v33_v1  ;;  %v43_v20 = vld [vmem:[%s534_s1 + $0x8] sm:$0xf] }
   0x4   :  { %v77_v8 = vld [vmem:[%s536_s3] sm:$0xf]  ;;  %v78_v10 = vld [vmem:[%s536_s3 + $0x4] sm:$0xf]  ;;  %v44_v22 = vld [vmem:[%s534_s1 + $0xc] sm:$0xf]  ;;  %v52_v23 = vmax.bf16 %v43_v20, %v34_v18 }
   0x5   :  { %v68_v9 = vmax.bf16 %v59_v5, %v50_v4  ;;  %v69_v11 = vmax.bf16 %v60_v6, %v51_v7  ;;  %v95_v12 = vld [vmem:[%s537_s4] sm:$0xf]  ;;  %v96_v14 = vld [vmem:[%s537_s4 + $0x4] sm:$0xf]  ;;  %v61_v24 = vld [vmem:[%s535_s2 + $0x8] sm:$0xf]  ;;  %v53_v28 = vmax.bf16 %v44_v22, %v35_v19 }
   0x6   :  { %v113_v15 = vld [vmem:[%s538_s5] sm:$0xf]  ;;  %v114_v16 = vld [vmem:[%s538_s5 + $0x4] sm:$0xf]  ;;  %v62_v25 = vld [vmem:[%s535_s2 + $0xc] sm:$0xf]  ;;  %v70_v33 = vmax.bf16 %v61_v24, %v52_v23 }
   0x7   :  { %v86_v13 = vmax.bf16 %v77_v8, %v68_v9  ;;  %v87_v17 = vmax.bf16 %v78_v10, %v69_v11  ;;  %v131_v27 = vld [vmem:[%s539_s6] sm:$0xf]  ;;  %v79_v29 = vld [vmem:[%s536_s3 + $0x8] sm:$0xf]  ;;  %v132_v31 = vld [vmem:[%s539_s6 + $0x4] sm:$0xf]  ;;  %v71_v38 = vmax.bf16 %v62_v25, %v53_v28 }
   0x8   :  { %v149_v32 = vld [vmem:[%s540_s7] sm:$0xf]  ;;  %v80_v34 = vld [vmem:[%s536_s3 + $0xc] sm:$0xf]  ;;  %v150_v36 = vld [vmem:[%s540_s7 + $0x4] sm:$0xf]  ;;  %v88_v42 = vmax.bf16 %v79_v29, %v70_v33 }
   0x9   :  { %v104_v21 = vmax.bf16 %v95_v12, %v86_v13  ;;  %v105_v26 = vmax.bf16 %v96_v14, %v87_v17  ;;  %v167_v37 = vld [vmem:[%s541_s8] sm:$0xf]  ;;  %v97_v39 = vld [vmem:[%s537_s4 + $0x8] sm:$0xf]  ;;  %v168_v41 = vld [vmem:[%s541_s8 + $0x4] sm:$0xf]  ;;  %v89_v47 = vmax.bf16 %v80_v34, %v71_v38 }
   0xa   :  { %v98_v43 = vld [vmem:[%s537_s4 + $0xc] sm:$0xf]  ;;  %v115_v44 = vld [vmem:[%s538_s5 + $0x8] sm:$0xf]  ;;  %v36_v48 = vld [vmem:[%s533_s0 + $0x10] sm:$0xf]  ;;  %v106_v52 = vmax.bf16 %v97_v39, %v88_v42 }
   0xb   :  { %v122_v30 = vmax.bf16 %v113_v15, %v104_v21  ;;  %v123_v35 = vmax.bf16 %v114_v16, %v105_v26  ;;  %v116_v45 = vld [vmem:[%s538_s5 + $0xc] sm:$0xf]  ;;  %v37_v49 = vld [vmem:[%s533_s0 + $0x14] sm:$0xf]  ;;  %v45_v50 = vld [vmem:[%s534_s1 + $0x10] sm:$0xf]  ;;  %v107_v58 = vmax.bf16 %v98_v43, %v89_v47 }
   0xc   :  { %v46_v53 = vld [vmem:[%s534_s1 + $0x14] sm:$0xf]  ;;  %v54_v54 = vmax.bf16 %v45_v50, %v36_v48  ;;  %v63_v55 = vld [vmem:[%s535_s2 + $0x10] sm:$0xf]  ;;  %v133_v59 = vld [vmem:[%s539_s6 + $0x8] sm:$0xf]  ;;  %v124_v63 = vmax.bf16 %v115_v44, %v106_v52 }
   0xd   :  { %v140_v40 = vmax.bf16 %v131_v27, %v122_v30  ;;  %v141_v46 = vmax.bf16 %v132_v31, %v123_v35  ;;  %v64_v56 = vld [vmem:[%s535_s2 + $0x14] sm:$0xf]  ;;  %v55_v60 = vmax.bf16 %v46_v53, %v37_v49  ;;  %v81_v61 = vld [vmem:[%s536_s3 + $0x10] sm:$0xf]  ;;  %v134_v0 = vld [vmem:[%s539_s6 + $0xc] sm:$0xf]  ;;  %v125_v5 = vmax.bf16 %v116_v45, %v107_v58 }
   0xe   :  { %v151_v1 = vld [vmem:[%s540_s7 + $0x8] sm:$0xf]  ;;  %v72_v2 = vmax.bf16 %v63_v55, %v54_v54  ;;  %v82_v3 = vld [vmem:[%s536_s3 + $0x14] sm:$0xf]  ;;  %v152_v6 = vld [vmem:[%s540_s7 + $0xc] sm:$0xf]  ;;  %v142_v10 = vmax.bf16 %v133_v59, %v124_v63 }
   0xf   :  { %v158_v51 = vmax.bf16 %v149_v32, %v140_v40  ;;  %v159_v57 = vmax.bf16 %v150_v36, %v141_v46  ;;  %v169_v7 = vld [vmem:[%s541_s8 + $0x8] sm:$0xf]  ;;  %v73_v8 = vmax.bf16 %v64_v56, %v55_v60  ;;  %v99_v9 = vld [vmem:[%s537_s4 + $0x10] sm:$0xf]  ;;  %v170_v11 = vld [vmem:[%s541_s8 + $0xc] sm:$0xf]  ;;  %v143_v17 = vmax.bf16 %v134_v0, %v125_v5 }
  0x10   :  { %v90_v12 = vmax.bf16 %v81_v61, %v72_v2  ;;  %v100_v13 = vld [vmem:[%s537_s4 + $0x14] sm:$0xf]  ;;  %v117_v14 = vld [vmem:[%s538_s5 + $0x10] sm:$0xf]  ;;  %v38_v19 = vld [vmem:[%s533_s0 + $0x18] sm:$0xf]  ;;  %v160_v22 = vmax.bf16 %v151_v1, %v142_v10 }
  0x11   :  { %v176_v62 = vmax.bf16 %v167_v37, %v158_v51  ;;  %v177_v4 = vmax.bf16 %v168_v41, %v159_v57  ;;  %v118_v15 = vld [vmem:[%s538_s5 + $0x14] sm:$0xf]  ;;  %v91_v18 = vmax.bf16 %v82_v3, %v73_v8  ;;  %v39_v20 = vld [vmem:[%s533_s0 + $0x1c] sm:$0xf]  ;;  %v47_v21 = vld [vmem:[%s534_s1 + $0x18] sm:$0xf]  ;;  %v161_v28 = vmax.bf16 %v152_v6, %v143_v17 }
  0x12   :  { %v108_v23 = vmax.bf16 %v99_v9, %v90_v12  ;;  %v48_v24 = vld [vmem:[%s534_s1 + $0x1c] sm:$0xf]  ;;  %v56_v25 = vmax.bf16 %v47_v21, %v38_v19  ;;  %v65_v26 = vld [vmem:[%s535_s2 + $0x18] sm:$0xf]  ;;  %v135_v30 = vld [vmem:[%s539_s6 + $0x10] sm:$0xf]  ;;  %v178_v33 = vmax.bf16 %v169_v7, %v160_v22 }
  0x13   :  { %v218_v16 = vcombine.low %v176_v62, %v177_v4  ;;  %v66_v27 = vld [vmem:[%s535_s2 + $0x1c] sm:$0xf]  ;;  %v109_v29 = vmax.bf16 %v100_v13, %v91_v18  ;;  %v57_v31 = vmax.bf16 %v48_v24, %v39_v20  ;;  %v83_v32 = vld [vmem:[%s536_s3 + $0x18] sm:$0xf]  ;;  %v136_v35 = vld [vmem:[%s539_s6 + $0x14] sm:$0xf]  ;;  %v179_v38 = vmax.bf16 %v170_v11, %v161_v28 }
  0x14   :  { %v126_v34 = vmax.bf16 %v117_v14, %v108_v23  ;;  %v74_v36 = vmax.bf16 %v65_v26, %v56_v25  ;;  %v84_v37 = vld [vmem:[%s536_s3 + $0x1c] sm:$0xf]  ;;  %v153_v40 = vld [vmem:[%s540_s7 + $0x10] sm:$0xf]  ;;  %v154_v41 = vld [vmem:[%s540_s7 + $0x14] sm:$0xf] }
  0x15   :  { %202 = vst [vmem:[%s542_s9] sm:$0xff] %v218_v16   ;;  %v127_v39 = vmax.bf16 %v118_v15, %v109_v29  ;;  %v75_v42 = vmax.bf16 %v66_v27, %v57_v31  ;;  %v101_v43 = vld [vmem:[%s537_s4 + $0x18] sm:$0xf]  ;;  %v171_v45 = vld [vmem:[%s541_s8 + $0x10] sm:$0xf]  ;;  %v102_v47 = vld [vmem:[%s537_s4 + $0x1c] sm:$0xf]  ;;  %v219_v49 = vcombine.low %v178_v33, %v179_v38 }
  0x16   :  { %v144_v44 = vmax.bf16 %v135_v30, %v126_v34  ;;  %v92_v46 = vmax.bf16 %v83_v32, %v74_v36  ;;  %v119_v48 = vld [vmem:[%s538_s5 + $0x18] sm:$0xf]  ;;  %v40_v52 = vld [vmem:[%s533_s0 + $0x20] sm:$0xf]  ;;  %v172_v56 = vld [vmem:[%s541_s8 + $0x14] sm:$0xf] }
  0x17   :  { %v145_v50 = vmax.bf16 %v136_v35, %v127_v39  ;;  %v93_v51 = vmax.bf16 %v84_v37, %v75_v42  ;;  %v49_v53 = vld [vmem:[%s534_s1 + $0x20] sm:$0xf]  ;;  %v120_v58 = vld [vmem:[%s538_s5 + $0x1c] sm:$0xf]  ;;  %220 = vst [vmem:[%s542_s9 + $0x8] sm:$0xff] %v219_v49  }
  0x18   :  { %v67_v54 = vld [vmem:[%s535_s2 + $0x20] sm:$0xf]  ;;  %v162_v55 = vmax.bf16 %v153_v40, %v144_v44  ;;  %v110_v57 = vmax.bf16 %v101_v43, %v92_v46  ;;  %v58_v59 = vmax.bf16 %v49_v53, %v40_v52  ;;  %v137_v62 = vld [vmem:[%s539_s6 + $0x18] sm:$0xf]  ;;  %v138_v2 = vld [vmem:[%s539_s6 + $0x1c] sm:$0xf] }
  0x19   :  { %v163_v60 = vmax.bf16 %v154_v41, %v145_v50  ;;  %v111_v61 = vmax.bf16 %v102_v47, %v93_v51  ;;  %v85_v63 = vld [vmem:[%s536_s3 + $0x20] sm:$0xf]  ;;  %v155_v6 = vld [vmem:[%s540_s7 + $0x18] sm:$0xf]  ;;  %v156_v9 = vld [vmem:[%s540_s7 + $0x1c] sm:$0xf] }
  0x1a   :  { %v180_v0 = vmax.bf16 %v171_v45, %v162_v55  ;;  %v128_v1 = vmax.bf16 %v119_v48, %v110_v57  ;;  %v76_v3 = vmax.bf16 %v67_v54, %v58_v59  ;;  %v103_v7 = vld [vmem:[%s537_s4 + $0x20] sm:$0xf]  ;;  %v173_v13 = vld [vmem:[%s541_s8 + $0x18] sm:$0xf]  ;;  %v174_v16 = vld [vmem:[%s541_s8 + $0x1c] sm:$0xf] }
  0x1b   :  { %v181_v4 = vmax.bf16 %v172_v56, %v163_v60  ;;  %v129_v5 = vmax.bf16 %v120_v58, %v111_v61  ;;  %v121_v14 = vld [vmem:[%s538_s5 + $0x20] sm:$0xf] }
  0x1c   :  { %v146_v8 = vmax.bf16 %v137_v62, %v128_v1  ;;  %v94_v10 = vmax.bf16 %v85_v63, %v76_v3  ;;  %v139_v19 = vld [vmem:[%s539_s6 + $0x20] sm:$0xf] }
  0x1d   :  { %v221_v11 = vcombine.low %v180_v0, %v181_v4  ;;  %v147_v12 = vmax.bf16 %v138_v2, %v129_v5  ;;  %v157_v23 = vld [vmem:[%s540_s7 + $0x20] sm:$0xf] }
  0x1e   :  { %v164_v15 = vmax.bf16 %v155_v6, %v146_v8  ;;  %v112_v17 = vmax.bf16 %v103_v7, %v94_v10  ;;  %v175_v26 = vld [vmem:[%s541_s8 + $0x20] sm:$0xf] }
  0x1f   :  { %222 = vst [vmem:[%s542_s9 + $0x10] sm:$0xff] %v221_v11   ;;  %v165_v18 = vmax.bf16 %v156_v9, %v147_v12 }
  0x20   :  { %v182_v20 = vmax.bf16 %v173_v13, %v164_v15  ;;  %v130_v21 = vmax.bf16 %v121_v14, %v112_v17 }
  0x21   :  { %v183_v22 = vmax.bf16 %v174_v16, %v165_v18 }
  0x22   :  { %v148_v24 = vmax.bf16 %v139_v19, %v130_v21 }
  0x23   :  { %v223_v25 = vcombine.low %v182_v20, %v183_v22 }
  0x24   :  { %v166_v27 = vmax.bf16 %v157_v23, %v148_v24 }
  0x25   :  { %224 = vst [vmem:[%s542_s9 + $0x18] sm:$0xff] %v223_v25  }
  0x26   :  { %v184_v28 = vmax.bf16 %v175_v26, %v166_v27 }
  0x28   :  { %193 = vst [vmem:[%s542_s9 + $0x20] sm:$0xf] %v184_v28 }

// kernel: _lambda_.30
= control target key start
LH: loop header
LB: loop body
LE: loop exit
PB: predicated region body
PF: predicated region fallthrough
CT: control target
= control target key end

     0   :  { %s1036_s12 = smov 0   ;;  %s1038_s13 = smov 0   ;;  %s1144_s0 = inlined_call_operand.vmem [shape: bf16[72,640], index: 0, kind: input, shape index: {}]   ;;  %s1145_s1 = inlined_call_operand.vmem [shape: bf16[640,128], index: 1, kind: input, shape index: {}]   ;;  %s1146_s2 = inlined_call_operand.vmem [shape: bf16[72,128], index: 2, kind: output, shape index: {0}]   ;;  %s1147_s3 = inlined_call_operand.vmem [shape: f32[1,2,128], index: 3, kind: output, shape index: {1}]  }
   0x1   :  { %s1040_s14 = smov 0   ;;  %s1042_s15 = smov 0  }
   0x2   :  { %s1044_s16 = smov 0  }
   0x3 LB: > { %s26_s17 = sadd.s32 1, %s1008_s15  ;;  %p49_p1 = scmp.ne.s32.totalorder %s1000_s13, %s996_s12  ;;  %s1012_s16 = sphi %s1044_s16, %s14_s16   ;;  %s1008_s15 = sphi %s1042_s15, %s1151_s15   ;;  %s1004_s14 = sphi %s1040_s14, %s1150_s14   ;;  %s1000_s13 = sphi %s1038_s13, %s1149_s13   ;;  %s996_s12 = sphi %s1036_s12, %s1148_s12  }
   0x4   : > { %p27_p0 = scmp.ge.s32.totalorder %s26_s17, 5  ;;  %p50_p2 = scmp.eq.s32.totalorder %s1012_s16, 0 }
   0x5   : > { %s42_s19 = sadd.s32 1, %s1000_s13  ;;  %p785_p5 = scmp.ge.s32.totalorder %s1012_s16, 5 }
   0x6   : > { %s1153_s17 = smov (%p27_p0, %s26_s17), 0  ;;  %p51_p3 = por %p50_p2, %p49_p1 }
   0x7   : > { %s38_s18 = ssub.s32 %s1008_s15, %s1153_s17  ;;  %159 = sbr.rel (%p785_p5) target bundleno = 24 (0x18), region = 16 }
   0x8   : > { %p40_p4 = scmp.eq.s32.totalorder %s38_s18, 0 }
   0xa   : > { %s1071_s20 = scalar_select %p40_p4, %s1000_s13, %s42_s19  }
   0xe   : > { %162 = sbr.rel (!%p51_p3) target bundleno = 24 (0x18), region = 20  ;;  %s164_s21 = sand.u32 (%p51_p3), 1, %s1000_s13  }
   0xf   : > { %s786_s22 = sshll.u32 (%p51_p3), %s1008_s15, 2  ;;  %s917_s23 = smul.u32 (%p51_p3), 36, %s164_s21 }
  0x10   : > { %s171_s26 = scalar_lea.vmem (%p51_p3), %s1144_s0, %s786_s22 }
  0x11   : > { %v187_v0 = vld [vmem:[%s171_s26] sm:$0xf] (%p51_p3)  ;;  %v189_v1 = vld [vmem:[%s171_s26 + $0x14] sm:$0xf] (%p51_p3)  ;;  %v191_v2 = vld [vmem:[%s171_s26 + $0x28] sm:$0xf] (%p51_p3) }
  0x12   : > { %v193_v3 = vld [vmem:[%s171_s26 + $0x3c] sm:$0xf] (%p51_p3)  ;;  %v195_v4 = vld [vmem:[%s171_s26 + $0x50] sm:$0xf] (%p51_p3)  ;;  %s166_s27 = scalar_lea.vmem (%p51_p3), [#allocation3], %s917_s23 }
  0x13   : > { %188 = vst [vmem:[%s166_s27] sm:$0xf] (%p51_p3), %v187_v0  ;;  %190 = vst [vmem:[%s166_s27 + $0x4] sm:$0xf] (%p51_p3), %v189_v1  ;;  %v197_v5 = vld [vmem:[%s171_s26 + $0x64] sm:$0xf] (%p51_p3) }
  0x14   : > { %192 = vst [vmem:[%s166_s27 + $0x8] sm:$0xf] (%p51_p3), %v191_v2  ;;  %194 = vst [vmem:[%s166_s27 + $0xc] sm:$0xf] (%p51_p3), %v193_v3  ;;  %v199_v6 = vld [vmem:[%s171_s26 + $0x78] sm:$0xf] (%p51_p3) }
  0x15   : > { %196 = vst [vmem:[%s166_s27 + $0x10] sm:$0xf] %v195_v4  ;;  %v201_v7 = vld [vmem:[%s171_s26 + $0x8c] sm:$0xf]  ;;  %198 = vst [vmem:[%s166_s27 + $0x14] sm:$0xf] %v197_v5 }
  0x16   : > { %200 = vst [vmem:[%s166_s27 + $0x18] sm:$0xf] %v199_v6  ;;  %202 = vst [vmem:[%s166_s27 + $0x1c] sm:$0xf] %v201_v7  ;;  %v203_v8 = vld [vmem:[%s171_s26 + $0xa0] sm:$0xf] }
  0x17   : > { %204 = vst [vmem:[%s166_s27 + $0x20] sm:$0xf] %v203_v8 }
  0x18 PF: > { %p787_p6 = scmp.ge.s32.totalorder %s1012_s16, 1  ;;  %p256_p7 = scmp.lt.s32.totalorder %s1012_s16, 6 }
  0x1a   : > { %p257_p8 = pnand %p787_p6, %p256_p7 }
  0x1b   : > { %s788_s28 = sshll.u32 (!%p257_p8), %s1004_s14, 4  ;;  %s263_s29 = sand.u32 (!%p257_p8), 1, %s996_s12   ;;  %v1014_v9 = vmov (!%p257_p8), 0.0   ;;  %vm1015_vm0 = vmmov (!%p257_p8), 0  }
  0x1c   : > { %260 = sbr.rel (%p257_p8) target bundleno = 346 (0x15a), region = 65  ;;  %865 = vmatprep.subr.bf16.mxu0 (!%p257_p8), %v1014_v9  ;;  %p306_p9 = scmp.lt.s32.totalorder (!%p257_p8), %s788_s28, 79  ;;  %901 = vmatprep.subr.bf16.mxu1 (!%p257_p8), %v1014_v9 }
  0x1d   : > { %s918_s30 = smul.u32 (!%p257_p8), 36, %s263_s29  ;;  %881 = vmatprep.mubr.msk.bf16.mxu0 (!%p257_p8), %vm1015_vm0, %v1014_v9  ;;  %893 = vmatprep.mubr.msk.bf16.mxu1 (!%p257_p8), %vm1015_vm0, %v1014_v9  ;;  %p803_p10 = scmp.ne.s32.totalorder (!%p257_p8), %s1004_s14, 0 }
  0x1f   : > { %s1085_s5 = scalar_lea.vmem (!%p257_p8), [#allocation3], %s918_s30 }
  0x20   : > { %v969_v18 = vld [vmem:[%s1085_s5] sm:$0xff] (!%p257_p8)   ;;  %v970_v19 = vld [vmem:[%s1085_s5 + $0x18] sm:$0xff] (!%p257_p8)   ;;  %v971_v20 = vld [vmem:[%s1085_s5 + $0x8] sm:$0xff] (!%p257_p8)  }
  0x21   : > { %v972_v21 = vld [vmem:[%s1085_s5 + $0x20] ss:$0 sps:$4 sm:$0xff] (!%p257_p8)   ;;  %v973_v22 = vld [vmem:[%s1085_s5 + $0x10] sm:$0xff] (!%p257_p8)  }
  0x23   : > { %s1155_s28 = smov (!%p306_p9, %s788_s28), 79 }
  0x24   : > { %s789_s4 = sshll.u32 %s1155_s28, 2 }
  0x25   : > { %s1090_s8 = scalar_lea.vmem %s1145_s1, %s789_s4 }
  0x26   : > { %v961_v10 = vld [vmem:[%s1090_s8] sm:$0xff]   ;;  %v962_v11 = vld [vmem:[%s1090_s8 + $0x8] sm:$0xff]   ;;  %v963_v12 = vld [vmem:[%s1090_s8 + $0x10] sm:$0xff]  }
  0x27   : > { %866 = vmatpush3.bf16.msra.mxu0 %v961_v10  ;;  %909 = vmatpush3.bf16.msra.mxu1 %v961_v10  ;;  %v964_v13 = vld [vmem:[%s1090_s8 + $0x18] sm:$0xff]   ;;  %v965_v14 = vld [vmem:[%s1090_s8 + $0x20] sm:$0xff]   ;;  %v966_v15 = vld [vmem:[%s1090_s8 + $0x28] sm:$0xff]  }
  0x28   : > { %867 = vmatprep.subr.bf16.mxu0 %v1014_v9  ;;  %902 = vmatprep.subr.bf16.mxu1 %v1014_v9  ;;  %v967_v16 = vld [vmem:[%s1090_s8 + $0x30] sm:$0xff]   ;;  %v968_v17 = vld [vmem:[%s1090_s8 + $0x38] sm:$0xff]  }
  0x2b   : > { %868 = vmatpush3.bf16.msra.mxu0 %v962_v11  ;;  %910 = vmatpush3.bf16.msra.mxu1 %v962_v11 }
  0x2c   : > { %869 = vmatprep.subr.bf16.mxu0 %v1014_v9  ;;  %903 = vmatprep.subr.bf16.mxu1 %v1014_v9 }
  0x2f   : > { %870 = vmatpush3.bf16.msra.mxu0 %v963_v12  ;;  %911 = vmatpush3.bf16.msra.mxu1 %v963_v12 }
  0x30   : > { %871 = vmatprep.subr.bf16.mxu0 %v1014_v9  ;;  %904 = vmatprep.subr.bf16.mxu1 %v1014_v9 }
  0x33   : > { %872 = vmatpush3.bf16.msra.mxu0 %v964_v13  ;;  %912 = vmatpush3.bf16.msra.mxu1 %v964_v13 }
  0x34   : > { %873 = vmatprep.subr.bf16.mxu0 %v1014_v9  ;;  %905 = vmatprep.subr.bf16.mxu1 %v1014_v9 }
  0x37   : > { %874 = vmatpush3.bf16.msra.mxu0 %v965_v14  ;;  %913 = vmatpush3.bf16.msra.mxu1 %v965_v14 }
  0x38   : > { %875 = vmatprep.subr.bf16.mxu0 %v1014_v9  ;;  %906 = vmatprep.subr.bf16.mxu1 %v1014_v9 }
  0x3b   : > { %876 = vmatpush3.bf16.msra.mxu0 %v966_v15  ;;  %914 = vmatpush3.bf16.msra.mxu1 %v966_v15 }
  0x3c   : > { %877 = vmatprep.subr.bf16.mxu0 %v1014_v9  ;;  %907 = vmatprep.subr.bf16.mxu1 %v1014_v9 }
  0x3f   : > { %878 = vmatpush3.bf16.msra.mxu0 %v967_v16  ;;  %915 = vmatpush3.bf16.msra.mxu1 %v967_v16 }
  0x40   : > { %879 = vmatprep.subr.bf16.mxu0 %v1014_v9  ;;  %908 = vmatprep.subr.bf16.mxu1 %v1014_v9 }
  0x43   : > { %880 = vmatpush3.bf16.msra.mxu0 %v968_v17  ;;  %916 = vmatpush3.bf16.msra.mxu1 %v968_v17 }
  0x46   : > { %882 = vmatmul.mubr.bf16.vlgmr.msra.gmra.mrb[0].mxu0 %v969_v18  ;;  %894 = vmatmul.mubr.bf16.vlgmr.msra.gmra.mrb[0].mxu1 %v970_v19 }
  0x47   : > { %885 = vmatprep.mubr.msk.bf16.mxu0 %vm1015_vm0, %v1014_v9  ;;  %897 = vmatprep.mubr.msk.bf16.mxu1 %vm1015_vm0, %v1014_v9 }
  0x4e   : > { %886 = vmatmul.mubr.bf16.gmra.mrb[4].mxu0 %v971_v20  ;;  %898 = vmatmul.mubr.bf16.gmra.mrb[4].mxu1 %v972_v21 }
  0x4f   : > { %889 = vmatprep.mubr.msk.bf16.mxu0 %vm1015_vm0, %v1014_v9 }
  0x56   : > { %890 = vmatmul.mubr.bf16.gmra.mrb[8].mxu0 %v973_v22 }
 0x119   : > { %v466_v23 = vpop.f32.mrb[0].mxu0  ;;  %v490_v24 = vpop.f32.mrb[0].mxu1 }
 0x11a   : > { %v883_v25 = vpop.f32.mrb[1].mxu0  ;;  %v895_v26 = vpop.f32.mrb[1].mxu1  ;;  %508 = vst [vmem:[#allocation2] sm:$0xff] (!%p803_p10), %v466_v23  ;;  %514 = vst [vmem:[#allocation2 + $0x30] sm:$0xff] (!%p803_p10), %v490_v24 }
 0x11b   : > { %v469_v27 = vpop.f32.mrb[2].mxu0  ;;  %v493_v28 = vpop.f32.mrb[2].mxu1 }
 0x11c   : > { %v884_v29 = vpop.f32.mrb[3].mxu0  ;;  %v896_v30 = vpop.f32.mrb[3].mxu1  ;;  %509 = vst [vmem:[#allocation2 + $0x8] sm:$0xff] (!%p803_p10), %v469_v27  ;;  %515 = vst [vmem:[#allocation2 + $0x38] sm:$0xff] (!%p803_p10), %v493_v28 }
 0x121   : > { %v474_v31 = vpop.f32.mrb[4].mxu0  ;;  %v498_v32 = vpop.f32.mrb[4].mxu1 }
 0x122   : > { %v887_v33 = vpop.f32.mrb[5].mxu0  ;;  %v899_v34 = vpop.f32.mrb[5].mxu1  ;;  %510 = vst [vmem:[#allocation2 + $0x10] sm:$0xff] (!%p803_p10), %v474_v31  ;;  %516 = vst [vmem:[#allocation2 + $0x40] sm:$0xff] (!%p803_p10), %v498_v32 }
 0x123   : > { %v477_v35 = vpop.f32.mrb[6].mxu0  ;;  %v501_v36 = vpop.f32.mrb[6].mxu1 }
 0x124   : > { %v888_v37 = vpop.f32.mrb[7].mxu0  ;;  %v900_v38 = vpop.f32.mrb[7].mxu1  ;;  %511 = vst [vmem:[#allocation2 + $0x18] sm:$0xff] (!%p803_p10), %v477_v35 }
 0x126   : > { %507 = sbr.rel (%p803_p10) target bundleno = 301 (0x12d), region = 73 }
 0x129   : > { %v482_v39 = vpop.f32.mrb[8].mxu0 }
 0x12a   : > { %v891_v40 = vpop.f32.mrb[9].mxu0  ;;  %512 = vst [vmem:[#allocation2 + $0x20] sm:$0xff] (!%p803_p10), %v482_v39 }
 0x12b   : > { %v485_v41 = vpop.f32.mrb[10].mxu0 }
 0x12c   : > { %v892_v42 = vpop.f32.mrb[11].mxu0  ;;  %513 = vst [vmem:[#allocation2 + $0x28] sm:$0xff] (!%p803_p10), %v485_v41 }
 0x12d PF: > { %p804_p11 = scmp.le.s32.totalorder %s1004_s14, 0 }
 0x12e   : > { %v521_v43 = vld [vmem:[#allocation2] sm:$0xff] (!%p804_p11)  ;;  %v522_v44 = vld [vmem:[#allocation2 + $0x8] sm:$0xff] (!%p804_p11)  ;;  %v523_v45 = vld [vmem:[#allocation2 + $0x10] sm:$0xff] (!%p804_p11) }
 0x12f   : > { %520 = sbr.rel (%p804_p11) target bundleno = 311 (0x137), region = 77  ;;  %v530_v46 = vadd.f32 (!%p804_p11), %v521_v43, %v466_v23  ;;  %v531_v47 = vadd.f32 (!%p804_p11), %v522_v44, %v469_v27  ;;  %v532_v48 = vadd.f32 (!%p804_p11), %v523_v45, %v474_v31  ;;  %v524_v49 = vld [vmem:[#allocation2 + $0x18] sm:$0xff] (!%p804_p11)  ;;  %v527_v55 = vld [vmem:[#allocation2 + $0x30] sm:$0xff] (!%p804_p11)  ;;  %v529_v57 = vld [vmem:[#allocation2 + $0x40] sm:$0xff] (!%p804_p11) }
 0x130   : > { %v533_v52 = vadd.f32 (!%p804_p11), %v524_v49, %v477_v35  ;;  %v528_v56 = vld [vmem:[#allocation2 + $0x38] sm:$0xff] (!%p804_p11)  ;;  %v536_v58 = vadd.f32 (!%p804_p11), %v527_v55, %v490_v24  ;;  %v538_v60 = vadd.f32 (!%p804_p11), %v529_v57, %v498_v32 }
 0x131   : > { %v525_v50 = vld [vmem:[#allocation2 + $0x20] sm:$0xff] (!%p804_p11)  ;;  %539 = vst [vmem:[#allocation2] sm:$0xff] (!%p804_p11), %v530_v46  ;;  %540 = vst [vmem:[#allocation2 + $0x8] sm:$0xff] (!%p804_p11), %v531_v47  ;;  %v537_v59 = vadd.f32 (!%p804_p11), %v528_v56, %v493_v28 }
 0x132   : > { %v534_v53 = vadd.f32 (!%p804_p11), %v525_v50, %v482_v39  ;;  %541 = vst [vmem:[#allocation2 + $0x10] sm:$0xff] (!%p804_p11), %v532_v48  ;;  %542 = vst [vmem:[#allocation2 + $0x18] sm:$0xff] (!%p804_p11), %v533_v52 }
 0x133   : > { %v526_v51 = vld [vmem:[#allocation2 + $0x28] sm:$0xff] (!%p804_p11)  ;;  %545 = vst [vmem:[#allocation2 + $0x30] sm:$0xff] (!%p804_p11), %v536_v58  ;;  %546 = vst [vmem:[#allocation2 + $0x38] sm:$0xff] (!%p804_p11), %v537_v59 }
 0x134   : > { %v535_v54 = vadd.f32 (!%p804_p11), %v526_v51, %v485_v41  ;;  %543 = vst [vmem:[#allocation2 + $0x20] sm:$0xff] (!%p804_p11), %v534_v53  ;;  %547 = vst [vmem:[#allocation2 + $0x40] sm:$0xff] (!%p804_p11), %v538_v60 }
 0x136   : > { %544 = vst [vmem:[#allocation2 + $0x28] sm:$0xff] %v535_v54 }
 0x137 PF: > { %p805_p12 = scmp.ne.s32.totalorder %s1004_s14, 4 }
 0x138   : > { %vm644_vm1 = vcmask (!%p805_p12), 1040384  }
 0x139   : > { %551 = sbr.rel (%p805_p12) target bundleno = 346 (0x15a), region = 81  ;;  %v552_v61 = vld [vmem:[#allocation2] sm:$0xff] (!%p805_p12)  ;;  %v553_v62 = vld [vmem:[#allocation2 + $0x8] sm:$0xff] (!%p805_p12) }
 0x13a   : > { %v554_v63 = vld [vmem:[#allocation2 + $0x10] sm:$0xff] (!%p805_p12)  ;;  %v832_v0 = vpack.c.bf16 (!%p805_p12), %v553_v62, %v552_v61  ;;  %v607_v1 = vadd.f32 (!%p805_p12), %v553_v62, %v552_v61  ;;  %v621_v2 = vmul.f32 (!%p805_p12), %v552_v61, %v552_v61  ;;  %v622_v3 = vmul.f32 (!%p805_p12), %v553_v62, %v553_v62  ;;  %v555_v4 = vld [vmem:[#allocation2 + $0x18] sm:$0xff] (!%p805_p12) }
 0x13b   : > { %v837_v7 = vpack.c.bf16 (!%p805_p12), %v555_v4, %v554_v63  ;;  %v623_v8 = vmul.f32 (!%p805_p12), %v554_v63, %v554_v63  ;;  %v624_v12 = vmul.f32 (!%p805_p12), %v555_v4, %v555_v4  ;;  %v558_v13 = vld [vmem:[#allocation2 + $0x30] sm:$0xff] (!%p805_p12)  ;;  %v559_v14 = vld [vmem:[#allocation2 + $0x38] sm:$0xff] (!%p805_p12) }
 0x13c   : > { %v556_v5 = vld [vmem:[#allocation2 + $0x20] sm:$0xff] (!%p805_p12)  ;;  %833 = vst [vmem:[%s1146_s2] sm:$0xff] (!%p805_p12), %v832_v0   ;;  %v630_v10 = vadd.f32 (!%p805_p12), %v622_v3, %v621_v2  ;;  %v608_v11 = vadd.f32 (!%p805_p12), %v607_v1, %v554_v63  ;;  %v847_v16 = vpack.c.bf16 (!%p805_p12), %v559_v14, %v558_v13  ;;  %v627_v26 = vmul.f32 (!%p805_p12), %v558_v13, %v558_v13 }
 0x13d   : > { %v557_v6 = vld [vmem:[#allocation2 + $0x28] sm:$0xff] (!%p805_p12)  ;;  %v560_v15 = vld [vmem:[#allocation2 + $0x40] sm:$0xff] (!%p805_p12)  ;;  %849 = vst [vmem:[%s1146_s2 + $0x8] sm:$0xff] (!%p805_p12), %v837_v7   ;;  %v625_v20 = vmul.f32 (!%p805_p12), %v556_v5, %v556_v5  ;;  %v628_v29 = vmul.f32 (!%p805_p12), %v559_v14, %v559_v14 }
 0x13e   : > { %v842_v9 = vpack.c.bf16 (!%p805_p12), %v557_v6, %v556_v5  ;;  %v828_v17 = vpack.c.bf16 (!%p805_p12), %v560_v15, %v560_v15  ;;  %v609_v18 = vadd.f32 (!%p805_p12), %v608_v11, %v555_v4  ;;  %v631_v19 = vadd.f32 (!%p805_p12), %v630_v10, %v623_v8  ;;  %851 = vst [vmem:[%s1146_s2 + $0x18] sm:$0xff] (!%p805_p12), %v847_v16  }
 0x13f   : > { %v626_v23 = vmul.f32 (!%p805_p12), %v557_v6, %v557_v6  ;;  %v629_v32 = vmul.f32 (!%p805_p12), %v560_v15, %v560_v15 }
 0x140   : > { %850 = vst [vmem:[%s1146_s2 + $0x10] sm:$0xff] %v842_v9   ;;  %606 = vst [vmem:[%s1146_s2 + $0x20] sm:$0xf] %v828_v17  ;;  %v632_v21 = vadd.f32 %v631_v19, %v624_v12  ;;  %v610_v22 = vadd.f32 %v609_v18, %v556_v5 }
 0x142   : > { %v611_v24 = vadd.f32 %v610_v22, %v557_v6  ;;  %v633_v25 = vadd.f32 %v632_v21, %v625_v20 }
 0x144   : > { %v634_v27 = vadd.f32 %v633_v25, %v626_v23  ;;  %v612_v28 = vadd.f32 %v611_v24, %v558_v13 }
 0x146   : > { %v613_v30 = vadd.f32 %v612_v28, %v559_v14  ;;  %v635_v31 = vadd.f32 %v634_v27, %v627_v26 }
 0x148   : > { %v636_v33 = vadd.f32 %v635_v31, %v628_v29  ;;  %v614_v34 = vadd.f32 %v613_v30, %v560_v15 }
 0x14a   : > { %v615_v35 = vrot.slane %v614_v34, 4  ;;  %v637_v36 = vadd.f32 %v636_v33, %v629_v32 }
 0x14c   : > { %v616_v37 = vadd.f32 %v615_v35, %v614_v34  ;;  %v638_v38 = vrot.slane %v637_v36, 4 }
 0x14e   : > { %v617_v39 = vrot.slane %v616_v37, 2  ;;  %v639_v40 = vadd.f32 %v638_v38, %v637_v36 }
 0x150   : > { %v618_v41 = vadd.f32 %v617_v39, %v616_v37  ;;  %v640_v42 = vrot.slane %v639_v40, 2 }
 0x152   : > { %v619_v43 = vrot.slane %v618_v41, 1  ;;  %v641_v44 = vadd.f32 %v640_v42, %v639_v40 }
 0x154   : > { %v620_v45 = vadd.f32 %v619_v43, %v618_v41  ;;  %v642_v46 = vrot.slane %v641_v44, 1 }
 0x156   : > { %v643_v47 = vadd.f32 %v642_v46, %v641_v44 }
 0x158   : > { %v645_v48 = vsel %vm644_vm1, %v620_v45, %v643_v47 }
 0x159   : > { %646 = vst [vmem:[%s1147_s3] sm:$0x3] %v645_v48 }
 0x15a PF: > { %s14_s16 = sadd.s32 1, %s1012_s16   ;;  %s1148_s12 = smov %s1000_s13 }
 0x15b   : > { %p11_p13 = scmp.ge.s32.totalorder %s14_s16, 7   ;;  %s1149_s13 = smov %s1071_s20 }
 0x15c   : > { %s1150_s14 = smov %s1008_s15  ;;  %s1151_s15 = smov %s1153_s17 }
 0x15d   :  { %13 = sbr.rel (!%p11_p13) target bundleno = 3 (0x3), region = 131 }

// kernel: _lambda_.31
= control target key start
LH: loop header
LB: loop body
LE: loop exit
PB: predicated region body
PF: predicated region fallthrough
CT: control target
= control target key end

     0   :  { %v220_v7 = vmov 1966171168   ;;  %v33_v9 = vlaneseq  ;;  %s285_s1 = inlined_call_operand.vmem [shape: f32[1,2,128], index: 1, kind: input, shape index: {}]   ;;  %s286_s0 = inlined_call_operand.vmem [shape: bf16[72,128], index: 0, kind: input, shape index: {}]   ;;  %s287_s2 = inlined_call_operand.vmem [shape: f32[1,128], index: 2, kind: input, shape index: {}]   ;;  %s288_s3 = inlined_call_operand.vmem [shape: f32[1,128], index: 3, kind: input, shape index: {}]   ;;  %s289_s4 = inlined_call_operand.vmem [shape: bf16[72,128], index: 4, kind: output, shape index: {}]  }
   0x1   :  { %v17_v0 = vld [vmem:[%s285_s1] sm:$0x3]  ;;  %v31_v8 = vunpack.c.l.s4 %v220_v7  ;;  %v211_v18 = vld [vmem:[%s286_s0 + $0x8] sm:$0xff]   ;;  %v212_v21 = vld [vmem:[%s286_s0 + $0x10] sm:$0xff]  }
   0x2   :  { %v19_v1 = vmul.f32 0.013888889, %v17_v0  ;;  %v34_v11 = vshrl.u32 %v33_v9, 7  ;;  %v26_v16 = vld [vmem:[%s287_s2] sm:$0x1]  ;;  %v213_v22 = vld [vmem:[%s286_s0 + $0x18] sm:$0xff]   ;;  %v181_v26 = vunpack.c.l.bf16 %v211_v18  ;;  %v182_v29 = vunpack.c.h.bf16 %v211_v18 }
   0x3   :  { %v32_v10 = vunpack.c.0.s8 %v31_v8  ;;  %v176_v17 = vld [vmem:[%s286_s0] sm:$0xff]   ;;  %v185_v30 = vunpack.c.l.bf16 %v212_v21  ;;  %v186_v31 = vunpack.c.h.bf16 %v212_v21  ;;  %v189_v32 = vunpack.c.l.bf16 %v213_v22 }
   0x4   :  { %v20_v2 = vmul.f32 %v19_v1, %v19_v1  ;;  %v71_v20 = vsub.s32 0, %v34_v11  ;;  %v177_v24 = vunpack.c.l.bf16 %v176_v17  ;;  %v178_v25 = vunpack.c.h.bf16 %v176_v17  ;;  %v58_v27 = vld [vmem:[%s286_s0 + $0x20] sm:$0xf] }
   0x5   :  { %v35_v12 = vsub.s32 %v32_v10, %v34_v11  ;;  %v47_v28 = vld [vmem:[%s288_s3] sm:$0x1]  ;;  %v190_v35 = vunpack.c.h.bf16 %v213_v22  ;;  %v67_v36 = vunpack.c.l.bf16 %v58_v27 }
   0x6   :  { %v22_v3 = vrot.slane %v20_v2, 7 }
   0x8   :  { %v24_v4 = vsub.f32 %v19_v1, %v22_v3 }
   0xa   :  { %v25_v5 = vmax.f32 %v24_v4, 0.0 }
   0xc   :  { %v27_v6 = vadd.f32 1e-05, %v25_v5 }
   0xe   :  { %218 = vrsqrt.f32 %v27_v6 }
  0x18   :  { %v219_v13 = vpop.eup %218 }
  0x19   :  { %v36_v14 = vrot.slane %v219_v13, %v35_v12 }
  0x1b   :  { %v37_v15 = vcombine.high %v36_v14, %v36_v14 }
  0x1d   :  { %v44_v19 = vrot.slane %v37_v15, %v35_v12 }
  0x1f   :  { %v46_v23 = vmul.f32 %v44_v19, %v26_v16 }
  0x21   :  { %v48_v33 = vmul.f32 %v46_v23, %v19_v1  ;;  %v72_v34 = vrot.slane %v46_v23, %v71_v20 }
  0x23   :  { %v49_v37 = vsub.f32 %v47_v28, %v48_v33  ;;  %v74_v38 = vmul.f32 %v177_v24, %v72_v34  ;;  %v75_v39 = vmul.f32 %v178_v25, %v72_v34  ;;  %v76_v40 = vmul.f32 %v181_v26, %v72_v34 }
  0x24   :  { %v77_v41 = vmul.f32 %v182_v29, %v72_v34  ;;  %v78_v42 = vmul.f32 %v185_v30, %v72_v34  ;;  %v79_v43 = vmul.f32 %v186_v31, %v72_v34  ;;  %v80_v44 = vmul.f32 %v189_v32, %v72_v34 }
  0x25   :  { %v87_v45 = vrot.slane %v49_v37, %v71_v20  ;;  %v81_v46 = vmul.f32 %v190_v35, %v72_v34  ;;  %v82_v47 = vmul.f32 %v72_v34, %v67_v36 }
  0x27   :  { %v89_v48 = vadd.f32 %v87_v45, %v74_v38  ;;  %v90_v49 = vadd.f32 %v87_v45, %v75_v39  ;;  %v91_v50 = vadd.f32 %v87_v45, %v76_v40  ;;  %v92_v51 = vadd.f32 %v87_v45, %v77_v41 }
  0x28   :  { %v93_v52 = vadd.f32 %v87_v45, %v78_v42  ;;  %v94_v53 = vadd.f32 %v87_v45, %v79_v43  ;;  %v95_v54 = vadd.f32 %v87_v45, %v80_v44  ;;  %v96_v55 = vadd.f32 %v87_v45, %v81_v46 }
  0x29   :  { %v98_v56 = vmax.f32 %v89_v48, 0.0  ;;  %v99_v57 = vmax.f32 %v90_v49, 0.0  ;;  %v100_v58 = vmax.f32 %v91_v50, 0.0  ;;  %v101_v59 = vmax.f32 %v92_v51, 0.0 }
  0x2a   :  { %v102_v60 = vmax.f32 %v93_v52, 0.0  ;;  %v103_v61 = vmax.f32 %v94_v53, 0.0  ;;  %v104_v62 = vmax.f32 %v95_v54, 0.0  ;;  %v105_v63 = vmax.f32 %v96_v55, 0.0 }
  0x2b   :  { %v194_v0 = vpack.c.bf16 %v99_v57, %v98_v56  ;;  %v199_v1 = vpack.c.bf16 %v101_v59, %v100_v58  ;;  %v97_v2 = vadd.f32 %v87_v45, %v82_v47 }
  0x2c   :  { %v204_v3 = vpack.c.bf16 %v103_v61, %v102_v60  ;;  %v209_v4 = vpack.c.bf16 %v105_v63, %v104_v62 }
  0x2d   :  { %195 = vst [vmem:[%s289_s4] sm:$0xff] %v194_v0   ;;  %214 = vst [vmem:[%s289_s4 + $0x8] sm:$0xff] %v199_v1   ;;  %v106_v5 = vmax.f32 %v97_v2, 0.0 }
  0x2e   :  { %215 = vst [vmem:[%s289_s4 + $0x10] sm:$0xff] %v204_v3   ;;  %216 = vst [vmem:[%s289_s4 + $0x18] sm:$0xff] %v209_v4  }
  0x2f   :  { %v174_v6 = vpack.c.bf16 %v106_v5, %v106_v5 }
  0x31   :  { %152 = vst [vmem:[%s289_s4 + $0x20] sm:$0xf] %v174_v6 }

// kernel: _lambda_.33
= control target key start
LH: loop header
LB: loop body
LE: loop exit
PB: predicated region body
PF: predicated region fallthrough
CT: control target
= control target key end

     0   :  { %v269_v7 = vmov 1966171168   ;;  %v36_v9 = vlaneseq  ;;  %s354_s1 = inlined_call_operand.vmem [shape: f32[1,2,128], index: 1, kind: input, shape index: {}]   ;;  %s355_s0 = inlined_call_operand.vmem [shape: bf16[72,128], index: 0, kind: input, shape index: {}]   ;;  %s356_s2 = inlined_call_operand.vmem [shape: f32[1,128], index: 2, kind: input, shape index: {}]   ;;  %s357_s4 = inlined_call_operand.vmem [shape: bf16[72,128], index: 4, kind: input, shape index: {}]   ;;  %s358_s3 = inlined_call_operand.vmem [shape: f32[1,128], index: 3, kind: input, shape index: {}]   ;;  %s359_s5 = inlined_call_operand.vmem [shape: bf16[72,128], index: 5, kind: output, shape index: {}]  }
   0x1   :  { %v20_v0 = vld [vmem:[%s354_s1] sm:$0x3]  ;;  %v34_v8 = vunpack.c.l.s4 %v269_v7  ;;  %v257_v18 = vld [vmem:[%s355_s0 + $0x8] sm:$0xff]   ;;  %v258_v21 = vld [vmem:[%s355_s0 + $0x10] sm:$0xff]  }
   0x2   :  { %v22_v1 = vmul.f32 0.013888889, %v20_v0  ;;  %v37_v11 = vshrl.u32 %v36_v9, 7  ;;  %v29_v16 = vld [vmem:[%s356_s2] sm:$0x1]  ;;  %v259_v22 = vld [vmem:[%s355_s0 + $0x18] sm:$0xff]   ;;  %v211_v27 = vunpack.c.l.bf16 %v257_v18  ;;  %v212_v31 = vunpack.c.h.bf16 %v257_v18 }
   0x3   :  { %v35_v10 = vunpack.c.0.s8 %v34_v8  ;;  %v206_v17 = vld [vmem:[%s355_s0] sm:$0xff]   ;;  %v260_v28 = vld [vmem:[%s357_s4 + $0x8] sm:$0xff]   ;;  %v215_v32 = vunpack.c.l.bf16 %v258_v21  ;;  %v216_v33 = vunpack.c.h.bf16 %v258_v21  ;;  %v219_v34 = vunpack.c.l.bf16 %v259_v22  ;;  %v261_v42 = vld [vmem:[%s357_s4 + $0x10] sm:$0xff]  }
   0x4   :  { %v23_v2 = vmul.f32 %v22_v1, %v22_v1  ;;  %v74_v20 = vsub.s32 0, %v37_v11  ;;  %v222_v23 = vld [vmem:[%s357_s4] sm:$0xff]   ;;  %v207_v25 = vunpack.c.l.bf16 %v206_v17  ;;  %v208_v26 = vunpack.c.h.bf16 %v206_v17  ;;  %v262_v48 = vld [vmem:[%s357_s4 + $0x18] sm:$0xff]  }
   0x5   :  { %v38_v12 = vsub.s32 %v35_v10, %v37_v11  ;;  %v61_v29 = vld [vmem:[%s355_s0 + $0x20] sm:$0xf]  ;;  %v223_v37 = vunpack.c.l.bf16 %v222_v23  ;;  %v220_v38 = vunpack.c.h.bf16 %v259_v22  ;;  %v224_v39 = vunpack.c.h.bf16 %v222_v23 }
   0x6   :  { %v25_v3 = vrot.slane %v23_v2, 7  ;;  %v50_v30 = vld [vmem:[%s358_s3] sm:$0x1]  ;;  %v227_v40 = vunpack.c.l.bf16 %v260_v28  ;;  %v228_v41 = vunpack.c.h.bf16 %v260_v28  ;;  %v70_v43 = vunpack.c.l.bf16 %v61_v29 }
   0x7   :  { %v109_v49 = vld [vmem:[%s357_s4 + $0x20] sm:$0xf]  ;;  %v231_v55 = vunpack.c.l.bf16 %v261_v42  ;;  %v232_v56 = vunpack.c.h.bf16 %v261_v42  ;;  %v235_v58 = vunpack.c.l.bf16 %v262_v48  ;;  %v236_v59 = vunpack.c.h.bf16 %v262_v48 }
   0x8   :  { %v27_v4 = vsub.f32 %v22_v1, %v25_v3  ;;  %v118_v61 = vunpack.c.l.bf16 %v109_v49 }
   0xa   :  { %v28_v5 = vmax.f32 %v27_v4, 0.0 }
   0xc   :  { %v30_v6 = vadd.f32 1e-05, %v28_v5 }
   0xe   :  { %267 = vrsqrt.f32 %v30_v6 }
  0x18   :  { %v268_v13 = vpop.eup %267 }
  0x19   :  { %v39_v14 = vrot.slane %v268_v13, %v38_v12 }
  0x1b   :  { %v40_v15 = vcombine.high %v39_v14, %v39_v14 }
  0x1d   :  { %v47_v19 = vrot.slane %v40_v15, %v38_v12 }
  0x1f   :  { %v49_v24 = vmul.f32 %v47_v19, %v29_v16 }
  0x21   :  { %v51_v35 = vmul.f32 %v49_v24, %v22_v1  ;;  %v75_v36 = vrot.slane %v49_v24, %v74_v20 }
  0x23   :  { %v52_v44 = vsub.f32 %v50_v30, %v51_v35  ;;  %v77_v45 = vmul.f32 %v207_v25, %v75_v36  ;;  %v78_v46 = vmul.f32 %v208_v26, %v75_v36  ;;  %v79_v47 = vmul.f32 %v211_v27, %v75_v36 }
  0x24   :  { %v80_v50 = vmul.f32 %v212_v31, %v75_v36  ;;  %v81_v51 = vmul.f32 %v215_v32, %v75_v36  ;;  %v82_v52 = vmul.f32 %v216_v33, %v75_v36  ;;  %v83_v53 = vmul.f32 %v219_v34, %v75_v36 }
  0x25   :  { %v90_v54 = vrot.slane %v52_v44, %v74_v20  ;;  %v84_v57 = vmul.f32 %v220_v38, %v75_v36  ;;  %v85_v60 = vmul.f32 %v75_v36, %v70_v43 }
  0x27   :  { %v92_v62 = vadd.f32 %v90_v54, %v77_v45  ;;  %v93_v63 = vadd.f32 %v90_v54, %v78_v46  ;;  %v94_v0 = vadd.f32 %v90_v54, %v79_v47  ;;  %v95_v1 = vadd.f32 %v90_v54, %v80_v50 }
  0x28   :  { %v96_v2 = vadd.f32 %v90_v54, %v81_v51  ;;  %v97_v3 = vadd.f32 %v90_v54, %v82_v52  ;;  %v98_v4 = vadd.f32 %v90_v54, %v83_v53  ;;  %v99_v5 = vadd.f32 %v90_v54, %v84_v57 }
  0x29   :  { %v119_v6 = vadd.f32 %v223_v37, %v92_v62  ;;  %v120_v7 = vadd.f32 %v224_v39, %v93_v63  ;;  %v121_v8 = vadd.f32 %v227_v40, %v94_v0  ;;  %v122_v9 = vadd.f32 %v228_v41, %v95_v1 }
  0x2a   :  { %v123_v10 = vadd.f32 %v231_v55, %v96_v2  ;;  %v124_v11 = vadd.f32 %v232_v56, %v97_v3  ;;  %v125_v12 = vadd.f32 %v235_v58, %v98_v4  ;;  %v126_v13 = vadd.f32 %v236_v59, %v99_v5 }
  0x2b   :  { %v128_v14 = vmax.f32 %v119_v6, 0.0  ;;  %v129_v15 = vmax.f32 %v120_v7, 0.0  ;;  %v130_v16 = vmax.f32 %v121_v8, 0.0  ;;  %v131_v17 = vmax.f32 %v122_v9, 0.0 }
  0x2c   :  { %v132_v18 = vmax.f32 %v123_v10, 0.0  ;;  %v133_v19 = vmax.f32 %v124_v11, 0.0  ;;  %v134_v20 = vmax.f32 %v125_v12, 0.0  ;;  %v135_v21 = vmax.f32 %v126_v13, 0.0 }
  0x2d   :  { %v240_v22 = vpack.c.bf16 %v129_v15, %v128_v14  ;;  %v245_v23 = vpack.c.bf16 %v131_v17, %v130_v16  ;;  %v100_v24 = vadd.f32 %v90_v54, %v85_v60 }
  0x2e   :  { %v250_v25 = vpack.c.bf16 %v133_v19, %v132_v18  ;;  %v255_v26 = vpack.c.bf16 %v135_v21, %v134_v20 }
  0x2f   :  { %241 = vst [vmem:[%s359_s5] sm:$0xff] %v240_v22   ;;  %263 = vst [vmem:[%s359_s5 + $0x8] sm:$0xff] %v245_v23   ;;  %v127_v27 = vadd.f32 %v118_v61, %v100_v24 }
  0x30   :  { %264 = vst [vmem:[%s359_s5 + $0x10] sm:$0xff] %v250_v25   ;;  %265 = vst [vmem:[%s359_s5 + $0x18] sm:$0xff] %v255_v26  }
  0x31   :  { %v136_v28 = vmax.f32 %v127_v27, 0.0 }
  0x33   :  { %v204_v29 = vpack.c.bf16 %v136_v28, %v136_v28 }
  0x35   :  { %182 = vst [vmem:[%s359_s5 + $0x20] sm:$0xf] %v204_v29 }

// kernel: _lambda_.37
= control target key start
LH: loop header
LB: loop body
LE: loop exit
PB: predicated region body
PF: predicated region fallthrough
CT: control target
= control target key end

     0   :  { %v112_v7 = vmov 1966171168   ;;  %v33_v9 = vlaneseq  ;;  %s159_s1 = inlined_call_operand.vmem [shape: f32[1,2,128], index: 1, kind: input, shape index: {}]   ;;  %s160_s0 = inlined_call_operand.vmem [shape: bf16[24,128], index: 0, kind: input, shape index: {}]   ;;  %s161_s2 = inlined_call_operand.vmem [shape: f32[1,128], index: 2, kind: input, shape index: {}]   ;;  %s162_s3 = inlined_call_operand.vmem [shape: f32[1,128], index: 3, kind: input, shape index: {}]   ;;  %s163_s4 = inlined_call_operand.vmem [shape: bf16[24,128], index: 4, kind: output, shape index: {}]  }
   0x1   :  { %v17_v0 = vld [vmem:[%s159_s1] sm:$0x3]  ;;  %v31_v8 = vunpack.c.l.s4 %v112_v7  ;;  %v52_v18 = vld [vmem:[%s160_s0 + $0x8] sm:$0xf] }
   0x2   :  { %v19_v1 = vmul.f32 0.055555556, %v17_v0  ;;  %v34_v11 = vshrl.u32 %v33_v9, 7  ;;  %v26_v16 = vld [vmem:[%s161_s2] sm:$0x1]  ;;  %v55_v24 = vunpack.c.l.bf16 %v52_v18 }
   0x3   :  { %v32_v10 = vunpack.c.0.s8 %v31_v8  ;;  %v101_v17 = vld [vmem:[%s160_s0] sm:$0xff]  }
   0x4   :  { %v20_v2 = vmul.f32 %v19_v1, %v19_v1  ;;  %v59_v20 = vsub.s32 0, %v34_v11  ;;  %v102_v22 = vunpack.c.l.bf16 %v101_v17  ;;  %v103_v23 = vunpack.c.h.bf16 %v101_v17  ;;  %v47_v25 = vld [vmem:[%s162_s3] sm:$0x1] }
   0x5   :  { %v35_v12 = vsub.s32 %v32_v10, %v34_v11 }
   0x6   :  { %v22_v3 = vrot.slane %v20_v2, 7 }
   0x8   :  { %v24_v4 = vsub.f32 %v19_v1, %v22_v3 }
   0xa   :  { %v25_v5 = vmax.f32 %v24_v4, 0.0 }
   0xc   :  { %v27_v6 = vadd.f32 1e-05, %v25_v5 }
   0xe   :  { %110 = vrsqrt.f32 %v27_v6 }
  0x18   :  { %v111_v13 = vpop.eup %110 }
  0x19   :  { %v36_v14 = vrot.slane %v111_v13, %v35_v12 }
  0x1b   :  { %v37_v15 = vcombine.high %v36_v14, %v36_v14 }
  0x1d   :  { %v44_v19 = vrot.slane %v37_v15, %v35_v12 }
  0x1f   :  { %v46_v21 = vmul.f32 %v44_v19, %v26_v16 }
  0x21   :  { %v48_v26 = vmul.f32 %v46_v21, %v19_v1  ;;  %v60_v27 = vrot.slane %v46_v21, %v59_v20 }
  0x23   :  { %v49_v28 = vsub.f32 %v47_v25, %v48_v26  ;;  %v62_v29 = vmul.f32 %v102_v22, %v60_v27  ;;  %v63_v30 = vmul.f32 %v103_v23, %v60_v27  ;;  %v64_v31 = vmul.f32 %v60_v27, %v55_v24 }
  0x25   :  { %v69_v32 = vrot.slane %v49_v28, %v59_v20 }
  0x27   :  { %v71_v33 = vadd.f32 %v69_v32, %v62_v29  ;;  %v72_v34 = vadd.f32 %v69_v32, %v63_v30  ;;  %v73_v35 = vadd.f32 %v69_v32, %v64_v31 }
  0x29   :  { %v107_v36 = vpack.c.bf16 %v72_v34, %v71_v33  ;;  %v99_v37 = vpack.c.bf16 %v73_v35, %v73_v35 }
  0x2b   :  { %108 = vst [vmem:[%s163_s4] sm:$0xff] %v107_v36   ;;  %89 = vst [vmem:[%s163_s4 + $0x8] sm:$0xf] %v99_v37 }

// kernel: _lambda_.36
= control target key start
LH: loop header
LB: loop body
LE: loop exit
PB: predicated region body
PF: predicated region fallthrough
CT: control target
= control target key end

     0   :  { %vm200_vm0 = vcmask 1040384   ;;  %s331_s1 = inlined_call_operand.vmem [shape: bf16[128,128], index: 1, kind: input, shape index: {}]   ;;  %s332_s0 = inlined_call_operand.vmem [shape: bf16[24,128], index: 0, kind: input, shape index: {}]   ;;  %s333_s2 = inlined_call_operand.vmem [shape: bf16[24,128], index: 2, kind: output, shape index: {0}]   ;;  %s334_s3 = inlined_call_operand.vmem [shape: f32[1,2,128], index: 3, kind: output, shape index: {1}]  }
   0x1   :  { %v262_v0 = vld [vmem:[%s331_s1] sm:$0xff]   ;;  %v263_v1 = vld [vmem:[%s331_s1 + $0x8] sm:$0xff]   ;;  %v264_v2 = vld [vmem:[%s331_s1 + $0x10] sm:$0xff]  }
   0x2   :  { %242 = vmatprep.subr.bf16.mxu0 %v262_v0  ;;  %v265_v3 = vld [vmem:[%s331_s1 + $0x18] sm:$0xff]   ;;  %v270_v4 = vld [vmem:[%s332_s0] sm:$0xff]   ;;  %v267_v6 = vld [vmem:[%s331_s1 + $0x28] sm:$0xff]  }
   0x3   :  { %243 = vmatpush3.bf16.msra.mxu0 %v262_v0  ;;  %258 = vmatprep.mubr.bf16.mxu0 %v270_v4  ;;  %v266_v5 = vld [vmem:[%s331_s1 + $0x20] sm:$0xff]   ;;  %v268_v7 = vld [vmem:[%s331_s1 + $0x30] sm:$0xff]   ;;  %v269_v8 = vld [vmem:[%s331_s1 + $0x38] sm:$0xff]  }
   0x4   :  { %244 = vmatprep.subr.bf16.mxu0 %v263_v1  ;;  %v271_v9 = vld [vmem:[%s332_s0 + $0x8] ss:$0 sps:$4 sm:$0xff]  }
   0x7   :  { %245 = vmatpush3.bf16.msra.mxu0 %v263_v1 }
   0x8   :  { %246 = vmatprep.subr.bf16.mxu0 %v264_v2 }
   0xb   :  { %247 = vmatpush3.bf16.msra.mxu0 %v264_v2 }
   0xc   :  { %248 = vmatprep.subr.bf16.mxu0 %v265_v3 }
   0xf   :  { %249 = vmatpush3.bf16.msra.mxu0 %v265_v3 }
  0x10   :  { %250 = vmatprep.subr.bf16.mxu0 %v266_v5 }
  0x13   :  { %251 = vmatpush3.bf16.msra.mxu0 %v266_v5 }
  0x14   :  { %252 = vmatprep.subr.bf16.mxu0 %v267_v6 }
  0x17   :  { %253 = vmatpush3.bf16.msra.mxu0 %v267_v6 }
  0x18   :  { %254 = vmatprep.subr.bf16.mxu0 %v268_v7 }
  0x1b   :  { %255 = vmatpush3.bf16.msra.mxu0 %v268_v7 }
  0x1c   :  { %256 = vmatprep.subr.bf16.mxu0 %v269_v8 }
  0x1f   :  { %257 = vmatpush3.bf16.msra.mxu0 %v269_v8 }
  0x22   :  { %259 = vmatmul.mubr.bf16.vlgmr.msra.gmra.mrb[0].mxu0 %v271_v9 }
  0xf5   :  { %v260_v10 = vpop.f32.mrb[0].mxu0 }
  0xf6   :  { %v226_v11 = vpack.c.bf16 %v260_v10, %v260_v10  ;;  %v125_v12 = vpop.f32.mrb[1].mxu0  ;;  %v191_v19 = vmul.f32 %v260_v10, %v260_v10 }
  0xf7   :  { %v261_v13 = vpop.f32.mrb[2].mxu0  ;;  %v189_v15 = vmul.f32 %v125_v12, %v125_v12 }
  0xf8   :  { %v128_v14 = vpop.f32.mrb[3].mxu0  ;;  %180 = vst [vmem:[%s333_s2 + $0x8] sm:$0xf] %v226_v11 }
  0xf9   :  { %v230_v16 = vpack.c.bf16 %v128_v14, %v125_v12  ;;  %v181_v17 = vadd.f32 %v128_v14, %v125_v12  ;;  %v190_v18 = vmul.f32 %v128_v14, %v128_v14 }
  0xfb   :  { %231 = vst [vmem:[%s333_s2] sm:$0xff] %v230_v16   ;;  %v182_v20 = vadd.f32 %v260_v10, %v181_v17  ;;  %v192_v21 = vadd.f32 %v190_v18, %v189_v15 }
  0xfd   :  { %v183_v22 = vrot.slane %v182_v20, 4  ;;  %v193_v23 = vadd.f32 %v192_v21, %v191_v19 }
  0xff   :  { %v184_v24 = vadd.f32 %v183_v22, %v182_v20  ;;  %v194_v25 = vrot.slane %v193_v23, 4 }
 0x101   :  { %v185_v26 = vrot.slane %v184_v24, 2  ;;  %v195_v27 = vadd.f32 %v194_v25, %v193_v23 }
 0x103   :  { %v186_v28 = vadd.f32 %v185_v26, %v184_v24  ;;  %v196_v29 = vrot.slane %v195_v27, 2 }
 0x105   :  { %v187_v30 = vrot.slane %v186_v28, 1  ;;  %v197_v31 = vadd.f32 %v196_v29, %v195_v27 }
 0x107   :  { %v198_v32 = vrot.slane %v197_v31, 1  ;;  %v188_v33 = vadd.f32 %v187_v30, %v186_v28 }
 0x109   :  { %v199_v34 = vadd.f32 %v198_v32, %v197_v31 }
 0x10b   :  { %v201_v35 = vsel %vm200_vm0, %v188_v33, %v199_v34 }
 0x10c   :  { %202 = vst [vmem:[%s334_s3] sm:$0x3] %v201_v35 }

// kernel: _lambda_.35
= control target key start
LH: loop header
LB: loop body
LE: loop exit
PB: predicated region body
PF: predicated region fallthrough
CT: control target
= control target key end

     0   :  { %v115_v7 = vmov 1966171168   ;;  %v33_v9 = vlaneseq  ;;  %s162_s1 = inlined_call_operand.vmem [shape: f32[1,2,128], index: 1, kind: input, shape index: {}]   ;;  %s163_s0 = inlined_call_operand.vmem [shape: bf16[24,128], index: 0, kind: input, shape index: {}]   ;;  %s164_s2 = inlined_call_operand.vmem [shape: f32[1,128], index: 2, kind: input, shape index: {}]   ;;  %s165_s3 = inlined_call_operand.vmem [shape: f32[1,128], index: 3, kind: input, shape index: {}]   ;;  %s166_s4 = inlined_call_operand.vmem [shape: bf16[24,128], index: 4, kind: output, shape index: {}]  }
   0x1   :  { %v17_v0 = vld [vmem:[%s162_s1] sm:$0x3]  ;;  %v31_v8 = vunpack.c.l.s4 %v115_v7  ;;  %v52_v18 = vld [vmem:[%s163_s0 + $0x8] sm:$0xf] }
   0x2   :  { %v19_v1 = vmul.f32 0.055555556, %v17_v0  ;;  %v34_v11 = vshrl.u32 %v33_v9, 7  ;;  %v26_v16 = vld [vmem:[%s164_s2] sm:$0x1]  ;;  %v55_v24 = vunpack.c.l.bf16 %v52_v18 }
   0x3   :  { %v32_v10 = vunpack.c.0.s8 %v31_v8  ;;  %v104_v17 = vld [vmem:[%s163_s0] sm:$0xff]  }
   0x4   :  { %v20_v2 = vmul.f32 %v19_v1, %v19_v1  ;;  %v59_v20 = vsub.s32 0, %v34_v11  ;;  %v105_v22 = vunpack.c.l.bf16 %v104_v17  ;;  %v106_v23 = vunpack.c.h.bf16 %v104_v17  ;;  %v47_v25 = vld [vmem:[%s165_s3] sm:$0x1] }
   0x5   :  { %v35_v12 = vsub.s32 %v32_v10, %v34_v11 }
   0x6   :  { %v22_v3 = vrot.slane %v20_v2, 7 }
   0x8   :  { %v24_v4 = vsub.f32 %v19_v1, %v22_v3 }
   0xa   :  { %v25_v5 = vmax.f32 %v24_v4, 0.0 }
   0xc   :  { %v27_v6 = vadd.f32 1e-05, %v25_v5 }
   0xe   :  { %113 = vrsqrt.f32 %v27_v6 }
  0x18   :  { %v114_v13 = vpop.eup %113 }
  0x19   :  { %v36_v14 = vrot.slane %v114_v13, %v35_v12 }
  0x1b   :  { %v37_v15 = vcombine.high %v36_v14, %v36_v14 }
  0x1d   :  { %v44_v19 = vrot.slane %v37_v15, %v35_v12 }
  0x1f   :  { %v46_v21 = vmul.f32 %v44_v19, %v26_v16 }
  0x21   :  { %v48_v26 = vmul.f32 %v46_v21, %v19_v1  ;;  %v60_v27 = vrot.slane %v46_v21, %v59_v20 }
  0x23   :  { %v49_v28 = vsub.f32 %v47_v25, %v48_v26  ;;  %v62_v29 = vmul.f32 %v105_v22, %v60_v27  ;;  %v63_v30 = vmul.f32 %v106_v23, %v60_v27  ;;  %v64_v31 = vmul.f32 %v60_v27, %v55_v24 }
  0x25   :  { %v69_v32 = vrot.slane %v49_v28, %v59_v20 }
  0x27   :  { %v71_v33 = vadd.f32 %v69_v32, %v62_v29  ;;  %v72_v34 = vadd.f32 %v69_v32, %v63_v30  ;;  %v73_v35 = vadd.f32 %v69_v32, %v64_v31 }
  0x29   :  { %v74_v36 = vmax.f32 %v71_v33, 0.0  ;;  %v75_v37 = vmax.f32 %v72_v34, 0.0  ;;  %v76_v38 = vmax.f32 %v73_v35, 0.0 }
  0x2b   :  { %v110_v39 = vpack.c.bf16 %v75_v37, %v74_v36  ;;  %v102_v40 = vpack.c.bf16 %v76_v38, %v76_v38 }
  0x2d   :  { %111 = vst [vmem:[%s166_s4] sm:$0xff] %v110_v39   ;;  %92 = vst [vmem:[%s166_s4 + $0x8] sm:$0xf] %v102_v40 }

// kernel: _lambda_.34
= control target key start
LH: loop header
LB: loop body
LE: loop exit
PB: predicated region body
PF: predicated region fallthrough
CT: control target
= control target key end

     0   :  { %s811_s12 = smov 0   ;;  %s813_s13 = smov 0   ;;  %s891_s0 = inlined_call_operand.vmem [shape: bf16[24,640], index: 0, kind: input, shape index: {}]   ;;  %s892_s1 = inlined_call_operand.vmem [shape: bf16[640,128], index: 1, kind: input, shape index: {}]   ;;  %s893_s2 = inlined_call_operand.vmem [shape: bf16[24,128], index: 2, kind: output, shape index: {0}]   ;;  %s894_s3 = inlined_call_operand.vmem [shape: f32[1,2,128], index: 3, kind: output, shape index: {1}]  }
   0x1   :  { %s815_s14 = smov 0   ;;  %s817_s15 = smov 0  }
   0x2   :  { %s819_s16 = smov 0  }
   0x3 LB: > { %s26_s17 = sadd.s32 1, %s785_s15  ;;  %p49_p1 = scmp.ne.s32.totalorder %s777_s13, %s773_s12  ;;  %s789_s16 = sphi %s819_s16, %s14_s16   ;;  %s785_s15 = sphi %s817_s15, %s898_s15   ;;  %s781_s14 = sphi %s815_s14, %s897_s14   ;;  %s777_s13 = sphi %s813_s13, %s896_s13   ;;  %s773_s12 = sphi %s811_s12, %s895_s12  }
   0x4   : > { %p27_p0 = scmp.ge.s32.totalorder %s26_s17, 5  ;;  %p50_p2 = scmp.eq.s32.totalorder %s789_s16, 0 }
   0x5   : > { %s42_s19 = sadd.s32 1, %s777_s13  ;;  %p635_p5 = scmp.ge.s32.totalorder %s789_s16, 5 }
   0x6   : > { %s900_s17 = smov (%p27_p0, %s26_s17), 0  ;;  %p51_p3 = por %p50_p2, %p49_p1 }
   0x7   : > { %s38_s18 = ssub.s32 %s785_s15, %s900_s17  ;;  %159 = sbr.rel (%p635_p5) target bundleno = 21 (0x15), region = 16 }
   0x8   : > { %p40_p4 = scmp.eq.s32.totalorder %s38_s18, 0 }
   0xa   : > { %s846_s20 = scalar_select %p40_p4, %s777_s13, %s42_s19  }
   0xe   : > { %162 = sbr.rel (!%p51_p3) target bundleno = 21 (0x15), region = 20  ;;  %s164_s21 = sand.u32 (%p51_p3), 1, %s777_s13  }
   0xf   : > { %s636_s22 = sshll.u32 (%p51_p3), %s785_s15, 2  ;;  %s699_s23 = smul.u32 (%p51_p3), 12, %s164_s21 }
  0x10   : > { %s171_s26 = scalar_lea.vmem (%p51_p3), %s891_s0, %s636_s22 }
  0x11   : > { %v187_v0 = vld [vmem:[%s171_s26] sm:$0xf] (%p51_p3)  ;;  %v189_v1 = vld [vmem:[%s171_s26 + $0x14] sm:$0xf] (%p51_p3)  ;;  %v191_v2 = vld [vmem:[%s171_s26 + $0x28] sm:$0xf] (%p51_p3) }
  0x12   : > { %s166_s27 = scalar_lea.vmem (%p51_p3), [#allocation3], %s699_s23 }
  0x13   : > { %188 = vst [vmem:[%s166_s27] sm:$0xf] (%p51_p3), %v187_v0  ;;  %190 = vst [vmem:[%s166_s27 + $0x4] sm:$0xf] (%p51_p3), %v189_v1 }
  0x14   : > { %192 = vst [vmem:[%s166_s27 + $0x8] sm:$0xf] (%p51_p3), %v191_v2 }
  0x15 PF: > { %p637_p6 = scmp.ge.s32.totalorder %s789_s16, 1  ;;  %p232_p7 = scmp.lt.s32.totalorder %s789_s16, 6 }
  0x17   : > { %p233_p8 = pnand %p637_p6, %p232_p7 }
  0x18   : > { %s638_s28 = sshll.u32 (!%p233_p8), %s781_s14, 4  ;;  %s239_s29 = sand.u32 (!%p233_p8), 1, %s773_s12  }
  0x19   : > { %236 = sbr.rel (%p233_p8) target bundleno = 321 (0x141), region = 65  ;;  %p282_p9 = scmp.lt.s32.totalorder (!%p233_p8), %s638_s28, 79 }
  0x1a   : > { %s858_s30 = smul.u32 (!%p233_p8), 12, %s239_s29  ;;  %p650_p10 = scmp.ne.s32.totalorder (!%p233_p8), %s781_s14, 0 }
  0x1c   : > { %s241_s5 = scalar_lea.vmem (!%p233_p8), [#allocation3], %s858_s30 }
  0x1d   : > { %v749_v3 = vld [vmem:[%s241_s5] sm:$0xff] (!%p233_p8)   ;;  %v750_v12 = vld [vmem:[%s241_s5 + $0x8] ss:$0 sps:$4 sm:$0xff] (!%p233_p8)  }
  0x1e   : > { %695 = vmatprep.mubr.bf16.mxu0 (!%p233_p8), %v749_v3 }
  0x20   : > { %s902_s28 = smov (!%p282_p9, %s638_s28), 79 }
  0x21   : > { %s639_s4 = sshll.u32 %s902_s28, 2 }
  0x22   : > { %s288_s8 = scalar_lea.vmem %s892_s1, %s639_s4 }
  0x23   : > { %v741_v4 = vld [vmem:[%s288_s8] sm:$0xff]   ;;  %v742_v5 = vld [vmem:[%s288_s8 + $0x8] sm:$0xff]   ;;  %v743_v6 = vld [vmem:[%s288_s8 + $0x10] sm:$0xff]  }
  0x24   : > { %679 = vmatprep.subr.bf16.mxu0 %v741_v4  ;;  %v744_v7 = vld [vmem:[%s288_s8 + $0x18] sm:$0xff]   ;;  %v745_v8 = vld [vmem:[%s288_s8 + $0x20] sm:$0xff]   ;;  %v746_v9 = vld [vmem:[%s288_s8 + $0x28] sm:$0xff]  }
  0x25   : > { %680 = vmatpush3.bf16.msra.mxu0 %v741_v4  ;;  %v747_v10 = vld [vmem:[%s288_s8 + $0x30] sm:$0xff]   ;;  %v748_v11 = vld [vmem:[%s288_s8 + $0x38] sm:$0xff]  }
  0x26   : > { %681 = vmatprep.subr.bf16.mxu0 %v742_v5 }
  0x29   : > { %682 = vmatpush3.bf16.msra.mxu0 %v742_v5 }
  0x2a   : > { %683 = vmatprep.subr.bf16.mxu0 %v743_v6 }
  0x2d   : > { %684 = vmatpush3.bf16.msra.mxu0 %v743_v6 }
  0x2e   : > { %685 = vmatprep.subr.bf16.mxu0 %v744_v7 }
  0x31   : > { %686 = vmatpush3.bf16.msra.mxu0 %v744_v7 }
  0x32   : > { %687 = vmatprep.subr.bf16.mxu0 %v745_v8 }
  0x35   : > { %688 = vmatpush3.bf16.msra.mxu0 %v745_v8 }
  0x36   : > { %689 = vmatprep.subr.bf16.mxu0 %v746_v9 }
  0x39   : > { %690 = vmatpush3.bf16.msra.mxu0 %v746_v9 }
  0x3a   : > { %691 = vmatprep.subr.bf16.mxu0 %v747_v10 }
  0x3d   : > { %692 = vmatpush3.bf16.msra.mxu0 %v747_v10 }
  0x3e   : > { %693 = vmatprep.subr.bf16.mxu0 %v748_v11 }
  0x41   : > { %694 = vmatpush3.bf16.msra.mxu0 %v748_v11 }
  0x44   : > { %696 = vmatmul.mubr.bf16.vlgmr.msra.gmra.mrb[0].mxu0 %v750_v12 }
 0x114   : > { %435 = sbr.rel (%p650_p10) target bundleno = 284 (0x11c), region = 73 }
 0x117   : > { %v697_v13 = vpop.f32.mrb[0].mxu0 }
 0x118   : > { %v418_v14 = vpop.f32.mrb[1].mxu0  ;;  %438 = vst [vmem:[#allocation2 + $0x10] sm:$0xff] (!%p650_p10), %v697_v13 }
 0x119   : > { %v698_v15 = vpop.f32.mrb[2].mxu0  ;;  %436 = vst [vmem:[#allocation2] sm:$0xff] (!%p650_p10), %v418_v14 }
 0x11a   : > { %v421_v16 = vpop.f32.mrb[3].mxu0 }
 0x11b   : > { %437 = vst [vmem:[#allocation2 + $0x8] sm:$0xff] %v421_v16 }
 0x11c PF: > { %p651_p11 = scmp.le.s32.totalorder %s781_s14, 0 }
 0x11e   : > { %442 = sbr.rel (%p651_p11) target bundleno = 294 (0x126), region = 77 }
 0x120   : > { %v445_v19 = vld [vmem:[#allocation2 + $0x10] sm:$0xff] (!%p651_p11) }
 0x121   : > { %v443_v17 = vld [vmem:[#allocation2] sm:$0xff] (!%p651_p11)  ;;  %v448_v22 = vadd.f32 (!%p651_p11), %v697_v13, %v445_v19 }
 0x122   : > { %v444_v18 = vld [vmem:[#allocation2 + $0x8] sm:$0xff] (!%p651_p11)  ;;  %v446_v20 = vadd.f32 (!%p651_p11), %v443_v17, %v418_v14 }
 0x123   : > { %v447_v21 = vadd.f32 (!%p651_p11), %v444_v18, %v421_v16  ;;  %451 = vst [vmem:[#allocation2 + $0x10] sm:$0xff] (!%p651_p11), %v448_v22 }
 0x124   : > { %449 = vst [vmem:[#allocation2] sm:$0xff] (!%p651_p11), %v446_v20 }
 0x125   : > { %450 = vst [vmem:[#allocation2 + $0x8] sm:$0xff] %v447_v21 }
 0x126 PF: > { %p652_p12 = scmp.ne.s32.totalorder %s781_s14, 4 }
 0x127   : > { %vm494_vm0 = vcmask (!%p652_p12), 1040384  }
 0x128   : > { %455 = sbr.rel (%p652_p12) target bundleno = 321 (0x141), region = 81 }
 0x12b   : > { %v458_v25 = vld [vmem:[#allocation2 + $0x10] sm:$0xff] (!%p652_p12) }
 0x12c   : > { %v456_v23 = vld [vmem:[#allocation2] sm:$0xff] (!%p652_p12)  ;;  %v457_v24 = vld [vmem:[#allocation2 + $0x8] sm:$0xff] (!%p652_p12)  ;;  %v663_v30 = vpack.c.bf16 (!%p652_p12), %v458_v25, %v458_v25  ;;  %v485_v31 = vmul.f32 (!%p652_p12), %v458_v25, %v458_v25 }
 0x12d   : > { %v667_v26 = vpack.c.bf16 (!%p652_p12), %v457_v24, %v456_v23  ;;  %v475_v27 = vadd.f32 (!%p652_p12), %v457_v24, %v456_v23  ;;  %v483_v28 = vmul.f32 (!%p652_p12), %v456_v23, %v456_v23  ;;  %v484_v29 = vmul.f32 (!%p652_p12), %v457_v24, %v457_v24 }
 0x12e   : > { %474 = vst [vmem:[%s893_s2 + $0x8] sm:$0xf] (!%p652_p12), %v663_v30 }
 0x12f   : > { %668 = vst [vmem:[%s893_s2] sm:$0xff] %v667_v26   ;;  %v486_v32 = vadd.f32 %v484_v29, %v483_v28  ;;  %v476_v33 = vadd.f32 %v475_v27, %v458_v25 }
 0x131   : > { %v477_v34 = vrot.slane %v476_v33, 4  ;;  %v487_v35 = vadd.f32 %v486_v32, %v485_v31 }
 0x133   : > { %v478_v36 = vadd.f32 %v477_v34, %v476_v33  ;;  %v488_v37 = vrot.slane %v487_v35, 4 }
 0x135   : > { %v479_v38 = vrot.slane %v478_v36, 2  ;;  %v489_v39 = vadd.f32 %v488_v37, %v487_v35 }
 0x137   : > { %v480_v40 = vadd.f32 %v479_v38, %v478_v36  ;;  %v490_v41 = vrot.slane %v489_v39, 2 }
 0x139   : > { %v481_v42 = vrot.slane %v480_v40, 1  ;;  %v491_v43 = vadd.f32 %v490_v41, %v489_v39 }
 0x13b   : > { %v482_v44 = vadd.f32 %v481_v42, %v480_v40  ;;  %v492_v45 = vrot.slane %v491_v43, 1 }
 0x13d   : > { %v493_v46 = vadd.f32 %v492_v45, %v491_v43 }
 0x13f   : > { %v495_v47 = vsel %vm494_vm0, %v482_v44, %v493_v46 }
 0x140   : > { %496 = vst [vmem:[%s894_s3] sm:$0x3] %v495_v47 }
 0x141 PF: > { %s14_s16 = sadd.s32 1, %s789_s16   ;;  %s895_s12 = smov %s777_s13 }
 0x142   : > { %p11_p13 = scmp.ge.s32.totalorder %s14_s16, 7   ;;  %s896_s13 = smov %s846_s20 }
 0x143   : > { %s897_s14 = smov %s785_s15  ;;  %s898_s15 = smov %s900_s17 }
 0x144   :  { %13 = sbr.rel (!%p11_p13) target bundleno = 3 (0x3), region = 131 }

// kernel: _lambda_.39
= control target key start
LH: loop header
LB: loop body
LE: loop exit
PB: predicated region body
PF: predicated region fallthrough
CT: control target
= control target key end

     0   :  { %v131_v7 = vmov 1966171168   ;;  %v36_v9 = vlaneseq  ;;  %s189_s1 = inlined_call_operand.vmem [shape: f32[1,2,128], index: 1, kind: input, shape index: {}]   ;;  %s190_s0 = inlined_call_operand.vmem [shape: bf16[24,128], index: 0, kind: input, shape index: {}]   ;;  %s191_s2 = inlined_call_operand.vmem [shape: f32[1,128], index: 2, kind: input, shape index: {}]   ;;  %s192_s3 = inlined_call_operand.vmem [shape: f32[1,128], index: 3, kind: input, shape index: {}]   ;;  %s193_s4 = inlined_call_operand.vmem [shape: bf16[24,128], index: 4, kind: input, shape index: {}]   ;;  %s194_s5 = inlined_call_operand.vmem [shape: bf16[24,128], index: 5, kind: output, shape index: {}]  }
   0x1   :  { %v20_v0 = vld [vmem:[%s189_s1] sm:$0x3]  ;;  %v34_v8 = vunpack.c.l.s4 %v131_v7  ;;  %v55_v18 = vld [vmem:[%s190_s0 + $0x8] sm:$0xf] }
   0x2   :  { %v22_v1 = vmul.f32 0.055555556, %v20_v0  ;;  %v37_v11 = vshrl.u32 %v36_v9, 7  ;;  %v29_v16 = vld [vmem:[%s191_s2] sm:$0x1]  ;;  %v58_v24 = vunpack.c.l.bf16 %v55_v18 }
   0x3   :  { %v35_v10 = vunpack.c.0.s8 %v34_v8  ;;  %v116_v17 = vld [vmem:[%s190_s0] sm:$0xff]   ;;  %v79_v29 = vld [vmem:[%s193_s4 + $0x8] sm:$0xf] }
   0x4   :  { %v23_v2 = vmul.f32 %v22_v1, %v22_v1  ;;  %v62_v20 = vsub.s32 0, %v37_v11  ;;  %v117_v22 = vunpack.c.l.bf16 %v116_v17  ;;  %v118_v23 = vunpack.c.h.bf16 %v116_v17  ;;  %v50_v25 = vld [vmem:[%s192_s3] sm:$0x1] }
   0x5   :  { %v38_v12 = vsub.s32 %v35_v10, %v37_v11  ;;  %v120_v28 = vld [vmem:[%s193_s4] sm:$0xff]   ;;  %v82_v37 = vunpack.c.l.bf16 %v79_v29 }
   0x6   :  { %v25_v3 = vrot.slane %v23_v2, 7  ;;  %v121_v35 = vunpack.c.l.bf16 %v120_v28  ;;  %v122_v36 = vunpack.c.h.bf16 %v120_v28 }
   0x8   :  { %v27_v4 = vsub.f32 %v22_v1, %v25_v3 }
   0xa   :  { %v28_v5 = vmax.f32 %v27_v4, 0.0 }
   0xc   :  { %v30_v6 = vadd.f32 1e-05, %v28_v5 }
   0xe   :  { %129 = vrsqrt.f32 %v30_v6 }
  0x18   :  { %v130_v13 = vpop.eup %129 }
  0x19   :  { %v39_v14 = vrot.slane %v130_v13, %v38_v12 }
  0x1b   :  { %v40_v15 = vcombine.high %v39_v14, %v39_v14 }
  0x1d   :  { %v47_v19 = vrot.slane %v40_v15, %v38_v12 }
  0x1f   :  { %v49_v21 = vmul.f32 %v47_v19, %v29_v16 }
  0x21   :  { %v51_v26 = vmul.f32 %v49_v21, %v22_v1  ;;  %v63_v27 = vrot.slane %v49_v21, %v62_v20 }
  0x23   :  { %v52_v30 = vsub.f32 %v50_v25, %v51_v26  ;;  %v65_v31 = vmul.f32 %v117_v22, %v63_v27  ;;  %v66_v32 = vmul.f32 %v118_v23, %v63_v27  ;;  %v67_v33 = vmul.f32 %v63_v27, %v58_v24 }
  0x25   :  { %v72_v34 = vrot.slane %v52_v30, %v62_v20 }
  0x27   :  { %v74_v38 = vadd.f32 %v72_v34, %v65_v31  ;;  %v75_v39 = vadd.f32 %v72_v34, %v66_v32  ;;  %v76_v40 = vadd.f32 %v72_v34, %v67_v33 }
  0x29   :  { %v83_v41 = vadd.f32 %v121_v35, %v74_v38  ;;  %v84_v42 = vadd.f32 %v122_v36, %v75_v39  ;;  %v85_v43 = vadd.f32 %v82_v37, %v76_v40 }
  0x2b   :  { %v86_v44 = vmax.f32 %v83_v41, 0.0  ;;  %v87_v45 = vmax.f32 %v84_v42, 0.0  ;;  %v88_v46 = vmax.f32 %v85_v43, 0.0 }
  0x2d   :  { %v126_v47 = vpack.c.bf16 %v87_v45, %v86_v44  ;;  %v114_v48 = vpack.c.bf16 %v88_v46, %v88_v46 }
  0x2f   :  { %127 = vst [vmem:[%s194_s5] sm:$0xff] %v126_v47   ;;  %104 = vst [vmem:[%s194_s5 + $0x8] sm:$0xf] %v114_v48 }

// kernel: _lambda_.43
= control target key start
LH: loop header
LB: loop body
LE: loop exit
PB: predicated region body
PF: predicated region fallthrough
CT: control target
= control target key end

     0   :  { %v108_v7 = vmov 1966171168   ;;  %v33_v9 = vlaneseq  ;;  %v109_v12 = vmov 857870592   ;;  %s150_s1 = inlined_call_operand.vmem [shape: f32[1,2,256], index: 1, kind: input, shape index: {}]   ;;  %s151_s2 = inlined_call_operand.vmem [shape: f32[1,256], index: 2, kind: input, shape index: {}]   ;;  %s152_s0 = inlined_call_operand.vmem [shape: bf16[8,256], index: 0, kind: input, shape index: {}]   ;;  %s153_s3 = inlined_call_operand.vmem [shape: f32[1,256], index: 3, kind: input, shape index: {}]   ;;  %s154_s4 = inlined_call_operand.vmem [shape: bf16[8,256], index: 4, kind: output, shape index: {}]  }
   0x1   :  { %v17_v0 = vld [vmem:[%s150_s1] sm:$0xf]  ;;  %v31_v8 = vunpack.c.l.s4 %v108_v7  ;;  %v43_v13 = vunpack.c.l.s4 %v109_v12 }
   0x2   :  { %v19_v1 = vmul.f32 0.125, %v17_v0  ;;  %v34_v11 = vshrl.u32 %v33_v9, 7  ;;  %v26_v18 = vld [vmem:[%s151_s2] sm:$0x3] }
   0x3   :  { %v32_v10 = vunpack.c.0.s8 %v31_v8  ;;  %v44_v15 = vunpack.c.0.s8 %v43_v13  ;;  %v61_v22 = vld [vmem:[%s152_s0] sm:$0xff] }
   0x4   :  { %v20_v2 = vmul.f32 %v19_v1, %v19_v1  ;;  %v66_v23 = vsub.s32 0, %v34_v11  ;;  %v70_v24 = vsub.s32 1, %v34_v11  ;;  %v62_v26 = vunpack.c.l.bf16 %v61_v22  ;;  %v40_v31 = vld [vmem:[%s153_s3] sm:$0x3] }
   0x5   :  { %v35_v14 = vsub.s32 %v32_v10, %v34_v11  ;;  %v47_v20 = vsub.s32 %v44_v15, %v34_v11  ;;  %v63_v28 = vunpack.c.h.bf16 %v61_v22 }
   0x6   :  { %v22_v3 = vrot.slane %v20_v2, 7 }
   0x8   :  { %v24_v4 = vsub.f32 %v19_v1, %v22_v3 }
   0xa   :  { %v25_v5 = vmax.f32 %v24_v4, 0.0 }
   0xc   :  { %v27_v6 = vadd.f32 1e-05, %v25_v5 }
   0xe   :  { %106 = vrsqrt.f32 %v27_v6 }
  0x18   :  { %v107_v16 = vpop.eup %106 }
  0x19   :  { %v36_v17 = vrot.slane %v107_v16, %v35_v14 }
  0x1b   :  { %v37_v19 = vcombine.high %v36_v17, %v36_v17 }
  0x1d   :  { %v39_v21 = vmul.f32 %v37_v19, %v26_v18 }
  0x1f   :  { %v48_v25 = vrot.slane %v39_v21, %v47_v20  ;;  %v67_v29 = vrot.slane %v39_v21, %v66_v23  ;;  %v71_v30 = vrot.slane %v39_v21, %v70_v24 }
  0x21   :  { %v50_v27 = vmul.f32 %v48_v25, %v19_v1  ;;  %v74_v34 = vmul.f32 %v67_v29, %v62_v26  ;;  %v75_v35 = vmul.f32 %v71_v30, %v63_v28 }
  0x23   :  { %v58_v32 = vrot.slane %v50_v27, %v35_v14 }
  0x25   :  { %v60_v33 = vsub.f32 %v40_v31, %v58_v32 }
  0x27   :  { %v80_v36 = vrot.slane %v60_v33, %v66_v23  ;;  %v84_v37 = vrot.slane %v60_v33, %v70_v24 }
  0x29   :  { %v87_v38 = vadd.f32 %v80_v36, %v74_v34  ;;  %v88_v39 = vadd.f32 %v84_v37, %v75_v35 }
  0x2b   :  { %v103_v40 = vpack.c.bf16 %v88_v39, %v87_v38 }
  0x2d   :  { %97 = vst [vmem:[%s154_s4] sm:$0xff] %v103_v40 }

// kernel: _lambda_.38
= control target key start
LH: loop header
LB: loop body
LE: loop exit
PB: predicated region body
PF: predicated region fallthrough
CT: control target
= control target key end

     0   :  { %s1078_s12 = smov 0   ;;  %s1080_s13 = smov 0   ;;  %s1188_s0 = inlined_call_operand.vmem [shape: bf16[24,1152], index: 0, kind: input, shape index: {}]   ;;  %s1189_s1 = inlined_call_operand.vmem [shape: bf16[1152,128], index: 1, kind: input, shape index: {}]   ;;  %s1190_s2 = inlined_call_operand.vmem [shape: bf16[24,128], index: 2, kind: output, shape index: {0}]   ;;  %s1191_s3 = inlined_call_operand.vmem [shape: f32[1,2,128], index: 3, kind: output, shape index: {1}]  }
   0x1   :  { %s1082_s14 = smov 0   ;;  %s1084_s15 = smov 0  }
   0x2   :  { %s1086_s16 = smov 0  }
   0x3 LB: > { %s26_s17 = sadd.s32 1, %s1052_s15  ;;  %p49_p1 = scmp.ne.s32.totalorder %s1044_s13, %s1040_s12  ;;  %s1056_s16 = sphi %s1086_s16, %s14_s16   ;;  %s1052_s15 = sphi %s1084_s15, %s1195_s15   ;;  %s1048_s14 = sphi %s1082_s14, %s1194_s14   ;;  %s1044_s13 = sphi %s1080_s13, %s1193_s13   ;;  %s1040_s12 = sphi %s1078_s12, %s1192_s12  }
   0x4   : > { %p27_p0 = scmp.ge.s32.totalorder %s26_s17, 3  ;;  %p50_p2 = scmp.eq.s32.totalorder %s1056_s16, 0 }
   0x5   : > { %s42_s19 = sadd.s32 1, %s1044_s13  ;;  %p827_p5 = scmp.ge.s32.totalorder %s1056_s16, 3 }
   0x6   : > { %s1197_s17 = smov (%p27_p0, %s26_s17), 0  ;;  %p51_p3 = por %p50_p2, %p49_p1 }
   0x7   : > { %s38_s18 = ssub.s32 %s1052_s15, %s1197_s17  ;;  %159 = sbr.rel (%p827_p5) target bundleno = 22 (0x16), region = 16 }
   0x8   : > { %p40_p4 = scmp.eq.s32.totalorder %s38_s18, 0 }
   0xa   : > { %s1113_s20 = scalar_select %p40_p4, %s1044_s13, %s42_s19  }
   0xe   : > { %162 = sbr.rel (!%p51_p3) target bundleno = 22 (0x16), region = 20  ;;  %s164_s21 = sand.u32 (%p51_p3), 1, %s1044_s13  }
   0xf   : > { %s878_s22 = smul.u32 (%p51_p3), 12, %s1052_s15 }
  0x10   : > { %s945_s23 = smul.u32 (%p51_p3), 36, %s164_s21 }
  0x11   : > { %s172_s26 = scalar_lea.vmem (%p51_p3), %s1188_s0, %s878_s22 }
  0x12   : > { %v187_v0 = vld [vmem:[%s172_s26] sm:$0xff] (%p51_p3)  ;;  %v191_v2 = vld [vmem:[%s172_s26 + $0x48] sm:$0xff] (%p51_p3)  ;;  %s166_s27 = scalar_lea.vmem (%p51_p3), [#allocation3], %s945_s23  ;;  %v833_v5 = vld [vmem:[%s172_s26 + $0x50] sm:$0xf] (%p51_p3) }
  0x13   : > { %v189_v1 = vld [vmem:[%s172_s26 + $0x24] sm:$0xff] (%p51_p3)  ;;  %188 = vst [vmem:[%s166_s27] sm:$0xff] (%p51_p3), %v187_v0  ;;  %192 = vst [vmem:[%s166_s27 + $0x18] sm:$0xff] (%p51_p3), %v191_v2  ;;  %v831_v4 = vld [vmem:[%s172_s26 + $0x2c] sm:$0xf] (%p51_p3) }
  0x14   : > { %190 = vst [vmem:[%s166_s27 + $0xc] sm:$0xff] (%p51_p3), %v189_v1  ;;  %v829_v3 = vld [vmem:[%s172_s26 + $0x8] sm:$0xf] (%p51_p3)  ;;  %832 = vst [vmem:[%s166_s27 + $0x14] sm:$0xf] (%p51_p3), %v831_v4 }
  0x15   : > { %830 = vst [vmem:[%s166_s27 + $0x8] sm:$0xf] %v829_v3  ;;  %834 = vst [vmem:[%s166_s27 + $0x20] sm:$0xf] %v833_v5 }
  0x16 PF: > { %p835_p6 = scmp.ge.s32.totalorder %s1056_s16, 1  ;;  %p222_p7 = scmp.lt.s32.totalorder %s1056_s16, 4 }
  0x18   : > { %p223_p8 = pnand %p835_p6, %p222_p7 }
  0x19   : > { %s272_s28 = smul.u32 (!%p223_p8), 48, %s1048_s14  ;;  %s229_s29 = sand.u32 (!%p223_p8), 1, %s1040_s12  }
  0x1a   : > { %226 = sbr.rel (%p223_p8) target bundleno = 330 (0x14a), region = 50  ;;  %p867_p10 = scmp.ne.s32.totalorder (!%p223_p8), %s1048_s14, 0 }
  0x1b   : > { %s946_s30 = smul.u32 (!%p223_p8), 36, %s229_s29  ;;  %p273_p9 = scmp.lt.s32.totalorder (!%p223_p8), %s272_s28, 143 }
  0x1d   : > { %s1125_s4 = scalar_lea.vmem (!%p223_p8), [#allocation3], %s946_s30 }
  0x1e   : > { %v1013_v6 = vld [vmem:[%s1125_s4 + $0x4] ss:$12 sps:$4 sm:$0xff] (!%p223_p8)   ;;  %v1014_v7 = vld [vmem:[%s1125_s4 + $0x8] ss:$12 sps:$4 sm:$0xff] (!%p223_p8)   ;;  %v302_v32 = vld [vmem:[%s1125_s4 + $0x18] sm:$0xff] (!%p223_p8) }
  0x1f   : > { %555 = vmatprep.mubr.bf16.mxu0 (!%p223_p8), %v1013_v6  ;;  %941 = vmatprep.mubr.bf16.mxu1 (!%p223_p8), %v1014_v7  ;;  %v1011_v33 = vld [vmem:[%s1125_s4] ss:$12 sps:$4 sm:$0xff] (!%p223_p8)   ;;  %v841_v34 = vcombine.high (!%p223_p8), %v302_v32, %v302_v32  ;;  %v840_v36 = vcombine.low (!%p223_p8), %v302_v32, %v302_v32 }
  0x20   : > { %v1015_v35 = vld [vmem:[%s1125_s4 + $0x20] ss:$0 sps:$4 sm:$0xff] (!%p223_p8)  }
  0x21   : > { %s1199_s28 = smov (!%p273_p9, %s272_s28), 143 }
  0x22   : > { %s836_s5 = sshll.u32 %s1199_s28, 2 }
  0x23   : > { %s1132_s8 = scalar_lea.vmem %s1189_s1, %s836_s5 }
  0x24   : > { %v987_v8 = vld [vmem:[%s1132_s8 + $0x40] sm:$0xff]   ;;  %v990_v11 = vld [vmem:[%s1132_s8 + $0x48] sm:$0xff]   ;;  %v993_v14 = vld [vmem:[%s1132_s8 + $0x50] sm:$0xff]  }
  0x25   : > { %v988_v9 = vld [vmem:[%s1132_s8] sm:$0xff]   ;;  %887 = vmatprep.subr.bf16.mxu0 %v987_v8  ;;  %v991_v12 = vld [vmem:[%s1132_s8 + $0x8] sm:$0xff]   ;;  %v994_v15 = vld [vmem:[%s1132_s8 + $0x10] sm:$0xff]  }
  0x26   : > { %v989_v10 = vld [vmem:[%s1132_s8 + $0x80] sm:$0xff]   ;;  %888 = vmatpush3.bf16.msra.mxu0 %v988_v9  ;;  %v992_v13 = vld [vmem:[%s1132_s8 + $0x88] sm:$0xff]   ;;  %v995_v16 = vld [vmem:[%s1132_s8 + $0x90] sm:$0xff]  }
  0x27   : > { %925 = vmatprep.subr.bf16.mxu1 %v989_v10  ;;  %889 = vmatprep.subr.bf16.mxu0 %v990_v11  ;;  %v996_v17 = vld [vmem:[%s1132_s8 + $0x58] sm:$0xff]   ;;  %v999_v20 = vld [vmem:[%s1132_s8 + $0x60] sm:$0xff]   ;;  %v1002_v23 = vld [vmem:[%s1132_s8 + $0x68] sm:$0xff]  }
  0x28   : > { %926 = vmatpush3.bf16.msra.mxu1 %v989_v10  ;;  %v997_v18 = vld [vmem:[%s1132_s8 + $0x18] sm:$0xff]   ;;  %v1001_v21 = vld [vmem:[%s1132_s8 + $0xa0] sm:$0xff]   ;;  %v1004_v24 = vld [vmem:[%s1132_s8 + $0xa8] sm:$0xff]  }
  0x29   : > { %927 = vmatprep.subr.bf16.mxu1 %v992_v13  ;;  %v998_v19 = vld [vmem:[%s1132_s8 + $0x98] sm:$0xff]   ;;  %v1000_v22 = vld [vmem:[%s1132_s8 + $0x20] sm:$0xff]   ;;  %v1003_v25 = vld [vmem:[%s1132_s8 + $0x28] sm:$0xff]  }
  0x2a   : > { %890 = vmatpush3.bf16.msra.mxu0 %v991_v12  ;;  %v1005_v26 = vld [vmem:[%s1132_s8 + $0x70] sm:$0xff]   ;;  %v1008_v29 = vld [vmem:[%s1132_s8 + $0x78] sm:$0xff]  }
  0x2b   : > { %891 = vmatprep.subr.bf16.mxu0 %v993_v14  ;;  %v1007_v27 = vld [vmem:[%s1132_s8 + $0xb0] sm:$0xff]   ;;  %v1010_v30 = vld [vmem:[%s1132_s8 + $0xb8] sm:$0xff]  }
  0x2c   : > { %928 = vmatpush3.bf16.msra.mxu1 %v992_v13  ;;  %v1006_v28 = vld [vmem:[%s1132_s8 + $0x30] sm:$0xff]   ;;  %v1009_v31 = vld [vmem:[%s1132_s8 + $0x38] sm:$0xff]  }
  0x2d   : > { %929 = vmatprep.subr.bf16.mxu1 %v995_v16 }
  0x2e   : > { %892 = vmatpush3.bf16.msra.mxu0 %v994_v15 }
  0x2f   : > { %893 = vmatprep.subr.bf16.mxu0 %v996_v17 }
  0x30   : > { %930 = vmatpush3.bf16.msra.mxu1 %v995_v16 }
  0x31   : > { %931 = vmatprep.subr.bf16.mxu1 %v998_v19 }
  0x32   : > { %894 = vmatpush3.bf16.msra.mxu0 %v997_v18 }
  0x33   : > { %895 = vmatprep.subr.bf16.mxu0 %v999_v20 }
  0x34   : > { %932 = vmatpush3.bf16.msra.mxu1 %v998_v19 }
  0x35   : > { %933 = vmatprep.subr.bf16.mxu1 %v1001_v21 }
  0x36   : > { %896 = vmatpush3.bf16.msra.mxu0 %v1000_v22 }
  0x37   : > { %897 = vmatprep.subr.bf16.mxu0 %v1002_v23 }
  0x38   : > { %934 = vmatpush3.bf16.msra.mxu1 %v1001_v21 }
  0x39   : > { %935 = vmatprep.subr.bf16.mxu1 %v1004_v24 }
  0x3a   : > { %898 = vmatpush3.bf16.msra.mxu0 %v1003_v25 }
  0x3b   : > { %899 = vmatprep.subr.bf16.mxu0 %v1005_v26 }
  0x3c   : > { %936 = vmatpush3.bf16.msra.mxu1 %v1004_v24 }
  0x3d   : > { %937 = vmatprep.subr.bf16.mxu1 %v1007_v27 }
  0x3e   : > { %900 = vmatpush3.bf16.msra.mxu0 %v1006_v28 }
  0x3f   : > { %901 = vmatprep.subr.bf16.mxu0 %v1008_v29 }
  0x40   : > { %938 = vmatpush3.bf16.msra.mxu1 %v1007_v27 }
  0x41   : > { %939 = vmatprep.subr.bf16.mxu1 %v1010_v30 }
  0x42   : > { %902 = vmatpush3.bf16.msra.mxu0 %v1009_v31 }
  0x44   : > { %940 = vmatpush3.bf16.msra.mxu1 %v1010_v30 }
  0x45   : > { %556 = vmatmul.mubr.bf16.vlgmr.msra.gmra.mrb[0].mxu0 %v1011_v33 }
  0x46   : > { %563 = vmatprep.mubr.bf16.mxu0 %v841_v34 }
  0x47   : > { %942 = vmatmul.mubr.bf16.vlgmr.msra.gmra.mrb[0].mxu1 %v1015_v35 }
  0x4d   : > { %564 = vmatmul.mubr.bf16.gmra.mrb[4].mxu0 %v840_v36 }
 0x118   : > { %v903_v37 = vpop.f32.mrb[0].mxu0 }
 0x119   : > { %v904_v38 = vpop.f32.mrb[1].mxu0 }
 0x11a   : > { %v905_v39 = vadd.f32 %v904_v38, %v903_v37  ;;  %v906_v40 = vpop.f32.mrb[2].mxu0  ;;  %v943_v41 = vpop.f32.mrb[0].mxu1 }
 0x11b   : > { %v907_v42 = vpop.f32.mrb[3].mxu0  ;;  %v605_v43 = vpop.f32.mrb[1].mxu1 }
 0x11c   : > { %v908_v44 = vadd.f32 %v907_v42, %v906_v40  ;;  %v606_v45 = vadd.f32 %v905_v39, %v605_v43  ;;  %v944_v46 = vpop.f32.mrb[2].mxu1 }
 0x11d   : > { %v608_v47 = vpop.f32.mrb[3].mxu1 }
 0x11e   : > { %v609_v48 = vadd.f32 %v908_v44, %v608_v47  ;;  %622 = sbr.rel (%p867_p10) target bundleno = 295 (0x127), region = 58  ;;  %623 = vst [vmem:[#allocation2] sm:$0xff] (!%p867_p10), %v606_v45 }
 0x120   : > { %v909_v49 = vpop.f32.mrb[4].mxu0  ;;  %624 = vst [vmem:[#allocation2 + $0x8] sm:$0xff] (!%p867_p10), %v609_v48 }
 0x121   : > { %v910_v50 = vpop.f32.mrb[5].mxu0 }
 0x122   : > { %v911_v51 = vadd.f32 %v910_v50, %v909_v49  ;;  %v912_v52 = vpop.f32.mrb[6].mxu0 }
 0x123   : > { %v913_v53 = vpop.f32.mrb[7].mxu0 }
 0x124   : > { %v614_v54 = vadd.f32 %v943_v41, %v911_v51 }
 0x126   : > { %625 = vst [vmem:[#allocation2 + $0x10] sm:$0xff] %v614_v54 }
 0x127 PF: > { %p868_p11 = scmp.le.s32.totalorder %s1048_s14, 0 }
 0x128   : > { %v630_v55 = vld [vmem:[#allocation2] sm:$0xff] (!%p868_p11) }
 0x129   : > { %629 = sbr.rel (%p868_p11) target bundleno = 305 (0x131), region = 62  ;;  %v631_v56 = vld [vmem:[#allocation2 + $0x8] sm:$0xff] (!%p868_p11)  ;;  %v633_v58 = vadd.f32 (!%p868_p11), %v630_v55, %v606_v45 }
 0x12a   : > { %v634_v59 = vadd.f32 (!%p868_p11), %v631_v56, %v609_v48 }
 0x12b   : > { %636 = vst [vmem:[#allocation2] sm:$0xff] (!%p868_p11), %v633_v58 }
 0x12c   : > { %637 = vst [vmem:[#allocation2 + $0x8] sm:$0xff] (!%p868_p11), %v634_v59 }
 0x12d   : > { %v632_v57 = vld [vmem:[#allocation2 + $0x10] sm:$0xff] (!%p868_p11) }
 0x12e   : > { %v635_v60 = vadd.f32 (!%p868_p11), %v632_v57, %v614_v54 }
 0x130   : > { %638 = vst [vmem:[#allocation2 + $0x10] sm:$0xff] %v635_v60 }
 0x131 PF: > { %p869_p12 = scmp.ne.s32.totalorder %s1048_s14, 2 }
 0x132   : > { %vm681_vm0 = vcmask (!%p869_p12), 1040384  }
 0x133   : > { %642 = sbr.rel (%p869_p12) target bundleno = 330 (0x14a), region = 66  ;;  %v643_v61 = vld [vmem:[#allocation2] sm:$0xff] (!%p869_p12) }
 0x134   : > { %v644_v62 = vld [vmem:[#allocation2 + $0x8] sm:$0xff] (!%p869_p12)  ;;  %v670_v2 = vmul.f32 (!%p869_p12), %v643_v61, %v643_v61 }
 0x135   : > { %v885_v0 = vpack.c.bf16 (!%p869_p12), %v644_v62, %v643_v61  ;;  %v662_v1 = vadd.f32 (!%p869_p12), %v644_v62, %v643_v61  ;;  %v671_v3 = vmul.f32 (!%p869_p12), %v644_v62, %v644_v62 }
 0x137   : > { %v645_v63 = vld [vmem:[#allocation2 + $0x10] sm:$0xff] (!%p869_p12)  ;;  %886 = vst [vmem:[%s1190_s2] sm:$0xff] (!%p869_p12), %v885_v0   ;;  %v673_v6 = vadd.f32 (!%p869_p12), %v671_v3, %v670_v2 }
 0x138   : > { %v881_v4 = vpack.c.bf16 (!%p869_p12), %v645_v63, %v645_v63  ;;  %v672_v5 = vmul.f32 (!%p869_p12), %v645_v63, %v645_v63  ;;  %v663_v7 = vadd.f32 (!%p869_p12), %v662_v1, %v645_v63 }
 0x13a   : > { %661 = vst [vmem:[%s1190_s2 + $0x8] sm:$0xf] %v881_v4  ;;  %v664_v8 = vrot.slane %v663_v7, 4  ;;  %v674_v9 = vadd.f32 %v673_v6, %v672_v5 }
 0x13c   : > { %v665_v10 = vadd.f32 %v664_v8, %v663_v7  ;;  %v675_v11 = vrot.slane %v674_v9, 4 }
 0x13e   : > { %v666_v12 = vrot.slane %v665_v10, 2  ;;  %v676_v13 = vadd.f32 %v675_v11, %v674_v9 }
 0x140   : > { %v667_v14 = vadd.f32 %v666_v12, %v665_v10  ;;  %v677_v15 = vrot.slane %v676_v13, 2 }
 0x142   : > { %v668_v16 = vrot.slane %v667_v14, 1  ;;  %v678_v17 = vadd.f32 %v677_v15, %v676_v13 }
 0x144   : > { %v669_v18 = vadd.f32 %v668_v16, %v667_v14  ;;  %v679_v19 = vrot.slane %v678_v17, 1 }
 0x146   : > { %v680_v20 = vadd.f32 %v679_v19, %v678_v17 }
 0x148   : > { %v682_v21 = vsel %vm681_vm0, %v669_v18, %v680_v20 }
 0x149   : > { %683 = vst [vmem:[%s1191_s3] sm:$0x3] %v682_v21 }
 0x14a PF: > { %s14_s16 = sadd.s32 1, %s1056_s16   ;;  %s1192_s12 = smov %s1044_s13 }
 0x14b   : > { %p11_p13 = scmp.ge.s32.totalorder %s14_s16, 5   ;;  %s1193_s13 = smov %s1113_s20 }
 0x14c   : > { %s1194_s14 = smov %s1052_s15  ;;  %s1195_s15 = smov %s1197_s17 }
 0x14d   :  { %13 = sbr.rel (!%p11_p13) target bundleno = 3 (0x3), region = 122 }

// kernel: _lambda_.42
= control target key start
LH: loop header
LB: loop body
LE: loop exit
PB: predicated region body
PF: predicated region fallthrough
CT: control target
= control target key end

     0   :  { %v275_v1 = vmov 0   ;;  %vm208_vm0 = vcmask 1040384   ;;  %s353_s1 = inlined_call_operand.vmem [shape: bf16[128,256], index: 1, kind: input, shape index: {}]   ;;  %s354_s0 = inlined_call_operand.vmem [shape: bf16[8,128], index: 0, kind: input, shape index: {}]   ;;  %s355_s2 = inlined_call_operand.vmem [shape: bf16[8,256], index: 2, kind: output, shape index: {0}]   ;;  %s356_s3 = inlined_call_operand.vmem [shape: f32[1,2,256], index: 3, kind: output, shape index: {1}]  }
   0x1   :  { %v251_v0 = vld [vmem:[%s353_s1 + $0x4] ss:$8 sps:$4 sm:$0xff]   ;;  %143 = vmatprep.mubr.bf16.mxu0 %v275_v1  ;;  %v253_v2 = vld [vmem:[%s353_s1] ss:$8 sps:$4 sm:$0xff]   ;;  %v254_v3 = vld [vmem:[%s353_s1 + $0x14] ss:$8 sps:$4 sm:$0xff]  }
   0x2   :  { %111 = vmatprep.subr.bf16.mxu0 %v251_v0  ;;  %v256_v4 = vld [vmem:[%s353_s1 + $0x10] ss:$8 sps:$4 sm:$0xff]   ;;  %v257_v5 = vld [vmem:[%s353_s1 + $0x24] ss:$8 sps:$4 sm:$0xff]   ;;  %v259_v6 = vld [vmem:[%s353_s1 + $0x20] ss:$8 sps:$4 sm:$0xff]  }
   0x3   :  { %112 = vmatpush1.bf16.msra.mxu0 %v253_v2  ;;  %v260_v7 = vld [vmem:[%s353_s1 + $0x34] ss:$8 sps:$4 sm:$0xff]   ;;  %v262_v8 = vld [vmem:[%s353_s1 + $0x30] ss:$8 sps:$4 sm:$0xff]   ;;  %v263_v9 = vld [vmem:[%s353_s1 + $0x44] ss:$8 sps:$4 sm:$0xff]  }
   0x4   :  { %113 = vmatprep.subr.bf16.mxu0 %v254_v3  ;;  %v265_v10 = vld [vmem:[%s353_s1 + $0x40] ss:$8 sps:$4 sm:$0xff]   ;;  %v266_v11 = vld [vmem:[%s353_s1 + $0x54] ss:$8 sps:$4 sm:$0xff]   ;;  %v268_v12 = vld [vmem:[%s353_s1 + $0x50] ss:$8 sps:$4 sm:$0xff]  }
   0x5   :  { %v269_v13 = vld [vmem:[%s353_s1 + $0x64] ss:$8 sps:$4 sm:$0xff]   ;;  %v271_v14 = vld [vmem:[%s353_s1 + $0x60] ss:$8 sps:$4 sm:$0xff]   ;;  %v272_v15 = vld [vmem:[%s353_s1 + $0x74] ss:$8 sps:$4 sm:$0xff]  }
   0x6   :  { %v274_v16 = vld [vmem:[%s353_s1 + $0x70] ss:$8 sps:$4 sm:$0xff]   ;;  %v14_v17 = vld [vmem:[%s354_s0] sm:$0xf] }
   0x7   :  { %114 = vmatpush1.bf16.msra.mxu0 %v256_v4 }
   0x8   :  { %115 = vmatprep.subr.bf16.mxu0 %v257_v5 }
   0xb   :  { %116 = vmatpush1.bf16.msra.mxu0 %v259_v6 }
   0xc   :  { %117 = vmatprep.subr.bf16.mxu0 %v260_v7 }
   0xf   :  { %118 = vmatpush1.bf16.msra.mxu0 %v262_v8 }
  0x10   :  { %119 = vmatprep.subr.bf16.mxu0 %v263_v9 }
  0x13   :  { %120 = vmatpush1.bf16.msra.mxu0 %v265_v10 }
  0x14   :  { %121 = vmatprep.subr.bf16.mxu0 %v266_v11 }
  0x17   :  { %122 = vmatpush1.bf16.msra.mxu0 %v268_v12 }
  0x18   :  { %123 = vmatprep.subr.bf16.mxu0 %v269_v13 }
  0x1b   :  { %124 = vmatpush1.bf16.msra.mxu0 %v271_v14 }
  0x1c   :  { %125 = vmatprep.subr.bf16.mxu0 %v272_v15 }
  0x1f   :  { %126 = vmatpush1.bf16.msra.mxu0 %v274_v16 }
  0x22   :  { %144 = vmatmul.mubr.bf16.vlgmr.msra.gmra.mrb[0].mxu0 %v14_v17 }
  0xf5   :  { %v145_v18 = vpop.f32.mrb[0].mxu0 }
  0xf6   :  { %v182_v19 = vrot.slane %v145_v18, 4  ;;  %v194_v20 = vmul.f32 %v145_v18, %v145_v18  ;;  %v147_v21 = vpop.f32.mrb[1].mxu0 }
  0xf7   :  { %v249_v22 = vpack.c.bf16 %v147_v21, %v145_v18  ;;  %v188_v23 = vrot.slane %v147_v21, 4  ;;  %v195_v24 = vmul.f32 %v147_v21, %v147_v21  ;;  %v149_v25 = vpop.f32.mrb[2].mxu0 }
  0xf8   :  { %v183_v26 = vadd.f32 %v182_v19, %v145_v18  ;;  %v196_v27 = vrot.slane %v194_v20, 4  ;;  %v150_v28 = vpop.f32.mrb[3].mxu0 }
  0xf9   :  { %181 = vst [vmem:[%s355_s2] sm:$0xff] %v249_v22  ;;  %v189_v29 = vadd.f32 %v188_v23, %v147_v21  ;;  %v202_v30 = vrot.slane %v195_v24, 4 }
  0xfa   :  { %v184_v31 = vrot.slane %v183_v26, 2  ;;  %v197_v32 = vadd.f32 %v196_v27, %v194_v20 }
  0xfb   :  { %v190_v33 = vrot.slane %v189_v29, 2  ;;  %v203_v34 = vadd.f32 %v202_v30, %v195_v24 }
  0xfc   :  { %v185_v35 = vadd.f32 %v184_v31, %v183_v26  ;;  %v198_v36 = vrot.slane %v197_v32, 2 }
  0xfd   :  { %v191_v37 = vadd.f32 %v190_v33, %v189_v29  ;;  %v204_v38 = vrot.slane %v203_v34, 2 }
  0xfe   :  { %v186_v39 = vrot.slane %v185_v35, 1  ;;  %v199_v40 = vadd.f32 %v198_v36, %v197_v32 }
  0xff   :  { %v192_v41 = vrot.slane %v191_v37, 1  ;;  %v205_v42 = vadd.f32 %v204_v38, %v203_v34 }
 0x100   :  { %v200_v43 = vrot.slane %v199_v40, 1  ;;  %v187_v45 = vadd.f32 %v186_v39, %v185_v35 }
 0x101   :  { %v206_v44 = vrot.slane %v205_v42, 1  ;;  %v193_v47 = vadd.f32 %v192_v41, %v191_v37 }
 0x102   :  { %v201_v46 = vadd.f32 %v200_v43, %v199_v40 }
 0x103   :  { %v207_v48 = vadd.f32 %v206_v44, %v205_v42 }
 0x104   :  { %v209_v49 = vsel %vm208_vm0, %v187_v45, %v201_v46 }
 0x105   :  { %v210_v50 = vsel %vm208_vm0, %v193_v47, %v207_v48 }
 0x106   :  { %v213_v51 = vcombine.low %v209_v49, %v210_v50 }
 0x108   :  { %248 = vst.sshfl [vmem:[%s356_s3] sm:$0x33 pattern:$0x76325410] %v213_v51 }

// kernel: _lambda_.40
= control target key start
LH: loop header
LB: loop body
LE: loop exit
PB: predicated region body
PF: predicated region fallthrough
CT: control target
= control target key end

     0   :  { %s1108_s12 = smov 0   ;;  %s1110_s13 = smov 0   ;;  %s1204_s0 = inlined_call_operand.vmem [shape: bf16[8,1152], index: 0, kind: input, shape index: {}]   ;;  %s1205_s1 = inlined_call_operand.vmem [shape: bf16[1152,256], index: 1, kind: input, shape index: {}]   ;;  %s1206_s2 = inlined_call_operand.vmem [shape: bf16[8,256], index: 2, kind: output, shape index: {0}]   ;;  %s1207_s3 = inlined_call_operand.vmem [shape: f32[1,2,256], index: 3, kind: output, shape index: {1}]  }
   0x1   :  { %s1112_s14 = smov 0  }
   0x2 LB: > { %s26_s15 = sadd.s32 1, %s1081_s13  ;;  %p893_p0 = scmp.ge.s32.totalorder %s1085_s14, 1  ;;  %s1085_s14 = sphi %s1112_s14, %s14_s14   ;;  %s1081_s13 = sphi %s1110_s13, %s1209_s13   ;;  %s1077_s12 = sphi %s1108_s12, %s1208_s12  }
   0x3   : > { %p27_p1 = scmp.ge.s32.totalorder %s26_s15, 3  ;;  %p189_p2 = scmp.lt.s32.totalorder %s1085_s14, 4 }
   0x5   : > { %s1211_s15 = smov (%p27_p1, %s26_s15), 0  ;;  %p190_p3 = pnand %p893_p0, %p189_p2 }
   0x6   : > { %s250_s16 = smul.u32 (!%p190_p3), 48, %s1077_s12  ;;  %v1087_v0 = vmov (!%p190_p3), 0   ;;  %p948_p6 = scmp.ne.s32.totalorder (!%p190_p3), %s1077_s12, 0 }
   0x7   : > { %193 = sbr.rel (%p190_p3) target bundleno = 334 (0x14e), region = 28  ;;  %657 = vmatprep.mubr.bf16.mxu0 (!%p190_p3), %v1087_v0 }
   0x8   : > { %p252_p4 = scmp.lt.s32.totalorder (!%p190_p3), %s250_s16, 143  ;;  %s240_s21 = smul.u32 (!%p190_p3), 3, %s1077_s12 }
   0xa   : > { %p243_p5 = scmp.lt.s32.totalorder (!%p190_p3), %s240_s21, 8 }
   0xe   : > { %s1213_s16 = smov (!%p252_p4, %s250_s16), 143  ;;  %s1215_s21 = smov (!%p243_p5, %s240_s21), 8 }
   0xf   : > { %s959_s17 = sshll.u32 %s1213_s16, 3  ;;  %s894_s22 = sshll.u32 %s1215_s21, 2 }
  0x10   : > { %s1132_s20 = scalar_lea.vmem %s1205_s1, %s959_s17  ;;  %s248_s25 = scalar_lea.vmem %s1204_s0, %s894_s22 }
  0x11   : > { %v988_v1 = vld [vmem:[%s1132_s20 + $0x4] ss:$8 sps:$4 sm:$0xff]   ;;  %v990_v2 = vld [vmem:[%s1132_s20] ss:$8 sps:$4 sm:$0xff]   ;;  %v991_v3 = vld [vmem:[%s1132_s20 + $0x14] ss:$8 sps:$4 sm:$0xff]  }
  0x12   : > { %584 = vmatprep.subr.bf16.mxu1 %v988_v1  ;;  %v993_v4 = vld [vmem:[%s1132_s20 + $0x10] ss:$8 sps:$4 sm:$0xff]   ;;  %v994_v5 = vld [vmem:[%s1132_s20 + $0x24] ss:$8 sps:$4 sm:$0xff]   ;;  %v996_v6 = vld [vmem:[%s1132_s20 + $0x20] ss:$8 sps:$4 sm:$0xff]  }
  0x13   : > { %585 = vmatpush1.bf16.msra.mxu1 %v990_v2  ;;  %v997_v7 = vld [vmem:[%s1132_s20 + $0x34] ss:$8 sps:$4 sm:$0xff]   ;;  %v999_v8 = vld [vmem:[%s1132_s20 + $0x30] ss:$8 sps:$4 sm:$0xff]   ;;  %v1012_v9 = vld [vmem:[%s1132_s20 + $0x104] ss:$8 sps:$4 sm:$0xff]  }
  0x14   : > { %586 = vmatprep.subr.bf16.mxu1 %v991_v3  ;;  %v1014_v10 = vld [vmem:[%s1132_s20 + $0x100] ss:$8 sps:$4 sm:$0xff]   ;;  %v1000_v11 = vld [vmem:[%s1132_s20 + $0x44] ss:$8 sps:$4 sm:$0xff]   ;;  %625 = vmatprep.subr.bf16.mxu0 %v1012_v9  ;;  %v1018_v12 = vld [vmem:[%s1132_s20 + $0x114] ss:$8 sps:$4 sm:$0xff]  }
  0x15   : > { %626 = vmatpush1.bf16.msra.mxu0 %v1014_v10  ;;  %v1020_v13 = vld [vmem:[%s1132_s20 + $0x110] ss:$8 sps:$4 sm:$0xff]   ;;  %v1002_v14 = vld [vmem:[%s1132_s20 + $0x40] ss:$8 sps:$4 sm:$0xff]   ;;  %v1003_v15 = vld [vmem:[%s1132_s20 + $0x54] ss:$8 sps:$4 sm:$0xff]  }
  0x16   : > { %627 = vmatprep.subr.bf16.mxu0 %v1018_v12  ;;  %v1024_v16 = vld [vmem:[%s1132_s20 + $0x124] ss:$8 sps:$4 sm:$0xff]   ;;  %v1026_v17 = vld [vmem:[%s1132_s20 + $0x120] ss:$8 sps:$4 sm:$0xff]   ;;  %v1005_v18 = vld [vmem:[%s1132_s20 + $0x50] ss:$8 sps:$4 sm:$0xff]  }
  0x17   : > { %587 = vmatpush1.bf16.msra.mxu1 %v993_v4  ;;  %v1030_v19 = vld [vmem:[%s1132_s20 + $0x134] ss:$8 sps:$4 sm:$0xff]   ;;  %v1006_v20 = vld [vmem:[%s1132_s20 + $0x64] ss:$8 sps:$4 sm:$0xff]   ;;  %v1032_v21 = vld [vmem:[%s1132_s20 + $0x130] ss:$8 sps:$4 sm:$0xff]  }
  0x18   : > { %588 = vmatprep.subr.bf16.mxu1 %v994_v5  ;;  %v1008_v22 = vld [vmem:[%s1132_s20 + $0x60] ss:$8 sps:$4 sm:$0xff]   ;;  %v1036_v23 = vld [vmem:[%s1132_s20 + $0x144] ss:$8 sps:$4 sm:$0xff]   ;;  %v1009_v24 = vld [vmem:[%s1132_s20 + $0x74] ss:$8 sps:$4 sm:$0xff]  }
  0x19   : > { %628 = vmatpush1.bf16.msra.mxu0 %v1020_v13  ;;  %v1038_v25 = vld [vmem:[%s1132_s20 + $0x140] ss:$8 sps:$4 sm:$0xff]   ;;  %v1011_v26 = vld [vmem:[%s1132_s20 + $0x70] ss:$8 sps:$4 sm:$0xff]   ;;  %v1042_v27 = vld [vmem:[%s1132_s20 + $0x154] ss:$8 sps:$4 sm:$0xff]  }
  0x1a   : > { %629 = vmatprep.subr.bf16.mxu0 %v1024_v16  ;;  %v1015_v28 = vld [vmem:[%s1132_s20 + $0x84] ss:$8 sps:$4 sm:$0xff]   ;;  %v1044_v29 = vld [vmem:[%s1132_s20 + $0x150] ss:$8 sps:$4 sm:$0xff]   ;;  %v1017_v30 = vld [vmem:[%s1132_s20 + $0x80] ss:$8 sps:$4 sm:$0xff]  }
  0x1b   : > { %589 = vmatpush1.bf16.msra.mxu1 %v996_v6  ;;  %v1048_v31 = vld [vmem:[%s1132_s20 + $0x164] ss:$8 sps:$4 sm:$0xff]   ;;  %v1021_v32 = vld [vmem:[%s1132_s20 + $0x94] ss:$8 sps:$4 sm:$0xff]   ;;  %v1050_v35 = vld [vmem:[%s1132_s20 + $0x160] ss:$8 sps:$4 sm:$0xff]  }
  0x1c   : > { %590 = vmatprep.subr.bf16.mxu1 %v997_v7  ;;  %v283_v33 = vld [vmem:[%s248_s25] sm:$0xff]  ;;  %v1023_v36 = vld [vmem:[%s1132_s20 + $0x90] ss:$8 sps:$4 sm:$0xff]   ;;  %v1054_v37 = vld [vmem:[%s1132_s20 + $0x174] ss:$8 sps:$4 sm:$0xff]  }
  0x1d   : > { %630 = vmatpush1.bf16.msra.mxu0 %v1026_v17  ;;  %v898_v34 = vcombine.high %v283_v33, %v283_v33  ;;  %v1027_v38 = vld [vmem:[%s1132_s20 + $0xa4] ss:$8 sps:$4 sm:$0xff]   ;;  %v1056_v39 = vld [vmem:[%s1132_s20 + $0x170] ss:$8 sps:$4 sm:$0xff]   ;;  %v1029_v40 = vld [vmem:[%s1132_s20 + $0xa0] ss:$8 sps:$4 sm:$0xff]   ;;  %v897_v52 = vcombine.low %v283_v33, %v283_v33 }
  0x1e   : > { %631 = vmatprep.subr.bf16.mxu0 %v1030_v19  ;;  %v1033_v41 = vld [vmem:[%s1132_s20 + $0xb4] ss:$8 sps:$4 sm:$0xff]   ;;  %v1060_v42 = vld [vmem:[%s248_s25 + $0x8] ss:$0 sps:$4 sm:$0xff]   ;;  %v1035_v43 = vld [vmem:[%s1132_s20 + $0xb0] ss:$8 sps:$4 sm:$0xff]  }
  0x1f   : > { %591 = vmatpush1.bf16.msra.mxu1 %v999_v8  ;;  %616 = vmatprep.mubr.bf16.mxu1 %v898_v34  ;;  %v1039_v44 = vld [vmem:[%s1132_s20 + $0xc4] ss:$8 sps:$4 sm:$0xff]   ;;  %v1041_v45 = vld [vmem:[%s1132_s20 + $0xc0] ss:$8 sps:$4 sm:$0xff]   ;;  %v1045_v46 = vld [vmem:[%s1132_s20 + $0xd4] ss:$8 sps:$4 sm:$0xff]  }
  0x20   : > { %592 = vmatprep.subr.bf16.mxu1 %v1000_v11  ;;  %v1047_v47 = vld [vmem:[%s1132_s20 + $0xd0] ss:$8 sps:$4 sm:$0xff]   ;;  %v1051_v48 = vld [vmem:[%s1132_s20 + $0xe4] ss:$8 sps:$4 sm:$0xff]   ;;  %v1053_v49 = vld [vmem:[%s1132_s20 + $0xe0] ss:$8 sps:$4 sm:$0xff]  }
  0x21   : > { %632 = vmatpush1.bf16.msra.mxu0 %v1032_v21  ;;  %v1057_v50 = vld [vmem:[%s1132_s20 + $0xf4] ss:$8 sps:$4 sm:$0xff]   ;;  %v1059_v51 = vld [vmem:[%s1132_s20 + $0xf0] ss:$8 sps:$4 sm:$0xff]  }
  0x22   : > { %633 = vmatprep.subr.bf16.mxu0 %v1036_v23 }
  0x23   : > { %593 = vmatpush1.bf16.msra.mxu1 %v1002_v14 }
  0x24   : > { %594 = vmatprep.subr.bf16.mxu1 %v1003_v15 }
  0x25   : > { %634 = vmatpush1.bf16.msra.mxu0 %v1038_v25 }
  0x26   : > { %635 = vmatprep.subr.bf16.mxu0 %v1042_v27 }
  0x27   : > { %595 = vmatpush1.bf16.msra.mxu1 %v1005_v18 }
  0x28   : > { %596 = vmatprep.subr.bf16.mxu1 %v1006_v20 }
  0x29   : > { %636 = vmatpush1.bf16.msra.mxu0 %v1044_v29 }
  0x2a   : > { %637 = vmatprep.subr.bf16.mxu0 %v1048_v31 }
  0x2b   : > { %597 = vmatpush1.bf16.msra.mxu1 %v1008_v22 }
  0x2c   : > { %598 = vmatprep.subr.bf16.mxu1 %v1009_v24 }
  0x2d   : > { %638 = vmatpush1.bf16.msra.mxu0 %v1050_v35 }
  0x2e   : > { %639 = vmatprep.subr.bf16.mxu0 %v1054_v37 }
  0x2f   : > { %599 = vmatpush1.bf16.msra.mxu1 %v1011_v26 }
  0x30   : > { %600 = vmatprep.subr.bf16.mxu1 %v1015_v28 }
  0x31   : > { %640 = vmatpush1.bf16.msra.mxu0 %v1056_v39 }
  0x33   : > { %601 = vmatpush1.bf16.msra.mxu1 %v1017_v30 }
  0x34   : > { %602 = vmatprep.subr.bf16.mxu1 %v1021_v32  ;;  %658 = vmatmul.mubr.bf16.vlgmr.msra.gmra.mrb[0].mxu0 %v1060_v42 }
  0x37   : > { %603 = vmatpush1.bf16.msra.mxu1 %v1023_v36 }
  0x38   : > { %604 = vmatprep.subr.bf16.mxu1 %v1027_v38 }
  0x3b   : > { %605 = vmatpush1.bf16.msra.mxu1 %v1029_v40 }
  0x3c   : > { %606 = vmatprep.subr.bf16.mxu1 %v1033_v41 }
  0x3f   : > { %607 = vmatpush1.bf16.msra.mxu1 %v1035_v43 }
  0x40   : > { %608 = vmatprep.subr.bf16.mxu1 %v1039_v44 }
  0x43   : > { %609 = vmatpush1.bf16.msra.mxu1 %v1041_v45 }
  0x44   : > { %610 = vmatprep.subr.bf16.mxu1 %v1045_v46 }
  0x47   : > { %611 = vmatpush1.bf16.msra.mxu1 %v1047_v47 }
  0x48   : > { %612 = vmatprep.subr.bf16.mxu1 %v1051_v48 }
  0x4b   : > { %613 = vmatpush1.bf16.msra.mxu1 %v1053_v49 }
  0x4c   : > { %614 = vmatprep.subr.bf16.mxu1 %v1057_v50 }
  0x4f   : > { %615 = vmatpush1.bf16.msra.mxu1 %v1059_v51 }
  0x52   : > { %617 = vmatmul.mubr.bf16.vlgmr.msra.gmra.mrb[0].mxu1 %v897_v52 }
 0x107   : > { %v659_v53 = vpop.f32.mrb[0].mxu0 }
 0x108   : > { %v661_v54 = vpop.f32.mrb[1].mxu0 }
 0x109   : > { %v663_v55 = vpop.f32.mrb[2].mxu0 }
 0x10a   : > { %v664_v56 = vpop.f32.mrb[3].mxu0 }
 0x122   : > { %669 = sbr.rel (%p948_p6) target bundleno = 298 (0x12a), region = 32 }
 0x125   : > { %v618_v57 = vpop.f32.mrb[0].mxu1 }
 0x126   : > { %v660_v58 = vadd.f32 %v659_v53, %v618_v57  ;;  %v620_v59 = vpop.f32.mrb[1].mxu1 }
 0x127   : > { %v662_v60 = vadd.f32 %v661_v54, %v620_v59  ;;  %v622_v61 = vpop.f32.mrb[2].mxu1 }
 0x128   : > { %v623_v62 = vpop.f32.mrb[3].mxu1  ;;  %670 = vst [vmem:[#allocation2] sm:$0xff] (!%p948_p6), %v660_v58 }
 0x129   : > { %671 = vst [vmem:[#allocation2 + $0x8] sm:$0xff] %v662_v60 }
 0x12a PF: > { %p949_p7 = scmp.le.s32.totalorder %s1077_s12, 0 }
 0x12c   : > { %675 = sbr.rel (%p949_p7) target bundleno = 308 (0x134), region = 36 }
 0x130   : > { %v676_v63 = vld [vmem:[#allocation2] sm:$0xff] (!%p949_p7)  ;;  %v677_v0 = vld [vmem:[#allocation2 + $0x8] sm:$0xff] (!%p949_p7) }
 0x131   : > { %v678_v1 = vadd.f32 (!%p949_p7), %v676_v63, %v660_v58  ;;  %v679_v2 = vadd.f32 (!%p949_p7), %v677_v0, %v662_v60 }
 0x133   : > { %680 = vst [vmem:[#allocation2] sm:$0xff] %v678_v1  ;;  %681 = vst [vmem:[#allocation2 + $0x8] sm:$0xff] %v679_v2 }
 0x134 PF: > { %p950_p8 = scmp.ne.s32.totalorder %s1077_s12, 2 }
 0x135   : > { %vm723_vm0 = vcmask (!%p950_p8), 1040384  }
 0x136   : > { %685 = sbr.rel (%p950_p8) target bundleno = 334 (0x14e), region = 40 }
 0x13a   : > { %v686_v3 = vld [vmem:[#allocation2] sm:$0xff] (!%p950_p8)  ;;  %v687_v4 = vld [vmem:[#allocation2 + $0x8] sm:$0xff] (!%p950_p8) }
 0x13b   : > { %v960_v5 = vpack.c.bf16 (!%p950_p8), %v687_v4, %v686_v3  ;;  %v697_v6 = vrot.slane (!%p950_p8), %v686_v3, 4  ;;  %v703_v7 = vrot.slane (!%p950_p8), %v687_v4, 4  ;;  %v709_v8 = vmul.f32 (!%p950_p8), %v686_v3, %v686_v3 }
 0x13c   : > { %v710_v9 = vmul.f32 (!%p950_p8), %v687_v4, %v687_v4 }
 0x13d   : > { %696 = vst [vmem:[%s1206_s2] sm:$0xff] %v960_v5  ;;  %v698_v10 = vadd.f32 %v697_v6, %v686_v3  ;;  %v704_v11 = vadd.f32 %v703_v7, %v687_v4  ;;  %v711_v12 = vrot.slane %v709_v8, 4 }
 0x13e   : > { %v717_v13 = vrot.slane %v710_v9, 4 }
 0x13f   : > { %v699_v14 = vrot.slane %v698_v10, 2  ;;  %v705_v15 = vrot.slane %v704_v11, 2  ;;  %v712_v16 = vadd.f32 %v711_v12, %v709_v8 }
 0x140   : > { %v718_v17 = vadd.f32 %v717_v13, %v710_v9 }
 0x141   : > { %v700_v18 = vadd.f32 %v699_v14, %v698_v10  ;;  %v706_v19 = vadd.f32 %v705_v15, %v704_v11  ;;  %v713_v20 = vrot.slane %v712_v16, 2 }
 0x142   : > { %v719_v21 = vrot.slane %v718_v17, 2 }
 0x143   : > { %v701_v22 = vrot.slane %v700_v18, 1  ;;  %v707_v23 = vrot.slane %v706_v19, 1  ;;  %v714_v24 = vadd.f32 %v713_v20, %v712_v16 }
 0x144   : > { %v720_v25 = vadd.f32 %v719_v21, %v718_v17 }
 0x145   : > { %v702_v26 = vadd.f32 %v701_v22, %v700_v18  ;;  %v715_v27 = vrot.slane %v714_v24, 1  ;;  %v708_v28 = vadd.f32 %v707_v23, %v706_v19 }
 0x146   : > { %v721_v29 = vrot.slane %v720_v25, 1 }
 0x147   : > { %v716_v30 = vadd.f32 %v715_v27, %v714_v24 }
 0x148   : > { %v722_v31 = vadd.f32 %v721_v29, %v720_v25 }
 0x149   : > { %v724_v32 = vsel %vm723_vm0, %v702_v26, %v716_v30 }
 0x14a   : > { %v725_v33 = vsel %vm723_vm0, %v708_v28, %v722_v31 }
 0x14b   : > { %v728_v34 = vcombine.low %v724_v32, %v725_v33 }
 0x14d   : > { %952 = vst.sshfl [vmem:[%s1207_s3] sm:$0x33 pattern:$0x76325410] %v728_v34 }
 0x14e PF: > { %s14_s14 = sadd.s32 1, %s1085_s14   ;;  %s1208_s12 = smov %s1081_s13 }
 0x14f   : > { %p11_p9 = scmp.ge.s32.totalorder %s14_s14, 5   ;;  %s1209_s13 = smov %s1211_s15 }
 0x151   :  { %13 = sbr.rel (!%p11_p9) target bundleno = 2 (0x2), region = 85 }

// kernel: _lambda_.41
= control target key start
LH: loop header
LB: loop body
LE: loop exit
PB: predicated region body
PF: predicated region fallthrough
CT: control target
= control target key end

     0   :  { %v110_v7 = vmov 1966171168   ;;  %v33_v9 = vlaneseq  ;;  %v111_v12 = vmov 857870592   ;;  %s152_s1 = inlined_call_operand.vmem [shape: f32[1,2,256], index: 1, kind: input, shape index: {}]   ;;  %s153_s2 = inlined_call_operand.vmem [shape: f32[1,256], index: 2, kind: input, shape index: {}]   ;;  %s154_s0 = inlined_call_operand.vmem [shape: bf16[8,256], index: 0, kind: input, shape index: {}]   ;;  %s155_s3 = inlined_call_operand.vmem [shape: f32[1,256], index: 3, kind: input, shape index: {}]   ;;  %s156_s4 = inlined_call_operand.vmem [shape: bf16[8,256], index: 4, kind: output, shape index: {}]  }
   0x1   :  { %v17_v0 = vld [vmem:[%s152_s1] sm:$0xf]  ;;  %v31_v8 = vunpack.c.l.s4 %v110_v7  ;;  %v43_v13 = vunpack.c.l.s4 %v111_v12 }
   0x2   :  { %v19_v1 = vmul.f32 0.125, %v17_v0  ;;  %v34_v11 = vshrl.u32 %v33_v9, 7  ;;  %v26_v18 = vld [vmem:[%s153_s2] sm:$0x3] }
   0x3   :  { %v32_v10 = vunpack.c.0.s8 %v31_v8  ;;  %v44_v15 = vunpack.c.0.s8 %v43_v13  ;;  %v61_v22 = vld [vmem:[%s154_s0] sm:$0xff] }
   0x4   :  { %v20_v2 = vmul.f32 %v19_v1, %v19_v1  ;;  %v66_v23 = vsub.s32 0, %v34_v11  ;;  %v70_v24 = vsub.s32 1, %v34_v11  ;;  %v62_v26 = vunpack.c.l.bf16 %v61_v22  ;;  %v40_v31 = vld [vmem:[%s155_s3] sm:$0x3] }
   0x5   :  { %v35_v14 = vsub.s32 %v32_v10, %v34_v11  ;;  %v47_v20 = vsub.s32 %v44_v15, %v34_v11  ;;  %v63_v28 = vunpack.c.h.bf16 %v61_v22 }
   0x6   :  { %v22_v3 = vrot.slane %v20_v2, 7 }
   0x8   :  { %v24_v4 = vsub.f32 %v19_v1, %v22_v3 }
   0xa   :  { %v25_v5 = vmax.f32 %v24_v4, 0.0 }
   0xc   :  { %v27_v6 = vadd.f32 1e-05, %v25_v5 }
   0xe   :  { %108 = vrsqrt.f32 %v27_v6 }
  0x18   :  { %v109_v16 = vpop.eup %108 }
  0x19   :  { %v36_v17 = vrot.slane %v109_v16, %v35_v14 }
  0x1b   :  { %v37_v19 = vcombine.high %v36_v17, %v36_v17 }
  0x1d   :  { %v39_v21 = vmul.f32 %v37_v19, %v26_v18 }
  0x1f   :  { %v48_v25 = vrot.slane %v39_v21, %v47_v20  ;;  %v67_v29 = vrot.slane %v39_v21, %v66_v23  ;;  %v71_v30 = vrot.slane %v39_v21, %v70_v24 }
  0x21   :  { %v50_v27 = vmul.f32 %v48_v25, %v19_v1  ;;  %v74_v34 = vmul.f32 %v67_v29, %v62_v26  ;;  %v75_v35 = vmul.f32 %v71_v30, %v63_v28 }
  0x23   :  { %v58_v32 = vrot.slane %v50_v27, %v35_v14 }
  0x25   :  { %v60_v33 = vsub.f32 %v40_v31, %v58_v32 }
  0x27   :  { %v80_v36 = vrot.slane %v60_v33, %v66_v23  ;;  %v84_v37 = vrot.slane %v60_v33, %v70_v24 }
  0x29   :  { %v87_v38 = vadd.f32 %v80_v36, %v74_v34  ;;  %v88_v39 = vadd.f32 %v84_v37, %v75_v35 }
  0x2b   :  { %v89_v40 = vmax.f32 %v87_v38, 0.0  ;;  %v90_v41 = vmax.f32 %v88_v39, 0.0 }
  0x2d   :  { %v105_v42 = vpack.c.bf16 %v90_v41, %v89_v40 }
  0x2f   :  { %99 = vst [vmem:[%s156_s4] sm:$0xff] %v105_v42 }

// kernel: _lambda_.45
= control target key start
LH: loop header
LB: loop body
LE: loop exit
PB: predicated region body
PF: predicated region fallthrough
CT: control target
= control target key end

     0   :  { %v118_v7 = vmov 1966171168   ;;  %v36_v9 = vlaneseq  ;;  %v119_v12 = vmov 857870592   ;;  %s168_s1 = inlined_call_operand.vmem [shape: f32[1,2,256], index: 1, kind: input, shape index: {}]   ;;  %s169_s2 = inlined_call_operand.vmem [shape: f32[1,256], index: 2, kind: input, shape index: {}]   ;;  %s170_s0 = inlined_call_operand.vmem [shape: bf16[8,256], index: 0, kind: input, shape index: {}]   ;;  %s171_s3 = inlined_call_operand.vmem [shape: f32[1,256], index: 3, kind: input, shape index: {}]   ;;  %s172_s4 = inlined_call_operand.vmem [shape: bf16[8,256], index: 4, kind: input, shape index: {}]   ;;  %s173_s5 = inlined_call_operand.vmem [shape: bf16[8,256], index: 5, kind: output, shape index: {}]  }
   0x1   :  { %v20_v0 = vld [vmem:[%s168_s1] sm:$0xf]  ;;  %v34_v8 = vunpack.c.l.s4 %v118_v7  ;;  %v46_v13 = vunpack.c.l.s4 %v119_v12 }
   0x2   :  { %v22_v1 = vmul.f32 0.125, %v20_v0  ;;  %v37_v11 = vshrl.u32 %v36_v9, 7  ;;  %v29_v18 = vld [vmem:[%s169_s2] sm:$0x3] }
   0x3   :  { %v35_v10 = vunpack.c.0.s8 %v34_v8  ;;  %v47_v15 = vunpack.c.0.s8 %v46_v13  ;;  %v64_v22 = vld [vmem:[%s170_s0] sm:$0xff] }
   0x4   :  { %v23_v2 = vmul.f32 %v22_v1, %v22_v1  ;;  %v69_v23 = vsub.s32 0, %v37_v11  ;;  %v73_v24 = vsub.s32 1, %v37_v11  ;;  %v65_v26 = vunpack.c.l.bf16 %v64_v22  ;;  %v43_v31 = vld [vmem:[%s171_s3] sm:$0x3] }
   0x5   :  { %v38_v14 = vsub.s32 %v35_v10, %v37_v11  ;;  %v50_v20 = vsub.s32 %v47_v15, %v37_v11  ;;  %v66_v28 = vunpack.c.h.bf16 %v64_v22  ;;  %v92_v33 = vld [vmem:[%s172_s4] sm:$0xff] }
   0x6   :  { %v25_v3 = vrot.slane %v23_v2, 7  ;;  %v93_v39 = vunpack.c.l.bf16 %v92_v33  ;;  %v94_v40 = vunpack.c.h.bf16 %v92_v33 }
   0x8   :  { %v27_v4 = vsub.f32 %v22_v1, %v25_v3 }
   0xa   :  { %v28_v5 = vmax.f32 %v27_v4, 0.0 }
   0xc   :  { %v30_v6 = vadd.f32 1e-05, %v28_v5 }
   0xe   :  { %116 = vrsqrt.f32 %v30_v6 }
  0x18   :  { %v117_v16 = vpop.eup %116 }
  0x19   :  { %v39_v17 = vrot.slane %v117_v16, %v38_v14 }
  0x1b   :  { %v40_v19 = vcombine.high %v39_v17, %v39_v17 }
  0x1d   :  { %v42_v21 = vmul.f32 %v40_v19, %v29_v18 }
  0x1f   :  { %v51_v25 = vrot.slane %v42_v21, %v50_v20  ;;  %v70_v29 = vrot.slane %v42_v21, %v69_v23  ;;  %v74_v30 = vrot.slane %v42_v21, %v73_v24 }
  0x21   :  { %v53_v27 = vmul.f32 %v51_v25, %v22_v1  ;;  %v77_v35 = vmul.f32 %v70_v29, %v65_v26  ;;  %v78_v36 = vmul.f32 %v74_v30, %v66_v28 }
  0x23   :  { %v61_v32 = vrot.slane %v53_v27, %v38_v14 }
  0x25   :  { %v63_v34 = vsub.f32 %v43_v31, %v61_v32 }
  0x27   :  { %v83_v37 = vrot.slane %v63_v34, %v69_v23  ;;  %v87_v38 = vrot.slane %v63_v34, %v73_v24 }
  0x29   :  { %v90_v41 = vadd.f32 %v83_v37, %v77_v35  ;;  %v91_v42 = vadd.f32 %v87_v38, %v78_v36 }
  0x2b   :  { %v95_v43 = vadd.f32 %v93_v39, %v90_v41  ;;  %v96_v44 = vadd.f32 %v94_v40, %v91_v42 }
  0x2d   :  { %v97_v45 = vmax.f32 %v95_v43, 0.0  ;;  %v98_v46 = vmax.f32 %v96_v44, 0.0 }
  0x2f   :  { %v113_v47 = vpack.c.bf16 %v98_v46, %v97_v45 }
  0x31   :  { %107 = vst [vmem:[%s173_s5] sm:$0xff] %v113_v47 }

// kernel: _lambda_.44
= control target key start
LH: loop header
LB: loop body
LE: loop exit
PB: predicated region body
PF: predicated region fallthrough
CT: control target
= control target key end

     0   :  { %s1108_s12 = smov 0   ;;  %s1110_s13 = smov 0   ;;  %s1204_s0 = inlined_call_operand.vmem [shape: bf16[8,2304], index: 0, kind: input, shape index: {}]   ;;  %s1205_s1 = inlined_call_operand.vmem [shape: bf16[2304,256], index: 1, kind: input, shape index: {}]   ;;  %s1206_s2 = inlined_call_operand.vmem [shape: bf16[8,256], index: 2, kind: output, shape index: {0}]   ;;  %s1207_s3 = inlined_call_operand.vmem [shape: f32[1,2,256], index: 3, kind: output, shape index: {1}]  }
   0x1   :  { %s1112_s14 = smov 0  }
   0x2 LB: > { %s26_s15 = sadd.s32 1, %s1081_s13  ;;  %p893_p0 = scmp.ge.s32.totalorder %s1085_s14, 1  ;;  %s1085_s14 = sphi %s1112_s14, %s14_s14   ;;  %s1081_s13 = sphi %s1110_s13, %s1209_s13   ;;  %s1077_s12 = sphi %s1108_s12, %s1208_s12  }
   0x3   : > { %p27_p1 = scmp.ge.s32.totalorder %s26_s15, 6  ;;  %p189_p2 = scmp.lt.s32.totalorder %s1085_s14, 7 }
   0x5   : > { %s1211_s15 = smov (%p27_p1, %s26_s15), 0  ;;  %p190_p3 = pnand %p893_p0, %p189_p2 }
   0x6   : > { %s250_s16 = smul.u32 (!%p190_p3), 48, %s1077_s12  ;;  %v1087_v0 = vmov (!%p190_p3), 0   ;;  %p948_p6 = scmp.ne.s32.totalorder (!%p190_p3), %s1077_s12, 0 }
   0x7   : > { %193 = sbr.rel (%p190_p3) target bundleno = 334 (0x14e), region = 28  ;;  %657 = vmatprep.mubr.bf16.mxu0 (!%p190_p3), %v1087_v0 }
   0x8   : > { %p252_p4 = scmp.lt.s32.totalorder (!%p190_p3), %s250_s16, 287  ;;  %s240_s21 = smul.u32 (!%p190_p3), 3, %s1077_s12 }
   0xa   : > { %p243_p5 = scmp.lt.s32.totalorder (!%p190_p3), %s240_s21, 17 }
   0xe   : > { %s1213_s16 = smov (!%p252_p4, %s250_s16), 287  ;;  %s1215_s21 = smov (!%p243_p5, %s240_s21), 17 }
   0xf   : > { %s959_s17 = sshll.u32 %s1213_s16, 3  ;;  %s894_s22 = sshll.u32 %s1215_s21, 2 }
  0x10   : > { %s1132_s20 = scalar_lea.vmem %s1205_s1, %s959_s17  ;;  %s248_s25 = scalar_lea.vmem %s1204_s0, %s894_s22 }
  0x11   : > { %v988_v1 = vld [vmem:[%s1132_s20 + $0x4] ss:$8 sps:$4 sm:$0xff]   ;;  %v990_v2 = vld [vmem:[%s1132_s20] ss:$8 sps:$4 sm:$0xff]   ;;  %v991_v3 = vld [vmem:[%s1132_s20 + $0x14] ss:$8 sps:$4 sm:$0xff]  }
  0x12   : > { %584 = vmatprep.subr.bf16.mxu1 %v988_v1  ;;  %v993_v4 = vld [vmem:[%s1132_s20 + $0x10] ss:$8 sps:$4 sm:$0xff]   ;;  %v994_v5 = vld [vmem:[%s1132_s20 + $0x24] ss:$8 sps:$4 sm:$0xff]   ;;  %v996_v6 = vld [vmem:[%s1132_s20 + $0x20] ss:$8 sps:$4 sm:$0xff]  }
  0x13   : > { %585 = vmatpush1.bf16.msra.mxu1 %v990_v2  ;;  %v997_v7 = vld [vmem:[%s1132_s20 + $0x34] ss:$8 sps:$4 sm:$0xff]   ;;  %v999_v8 = vld [vmem:[%s1132_s20 + $0x30] ss:$8 sps:$4 sm:$0xff]   ;;  %v1012_v9 = vld [vmem:[%s1132_s20 + $0x104] ss:$8 sps:$4 sm:$0xff]  }
  0x14   : > { %586 = vmatprep.subr.bf16.mxu1 %v991_v3  ;;  %v1014_v10 = vld [vmem:[%s1132_s20 + $0x100] ss:$8 sps:$4 sm:$0xff]   ;;  %v1000_v11 = vld [vmem:[%s1132_s20 + $0x44] ss:$8 sps:$4 sm:$0xff]   ;;  %625 = vmatprep.subr.bf16.mxu0 %v1012_v9  ;;  %v1018_v12 = vld [vmem:[%s1132_s20 + $0x114] ss:$8 sps:$4 sm:$0xff]  }
  0x15   : > { %626 = vmatpush1.bf16.msra.mxu0 %v1014_v10  ;;  %v1020_v13 = vld [vmem:[%s1132_s20 + $0x110] ss:$8 sps:$4 sm:$0xff]   ;;  %v1002_v14 = vld [vmem:[%s1132_s20 + $0x40] ss:$8 sps:$4 sm:$0xff]   ;;  %v1003_v15 = vld [vmem:[%s1132_s20 + $0x54] ss:$8 sps:$4 sm:$0xff]  }
  0x16   : > { %627 = vmatprep.subr.bf16.mxu0 %v1018_v12  ;;  %v1024_v16 = vld [vmem:[%s1132_s20 + $0x124] ss:$8 sps:$4 sm:$0xff]   ;;  %v1026_v17 = vld [vmem:[%s1132_s20 + $0x120] ss:$8 sps:$4 sm:$0xff]   ;;  %v1005_v18 = vld [vmem:[%s1132_s20 + $0x50] ss:$8 sps:$4 sm:$0xff]  }
  0x17   : > { %587 = vmatpush1.bf16.msra.mxu1 %v993_v4  ;;  %v1030_v19 = vld [vmem:[%s1132_s20 + $0x134] ss:$8 sps:$4 sm:$0xff]   ;;  %v1006_v20 = vld [vmem:[%s1132_s20 + $0x64] ss:$8 sps:$4 sm:$0xff]   ;;  %v1032_v21 = vld [vmem:[%s1132_s20 + $0x130] ss:$8 sps:$4 sm:$0xff]  }
  0x18   : > { %588 = vmatprep.subr.bf16.mxu1 %v994_v5  ;;  %v1008_v22 = vld [vmem:[%s1132_s20 + $0x60] ss:$8 sps:$4 sm:$0xff]   ;;  %v1036_v23 = vld [vmem:[%s1132_s20 + $0x144] ss:$8 sps:$4 sm:$0xff]   ;;  %v1009_v24 = vld [vmem:[%s1132_s20 + $0x74] ss:$8 sps:$4 sm:$0xff]  }
  0x19   : > { %628 = vmatpush1.bf16.msra.mxu0 %v1020_v13  ;;  %v1038_v25 = vld [vmem:[%s1132_s20 + $0x140] ss:$8 sps:$4 sm:$0xff]   ;;  %v1011_v26 = vld [vmem:[%s1132_s20 + $0x70] ss:$8 sps:$4 sm:$0xff]   ;;  %v1042_v27 = vld [vmem:[%s1132_s20 + $0x154] ss:$8 sps:$4 sm:$0xff]  }
  0x1a   : > { %629 = vmatprep.subr.bf16.mxu0 %v1024_v16  ;;  %v1015_v28 = vld [vmem:[%s1132_s20 + $0x84] ss:$8 sps:$4 sm:$0xff]   ;;  %v1044_v29 = vld [vmem:[%s1132_s20 + $0x150] ss:$8 sps:$4 sm:$0xff]   ;;  %v1017_v30 = vld [vmem:[%s1132_s20 + $0x80] ss:$8 sps:$4 sm:$0xff]  }
  0x1b   : > { %589 = vmatpush1.bf16.msra.mxu1 %v996_v6  ;;  %v1048_v31 = vld [vmem:[%s1132_s20 + $0x164] ss:$8 sps:$4 sm:$0xff]   ;;  %v1021_v32 = vld [vmem:[%s1132_s20 + $0x94] ss:$8 sps:$4 sm:$0xff]   ;;  %v1050_v35 = vld [vmem:[%s1132_s20 + $0x160] ss:$8 sps:$4 sm:$0xff]  }
  0x1c   : > { %590 = vmatprep.subr.bf16.mxu1 %v997_v7  ;;  %v283_v33 = vld [vmem:[%s248_s25] sm:$0xff]  ;;  %v1023_v36 = vld [vmem:[%s1132_s20 + $0x90] ss:$8 sps:$4 sm:$0xff]   ;;  %v1054_v37 = vld [vmem:[%s1132_s20 + $0x174] ss:$8 sps:$4 sm:$0xff]  }
  0x1d   : > { %630 = vmatpush1.bf16.msra.mxu0 %v1026_v17  ;;  %v898_v34 = vcombine.high %v283_v33, %v283_v33  ;;  %v1027_v38 = vld [vmem:[%s1132_s20 + $0xa4] ss:$8 sps:$4 sm:$0xff]   ;;  %v1056_v39 = vld [vmem:[%s1132_s20 + $0x170] ss:$8 sps:$4 sm:$0xff]   ;;  %v1029_v40 = vld [vmem:[%s1132_s20 + $0xa0] ss:$8 sps:$4 sm:$0xff]   ;;  %v897_v52 = vcombine.low %v283_v33, %v283_v33 }
  0x1e   : > { %631 = vmatprep.subr.bf16.mxu0 %v1030_v19  ;;  %v1033_v41 = vld [vmem:[%s1132_s20 + $0xb4] ss:$8 sps:$4 sm:$0xff]   ;;  %v1060_v42 = vld [vmem:[%s248_s25 + $0x8] ss:$0 sps:$4 sm:$0xff]   ;;  %v1035_v43 = vld [vmem:[%s1132_s20 + $0xb0] ss:$8 sps:$4 sm:$0xff]  }
  0x1f   : > { %591 = vmatpush1.bf16.msra.mxu1 %v999_v8  ;;  %616 = vmatprep.mubr.bf16.mxu1 %v898_v34  ;;  %v1039_v44 = vld [vmem:[%s1132_s20 + $0xc4] ss:$8 sps:$4 sm:$0xff]   ;;  %v1041_v45 = vld [vmem:[%s1132_s20 + $0xc0] ss:$8 sps:$4 sm:$0xff]   ;;  %v1045_v46 = vld [vmem:[%s1132_s20 + $0xd4] ss:$8 sps:$4 sm:$0xff]  }
  0x20   : > { %592 = vmatprep.subr.bf16.mxu1 %v1000_v11  ;;  %v1047_v47 = vld [vmem:[%s1132_s20 + $0xd0] ss:$8 sps:$4 sm:$0xff]   ;;  %v1051_v48 = vld [vmem:[%s1132_s20 + $0xe4] ss:$8 sps:$4 sm:$0xff]   ;;  %v1053_v49 = vld [vmem:[%s1132_s20 + $0xe0] ss:$8 sps:$4 sm:$0xff]  }
  0x21   : > { %632 = vmatpush1.bf16.msra.mxu0 %v1032_v21  ;;  %v1057_v50 = vld [vmem:[%s1132_s20 + $0xf4] ss:$8 sps:$4 sm:$0xff]   ;;  %v1059_v51 = vld [vmem:[%s1132_s20 + $0xf0] ss:$8 sps:$4 sm:$0xff]  }
  0x22   : > { %633 = vmatprep.subr.bf16.mxu0 %v1036_v23 }
  0x23   : > { %593 = vmatpush1.bf16.msra.mxu1 %v1002_v14 }
  0x24   : > { %594 = vmatprep.subr.bf16.mxu1 %v1003_v15 }
  0x25   : > { %634 = vmatpush1.bf16.msra.mxu0 %v1038_v25 }
  0x26   : > { %635 = vmatprep.subr.bf16.mxu0 %v1042_v27 }
  0x27   : > { %595 = vmatpush1.bf16.msra.mxu1 %v1005_v18 }
  0x28   : > { %596 = vmatprep.subr.bf16.mxu1 %v1006_v20 }
  0x29   : > { %636 = vmatpush1.bf16.msra.mxu0 %v1044_v29 }
  0x2a   : > { %637 = vmatprep.subr.bf16.mxu0 %v1048_v31 }
  0x2b   : > { %597 = vmatpush1.bf16.msra.mxu1 %v1008_v22 }
  0x2c   : > { %598 = vmatprep.subr.bf16.mxu1 %v1009_v24 }
  0x2d   : > { %638 = vmatpush1.bf16.msra.mxu0 %v1050_v35 }
  0x2e   : > { %639 = vmatprep.subr.bf16.mxu0 %v1054_v37 }
  0x2f   : > { %599 = vmatpush1.bf16.msra.mxu1 %v1011_v26 }
  0x30   : > { %600 = vmatprep.subr.bf16.mxu1 %v1015_v28 }
  0x31   : > { %640 = vmatpush1.bf16.msra.mxu0 %v1056_v39 }
  0x33   : > { %601 = vmatpush1.bf16.msra.mxu1 %v1017_v30 }
  0x34   : > { %602 = vmatprep.subr.bf16.mxu1 %v1021_v32  ;;  %658 = vmatmul.mubr.bf16.vlgmr.msra.gmra.mrb[0].mxu0 %v1060_v42 }
  0x37   : > { %603 = vmatpush1.bf16.msra.mxu1 %v1023_v36 }
  0x38   : > { %604 = vmatprep.subr.bf16.mxu1 %v1027_v38 }
  0x3b   : > { %605 = vmatpush1.bf16.msra.mxu1 %v1029_v40 }
  0x3c   : > { %606 = vmatprep.subr.bf16.mxu1 %v1033_v41 }
  0x3f   : > { %607 = vmatpush1.bf16.msra.mxu1 %v1035_v43 }
  0x40   : > { %608 = vmatprep.subr.bf16.mxu1 %v1039_v44 }
  0x43   : > { %609 = vmatpush1.bf16.msra.mxu1 %v1041_v45 }
  0x44   : > { %610 = vmatprep.subr.bf16.mxu1 %v1045_v46 }
  0x47   : > { %611 = vmatpush1.bf16.msra.mxu1 %v1047_v47 }
  0x48   : > { %612 = vmatprep.subr.bf16.mxu1 %v1051_v48 }
  0x4b   : > { %613 = vmatpush1.bf16.msra.mxu1 %v1053_v49 }
  0x4c   : > { %614 = vmatprep.subr.bf16.mxu1 %v1057_v50 }
  0x4f   : > { %615 = vmatpush1.bf16.msra.mxu1 %v1059_v51 }
  0x52   : > { %617 = vmatmul.mubr.bf16.vlgmr.msra.gmra.mrb[0].mxu1 %v897_v52 }
 0x107   : > { %v659_v53 = vpop.f32.mrb[0].mxu0 }
 0x108   : > { %v661_v54 = vpop.f32.mrb[1].mxu0 }
 0x109   : > { %v663_v55 = vpop.f32.mrb[2].mxu0 }
 0x10a   : > { %v664_v56 = vpop.f32.mrb[3].mxu0 }
 0x122   : > { %669 = sbr.rel (%p948_p6) target bundleno = 298 (0x12a), region = 32 }
 0x125   : > { %v618_v57 = vpop.f32.mrb[0].mxu1 }
 0x126   : > { %v660_v58 = vadd.f32 %v659_v53, %v618_v57  ;;  %v620_v59 = vpop.f32.mrb[1].mxu1 }
 0x127   : > { %v662_v60 = vadd.f32 %v661_v54, %v620_v59  ;;  %v622_v61 = vpop.f32.mrb[2].mxu1 }
 0x128   : > { %v623_v62 = vpop.f32.mrb[3].mxu1  ;;  %670 = vst [vmem:[#allocation2] sm:$0xff] (!%p948_p6), %v660_v58 }
 0x129   : > { %671 = vst [vmem:[#allocation2 + $0x8] sm:$0xff] %v662_v60 }
 0x12a PF: > { %p949_p7 = scmp.le.s32.totalorder %s1077_s12, 0 }
 0x12c   : > { %675 = sbr.rel (%p949_p7) target bundleno = 308 (0x134), region = 36 }
 0x130   : > { %v676_v63 = vld [vmem:[#allocation2] sm:$0xff] (!%p949_p7)  ;;  %v677_v0 = vld [vmem:[#allocation2 + $0x8] sm:$0xff] (!%p949_p7) }
 0x131   : > { %v678_v1 = vadd.f32 (!%p949_p7), %v676_v63, %v660_v58  ;;  %v679_v2 = vadd.f32 (!%p949_p7), %v677_v0, %v662_v60 }
 0x133   : > { %680 = vst [vmem:[#allocation2] sm:$0xff] %v678_v1  ;;  %681 = vst [vmem:[#allocation2 + $0x8] sm:$0xff] %v679_v2 }
 0x134 PF: > { %p950_p8 = scmp.ne.s32.totalorder %s1077_s12, 5 }
 0x135   : > { %vm723_vm0 = vcmask (!%p950_p8), 1040384  }
 0x136   : > { %685 = sbr.rel (%p950_p8) target bundleno = 334 (0x14e), region = 40 }
 0x13a   : > { %v686_v3 = vld [vmem:[#allocation2] sm:$0xff] (!%p950_p8)  ;;  %v687_v4 = vld [vmem:[#allocation2 + $0x8] sm:$0xff] (!%p950_p8) }
 0x13b   : > { %v960_v5 = vpack.c.bf16 (!%p950_p8), %v687_v4, %v686_v3  ;;  %v697_v6 = vrot.slane (!%p950_p8), %v686_v3, 4  ;;  %v703_v7 = vrot.slane (!%p950_p8), %v687_v4, 4  ;;  %v709_v8 = vmul.f32 (!%p950_p8), %v686_v3, %v686_v3 }
 0x13c   : > { %v710_v9 = vmul.f32 (!%p950_p8), %v687_v4, %v687_v4 }
 0x13d   : > { %696 = vst [vmem:[%s1206_s2] sm:$0xff] %v960_v5  ;;  %v698_v10 = vadd.f32 %v697_v6, %v686_v3  ;;  %v704_v11 = vadd.f32 %v703_v7, %v687_v4  ;;  %v711_v12 = vrot.slane %v709_v8, 4 }
 0x13e   : > { %v717_v13 = vrot.slane %v710_v9, 4 }
 0x13f   : > { %v699_v14 = vrot.slane %v698_v10, 2  ;;  %v705_v15 = vrot.slane %v704_v11, 2  ;;  %v712_v16 = vadd.f32 %v711_v12, %v709_v8 }
 0x140   : > { %v718_v17 = vadd.f32 %v717_v13, %v710_v9 }
 0x141   : > { %v700_v18 = vadd.f32 %v699_v14, %v698_v10  ;;  %v706_v19 = vadd.f32 %v705_v15, %v704_v11  ;;  %v713_v20 = vrot.slane %v712_v16, 2 }
 0x142   : > { %v719_v21 = vrot.slane %v718_v17, 2 }
 0x143   : > { %v701_v22 = vrot.slane %v700_v18, 1  ;;  %v707_v23 = vrot.slane %v706_v19, 1  ;;  %v714_v24 = vadd.f32 %v713_v20, %v712_v16 }
 0x144   : > { %v720_v25 = vadd.f32 %v719_v21, %v718_v17 }
 0x145   : > { %v702_v26 = vadd.f32 %v701_v22, %v700_v18  ;;  %v715_v27 = vrot.slane %v714_v24, 1  ;;  %v708_v28 = vadd.f32 %v707_v23, %v706_v19 }
 0x146   : > { %v721_v29 = vrot.slane %v720_v25, 1 }
 0x147   : > { %v716_v30 = vadd.f32 %v715_v27, %v714_v24 }
 0x148   : > { %v722_v31 = vadd.f32 %v721_v29, %v720_v25 }
 0x149   : > { %v724_v32 = vsel %vm723_vm0, %v702_v26, %v716_v30 }
 0x14a   : > { %v725_v33 = vsel %vm723_vm0, %v708_v28, %v722_v31 }
 0x14b   : > { %v728_v34 = vcombine.low %v724_v32, %v725_v33 }
 0x14d   : > { %952 = vst.sshfl [vmem:[%s1207_s3] sm:$0x33 pattern:$0x76325410] %v728_v34 }
 0x14e PF: > { %s14_s14 = sadd.s32 1, %s1085_s14   ;;  %s1208_s12 = smov %s1081_s13 }
 0x14f   : > { %p11_p9 = scmp.ge.s32.totalorder %s14_s14, 8   ;;  %s1209_s13 = smov %s1211_s15 }
 0x151   :  { %13 = sbr.rel (!%p11_p9) target bundleno = 2 (0x2), region = 85 }

// kernel: _lambda_.48
= control target key start
LH: loop header
LB: loop body
LE: loop exit
PB: predicated region body
PF: predicated region fallthrough
CT: control target
= control target key end

     0   :  { %vm588_vm0 = vcmask 1040384   ;;  %s1025_s1 = inlined_call_operand.vmem [shape: bf16[256,512], index: 1, kind: input, shape index: {}]   ;;  %s1026_s0 = inlined_call_operand.vmem [shape: bf16[8,256], index: 0, kind: input, shape index: {}]   ;;  %s1027_s2 = inlined_call_operand.vmem [shape: bf16[8,512], index: 2, kind: output, shape index: {0}]   ;;  %s1028_s3 = inlined_call_operand.vmem [shape: f32[1,2,512], index: 3, kind: output, shape index: {1}]  }
   0x1   :  { %v695_v0 = vld [vmem:[%s1025_s1 + $0x4] ss:$16 sps:$4 sm:$0xff]   ;;  %v697_v1 = vld [vmem:[%s1025_s1 + $0xc] ss:$16 sps:$4 sm:$0xff]   ;;  %v699_v2 = vld [vmem:[%s1025_s1] ss:$16 sps:$4 sm:$0xff]  }
   0x2   :  { %405 = vmatprep.subr.bf16.mxu0 %v695_v0  ;;  %v700_v3 = vld [vmem:[%s1025_s1 + $0x8] ss:$16 sps:$4 sm:$0xff]   ;;  %446 = vmatprep.subr.bf16.mxu1 %v697_v1  ;;  %v701_v4 = vld [vmem:[%s1025_s1 + $0x24] ss:$16 sps:$4 sm:$0xff]   ;;  %v703_v5 = vld [vmem:[%s1025_s1 + $0x2c] ss:$16 sps:$4 sm:$0xff]  }
   0x3   :  { %406 = vmatpush1.bf16.msra.mxu0 %v699_v2  ;;  %447 = vmatpush1.bf16.msra.mxu1 %v700_v3  ;;  %v705_v6 = vld [vmem:[%s1025_s1 + $0x20] ss:$16 sps:$4 sm:$0xff]   ;;  %v706_v7 = vld [vmem:[%s1025_s1 + $0x28] ss:$16 sps:$4 sm:$0xff]   ;;  %v707_v8 = vld [vmem:[%s1025_s1 + $0x44] ss:$16 sps:$4 sm:$0xff]  }
   0x4   :  { %407 = vmatprep.subr.bf16.mxu0 %v701_v4  ;;  %448 = vmatprep.subr.bf16.mxu1 %v703_v5  ;;  %v709_v9 = vld [vmem:[%s1025_s1 + $0x4c] ss:$16 sps:$4 sm:$0xff]   ;;  %v711_v10 = vld [vmem:[%s1025_s1 + $0x40] ss:$16 sps:$4 sm:$0xff]   ;;  %v712_v11 = vld [vmem:[%s1025_s1 + $0x48] ss:$16 sps:$4 sm:$0xff]  }
   0x5   :  { %v713_v12 = vld [vmem:[%s1025_s1 + $0x64] ss:$16 sps:$4 sm:$0xff]   ;;  %v715_v13 = vld [vmem:[%s1025_s1 + $0x6c] ss:$16 sps:$4 sm:$0xff]   ;;  %v717_v14 = vld [vmem:[%s1025_s1 + $0x60] ss:$16 sps:$4 sm:$0xff]  }
   0x6   :  { %v718_v15 = vld [vmem:[%s1025_s1 + $0x68] ss:$16 sps:$4 sm:$0xff]   ;;  %v719_v16 = vld [vmem:[%s1025_s1 + $0x84] ss:$16 sps:$4 sm:$0xff]   ;;  %v721_v17 = vld [vmem:[%s1025_s1 + $0x8c] ss:$16 sps:$4 sm:$0xff]  }
   0x7   :  { %408 = vmatpush1.bf16.msra.mxu0 %v705_v6  ;;  %449 = vmatpush1.bf16.msra.mxu1 %v706_v7  ;;  %v723_v18 = vld [vmem:[%s1025_s1 + $0x80] ss:$16 sps:$4 sm:$0xff]   ;;  %v724_v19 = vld [vmem:[%s1025_s1 + $0x88] ss:$16 sps:$4 sm:$0xff]   ;;  %v725_v20 = vld [vmem:[%s1025_s1 + $0xa4] ss:$16 sps:$4 sm:$0xff]   ;;  %v602_v7 = vlaneseq }
   0x8   :  { %409 = vmatprep.subr.bf16.mxu0 %v707_v8  ;;  %450 = vmatprep.subr.bf16.mxu1 %v709_v9  ;;  %v727_v21 = vld [vmem:[%s1025_s1 + $0xac] ss:$16 sps:$4 sm:$0xff]   ;;  %v729_v22 = vld [vmem:[%s1025_s1 + $0xa0] ss:$16 sps:$4 sm:$0xff]   ;;  %v730_v23 = vld [vmem:[%s1025_s1 + $0xa8] ss:$16 sps:$4 sm:$0xff]  }
   0x9   :  { %v731_v24 = vld [vmem:[%s1025_s1 + $0xc4] ss:$16 sps:$4 sm:$0xff]   ;;  %v733_v25 = vld [vmem:[%s1025_s1 + $0xcc] ss:$16 sps:$4 sm:$0xff]   ;;  %v735_v26 = vld [vmem:[%s1025_s1 + $0xc0] ss:$16 sps:$4 sm:$0xff]  }
   0xa   :  { %v736_v27 = vld [vmem:[%s1025_s1 + $0xc8] ss:$16 sps:$4 sm:$0xff]   ;;  %v737_v28 = vld [vmem:[%s1025_s1 + $0xe4] ss:$16 sps:$4 sm:$0xff]   ;;  %v739_v29 = vld [vmem:[%s1025_s1 + $0xec] ss:$16 sps:$4 sm:$0xff]  }
   0xb   :  { %410 = vmatpush1.bf16.msra.mxu0 %v711_v10  ;;  %451 = vmatpush1.bf16.msra.mxu1 %v712_v11  ;;  %v741_v30 = vld [vmem:[%s1025_s1 + $0xe0] ss:$16 sps:$4 sm:$0xff]   ;;  %v742_v31 = vld [vmem:[%s1025_s1 + $0xe8] ss:$16 sps:$4 sm:$0xff]   ;;  %v743_v32 = vld [vmem:[%s1025_s1 + $0x104] ss:$16 sps:$4 sm:$0xff]  }
   0xc   :  { %411 = vmatprep.subr.bf16.mxu0 %v713_v12  ;;  %452 = vmatprep.subr.bf16.mxu1 %v715_v13  ;;  %v745_v33 = vld [vmem:[%s1025_s1 + $0x10c] ss:$16 sps:$4 sm:$0xff]   ;;  %v747_v34 = vld [vmem:[%s1025_s1 + $0x100] ss:$16 sps:$4 sm:$0xff]   ;;  %v748_v35 = vld [vmem:[%s1025_s1 + $0x108] ss:$16 sps:$4 sm:$0xff]  }
   0xd   :  { %v749_v36 = vld [vmem:[%s1025_s1 + $0x124] ss:$16 sps:$4 sm:$0xff]   ;;  %v751_v37 = vld [vmem:[%s1025_s1 + $0x12c] ss:$16 sps:$4 sm:$0xff]   ;;  %v753_v38 = vld [vmem:[%s1025_s1 + $0x120] ss:$16 sps:$4 sm:$0xff]  }
   0xe   :  { %v754_v39 = vld [vmem:[%s1025_s1 + $0x128] ss:$16 sps:$4 sm:$0xff]   ;;  %v755_v40 = vld [vmem:[%s1025_s1 + $0x144] ss:$16 sps:$4 sm:$0xff]   ;;  %v757_v41 = vld [vmem:[%s1025_s1 + $0x14c] ss:$16 sps:$4 sm:$0xff]  }
   0xf   :  { %412 = vmatpush1.bf16.msra.mxu0 %v717_v14  ;;  %453 = vmatpush1.bf16.msra.mxu1 %v718_v15  ;;  %v759_v42 = vld [vmem:[%s1025_s1 + $0x140] ss:$16 sps:$4 sm:$0xff]   ;;  %v760_v43 = vld [vmem:[%s1025_s1 + $0x148] ss:$16 sps:$4 sm:$0xff]   ;;  %v761_v44 = vld [vmem:[%s1025_s1 + $0x164] ss:$16 sps:$4 sm:$0xff]  }
  0x10   :  { %413 = vmatprep.subr.bf16.mxu0 %v719_v16  ;;  %454 = vmatprep.subr.bf16.mxu1 %v721_v17  ;;  %v763_v45 = vld [vmem:[%s1025_s1 + $0x16c] ss:$16 sps:$4 sm:$0xff]   ;;  %v13_v46 = vld [vmem:[%s1026_s0] sm:$0xff]  ;;  %v766_v49 = vld [vmem:[%s1025_s1 + $0x168] ss:$16 sps:$4 sm:$0xff]  }
  0x11   :  { %v625_v47 = vcombine.high %v13_v46, %v13_v46  ;;  %v765_v48 = vld [vmem:[%s1025_s1 + $0x160] ss:$16 sps:$4 sm:$0xff]   ;;  %v767_v50 = vld [vmem:[%s1025_s1 + $0x184] ss:$16 sps:$4 sm:$0xff]   ;;  %v769_v51 = vld [vmem:[%s1025_s1 + $0x18c] ss:$16 sps:$4 sm:$0xff]   ;;  %v624_v2 = vcombine.low %v13_v46, %v13_v46 }
  0x12   :  { %v771_v52 = vld [vmem:[%s1025_s1 + $0x180] ss:$16 sps:$4 sm:$0xff]   ;;  %v772_v53 = vld [vmem:[%s1025_s1 + $0x188] ss:$16 sps:$4 sm:$0xff]   ;;  %v773_v54 = vld [vmem:[%s1025_s1 + $0x1a4] ss:$16 sps:$4 sm:$0xff]  }
  0x13   :  { %414 = vmatpush1.bf16.msra.mxu0 %v723_v18  ;;  %455 = vmatpush1.bf16.msra.mxu1 %v724_v19  ;;  %v775_v55 = vld [vmem:[%s1025_s1 + $0x1ac] ss:$16 sps:$4 sm:$0xff]   ;;  %v777_v56 = vld [vmem:[%s1025_s1 + $0x1a0] ss:$16 sps:$4 sm:$0xff]   ;;  %v778_v57 = vld [vmem:[%s1025_s1 + $0x1a8] ss:$16 sps:$4 sm:$0xff]  }
  0x14   :  { %415 = vmatprep.subr.bf16.mxu0 %v725_v20  ;;  %456 = vmatprep.subr.bf16.mxu1 %v727_v21  ;;  %v779_v58 = vld [vmem:[%s1025_s1 + $0x1c4] ss:$16 sps:$4 sm:$0xff]   ;;  %v781_v59 = vld [vmem:[%s1025_s1 + $0x1cc] ss:$16 sps:$4 sm:$0xff]   ;;  %v783_v60 = vld [vmem:[%s1025_s1 + $0x1c0] ss:$16 sps:$4 sm:$0xff]  }
  0x15   :  { %437 = vmatprep.mubr.bf16.mxu0 %v625_v47  ;;  %478 = vmatprep.mubr.bf16.mxu1 %v625_v47  ;;  %v784_v61 = vld [vmem:[%s1025_s1 + $0x1c8] ss:$16 sps:$4 sm:$0xff]   ;;  %v785_v62 = vld [vmem:[%s1025_s1 + $0x1e4] ss:$16 sps:$4 sm:$0xff]   ;;  %v787_v63 = vld [vmem:[%s1025_s1 + $0x1ec] ss:$16 sps:$4 sm:$0xff]  }
  0x16   :  { %v789_v0 = vld [vmem:[%s1025_s1 + $0x1e0] ss:$16 sps:$4 sm:$0xff]   ;;  %v790_v1 = vld [vmem:[%s1025_s1 + $0x1e8] ss:$16 sps:$4 sm:$0xff]   ;;  %v793_v5 = vmov 1983009808  }
  0x17   :  { %416 = vmatpush1.bf16.msra.mxu0 %v729_v22  ;;  %457 = vmatpush1.bf16.msra.mxu1 %v730_v23  ;;  %v1009_v6 = vunpack.c.l.s4 %v793_v5 }
  0x18   :  { %417 = vmatprep.subr.bf16.mxu0 %v731_v24  ;;  %458 = vmatprep.subr.bf16.mxu1 %v733_v25 }
  0x1b   :  { %418 = vmatpush1.bf16.msra.mxu0 %v735_v26  ;;  %459 = vmatpush1.bf16.msra.mxu1 %v736_v27 }
  0x1c   :  { %419 = vmatprep.subr.bf16.mxu0 %v737_v28  ;;  %460 = vmatprep.subr.bf16.mxu1 %v739_v29 }
  0x1f   :  { %420 = vmatpush1.bf16.msra.mxu0 %v741_v30  ;;  %461 = vmatpush1.bf16.msra.mxu1 %v742_v31 }
  0x20   :  { %421 = vmatprep.subr.bf16.mxu0 %v743_v32  ;;  %462 = vmatprep.subr.bf16.mxu1 %v745_v33 }
  0x23   :  { %422 = vmatpush1.bf16.msra.mxu0 %v747_v34  ;;  %463 = vmatpush1.bf16.msra.mxu1 %v748_v35 }
  0x24   :  { %423 = vmatprep.subr.bf16.mxu0 %v749_v36  ;;  %464 = vmatprep.subr.bf16.mxu1 %v751_v37 }
  0x27   :  { %424 = vmatpush1.bf16.msra.mxu0 %v753_v38  ;;  %465 = vmatpush1.bf16.msra.mxu1 %v754_v39 }
  0x28   :  { %425 = vmatprep.subr.bf16.mxu0 %v755_v40  ;;  %466 = vmatprep.subr.bf16.mxu1 %v757_v41 }
  0x2b   :  { %426 = vmatpush1.bf16.msra.mxu0 %v759_v42  ;;  %467 = vmatpush1.bf16.msra.mxu1 %v760_v43 }
  0x2c   :  { %427 = vmatprep.subr.bf16.mxu0 %v761_v44  ;;  %468 = vmatprep.subr.bf16.mxu1 %v763_v45 }
  0x2f   :  { %428 = vmatpush1.bf16.msra.mxu0 %v765_v48  ;;  %469 = vmatpush1.bf16.msra.mxu1 %v766_v49 }
  0x30   :  { %429 = vmatprep.subr.bf16.mxu0 %v767_v50  ;;  %470 = vmatprep.subr.bf16.mxu1 %v769_v51 }
  0x33   :  { %430 = vmatpush1.bf16.msra.mxu0 %v771_v52  ;;  %471 = vmatpush1.bf16.msra.mxu1 %v772_v53 }
  0x34   :  { %431 = vmatprep.subr.bf16.mxu0 %v773_v54  ;;  %472 = vmatprep.subr.bf16.mxu1 %v775_v55 }
  0x37   :  { %432 = vmatpush1.bf16.msra.mxu0 %v777_v56  ;;  %473 = vmatpush1.bf16.msra.mxu1 %v778_v57  ;;  %v601_v56 = vunpack.c.0.s8 %v1009_v6  ;;  %v603_v57 = vshrl.u32 %v602_v7, 7 }
  0x38   :  { %433 = vmatprep.subr.bf16.mxu0 %v779_v58  ;;  %474 = vmatprep.subr.bf16.mxu1 %v781_v59 }
  0x39   :  { %v604_v5 = vsub.s32 %v601_v56, %v603_v57 }
  0x3b   :  { %434 = vmatpush1.bf16.msra.mxu0 %v783_v60  ;;  %475 = vmatpush1.bf16.msra.mxu1 %v784_v61 }
  0x3c   :  { %435 = vmatprep.subr.bf16.mxu0 %v785_v62  ;;  %476 = vmatprep.subr.bf16.mxu1 %v787_v63 }
  0x3f   :  { %436 = vmatpush1.bf16.msra.mxu0 %v789_v0  ;;  %477 = vmatpush1.bf16.msra.mxu1 %v790_v1 }
  0x42   :  { %438 = vmatmul.mubr.bf16.vlgmr.msra.gmra.mrb[0].mxu0 %v624_v2  ;;  %479 = vmatmul.mubr.bf16.vlgmr.msra.gmra.mrb[0].mxu1 %v624_v2 }
 0x115   :  { %v439_v3 = vpop.f32.mrb[0].mxu0  ;;  %v480_v4 = vpop.f32.mrb[0].mxu1 }
 0x116   :  { %v536_v8 = vrot.slane %v439_v3, 4  ;;  %v560_v9 = vmul.f32 %v439_v3, %v439_v3  ;;  %v548_v10 = vrot.slane %v480_v4, 4  ;;  %v562_v11 = vmul.f32 %v480_v4, %v480_v4  ;;  %v441_v12 = vpop.f32.mrb[1].mxu0  ;;  %v482_v13 = vpop.f32.mrb[1].mxu1 }
 0x117   :  { %v692_v14 = vpack.c.bf16 %v441_v12, %v439_v3  ;;  %v542_v15 = vrot.slane %v441_v12, 4  ;;  %v561_v16 = vmul.f32 %v441_v12, %v441_v12  ;;  %v693_v17 = vpack.c.bf16 %v482_v13, %v480_v4  ;;  %v443_v18 = vpop.f32.mrb[2].mxu0  ;;  %v484_v19 = vpop.f32.mrb[2].mxu1 }
 0x118   :  { %v537_v20 = vadd.f32 %v536_v8, %v439_v3  ;;  %v564_v21 = vrot.slane %v560_v9, 4  ;;  %v549_v22 = vadd.f32 %v548_v10, %v480_v4  ;;  %v576_v23 = vrot.slane %v562_v11, 4  ;;  %v444_v24 = vpop.f32.mrb[3].mxu0  ;;  %v485_v25 = vpop.f32.mrb[3].mxu1 }
 0x119   :  { %534 = vst [vmem:[%s1027_s2] sm:$0xff] %v692_v14  ;;  %v543_v26 = vadd.f32 %v542_v15, %v441_v12  ;;  %v570_v27 = vrot.slane %v561_v16, 4  ;;  %535 = vst [vmem:[%s1027_s2 + $0x8] sm:$0xff] %v693_v17  ;;  %v554_v28 = vrot.slane %v482_v13, 4  ;;  %v563_v29 = vmul.f32 %v482_v13, %v482_v13 }
 0x11a   :  { %v538_v30 = vrot.slane %v537_v20, 2  ;;  %v565_v31 = vadd.f32 %v564_v21, %v560_v9  ;;  %v550_v32 = vrot.slane %v549_v22, 2  ;;  %v577_v33 = vadd.f32 %v576_v23, %v562_v11 }
 0x11b   :  { %v544_v34 = vrot.slane %v543_v26, 2  ;;  %v571_v35 = vadd.f32 %v570_v27, %v561_v16  ;;  %v555_v36 = vadd.f32 %v554_v28, %v482_v13  ;;  %v582_v37 = vrot.slane %v563_v29, 4 }
 0x11c   :  { %v539_v38 = vadd.f32 %v538_v30, %v537_v20  ;;  %v566_v39 = vrot.slane %v565_v31, 2  ;;  %v551_v40 = vadd.f32 %v550_v32, %v549_v22  ;;  %v578_v41 = vrot.slane %v577_v33, 2 }
 0x11d   :  { %v545_v42 = vadd.f32 %v544_v34, %v543_v26  ;;  %v572_v43 = vrot.slane %v571_v35, 2  ;;  %v556_v44 = vrot.slane %v555_v36, 2  ;;  %v583_v45 = vadd.f32 %v582_v37, %v563_v29 }
 0x11e   :  { %v540_v46 = vrot.slane %v539_v38, 1  ;;  %v567_v47 = vadd.f32 %v566_v39, %v565_v31  ;;  %v552_v48 = vrot.slane %v551_v40, 1  ;;  %v579_v49 = vadd.f32 %v578_v41, %v577_v33 }
 0x11f   :  { %v546_v50 = vrot.slane %v545_v42, 1  ;;  %v573_v51 = vadd.f32 %v572_v43, %v571_v35  ;;  %v557_v52 = vadd.f32 %v556_v44, %v555_v36  ;;  %v584_v53 = vrot.slane %v583_v45, 2 }
 0x120   :  { %v568_v54 = vrot.slane %v567_v47, 1  ;;  %v580_v55 = vrot.slane %v579_v49, 1  ;;  %v541_v61 = vadd.f32 %v540_v46, %v539_v38  ;;  %v553_v0 = vadd.f32 %v552_v48, %v551_v40 }
 0x121   :  { %v574_v58 = vrot.slane %v573_v51, 1  ;;  %v558_v59 = vrot.slane %v557_v52, 1  ;;  %v585_v60 = vadd.f32 %v584_v53, %v583_v45  ;;  %v547_v1 = vadd.f32 %v546_v50, %v545_v42 }
 0x122   :  { %v569_v62 = vadd.f32 %v568_v54, %v567_v47  ;;  %v581_v63 = vadd.f32 %v580_v55, %v579_v49 }
 0x123   :  { %v575_v2 = vadd.f32 %v574_v58, %v573_v51  ;;  %v586_v3 = vrot.slane %v585_v60, 1  ;;  %v559_v6 = vadd.f32 %v558_v59, %v557_v52 }
 0x124   :  { %v589_v4 = vsel %vm588_vm0, %v541_v61, %v569_v62  ;;  %v591_v8 = vsel %vm588_vm0, %v553_v0, %v581_v63 }
 0x125   :  { %v590_v9 = vsel %vm588_vm0, %v547_v1, %v575_v2  ;;  %v587_v7 = vadd.f32 %v586_v3, %v585_v60 }
 0x126   :  { %v597_v10 = vcombine.low %v589_v4, %v590_v9 }
 0x127   :  { %v592_v11 = vsel %vm588_vm0, %v559_v6, %v587_v7 }
 0x128   :  { %v605_v12 = vrot.slane %v597_v10, %v604_v5  ;;  %v598_v13 = vcombine.low %v591_v8, %v592_v11 }
 0x12a   :  { %v612_v14 = vrot.slane %v598_v13, %v604_v5 }
 0x12c   :  { %v613_v15 = vcombine.low %v605_v12, %v612_v14 }
 0x12e   :  { %615 = vst [vmem:[%s1028_s3] sm:$0xff] %v613_v15 }

// kernel: _lambda_.49
= control target key start
LH: loop header
LB: loop body
LE: loop exit
PB: predicated region body
PF: predicated region fallthrough
CT: control target
= control target key end

     0   :  { %v146_v7 = vmov 1966171168   ;;  %v33_v9 = vlaneseq  ;;  %v147_v12 = vmov 857870592   ;;  %s194_s1 = inlined_call_operand.vmem [shape: f32[1,2,512], index: 1, kind: input, shape index: {}]   ;;  %s195_s2 = inlined_call_operand.vmem [shape: f32[1,512], index: 2, kind: input, shape index: {}]   ;;  %s196_s0 = inlined_call_operand.vmem [shape: bf16[8,512], index: 0, kind: input, shape index: {}]   ;;  %s197_s3 = inlined_call_operand.vmem [shape: f32[1,512], index: 3, kind: input, shape index: {}]   ;;  %s198_s4 = inlined_call_operand.vmem [shape: bf16[8,512], index: 4, kind: output, shape index: {}]  }
   0x1   :  { %v17_v0 = vld [vmem:[%s194_s1] sm:$0xff]  ;;  %v31_v8 = vunpack.c.l.s4 %v146_v7  ;;  %v43_v13 = vunpack.c.l.s4 %v147_v12  ;;  %v62_v25 = vld [vmem:[%s196_s0 + $0x8] sm:$0xff] }
   0x2   :  { %v19_v1 = vmul.f32 0.5, %v17_v0  ;;  %v34_v11 = vshrl.u32 %v33_v9, 7  ;;  %v26_v18 = vld [vmem:[%s195_s2] sm:$0xf]  ;;  %v65_v32 = vunpack.c.l.bf16 %v62_v25  ;;  %v66_v33 = vunpack.c.h.bf16 %v62_v25 }
   0x3   :  { %v32_v10 = vunpack.c.0.s8 %v31_v8  ;;  %v44_v15 = vunpack.c.0.s8 %v43_v13  ;;  %v61_v21 = vld [vmem:[%s196_s0] sm:$0xff] }
   0x4   :  { %v20_v2 = vmul.f32 %v19_v1, %v19_v1  ;;  %v69_v22 = vsub.s32 0, %v34_v11  ;;  %v73_v24 = vsub.s32 1, %v34_v11  ;;  %v77_v26 = vsub.s32 2, %v34_v11  ;;  %v40_v38 = vld [vmem:[%s197_s3] sm:$0xf] }
   0x5   :  { %v35_v14 = vsub.s32 %v32_v10, %v34_v11  ;;  %v47_v20 = vsub.s32 %v44_v15, %v34_v11  ;;  %v81_v27 = vsub.s32 3, %v34_v11  ;;  %v63_v29 = vunpack.c.l.bf16 %v61_v21 }
   0x6   :  { %v22_v3 = vrot.slane %v20_v2, 7  ;;  %v64_v30 = vunpack.c.h.bf16 %v61_v21 }
   0x8   :  { %v24_v4 = vsub.f32 %v19_v1, %v22_v3 }
   0xa   :  { %v25_v5 = vmax.f32 %v24_v4, 0.0 }
   0xc   :  { %v27_v6 = vadd.f32 1e-05, %v25_v5 }
   0xe   :  { %144 = vrsqrt.f32 %v27_v6 }
  0x18   :  { %v145_v16 = vpop.eup %144 }
  0x19   :  { %v36_v17 = vrot.slane %v145_v16, %v35_v14 }
  0x1b   :  { %v37_v19 = vcombine.high %v36_v17, %v36_v17 }
  0x1d   :  { %v39_v23 = vmul.f32 %v37_v19, %v26_v18 }
  0x1f   :  { %v48_v28 = vrot.slane %v39_v23, %v47_v20  ;;  %v70_v31 = vrot.slane %v39_v23, %v69_v22  ;;  %v74_v35 = vrot.slane %v39_v23, %v73_v24  ;;  %v78_v36 = vrot.slane %v39_v23, %v77_v26 }
  0x20   :  { %v82_v37 = vrot.slane %v39_v23, %v81_v27 }
  0x21   :  { %v50_v34 = vmul.f32 %v48_v28, %v19_v1  ;;  %v87_v40 = vmul.f32 %v70_v31, %v63_v29  ;;  %v88_v42 = vmul.f32 %v74_v35, %v64_v30  ;;  %v89_v43 = vmul.f32 %v78_v36, %v65_v32 }
  0x22   :  { %v90_v44 = vmul.f32 %v82_v37, %v66_v33 }
  0x23   :  { %v58_v39 = vrot.slane %v50_v34, %v35_v14 }
  0x25   :  { %v60_v41 = vsub.f32 %v40_v38, %v58_v39 }
  0x27   :  { %v95_v45 = vrot.slane %v60_v41, %v69_v22  ;;  %v99_v46 = vrot.slane %v60_v41, %v73_v24  ;;  %v103_v47 = vrot.slane %v60_v41, %v77_v26  ;;  %v107_v48 = vrot.slane %v60_v41, %v81_v27 }
  0x29   :  { %v112_v49 = vadd.f32 %v95_v45, %v87_v40  ;;  %v113_v50 = vadd.f32 %v99_v46, %v88_v42  ;;  %v114_v51 = vadd.f32 %v103_v47, %v89_v43  ;;  %v115_v52 = vadd.f32 %v107_v48, %v90_v44 }
  0x2b   :  { %v140_v53 = vpack.c.bf16 %v113_v50, %v112_v49  ;;  %v141_v54 = vpack.c.bf16 %v115_v52, %v114_v51 }
  0x2d   :  { %132 = vst [vmem:[%s198_s4] sm:$0xff] %v140_v53  ;;  %133 = vst [vmem:[%s198_s4 + $0x8] sm:$0xff] %v141_v54 }

// kernel: _lambda_.47
= control target key start
LH: loop header
LB: loop body
LE: loop exit
PB: predicated region body
PF: predicated region fallthrough
CT: control target
= control target key end

     0   :  { %v150_v7 = vmov 1966171168   ;;  %v33_v9 = vlaneseq  ;;  %v151_v12 = vmov 857870592   ;;  %s198_s1 = inlined_call_operand.vmem [shape: f32[1,2,512], index: 1, kind: input, shape index: {}]   ;;  %s199_s2 = inlined_call_operand.vmem [shape: f32[1,512], index: 2, kind: input, shape index: {}]   ;;  %s200_s0 = inlined_call_operand.vmem [shape: bf16[8,512], index: 0, kind: input, shape index: {}]   ;;  %s201_s3 = inlined_call_operand.vmem [shape: f32[1,512], index: 3, kind: input, shape index: {}]   ;;  %s202_s4 = inlined_call_operand.vmem [shape: bf16[8,512], index: 4, kind: output, shape index: {}]  }
   0x1   :  { %v17_v0 = vld [vmem:[%s198_s1] sm:$0xff]  ;;  %v31_v8 = vunpack.c.l.s4 %v150_v7  ;;  %v43_v13 = vunpack.c.l.s4 %v151_v12  ;;  %v62_v25 = vld [vmem:[%s200_s0 + $0x8] sm:$0xff] }
   0x2   :  { %v19_v1 = vmul.f32 0.5, %v17_v0  ;;  %v34_v11 = vshrl.u32 %v33_v9, 7  ;;  %v26_v18 = vld [vmem:[%s199_s2] sm:$0xf]  ;;  %v65_v32 = vunpack.c.l.bf16 %v62_v25  ;;  %v66_v33 = vunpack.c.h.bf16 %v62_v25 }
   0x3   :  { %v32_v10 = vunpack.c.0.s8 %v31_v8  ;;  %v44_v15 = vunpack.c.0.s8 %v43_v13  ;;  %v61_v21 = vld [vmem:[%s200_s0] sm:$0xff] }
   0x4   :  { %v20_v2 = vmul.f32 %v19_v1, %v19_v1  ;;  %v69_v22 = vsub.s32 0, %v34_v11  ;;  %v73_v24 = vsub.s32 1, %v34_v11  ;;  %v77_v26 = vsub.s32 2, %v34_v11  ;;  %v40_v38 = vld [vmem:[%s201_s3] sm:$0xf] }
   0x5   :  { %v35_v14 = vsub.s32 %v32_v10, %v34_v11  ;;  %v47_v20 = vsub.s32 %v44_v15, %v34_v11  ;;  %v81_v27 = vsub.s32 3, %v34_v11  ;;  %v63_v29 = vunpack.c.l.bf16 %v61_v21 }
   0x6   :  { %v22_v3 = vrot.slane %v20_v2, 7  ;;  %v64_v30 = vunpack.c.h.bf16 %v61_v21 }
   0x8   :  { %v24_v4 = vsub.f32 %v19_v1, %v22_v3 }
   0xa   :  { %v25_v5 = vmax.f32 %v24_v4, 0.0 }
   0xc   :  { %v27_v6 = vadd.f32 1e-05, %v25_v5 }
   0xe   :  { %148 = vrsqrt.f32 %v27_v6 }
  0x18   :  { %v149_v16 = vpop.eup %148 }
  0x19   :  { %v36_v17 = vrot.slane %v149_v16, %v35_v14 }
  0x1b   :  { %v37_v19 = vcombine.high %v36_v17, %v36_v17 }
  0x1d   :  { %v39_v23 = vmul.f32 %v37_v19, %v26_v18 }
  0x1f   :  { %v48_v28 = vrot.slane %v39_v23, %v47_v20  ;;  %v70_v31 = vrot.slane %v39_v23, %v69_v22  ;;  %v74_v35 = vrot.slane %v39_v23, %v73_v24  ;;  %v78_v36 = vrot.slane %v39_v23, %v77_v26 }
  0x20   :  { %v82_v37 = vrot.slane %v39_v23, %v81_v27 }
  0x21   :  { %v50_v34 = vmul.f32 %v48_v28, %v19_v1  ;;  %v87_v40 = vmul.f32 %v70_v31, %v63_v29  ;;  %v88_v42 = vmul.f32 %v74_v35, %v64_v30  ;;  %v89_v43 = vmul.f32 %v78_v36, %v65_v32 }
  0x22   :  { %v90_v44 = vmul.f32 %v82_v37, %v66_v33 }
  0x23   :  { %v58_v39 = vrot.slane %v50_v34, %v35_v14 }
  0x25   :  { %v60_v41 = vsub.f32 %v40_v38, %v58_v39 }
  0x27   :  { %v95_v45 = vrot.slane %v60_v41, %v69_v22  ;;  %v99_v46 = vrot.slane %v60_v41, %v73_v24  ;;  %v103_v47 = vrot.slane %v60_v41, %v77_v26  ;;  %v107_v48 = vrot.slane %v60_v41, %v81_v27 }
  0x29   :  { %v112_v49 = vadd.f32 %v95_v45, %v87_v40  ;;  %v113_v50 = vadd.f32 %v99_v46, %v88_v42  ;;  %v114_v51 = vadd.f32 %v103_v47, %v89_v43  ;;  %v115_v52 = vadd.f32 %v107_v48, %v90_v44 }
  0x2b   :  { %v116_v53 = vmax.f32 %v112_v49, 0.0  ;;  %v117_v54 = vmax.f32 %v113_v50, 0.0  ;;  %v118_v55 = vmax.f32 %v114_v51, 0.0  ;;  %v119_v56 = vmax.f32 %v115_v52, 0.0 }
  0x2d   :  { %v144_v57 = vpack.c.bf16 %v117_v54, %v116_v53  ;;  %v145_v58 = vpack.c.bf16 %v119_v56, %v118_v55 }
  0x2f   :  { %136 = vst [vmem:[%s202_s4] sm:$0xff] %v144_v57  ;;  %137 = vst [vmem:[%s202_s4 + $0x8] sm:$0xff] %v145_v58 }

// kernel: _lambda_.46
= control target key start
LH: loop header
LB: loop body
LE: loop exit
PB: predicated region body
PF: predicated region fallthrough
CT: control target
= control target key end

     0   :  { %s1665_s12 = smov 0   ;;  %s1667_s13 = smov 0   ;;  %s1820_s0 = inlined_call_operand.vmem [shape: bf16[8,2304], index: 0, kind: input, shape index: {}]   ;;  %s1821_s1 = inlined_call_operand.vmem [shape: bf16[2304,512], index: 1, kind: input, shape index: {}]   ;;  %s1822_s2 = inlined_call_operand.vmem [shape: bf16[8,512], index: 2, kind: output, shape index: {0}]   ;;  %s1823_s3 = inlined_call_operand.vmem [shape: f32[1,2,512], index: 3, kind: output, shape index: {1}]  }
   0x1   :  { %s1669_s14 = smov 0  }
   0x2 LB: > { %s26_s15 = sadd.s32 1, %s1637_s13  ;;  %p1321_p0 = scmp.ge.s32.totalorder %s1641_s14, 1  ;;  %s1641_s14 = sphi %s1669_s14, %s14_s14   ;;  %s1637_s13 = sphi %s1667_s13, %s1825_s13   ;;  %s1633_s12 = sphi %s1665_s12, %s1824_s12  }
   0x3   : > { %p27_p1 = scmp.ge.s32.totalorder %s26_s15, 6  ;;  %p189_p2 = scmp.lt.s32.totalorder %s1641_s14, 7 }
   0x5   : > { %s1827_s15 = smov (%p27_p1, %s26_s15), 0  ;;  %p190_p3 = pnand %p1321_p0, %p189_p2 }
   0x6   : > { %s250_s16 = smul.u32 (!%p190_p3), 48, %s1633_s12  ;;  %p1424_p6 = scmp.ne.s32.totalorder (!%p190_p3), %s1633_s12, 0 }
   0x7   : > { %193 = sbr.rel (%p190_p3) target bundleno = 369 (0x171), region = 28 }
   0x8   : > { %p252_p4 = scmp.lt.s32.totalorder (!%p190_p3), %s250_s16, 287  ;;  %s240_s21 = smul.u32 (!%p190_p3), 3, %s1633_s12 }
   0xa   : > { %p243_p5 = scmp.lt.s32.totalorder (!%p190_p3), %s240_s21, 17 }
   0xe   : > { %s1829_s16 = smov (!%p252_p4, %s250_s16), 287  ;;  %s1831_s21 = smov (!%p243_p5, %s240_s21), 17 }
   0xf   : > { %s1435_s17 = sshll.u32 %s1829_s16, 4  ;;  %s1322_s22 = sshll.u32 %s1831_s21, 2 }
  0x10   : > { %s1689_s20 = scalar_lea.vmem %s1821_s1, %s1435_s17  ;;  %s1739_s25 = scalar_lea.vmem %s1820_s0, %s1322_s22 }
  0x11   : > { %v1472_v0 = vld [vmem:[%s1689_s20 + $0x4] ss:$16 sps:$4 sm:$0xff]   ;;  %v1474_v1 = vld [vmem:[%s1689_s20 + $0xc] ss:$16 sps:$4 sm:$0xff]   ;;  %v1476_v2 = vld [vmem:[%s1689_s20] ss:$16 sps:$4 sm:$0xff]  }
  0x12   : > { %872 = vmatprep.subr.bf16.mxu0 %v1472_v0  ;;  %v1477_v3 = vld [vmem:[%s1689_s20 + $0x8] ss:$16 sps:$4 sm:$0xff]   ;;  %954 = vmatprep.subr.bf16.mxu1 %v1474_v1  ;;  %v1478_v4 = vld [vmem:[%s1689_s20 + $0x24] ss:$16 sps:$4 sm:$0xff]   ;;  %v1480_v5 = vld [vmem:[%s1689_s20 + $0x2c] ss:$16 sps:$4 sm:$0xff]  }
  0x13   : > { %873 = vmatpush1.bf16.msra.mxu0 %v1476_v2  ;;  %955 = vmatpush1.bf16.msra.mxu1 %v1477_v3  ;;  %v1482_v6 = vld [vmem:[%s1689_s20 + $0x20] ss:$16 sps:$4 sm:$0xff]   ;;  %v1483_v7 = vld [vmem:[%s1689_s20 + $0x28] ss:$16 sps:$4 sm:$0xff]   ;;  %v1484_v8 = vld [vmem:[%s1689_s20 + $0x44] ss:$16 sps:$4 sm:$0xff]  }
  0x14   : > { %874 = vmatprep.subr.bf16.mxu0 %v1478_v4  ;;  %956 = vmatprep.subr.bf16.mxu1 %v1480_v5  ;;  %v1486_v9 = vld [vmem:[%s1689_s20 + $0x4c] ss:$16 sps:$4 sm:$0xff]   ;;  %v1488_v10 = vld [vmem:[%s1689_s20 + $0x40] ss:$16 sps:$4 sm:$0xff]   ;;  %v1489_v11 = vld [vmem:[%s1689_s20 + $0x48] ss:$16 sps:$4 sm:$0xff]  }
  0x15   : > { %v1490_v12 = vld [vmem:[%s1689_s20 + $0x64] ss:$16 sps:$4 sm:$0xff]   ;;  %v1492_v13 = vld [vmem:[%s1689_s20 + $0x6c] ss:$16 sps:$4 sm:$0xff]   ;;  %v1494_v14 = vld [vmem:[%s1689_s20 + $0x60] ss:$16 sps:$4 sm:$0xff]  }
  0x16   : > { %v1495_v15 = vld [vmem:[%s1689_s20 + $0x68] ss:$16 sps:$4 sm:$0xff]   ;;  %v1496_v16 = vld [vmem:[%s1689_s20 + $0x84] ss:$16 sps:$4 sm:$0xff]   ;;  %v1498_v17 = vld [vmem:[%s1689_s20 + $0x8c] ss:$16 sps:$4 sm:$0xff]  }
  0x17   : > { %875 = vmatpush1.bf16.msra.mxu0 %v1482_v6  ;;  %957 = vmatpush1.bf16.msra.mxu1 %v1483_v7  ;;  %v1500_v18 = vld [vmem:[%s1689_s20 + $0x80] ss:$16 sps:$4 sm:$0xff]   ;;  %v1501_v19 = vld [vmem:[%s1689_s20 + $0x88] ss:$16 sps:$4 sm:$0xff]   ;;  %v1502_v20 = vld [vmem:[%s1689_s20 + $0xa4] ss:$16 sps:$4 sm:$0xff]  }
  0x18   : > { %876 = vmatprep.subr.bf16.mxu0 %v1484_v8  ;;  %958 = vmatprep.subr.bf16.mxu1 %v1486_v9  ;;  %v1504_v21 = vld [vmem:[%s1689_s20 + $0xac] ss:$16 sps:$4 sm:$0xff]   ;;  %v1506_v22 = vld [vmem:[%s1689_s20 + $0xa0] ss:$16 sps:$4 sm:$0xff]   ;;  %v1507_v23 = vld [vmem:[%s1689_s20 + $0xa8] ss:$16 sps:$4 sm:$0xff]  }
  0x19   : > { %v1508_v24 = vld [vmem:[%s1689_s20 + $0xc4] ss:$16 sps:$4 sm:$0xff]   ;;  %v1510_v25 = vld [vmem:[%s1689_s20 + $0xcc] ss:$16 sps:$4 sm:$0xff]   ;;  %v1512_v26 = vld [vmem:[%s1689_s20 + $0xc0] ss:$16 sps:$4 sm:$0xff]  }
  0x1a   : > { %v1513_v27 = vld [vmem:[%s1689_s20 + $0xc8] ss:$16 sps:$4 sm:$0xff]   ;;  %v1514_v28 = vld [vmem:[%s1689_s20 + $0xe4] ss:$16 sps:$4 sm:$0xff]   ;;  %v1516_v29 = vld [vmem:[%s1689_s20 + $0xec] ss:$16 sps:$4 sm:$0xff]  }
  0x1b   : > { %877 = vmatpush1.bf16.msra.mxu0 %v1488_v10  ;;  %959 = vmatpush1.bf16.msra.mxu1 %v1489_v11  ;;  %v1518_v30 = vld [vmem:[%s1689_s20 + $0xe0] ss:$16 sps:$4 sm:$0xff]   ;;  %v1519_v31 = vld [vmem:[%s1689_s20 + $0xe8] ss:$16 sps:$4 sm:$0xff]   ;;  %v1520_v32 = vld [vmem:[%s1689_s20 + $0x104] ss:$16 sps:$4 sm:$0xff]  }
  0x1c   : > { %878 = vmatprep.subr.bf16.mxu0 %v1490_v12  ;;  %960 = vmatprep.subr.bf16.mxu1 %v1492_v13  ;;  %v1522_v33 = vld [vmem:[%s1689_s20 + $0x10c] ss:$16 sps:$4 sm:$0xff]   ;;  %v1524_v34 = vld [vmem:[%s1689_s20 + $0x100] ss:$16 sps:$4 sm:$0xff]   ;;  %v1525_v35 = vld [vmem:[%s1689_s20 + $0x108] ss:$16 sps:$4 sm:$0xff]  }
  0x1d   : > { %v1526_v36 = vld [vmem:[%s1689_s20 + $0x124] ss:$16 sps:$4 sm:$0xff]   ;;  %v1528_v37 = vld [vmem:[%s1689_s20 + $0x12c] ss:$16 sps:$4 sm:$0xff]   ;;  %v1530_v38 = vld [vmem:[%s1689_s20 + $0x120] ss:$16 sps:$4 sm:$0xff]  }
  0x1e   : > { %v1531_v39 = vld [vmem:[%s1689_s20 + $0x128] ss:$16 sps:$4 sm:$0xff]   ;;  %v1532_v40 = vld [vmem:[%s1689_s20 + $0x144] ss:$16 sps:$4 sm:$0xff]   ;;  %v1534_v41 = vld [vmem:[%s1689_s20 + $0x14c] ss:$16 sps:$4 sm:$0xff]  }
  0x1f   : > { %879 = vmatpush1.bf16.msra.mxu0 %v1494_v14  ;;  %961 = vmatpush1.bf16.msra.mxu1 %v1495_v15  ;;  %v1536_v42 = vld [vmem:[%s1689_s20 + $0x140] ss:$16 sps:$4 sm:$0xff]   ;;  %v1537_v43 = vld [vmem:[%s1689_s20 + $0x148] ss:$16 sps:$4 sm:$0xff]   ;;  %v1538_v44 = vld [vmem:[%s1689_s20 + $0x164] ss:$16 sps:$4 sm:$0xff]  }
  0x20   : > { %880 = vmatprep.subr.bf16.mxu0 %v1496_v16  ;;  %962 = vmatprep.subr.bf16.mxu1 %v1498_v17  ;;  %v1540_v45 = vld [vmem:[%s1689_s20 + $0x16c] ss:$16 sps:$4 sm:$0xff]   ;;  %v283_v46 = vld [vmem:[%s1739_s25] sm:$0xff]  ;;  %v1543_v49 = vld [vmem:[%s1689_s20 + $0x168] ss:$16 sps:$4 sm:$0xff]   ;;  %v1643_v13 = vmov 0  }
  0x21   : > { %v1542_v47 = vld [vmem:[%s1689_s20 + $0x160] ss:$16 sps:$4 sm:$0xff]   ;;  %v1326_v48 = vcombine.high %v283_v46, %v283_v46  ;;  %v1544_v50 = vld [vmem:[%s1689_s20 + $0x184] ss:$16 sps:$4 sm:$0xff]   ;;  %v1546_v51 = vld [vmem:[%s1689_s20 + $0x18c] ss:$16 sps:$4 sm:$0xff]   ;;  %v1325_v4 = vcombine.low %v283_v46, %v283_v46 }
  0x22   : > { %v1548_v52 = vld [vmem:[%s1689_s20 + $0x180] ss:$16 sps:$4 sm:$0xff]   ;;  %v1549_v53 = vld [vmem:[%s1689_s20 + $0x188] ss:$16 sps:$4 sm:$0xff]   ;;  %v1550_v54 = vld [vmem:[%s1689_s20 + $0x1a4] ss:$16 sps:$4 sm:$0xff]  }
  0x23   : > { %881 = vmatpush1.bf16.msra.mxu0 %v1500_v18  ;;  %963 = vmatpush1.bf16.msra.mxu1 %v1501_v19  ;;  %v1552_v55 = vld [vmem:[%s1689_s20 + $0x1ac] ss:$16 sps:$4 sm:$0xff]   ;;  %v1554_v56 = vld [vmem:[%s1689_s20 + $0x1a0] ss:$16 sps:$4 sm:$0xff]   ;;  %v1555_v57 = vld [vmem:[%s1689_s20 + $0x1a8] ss:$16 sps:$4 sm:$0xff]  }
  0x24   : > { %882 = vmatprep.subr.bf16.mxu0 %v1502_v20  ;;  %964 = vmatprep.subr.bf16.mxu1 %v1504_v21  ;;  %v1556_v58 = vld [vmem:[%s1689_s20 + $0x1c4] ss:$16 sps:$4 sm:$0xff]   ;;  %v1558_v59 = vld [vmem:[%s1689_s20 + $0x1cc] ss:$16 sps:$4 sm:$0xff]   ;;  %v1560_v60 = vld [vmem:[%s1689_s20 + $0x1c0] ss:$16 sps:$4 sm:$0xff]  }
  0x25   : > { %904 = vmatprep.mubr.bf16.mxu0 %v1326_v48  ;;  %986 = vmatprep.mubr.bf16.mxu1 %v1326_v48  ;;  %v1561_v61 = vld [vmem:[%s1689_s20 + $0x1c8] ss:$16 sps:$4 sm:$0xff]   ;;  %v1562_v62 = vld [vmem:[%s1689_s20 + $0x1e4] ss:$16 sps:$4 sm:$0xff]   ;;  %v1564_v63 = vld [vmem:[%s1689_s20 + $0x1ec] ss:$16 sps:$4 sm:$0xff]  }
  0x26   : > { %v1566_v0 = vld [vmem:[%s1689_s20 + $0x1e0] ss:$16 sps:$4 sm:$0xff]   ;;  %v1567_v1 = vld [vmem:[%s1689_s20 + $0x1e8] ss:$16 sps:$4 sm:$0xff]   ;;  %v1573_v2 = vld [vmem:[%s1689_s20 + $0x204] ss:$16 sps:$4 sm:$0xff]  }
  0x27   : > { %883 = vmatpush1.bf16.msra.mxu0 %v1506_v22  ;;  %965 = vmatpush1.bf16.msra.mxu1 %v1507_v23  ;;  %v1576_v3 = vld [vmem:[%s1689_s20 + $0x20c] ss:$16 sps:$4 sm:$0xff]   ;;  %v1571_v5 = vld [vmem:[%s1689_s20 + $0x200] ss:$16 sps:$4 sm:$0xff]   ;;  %v1574_v6 = vld [vmem:[%s1689_s20 + $0x208] ss:$16 sps:$4 sm:$0xff]  }
  0x28   : > { %884 = vmatprep.subr.bf16.mxu0 %v1508_v24  ;;  %966 = vmatprep.subr.bf16.mxu1 %v1510_v25  ;;  %v1579_v7 = vld [vmem:[%s1689_s20 + $0x224] ss:$16 sps:$4 sm:$0xff]   ;;  %v1582_v8 = vld [vmem:[%s1689_s20 + $0x22c] ss:$16 sps:$4 sm:$0xff]   ;;  %v1577_v9 = vld [vmem:[%s1689_s20 + $0x220] ss:$16 sps:$4 sm:$0xff]  }
  0x29   : > { %v1580_v10 = vld [vmem:[%s1689_s20 + $0x228] ss:$16 sps:$4 sm:$0xff]   ;;  %v1585_v11 = vld [vmem:[%s1689_s20 + $0x244] ss:$16 sps:$4 sm:$0xff]   ;;  %v1588_v12 = vld [vmem:[%s1689_s20 + $0x24c] ss:$16 sps:$4 sm:$0xff]  }
  0x2a   : > { %v1583_v14 = vld [vmem:[%s1689_s20 + $0x240] ss:$16 sps:$4 sm:$0xff]   ;;  %v1586_v15 = vld [vmem:[%s1689_s20 + $0x248] ss:$16 sps:$4 sm:$0xff]   ;;  %v1591_v16 = vld [vmem:[%s1689_s20 + $0x264] ss:$16 sps:$4 sm:$0xff]  }
  0x2b   : > { %885 = vmatpush1.bf16.msra.mxu0 %v1512_v26  ;;  %967 = vmatpush1.bf16.msra.mxu1 %v1513_v27  ;;  %v1594_v17 = vld [vmem:[%s1689_s20 + $0x26c] ss:$16 sps:$4 sm:$0xff]   ;;  %v1589_v18 = vld [vmem:[%s1689_s20 + $0x260] ss:$16 sps:$4 sm:$0xff]   ;;  %v1592_v19 = vld [vmem:[%s1689_s20 + $0x268] ss:$16 sps:$4 sm:$0xff]  }
  0x2c   : > { %886 = vmatprep.subr.bf16.mxu0 %v1514_v28  ;;  %968 = vmatprep.subr.bf16.mxu1 %v1516_v29  ;;  %v1597_v20 = vld [vmem:[%s1689_s20 + $0x284] ss:$16 sps:$4 sm:$0xff]   ;;  %v1600_v21 = vld [vmem:[%s1689_s20 + $0x28c] ss:$16 sps:$4 sm:$0xff]   ;;  %v1595_v22 = vld [vmem:[%s1689_s20 + $0x280] ss:$16 sps:$4 sm:$0xff]  }
  0x2d   : > { %v1598_v23 = vld [vmem:[%s1689_s20 + $0x288] ss:$16 sps:$4 sm:$0xff]   ;;  %v1603_v24 = vld [vmem:[%s1689_s20 + $0x2a4] ss:$16 sps:$4 sm:$0xff]   ;;  %v1606_v25 = vld [vmem:[%s1689_s20 + $0x2ac] ss:$16 sps:$4 sm:$0xff]  }
  0x2e   : > { %v1601_v26 = vld [vmem:[%s1689_s20 + $0x2a0] ss:$16 sps:$4 sm:$0xff]   ;;  %v1604_v27 = vld [vmem:[%s1689_s20 + $0x2a8] ss:$16 sps:$4 sm:$0xff]   ;;  %v1609_v28 = vld [vmem:[%s1689_s20 + $0x2c4] ss:$16 sps:$4 sm:$0xff]  }
  0x2f   : > { %887 = vmatpush1.bf16.msra.mxu0 %v1518_v30  ;;  %969 = vmatpush1.bf16.msra.mxu1 %v1519_v31  ;;  %v1612_v29 = vld [vmem:[%s1689_s20 + $0x2cc] ss:$16 sps:$4 sm:$0xff]   ;;  %v1607_v30 = vld [vmem:[%s1689_s20 + $0x2c0] ss:$16 sps:$4 sm:$0xff]   ;;  %v1610_v31 = vld [vmem:[%s1689_s20 + $0x2c8] ss:$16 sps:$4 sm:$0xff]  }
  0x30   : > { %888 = vmatprep.subr.bf16.mxu0 %v1520_v32  ;;  %970 = vmatprep.subr.bf16.mxu1 %v1522_v33  ;;  %v1615_v32 = vld [vmem:[%s1689_s20 + $0x2e4] ss:$16 sps:$4 sm:$0xff]   ;;  %v1618_v33 = vld [vmem:[%s1689_s20 + $0x2ec] ss:$16 sps:$4 sm:$0xff]  }
  0x33   : > { %889 = vmatpush1.bf16.msra.mxu0 %v1524_v34  ;;  %971 = vmatpush1.bf16.msra.mxu1 %v1525_v35  ;;  %v1613_v34 = vld [vmem:[%s1689_s20 + $0x2e0] ss:$16 sps:$4 sm:$0xff]   ;;  %v1616_v35 = vld [vmem:[%s1689_s20 + $0x2e8] ss:$16 sps:$4 sm:$0xff]  }
  0x34   : > { %890 = vmatprep.subr.bf16.mxu0 %v1526_v36  ;;  %972 = vmatprep.subr.bf16.mxu1 %v1528_v37  ;;  %v1570_v36 = vld [vmem:[%s1739_s25 + $0x8] ss:$0 sps:$4 sm:$0xff]  }
  0x37   : > { %891 = vmatpush1.bf16.msra.mxu0 %v1530_v38  ;;  %973 = vmatpush1.bf16.msra.mxu1 %v1531_v39 }
  0x38   : > { %892 = vmatprep.subr.bf16.mxu0 %v1532_v40  ;;  %974 = vmatprep.subr.bf16.mxu1 %v1534_v41 }
  0x3b   : > { %893 = vmatpush1.bf16.msra.mxu0 %v1536_v42  ;;  %975 = vmatpush1.bf16.msra.mxu1 %v1537_v43 }
  0x3c   : > { %894 = vmatprep.subr.bf16.mxu0 %v1538_v44  ;;  %976 = vmatprep.subr.bf16.mxu1 %v1540_v45 }
  0x3f   : > { %895 = vmatpush1.bf16.msra.mxu0 %v1542_v47  ;;  %977 = vmatpush1.bf16.msra.mxu1 %v1543_v49 }
  0x40   : > { %896 = vmatprep.subr.bf16.mxu0 %v1544_v50  ;;  %978 = vmatprep.subr.bf16.mxu1 %v1546_v51 }
  0x43   : > { %897 = vmatpush1.bf16.msra.mxu0 %v1548_v52  ;;  %979 = vmatpush1.bf16.msra.mxu1 %v1549_v53 }
  0x44   : > { %898 = vmatprep.subr.bf16.mxu0 %v1550_v54  ;;  %980 = vmatprep.subr.bf16.mxu1 %v1552_v55 }
  0x47   : > { %899 = vmatpush1.bf16.msra.mxu0 %v1554_v56  ;;  %981 = vmatpush1.bf16.msra.mxu1 %v1555_v57 }
  0x48   : > { %900 = vmatprep.subr.bf16.mxu0 %v1556_v58  ;;  %982 = vmatprep.subr.bf16.mxu1 %v1558_v59 }
  0x4b   : > { %901 = vmatpush1.bf16.msra.mxu0 %v1560_v60  ;;  %983 = vmatpush1.bf16.msra.mxu1 %v1561_v61 }
  0x4c   : > { %902 = vmatprep.subr.bf16.mxu0 %v1562_v62  ;;  %984 = vmatprep.subr.bf16.mxu1 %v1564_v63 }
  0x4f   : > { %903 = vmatpush1.bf16.msra.mxu0 %v1566_v0  ;;  %985 = vmatpush1.bf16.msra.mxu1 %v1567_v1 }
  0x50   : > { %913 = vmatprep.subr.bf16.mxu0 %v1573_v2  ;;  %995 = vmatprep.subr.bf16.mxu1 %v1576_v3 }
  0x52   : > { %905 = vmatmul.mubr.bf16.vlgmr.msra.gmra.mrb[0].mxu0 %v1325_v4  ;;  %987 = vmatmul.mubr.bf16.vlgmr.msra.gmra.mrb[0].mxu1 %v1325_v4 }
  0x53   : > { %914 = vmatpush1.bf16.msra.mxu0 %v1571_v5  ;;  %996 = vmatpush1.bf16.msra.mxu1 %v1574_v6 }
  0x54   : > { %915 = vmatprep.subr.bf16.mxu0 %v1579_v7  ;;  %997 = vmatprep.subr.bf16.mxu1 %v1582_v8 }
  0x55   : > { %945 = vmatprep.mubr.bf16.mxu0 %v1643_v13  ;;  %1027 = vmatprep.mubr.bf16.mxu1 %v1643_v13 }
  0x57   : > { %916 = vmatpush1.bf16.msra.mxu0 %v1577_v9  ;;  %998 = vmatpush1.bf16.msra.mxu1 %v1580_v10 }
  0x58   : > { %917 = vmatprep.subr.bf16.mxu0 %v1585_v11  ;;  %999 = vmatprep.subr.bf16.mxu1 %v1588_v12 }
  0x5b   : > { %918 = vmatpush1.bf16.msra.mxu0 %v1583_v14  ;;  %1000 = vmatpush1.bf16.msra.mxu1 %v1586_v15 }
  0x5c   : > { %919 = vmatprep.subr.bf16.mxu0 %v1591_v16  ;;  %1001 = vmatprep.subr.bf16.mxu1 %v1594_v17 }
  0x5f   : > { %920 = vmatpush1.bf16.msra.mxu0 %v1589_v18  ;;  %1002 = vmatpush1.bf16.msra.mxu1 %v1592_v19 }
  0x60   : > { %921 = vmatprep.subr.bf16.mxu0 %v1597_v20  ;;  %1003 = vmatprep.subr.bf16.mxu1 %v1600_v21 }
  0x63   : > { %922 = vmatpush1.bf16.msra.mxu0 %v1595_v22  ;;  %1004 = vmatpush1.bf16.msra.mxu1 %v1598_v23 }
  0x64   : > { %923 = vmatprep.subr.bf16.mxu0 %v1603_v24  ;;  %1005 = vmatprep.subr.bf16.mxu1 %v1606_v25 }
  0x67   : > { %924 = vmatpush1.bf16.msra.mxu0 %v1601_v26  ;;  %1006 = vmatpush1.bf16.msra.mxu1 %v1604_v27 }
  0x68   : > { %925 = vmatprep.subr.bf16.mxu0 %v1609_v28  ;;  %1007 = vmatprep.subr.bf16.mxu1 %v1612_v29 }
  0x6b   : > { %926 = vmatpush1.bf16.msra.mxu0 %v1607_v30  ;;  %1008 = vmatpush1.bf16.msra.mxu1 %v1610_v31 }
  0x6c   : > { %927 = vmatprep.subr.bf16.mxu0 %v1615_v32  ;;  %1009 = vmatprep.subr.bf16.mxu1 %v1618_v33 }
  0x6f   : > { %928 = vmatpush1.bf16.msra.mxu0 %v1613_v34  ;;  %1010 = vmatpush1.bf16.msra.mxu1 %v1616_v35 }
  0x72   : > { %946 = vmatmul.mubr.bf16.vlgmr.msra.gmra.mrb[0].mxu0 %v1570_v36  ;;  %1028 = vmatmul.mubr.bf16.vlgmr.msra.gmra.mrb[0].mxu1 %v1570_v36 }
 0x142   : > { %1039 = sbr.rel (%p1424_p6) target bundleno = 329 (0x149), region = 32 }
 0x145   : > { %v947_v37 = vpop.f32.mrb[0].mxu0  ;;  %v1029_v38 = vpop.f32.mrb[0].mxu1 }
 0x146   : > { %v949_v39 = vpop.f32.mrb[1].mxu0  ;;  %v1031_v40 = vpop.f32.mrb[1].mxu1  ;;  %1040 = vst [vmem:[#allocation2] sm:$0xff] (!%p1424_p6), %v947_v37  ;;  %1042 = vst [vmem:[#allocation2 + $0x10] sm:$0xff] (!%p1424_p6), %v1029_v38 }
 0x147   : > { %v951_v41 = vpop.f32.mrb[2].mxu0  ;;  %v1033_v42 = vpop.f32.mrb[2].mxu1  ;;  %1041 = vst [vmem:[#allocation2 + $0x8] sm:$0xff] (!%p1424_p6), %v949_v39  ;;  %1043 = vst [vmem:[#allocation2 + $0x18] sm:$0xff] (!%p1424_p6), %v1031_v40 }
 0x148   : > { %v952_v43 = vpop.f32.mrb[3].mxu0  ;;  %v1034_v44 = vpop.f32.mrb[3].mxu1 }
 0x149 PF: > { %p1425_p7 = scmp.le.s32.totalorder %s1633_s12, 0 }
 0x14b   : > { %1047 = sbr.rel (%p1425_p7) target bundleno = 338 (0x152), region = 36 }
 0x14d   : > { %v1048_v45 = vld [vmem:[#allocation2] sm:$0xff] (!%p1425_p7)  ;;  %v1050_v47 = vld [vmem:[#allocation2 + $0x10] sm:$0xff] (!%p1425_p7) }
 0x14e   : > { %v1049_v46 = vld [vmem:[#allocation2 + $0x8] sm:$0xff] (!%p1425_p7)  ;;  %v1052_v48 = vadd.f32 (!%p1425_p7), %v1048_v45, %v947_v37  ;;  %v1054_v50 = vadd.f32 (!%p1425_p7), %v1050_v47, %v1029_v38  ;;  %v1051_v51 = vld [vmem:[#allocation2 + $0x18] sm:$0xff] (!%p1425_p7) }
 0x14f   : > { %v1053_v49 = vadd.f32 (!%p1425_p7), %v1049_v46, %v949_v39  ;;  %v1055_v52 = vadd.f32 (!%p1425_p7), %v1051_v51, %v1031_v40 }
 0x150   : > { %1056 = vst [vmem:[#allocation2] sm:$0xff] (!%p1425_p7), %v1052_v48  ;;  %1058 = vst [vmem:[#allocation2 + $0x10] sm:$0xff] (!%p1425_p7), %v1054_v50 }
 0x151   : > { %1057 = vst [vmem:[#allocation2 + $0x8] sm:$0xff] (!%p1425_p7), %v1053_v49  ;;  %1059 = vst [vmem:[#allocation2 + $0x18] sm:$0xff] (!%p1425_p7), %v1055_v52 }
 0x152 PF: > { %p1426_p8 = scmp.ne.s32.totalorder %s1633_s12, 5 }
 0x153   : > { %v1152_v56 = vlaneseq (!%p1426_p8)  ;;  %vm1138_vm0 = vcmask (!%p1426_p8), 1040384   ;;  %v1644_v43 = vmov (!%p1426_p8), 1983009808  }
 0x154   : > { %1063 = sbr.rel (%p1426_p8) target bundleno = 369 (0x171), region = 40  ;;  %v1150_v44 = vunpack.c.l.s4 (!%p1426_p8), %v1644_v43 }
 0x155   : > { %v1153_v45 = vshrl.u32 (!%p1426_p8), %v1152_v56, 7 }
 0x156   : > { %v1151_v51 = vunpack.c.0.s8 (!%p1426_p8), %v1150_v44 }
 0x157   : > { %v1064_v53 = vld [vmem:[#allocation2] sm:$0xff] (!%p1426_p8)  ;;  %v1066_v55 = vld [vmem:[#allocation2 + $0x10] sm:$0xff] (!%p1426_p8) }
 0x158   : > { %v1065_v54 = vld [vmem:[#allocation2 + $0x8] sm:$0xff] (!%p1426_p8)  ;;  %v1086_v58 = vrot.slane (!%p1426_p8), %v1064_v53, 4  ;;  %v1110_v60 = vmul.f32 (!%p1426_p8), %v1064_v53, %v1064_v53  ;;  %v1067_v61 = vld [vmem:[#allocation2 + $0x18] sm:$0xff] (!%p1426_p8)  ;;  %v1098_v0 = vrot.slane (!%p1426_p8), %v1066_v55, 4  ;;  %v1112_v5 = vmul.f32 (!%p1426_p8), %v1066_v55, %v1066_v55 }
 0x159   : > { %v1436_v57 = vpack.c.bf16 (!%p1426_p8), %v1065_v54, %v1064_v53  ;;  %v1092_v59 = vrot.slane (!%p1426_p8), %v1065_v54, 4  ;;  %v1111_v62 = vmul.f32 (!%p1426_p8), %v1065_v54, %v1065_v54  ;;  %v1437_v63 = vpack.c.bf16 (!%p1426_p8), %v1067_v61, %v1066_v55 }
 0x15a   : > { %v1104_v1 = vrot.slane (!%p1426_p8), %v1067_v61, 4  ;;  %v1087_v2 = vadd.f32 (!%p1426_p8), %v1086_v58, %v1064_v53  ;;  %v1114_v4 = vrot.slane (!%p1426_p8), %v1110_v60, 4  ;;  %v1099_v7 = vadd.f32 (!%p1426_p8), %v1098_v0, %v1066_v55 }
 0x15b   : > { %1084 = vst [vmem:[%s1822_s2] sm:$0xff] %v1436_v57  ;;  %v1093_v3 = vadd.f32 %v1092_v59, %v1065_v54  ;;  %v1120_v6 = vrot.slane %v1111_v62, 4  ;;  %1085 = vst [vmem:[%s1822_s2 + $0x8] sm:$0xff] %v1437_v63  ;;  %v1113_v9 = vmul.f32 %v1067_v61, %v1067_v61  ;;  %v1126_v13 = vrot.slane %v1112_v5, 4 }
 0x15c   : > { %v1105_v8 = vadd.f32 %v1104_v1, %v1067_v61  ;;  %v1088_v10 = vrot.slane %v1087_v2, 2  ;;  %v1115_v12 = vadd.f32 %v1114_v4, %v1110_v60  ;;  %v1100_v15 = vrot.slane %v1099_v7, 2 }
 0x15d   : > { %v1094_v11 = vrot.slane %v1093_v3, 2  ;;  %v1121_v14 = vadd.f32 %v1120_v6, %v1111_v62  ;;  %v1132_v17 = vrot.slane %v1113_v9, 4  ;;  %v1127_v21 = vadd.f32 %v1126_v13, %v1112_v5 }
 0x15e   : > { %v1106_v16 = vrot.slane %v1105_v8, 2  ;;  %v1089_v18 = vadd.f32 %v1088_v10, %v1087_v2  ;;  %v1116_v20 = vrot.slane %v1115_v12, 2  ;;  %v1101_v23 = vadd.f32 %v1100_v15, %v1099_v7 }
 0x15f   : > { %v1095_v19 = vadd.f32 %v1094_v11, %v1093_v3  ;;  %v1122_v22 = vrot.slane %v1121_v14, 2  ;;  %v1133_v25 = vadd.f32 %v1132_v17, %v1113_v9  ;;  %v1128_v26 = vrot.slane %v1127_v21, 2 }
 0x160   : > { %v1107_v24 = vadd.f32 %v1106_v16, %v1105_v8  ;;  %v1090_v27 = vrot.slane %v1089_v18, 1  ;;  %v1117_v29 = vadd.f32 %v1116_v20, %v1115_v12  ;;  %v1102_v31 = vrot.slane %v1101_v23, 1 }
 0x161   : > { %v1096_v28 = vrot.slane %v1095_v19, 1  ;;  %v1134_v30 = vrot.slane %v1133_v25, 2  ;;  %v1123_v33 = vadd.f32 %v1122_v22, %v1121_v14  ;;  %v1129_v36 = vadd.f32 %v1128_v26, %v1127_v21 }
 0x162   : > { %v1108_v32 = vrot.slane %v1107_v24, 1  ;;  %v1091_v34 = vadd.f32 %v1090_v27, %v1089_v18  ;;  %v1118_v35 = vrot.slane %v1117_v29, 1  ;;  %v1103_v38 = vadd.f32 %v1102_v31, %v1101_v23 }
 0x163   : > { %v1097_v37 = vadd.f32 %v1096_v28, %v1095_v19  ;;  %v1124_v39 = vrot.slane %v1123_v33, 1  ;;  %v1135_v40 = vadd.f32 %v1134_v30, %v1133_v25  ;;  %v1130_v42 = vrot.slane %v1129_v36, 1 }
 0x164   : > { %v1119_v41 = vadd.f32 %v1118_v35, %v1117_v29  ;;  %v1109_v46 = vadd.f32 %v1108_v32, %v1107_v24  ;;  %v1154_v57 = vsub.s32 %v1151_v51, %v1153_v45 }
 0x165   : > { %v1125_v47 = vadd.f32 %v1124_v39, %v1123_v33  ;;  %v1136_v48 = vrot.slane %v1135_v40, 1  ;;  %v1131_v49 = vadd.f32 %v1130_v42, %v1129_v36 }
 0x166   : > { %v1139_v50 = vsel %vm1138_vm0, %v1091_v34, %v1119_v41 }
 0x167   : > { %v1137_v52 = vadd.f32 %v1136_v48, %v1135_v40  ;;  %v1140_v53 = vsel %vm1138_vm0, %v1097_v37, %v1125_v47  ;;  %v1141_v54 = vsel %vm1138_vm0, %v1103_v38, %v1131_v49 }
 0x168   : > { %v1147_v55 = vcombine.low %v1139_v50, %v1140_v53 }
 0x169   : > { %v1142_v58 = vsel %vm1138_vm0, %v1109_v46, %v1137_v52 }
 0x16a   : > { %v1148_v59 = vcombine.low %v1141_v54, %v1142_v58  ;;  %v1155_v60 = vrot.slane %v1147_v55, %v1154_v57 }
 0x16c   : > { %v1162_v61 = vrot.slane %v1148_v59, %v1154_v57 }
 0x16e   : > { %v1163_v56 = vcombine.low %v1155_v60, %v1162_v61 }
 0x170   : > { %1165 = vst [vmem:[%s1823_s3] sm:$0xff] %v1163_v56 }
 0x171 PF: > { %s14_s14 = sadd.s32 1, %s1641_s14   ;;  %s1824_s12 = smov %s1637_s13 }
 0x172   : > { %p11_p9 = scmp.ge.s32.totalorder %s14_s14, 8   ;;  %s1825_s13 = smov %s1827_s15 }
 0x174   :  { %13 = sbr.rel (!%p11_p9) target bundleno = 2 (0x2), region = 85 }

// kernel: _lambda_.51
= control target key start
LH: loop header
LB: loop body
LE: loop exit
PB: predicated region body
PF: predicated region fallthrough
CT: control target
= control target key end

     0   :  { %v163_v7 = vmov 1966171168   ;;  %v36_v9 = vlaneseq  ;;  %v164_v12 = vmov 857870592   ;;  %s222_s1 = inlined_call_operand.vmem [shape: f32[1,2,512], index: 1, kind: input, shape index: {}]   ;;  %s223_s2 = inlined_call_operand.vmem [shape: f32[1,512], index: 2, kind: input, shape index: {}]   ;;  %s224_s0 = inlined_call_operand.vmem [shape: bf16[8,512], index: 0, kind: input, shape index: {}]   ;;  %s225_s3 = inlined_call_operand.vmem [shape: f32[1,512], index: 3, kind: input, shape index: {}]   ;;  %s226_s4 = inlined_call_operand.vmem [shape: bf16[8,512], index: 4, kind: input, shape index: {}]   ;;  %s227_s5 = inlined_call_operand.vmem [shape: bf16[8,512], index: 5, kind: output, shape index: {}]  }
   0x1   :  { %v20_v0 = vld [vmem:[%s222_s1] sm:$0xff]  ;;  %v34_v8 = vunpack.c.l.s4 %v163_v7  ;;  %v46_v13 = vunpack.c.l.s4 %v164_v12  ;;  %v65_v25 = vld [vmem:[%s224_s0 + $0x8] sm:$0xff] }
   0x2   :  { %v22_v1 = vmul.f32 0.5, %v20_v0  ;;  %v37_v11 = vshrl.u32 %v36_v9, 7  ;;  %v29_v18 = vld [vmem:[%s223_s2] sm:$0xf]  ;;  %v68_v32 = vunpack.c.l.bf16 %v65_v25  ;;  %v69_v33 = vunpack.c.h.bf16 %v65_v25  ;;  %v120_v41 = vld [vmem:[%s226_s4 + $0x8] sm:$0xff] }
   0x3   :  { %v35_v10 = vunpack.c.0.s8 %v34_v8  ;;  %v47_v15 = vunpack.c.0.s8 %v46_v13  ;;  %v64_v21 = vld [vmem:[%s224_s0] sm:$0xff]  ;;  %v123_v49 = vunpack.c.l.bf16 %v120_v41  ;;  %v124_v50 = vunpack.c.h.bf16 %v120_v41 }
   0x4   :  { %v23_v2 = vmul.f32 %v22_v1, %v22_v1  ;;  %v72_v22 = vsub.s32 0, %v37_v11  ;;  %v76_v24 = vsub.s32 1, %v37_v11  ;;  %v80_v26 = vsub.s32 2, %v37_v11  ;;  %v43_v38 = vld [vmem:[%s225_s3] sm:$0xf] }
   0x5   :  { %v38_v14 = vsub.s32 %v35_v10, %v37_v11  ;;  %v50_v20 = vsub.s32 %v47_v15, %v37_v11  ;;  %v84_v27 = vsub.s32 3, %v37_v11  ;;  %v66_v29 = vunpack.c.l.bf16 %v64_v21  ;;  %v119_v40 = vld [vmem:[%s226_s4] sm:$0xff] }
   0x6   :  { %v25_v3 = vrot.slane %v23_v2, 7  ;;  %v67_v30 = vunpack.c.h.bf16 %v64_v21  ;;  %v121_v47 = vunpack.c.l.bf16 %v119_v40  ;;  %v122_v48 = vunpack.c.h.bf16 %v119_v40 }
   0x8   :  { %v27_v4 = vsub.f32 %v22_v1, %v25_v3 }
   0xa   :  { %v28_v5 = vmax.f32 %v27_v4, 0.0 }
   0xc   :  { %v30_v6 = vadd.f32 1e-05, %v28_v5 }
   0xe   :  { %161 = vrsqrt.f32 %v30_v6 }
  0x18   :  { %v162_v16 = vpop.eup %161 }
  0x19   :  { %v39_v17 = vrot.slane %v162_v16, %v38_v14 }
  0x1b   :  { %v40_v19 = vcombine.high %v39_v17, %v39_v17 }
  0x1d   :  { %v42_v23 = vmul.f32 %v40_v19, %v29_v18 }
  0x1f   :  { %v51_v28 = vrot.slane %v42_v23, %v50_v20  ;;  %v73_v31 = vrot.slane %v42_v23, %v72_v22  ;;  %v77_v35 = vrot.slane %v42_v23, %v76_v24  ;;  %v81_v36 = vrot.slane %v42_v23, %v80_v26 }
  0x20   :  { %v85_v37 = vrot.slane %v42_v23, %v84_v27 }
  0x21   :  { %v53_v34 = vmul.f32 %v51_v28, %v22_v1  ;;  %v90_v42 = vmul.f32 %v73_v31, %v66_v29  ;;  %v91_v44 = vmul.f32 %v77_v35, %v67_v30  ;;  %v92_v45 = vmul.f32 %v81_v36, %v68_v32 }
  0x22   :  { %v93_v46 = vmul.f32 %v85_v37, %v69_v33 }
  0x23   :  { %v61_v39 = vrot.slane %v53_v34, %v38_v14 }
  0x25   :  { %v63_v43 = vsub.f32 %v43_v38, %v61_v39 }
  0x27   :  { %v98_v51 = vrot.slane %v63_v43, %v72_v22  ;;  %v102_v52 = vrot.slane %v63_v43, %v76_v24  ;;  %v106_v53 = vrot.slane %v63_v43, %v80_v26  ;;  %v110_v54 = vrot.slane %v63_v43, %v84_v27 }
  0x29   :  { %v115_v55 = vadd.f32 %v98_v51, %v90_v42  ;;  %v116_v56 = vadd.f32 %v102_v52, %v91_v44  ;;  %v117_v57 = vadd.f32 %v106_v53, %v92_v45  ;;  %v118_v58 = vadd.f32 %v110_v54, %v93_v46 }
  0x2b   :  { %v125_v59 = vadd.f32 %v121_v47, %v115_v55  ;;  %v126_v60 = vadd.f32 %v122_v48, %v116_v56  ;;  %v127_v61 = vadd.f32 %v123_v49, %v117_v57  ;;  %v128_v62 = vadd.f32 %v124_v50, %v118_v58 }
  0x2d   :  { %v129_v63 = vmax.f32 %v125_v59, 0.0  ;;  %v130_v0 = vmax.f32 %v126_v60, 0.0  ;;  %v131_v1 = vmax.f32 %v127_v61, 0.0  ;;  %v132_v2 = vmax.f32 %v128_v62, 0.0 }
  0x2f   :  { %v157_v3 = vpack.c.bf16 %v130_v0, %v129_v63  ;;  %v158_v4 = vpack.c.bf16 %v132_v2, %v131_v1 }
  0x31   :  { %149 = vst [vmem:[%s227_s5] sm:$0xff] %v157_v3  ;;  %150 = vst [vmem:[%s227_s5 + $0x8] sm:$0xff] %v158_v4 }

// kernel: _lambda_.50
= control target key start
LH: loop header
LB: loop body
LE: loop exit
PB: predicated region body
PF: predicated region fallthrough
CT: control target
= control target key end

     0   :  { %s1941_s12 = smov 0   ;;  %s1943_s13 = smov 0   ;;  %s2134_s0 = inlined_call_operand.vmem [shape: bf16[8,4608], index: 0, kind: input, shape index: {}]   ;;  %s2135_s1 = inlined_call_operand.vmem [shape: bf16[4608,512], index: 1, kind: input, shape index: {}]   ;;  %s2136_s2 = inlined_call_operand.vmem [shape: bf16[8,512], index: 2, kind: output, shape index: {0}]   ;;  %s2137_s3 = inlined_call_operand.vmem [shape: f32[1,2,512], index: 3, kind: output, shape index: {1}]  }
   0x1   :  { %s1945_s14 = smov 0  }
   0x2 LB: > { %s26_s15 = sadd.s32 1, %s1914_s13  ;;  %p1515_p0 = scmp.ge.s32.totalorder %s1918_s14, 1  ;;  %s1918_s14 = sphi %s1945_s14, %s14_s14   ;;  %s1914_s13 = sphi %s1943_s13, %s2139_s13   ;;  %s1910_s12 = sphi %s1941_s12, %s2138_s12  }
   0x3   : > { %p27_p1 = scmp.ge.s32.totalorder %s26_s15, 9  ;;  %p189_p2 = scmp.lt.s32.totalorder %s1918_s14, 10 }
   0x5   : > { %s2141_s15 = smov (%p27_p1, %s26_s15), 0  ;;  %p190_p3 = pnand %p1515_p0, %p189_p2 }
   0x6   : > { %s1518_s16 = sshll.u32 (!%p190_p3), %s1910_s12, 6  ;;  %s1516_s21 = sshll.u32 (!%p190_p3), %s1910_s12, 2 }
   0x7   : > { %193 = sbr.rel (%p190_p3) target bundleno = 401 (0x191), region = 28  ;;  %p252_p4 = scmp.lt.s32.totalorder (!%p190_p3), %s1518_s16, 575 }
   0x8   : > { %p243_p5 = scmp.lt.s32.totalorder (!%p190_p3), %s1516_s21, 35  ;;  %p1653_p6 = scmp.ne.s32.totalorder (!%p190_p3), %s1910_s12, 0 }
   0xe   : > { %s2143_s16 = smov (!%p252_p4, %s1518_s16), 575  ;;  %s2145_s21 = smov (!%p243_p5, %s1516_s21), 35 }
   0xf   : > { %s1664_s17 = sshll.u32 %s2143_s16, 4  ;;  %s1517_s22 = sshll.u32 %s2145_s21, 2 }
  0x10   : > { %s1965_s20 = scalar_lea.vmem %s2135_s1, %s1664_s17  ;;  %s2015_s25 = scalar_lea.vmem %s2134_s0, %s1517_s22 }
  0x11   : > { %v1700_v0 = vld [vmem:[%s1965_s20 + $0x4] ss:$16 sps:$4 sm:$0xff]   ;;  %v1702_v1 = vld [vmem:[%s1965_s20 + $0xc] ss:$16 sps:$4 sm:$0xff]   ;;  %v1704_v2 = vld [vmem:[%s1965_s20] ss:$16 sps:$4 sm:$0xff]  }
  0x12   : > { %1066 = vmatprep.subr.bf16.mxu0 %v1700_v0  ;;  %v1705_v3 = vld [vmem:[%s1965_s20 + $0x8] ss:$16 sps:$4 sm:$0xff]   ;;  %1148 = vmatprep.subr.bf16.mxu1 %v1702_v1  ;;  %v1706_v4 = vld [vmem:[%s1965_s20 + $0x24] ss:$16 sps:$4 sm:$0xff]   ;;  %v1708_v5 = vld [vmem:[%s1965_s20 + $0x2c] ss:$16 sps:$4 sm:$0xff]  }
  0x13   : > { %1067 = vmatpush1.bf16.msra.mxu0 %v1704_v2  ;;  %1149 = vmatpush1.bf16.msra.mxu1 %v1705_v3  ;;  %v1710_v6 = vld [vmem:[%s1965_s20 + $0x20] ss:$16 sps:$4 sm:$0xff]   ;;  %v1711_v7 = vld [vmem:[%s1965_s20 + $0x28] ss:$16 sps:$4 sm:$0xff]   ;;  %v1712_v8 = vld [vmem:[%s1965_s20 + $0x44] ss:$16 sps:$4 sm:$0xff]  }
  0x14   : > { %1068 = vmatprep.subr.bf16.mxu0 %v1706_v4  ;;  %1150 = vmatprep.subr.bf16.mxu1 %v1708_v5  ;;  %v1714_v9 = vld [vmem:[%s1965_s20 + $0x4c] ss:$16 sps:$4 sm:$0xff]   ;;  %v1716_v10 = vld [vmem:[%s1965_s20 + $0x40] ss:$16 sps:$4 sm:$0xff]   ;;  %v1717_v11 = vld [vmem:[%s1965_s20 + $0x48] ss:$16 sps:$4 sm:$0xff]  }
  0x15   : > { %v1718_v12 = vld [vmem:[%s1965_s20 + $0x64] ss:$16 sps:$4 sm:$0xff]   ;;  %v1720_v13 = vld [vmem:[%s1965_s20 + $0x6c] ss:$16 sps:$4 sm:$0xff]   ;;  %v1722_v14 = vld [vmem:[%s1965_s20 + $0x60] ss:$16 sps:$4 sm:$0xff]  }
  0x16   : > { %v1723_v15 = vld [vmem:[%s1965_s20 + $0x68] ss:$16 sps:$4 sm:$0xff]   ;;  %v1724_v16 = vld [vmem:[%s1965_s20 + $0x84] ss:$16 sps:$4 sm:$0xff]   ;;  %v1726_v17 = vld [vmem:[%s1965_s20 + $0x8c] ss:$16 sps:$4 sm:$0xff]  }
  0x17   : > { %1069 = vmatpush1.bf16.msra.mxu0 %v1710_v6  ;;  %1151 = vmatpush1.bf16.msra.mxu1 %v1711_v7  ;;  %v1728_v18 = vld [vmem:[%s1965_s20 + $0x80] ss:$16 sps:$4 sm:$0xff]   ;;  %v1729_v19 = vld [vmem:[%s1965_s20 + $0x88] ss:$16 sps:$4 sm:$0xff]   ;;  %v1730_v20 = vld [vmem:[%s1965_s20 + $0xa4] ss:$16 sps:$4 sm:$0xff]  }
  0x18   : > { %1070 = vmatprep.subr.bf16.mxu0 %v1712_v8  ;;  %1152 = vmatprep.subr.bf16.mxu1 %v1714_v9  ;;  %v1732_v21 = vld [vmem:[%s1965_s20 + $0xac] ss:$16 sps:$4 sm:$0xff]   ;;  %v1734_v22 = vld [vmem:[%s1965_s20 + $0xa0] ss:$16 sps:$4 sm:$0xff]   ;;  %v1735_v23 = vld [vmem:[%s1965_s20 + $0xa8] ss:$16 sps:$4 sm:$0xff]  }
  0x19   : > { %v1736_v24 = vld [vmem:[%s1965_s20 + $0xc4] ss:$16 sps:$4 sm:$0xff]   ;;  %v1738_v25 = vld [vmem:[%s1965_s20 + $0xcc] ss:$16 sps:$4 sm:$0xff]   ;;  %v1740_v26 = vld [vmem:[%s1965_s20 + $0xc0] ss:$16 sps:$4 sm:$0xff]  }
  0x1a   : > { %v1741_v27 = vld [vmem:[%s1965_s20 + $0xc8] ss:$16 sps:$4 sm:$0xff]   ;;  %v1742_v28 = vld [vmem:[%s1965_s20 + $0xe4] ss:$16 sps:$4 sm:$0xff]   ;;  %v1744_v29 = vld [vmem:[%s1965_s20 + $0xec] ss:$16 sps:$4 sm:$0xff]  }
  0x1b   : > { %1071 = vmatpush1.bf16.msra.mxu0 %v1716_v10  ;;  %1153 = vmatpush1.bf16.msra.mxu1 %v1717_v11  ;;  %v1746_v30 = vld [vmem:[%s1965_s20 + $0xe0] ss:$16 sps:$4 sm:$0xff]   ;;  %v1747_v31 = vld [vmem:[%s1965_s20 + $0xe8] ss:$16 sps:$4 sm:$0xff]   ;;  %v1748_v32 = vld [vmem:[%s1965_s20 + $0x104] ss:$16 sps:$4 sm:$0xff]  }
  0x1c   : > { %1072 = vmatprep.subr.bf16.mxu0 %v1718_v12  ;;  %1154 = vmatprep.subr.bf16.mxu1 %v1720_v13  ;;  %v1750_v33 = vld [vmem:[%s1965_s20 + $0x10c] ss:$16 sps:$4 sm:$0xff]   ;;  %v1752_v34 = vld [vmem:[%s1965_s20 + $0x100] ss:$16 sps:$4 sm:$0xff]   ;;  %v1753_v35 = vld [vmem:[%s1965_s20 + $0x108] ss:$16 sps:$4 sm:$0xff]  }
  0x1d   : > { %v1754_v36 = vld [vmem:[%s1965_s20 + $0x124] ss:$16 sps:$4 sm:$0xff]   ;;  %v1756_v37 = vld [vmem:[%s1965_s20 + $0x12c] ss:$16 sps:$4 sm:$0xff]   ;;  %v1758_v38 = vld [vmem:[%s1965_s20 + $0x120] ss:$16 sps:$4 sm:$0xff]  }
  0x1e   : > { %v1759_v39 = vld [vmem:[%s1965_s20 + $0x128] ss:$16 sps:$4 sm:$0xff]   ;;  %v1760_v40 = vld [vmem:[%s1965_s20 + $0x144] ss:$16 sps:$4 sm:$0xff]   ;;  %v1762_v41 = vld [vmem:[%s1965_s20 + $0x14c] ss:$16 sps:$4 sm:$0xff]  }
  0x1f   : > { %1073 = vmatpush1.bf16.msra.mxu0 %v1722_v14  ;;  %1155 = vmatpush1.bf16.msra.mxu1 %v1723_v15  ;;  %v1764_v42 = vld [vmem:[%s1965_s20 + $0x140] ss:$16 sps:$4 sm:$0xff]   ;;  %v1765_v43 = vld [vmem:[%s1965_s20 + $0x148] ss:$16 sps:$4 sm:$0xff]   ;;  %v1766_v44 = vld [vmem:[%s1965_s20 + $0x164] ss:$16 sps:$4 sm:$0xff]  }
  0x20   : > { %1074 = vmatprep.subr.bf16.mxu0 %v1724_v16  ;;  %1156 = vmatprep.subr.bf16.mxu1 %v1726_v17  ;;  %v1768_v45 = vld [vmem:[%s1965_s20 + $0x16c] ss:$16 sps:$4 sm:$0xff]   ;;  %v282_v46 = vld [vmem:[%s2015_s25] sm:$0xff]  ;;  %v1771_v49 = vld [vmem:[%s1965_s20 + $0x168] ss:$16 sps:$4 sm:$0xff]  }
  0x21   : > { %v1522_v47 = vcombine.high %v282_v46, %v282_v46  ;;  %v1770_v48 = vld [vmem:[%s1965_s20 + $0x160] ss:$16 sps:$4 sm:$0xff]   ;;  %v1772_v50 = vld [vmem:[%s1965_s20 + $0x184] ss:$16 sps:$4 sm:$0xff]   ;;  %v1774_v51 = vld [vmem:[%s1965_s20 + $0x18c] ss:$16 sps:$4 sm:$0xff]   ;;  %v1521_v5 = vcombine.low %v282_v46, %v282_v46 }
  0x22   : > { %v1776_v52 = vld [vmem:[%s1965_s20 + $0x180] ss:$16 sps:$4 sm:$0xff]   ;;  %v1777_v53 = vld [vmem:[%s1965_s20 + $0x188] ss:$16 sps:$4 sm:$0xff]   ;;  %v1778_v54 = vld [vmem:[%s1965_s20 + $0x1a4] ss:$16 sps:$4 sm:$0xff]  }
  0x23   : > { %1075 = vmatpush1.bf16.msra.mxu0 %v1728_v18  ;;  %1157 = vmatpush1.bf16.msra.mxu1 %v1729_v19  ;;  %v1780_v55 = vld [vmem:[%s1965_s20 + $0x1ac] ss:$16 sps:$4 sm:$0xff]   ;;  %v1782_v56 = vld [vmem:[%s1965_s20 + $0x1a0] ss:$16 sps:$4 sm:$0xff]   ;;  %v1783_v57 = vld [vmem:[%s1965_s20 + $0x1a8] ss:$16 sps:$4 sm:$0xff]  }
  0x24   : > { %1076 = vmatprep.subr.bf16.mxu0 %v1730_v20  ;;  %1158 = vmatprep.subr.bf16.mxu1 %v1732_v21  ;;  %v1784_v58 = vld [vmem:[%s1965_s20 + $0x1c4] ss:$16 sps:$4 sm:$0xff]   ;;  %v1786_v59 = vld [vmem:[%s1965_s20 + $0x1cc] ss:$16 sps:$4 sm:$0xff]   ;;  %v1788_v60 = vld [vmem:[%s1965_s20 + $0x1c0] ss:$16 sps:$4 sm:$0xff]  }
  0x25   : > { %1098 = vmatprep.mubr.bf16.mxu0 %v1522_v47  ;;  %1180 = vmatprep.mubr.bf16.mxu1 %v1522_v47  ;;  %v1789_v61 = vld [vmem:[%s1965_s20 + $0x1c8] ss:$16 sps:$4 sm:$0xff]   ;;  %v1790_v62 = vld [vmem:[%s1965_s20 + $0x1e4] ss:$16 sps:$4 sm:$0xff]   ;;  %v1792_v63 = vld [vmem:[%s1965_s20 + $0x1ec] ss:$16 sps:$4 sm:$0xff]  }
  0x26   : > { %v1794_v0 = vld [vmem:[%s1965_s20 + $0x1e0] ss:$16 sps:$4 sm:$0xff]   ;;  %v1795_v1 = vld [vmem:[%s1965_s20 + $0x1e8] ss:$16 sps:$4 sm:$0xff]   ;;  %v1801_v2 = vld [vmem:[%s1965_s20 + $0x204] ss:$16 sps:$4 sm:$0xff]  }
  0x27   : > { %1077 = vmatpush1.bf16.msra.mxu0 %v1734_v22  ;;  %1159 = vmatpush1.bf16.msra.mxu1 %v1735_v23  ;;  %v1804_v3 = vld [vmem:[%s1965_s20 + $0x20c] ss:$16 sps:$4 sm:$0xff]   ;;  %v1799_v6 = vld [vmem:[%s1965_s20 + $0x200] ss:$16 sps:$4 sm:$0xff]   ;;  %v1802_v7 = vld [vmem:[%s1965_s20 + $0x208] ss:$16 sps:$4 sm:$0xff]  }
  0x28   : > { %1078 = vmatprep.subr.bf16.mxu0 %v1736_v24  ;;  %1160 = vmatprep.subr.bf16.mxu1 %v1738_v25  ;;  %v2041_v4 = vld [vmem:[%s2015_s25 + $0x8] sm:$0xff]  ;;  %v1807_v8 = vld [vmem:[%s1965_s20 + $0x224] ss:$16 sps:$4 sm:$0xff]   ;;  %v1805_v11 = vld [vmem:[%s1965_s20 + $0x220] ss:$16 sps:$4 sm:$0xff]  }
  0x29   : > { %v1810_v9 = vld [vmem:[%s1965_s20 + $0x22c] ss:$16 sps:$4 sm:$0xff]   ;;  %v1524_v10 = vcombine.high %v2041_v4, %v2041_v4  ;;  %v1808_v12 = vld [vmem:[%s1965_s20 + $0x228] ss:$16 sps:$4 sm:$0xff]   ;;  %v1813_v13 = vld [vmem:[%s1965_s20 + $0x244] ss:$16 sps:$4 sm:$0xff]  }
  0x2a   : > { %v1816_v14 = vld [vmem:[%s1965_s20 + $0x24c] ss:$16 sps:$4 sm:$0xff]   ;;  %v1811_v15 = vld [vmem:[%s1965_s20 + $0x240] ss:$16 sps:$4 sm:$0xff]   ;;  %v1814_v16 = vld [vmem:[%s1965_s20 + $0x248] ss:$16 sps:$4 sm:$0xff]  }
  0x2b   : > { %1079 = vmatpush1.bf16.msra.mxu0 %v1740_v26  ;;  %1161 = vmatpush1.bf16.msra.mxu1 %v1741_v27  ;;  %v1819_v17 = vld [vmem:[%s1965_s20 + $0x264] ss:$16 sps:$4 sm:$0xff]   ;;  %v1822_v18 = vld [vmem:[%s1965_s20 + $0x26c] ss:$16 sps:$4 sm:$0xff]   ;;  %v1817_v19 = vld [vmem:[%s1965_s20 + $0x260] ss:$16 sps:$4 sm:$0xff]  }
  0x2c   : > { %1080 = vmatprep.subr.bf16.mxu0 %v1742_v28  ;;  %1162 = vmatprep.subr.bf16.mxu1 %v1744_v29  ;;  %v1820_v20 = vld [vmem:[%s1965_s20 + $0x268] ss:$16 sps:$4 sm:$0xff]   ;;  %v1825_v21 = vld [vmem:[%s1965_s20 + $0x284] ss:$16 sps:$4 sm:$0xff]   ;;  %v1828_v22 = vld [vmem:[%s1965_s20 + $0x28c] ss:$16 sps:$4 sm:$0xff]  }
  0x2d   : > { %v1823_v23 = vld [vmem:[%s1965_s20 + $0x280] ss:$16 sps:$4 sm:$0xff]   ;;  %v1826_v24 = vld [vmem:[%s1965_s20 + $0x288] ss:$16 sps:$4 sm:$0xff]   ;;  %v1831_v25 = vld [vmem:[%s1965_s20 + $0x2a4] ss:$16 sps:$4 sm:$0xff]  }
  0x2e   : > { %v1834_v26 = vld [vmem:[%s1965_s20 + $0x2ac] ss:$16 sps:$4 sm:$0xff]   ;;  %v1829_v27 = vld [vmem:[%s1965_s20 + $0x2a0] ss:$16 sps:$4 sm:$0xff]   ;;  %v1832_v28 = vld [vmem:[%s1965_s20 + $0x2a8] ss:$16 sps:$4 sm:$0xff]  }
  0x2f   : > { %1081 = vmatpush1.bf16.msra.mxu0 %v1746_v30  ;;  %1163 = vmatpush1.bf16.msra.mxu1 %v1747_v31  ;;  %v1837_v29 = vld [vmem:[%s1965_s20 + $0x2c4] ss:$16 sps:$4 sm:$0xff]   ;;  %v1840_v30 = vld [vmem:[%s1965_s20 + $0x2cc] ss:$16 sps:$4 sm:$0xff]   ;;  %v1835_v31 = vld [vmem:[%s1965_s20 + $0x2c0] ss:$16 sps:$4 sm:$0xff]  }
  0x30   : > { %1082 = vmatprep.subr.bf16.mxu0 %v1748_v32  ;;  %1164 = vmatprep.subr.bf16.mxu1 %v1750_v33  ;;  %v1838_v32 = vld [vmem:[%s1965_s20 + $0x2c8] ss:$16 sps:$4 sm:$0xff]   ;;  %v1843_v33 = vld [vmem:[%s1965_s20 + $0x2e4] ss:$16 sps:$4 sm:$0xff]   ;;  %v1864_v46 = vld [vmem:[%s1965_s20 + $0x34c] ss:$16 sps:$4 sm:$0xff]  }
  0x31   : > { %v1859_v47 = vld [vmem:[%s1965_s20 + $0x340] ss:$16 sps:$4 sm:$0xff]  }
  0x33   : > { %1083 = vmatpush1.bf16.msra.mxu0 %v1752_v34  ;;  %1165 = vmatpush1.bf16.msra.mxu1 %v1753_v35  ;;  %v1846_v34 = vld [vmem:[%s1965_s20 + $0x2ec] ss:$16 sps:$4 sm:$0xff]   ;;  %v1841_v35 = vld [vmem:[%s1965_s20 + $0x2e0] ss:$16 sps:$4 sm:$0xff]  }
  0x34   : > { %1084 = vmatprep.subr.bf16.mxu0 %v1754_v36  ;;  %1166 = vmatprep.subr.bf16.mxu1 %v1756_v37  ;;  %v1844_v36 = vld [vmem:[%s1965_s20 + $0x2e8] ss:$16 sps:$4 sm:$0xff]   ;;  %v1849_v37 = vld [vmem:[%s1965_s20 + $0x304] ss:$16 sps:$4 sm:$0xff]  }
  0x37   : > { %1085 = vmatpush1.bf16.msra.mxu0 %v1758_v38  ;;  %1167 = vmatpush1.bf16.msra.mxu1 %v1759_v39  ;;  %v1852_v38 = vld [vmem:[%s1965_s20 + $0x30c] ss:$16 sps:$4 sm:$0xff]   ;;  %v1847_v39 = vld [vmem:[%s1965_s20 + $0x300] ss:$16 sps:$4 sm:$0xff]  }
  0x38   : > { %1086 = vmatprep.subr.bf16.mxu0 %v1760_v40  ;;  %1168 = vmatprep.subr.bf16.mxu1 %v1762_v41  ;;  %v1850_v40 = vld [vmem:[%s1965_s20 + $0x308] ss:$16 sps:$4 sm:$0xff]   ;;  %v1855_v41 = vld [vmem:[%s1965_s20 + $0x324] ss:$16 sps:$4 sm:$0xff]  }
  0x3b   : > { %1087 = vmatpush1.bf16.msra.mxu0 %v1764_v42  ;;  %1169 = vmatpush1.bf16.msra.mxu1 %v1765_v43  ;;  %v1858_v42 = vld [vmem:[%s1965_s20 + $0x32c] ss:$16 sps:$4 sm:$0xff]   ;;  %v1853_v43 = vld [vmem:[%s1965_s20 + $0x320] ss:$16 sps:$4 sm:$0xff]  }
  0x3c   : > { %1088 = vmatprep.subr.bf16.mxu0 %v1766_v44  ;;  %1170 = vmatprep.subr.bf16.mxu1 %v1768_v45  ;;  %v1856_v44 = vld [vmem:[%s1965_s20 + $0x328] ss:$16 sps:$4 sm:$0xff]   ;;  %v1861_v45 = vld [vmem:[%s1965_s20 + $0x344] ss:$16 sps:$4 sm:$0xff]  }
  0x3f   : > { %1089 = vmatpush1.bf16.msra.mxu0 %v1770_v48  ;;  %1171 = vmatpush1.bf16.msra.mxu1 %v1771_v49  ;;  %v1862_v48 = vld [vmem:[%s1965_s20 + $0x348] ss:$16 sps:$4 sm:$0xff]   ;;  %v1867_v49 = vld [vmem:[%s1965_s20 + $0x364] ss:$16 sps:$4 sm:$0xff]  }
  0x40   : > { %1090 = vmatprep.subr.bf16.mxu0 %v1772_v50  ;;  %1172 = vmatprep.subr.bf16.mxu1 %v1774_v51  ;;  %v1870_v50 = vld [vmem:[%s1965_s20 + $0x36c] ss:$16 sps:$4 sm:$0xff]   ;;  %v1865_v51 = vld [vmem:[%s1965_s20 + $0x360] ss:$16 sps:$4 sm:$0xff]  }
  0x43   : > { %1091 = vmatpush1.bf16.msra.mxu0 %v1776_v52  ;;  %1173 = vmatpush1.bf16.msra.mxu1 %v1777_v53  ;;  %v1868_v52 = vld [vmem:[%s1965_s20 + $0x368] ss:$16 sps:$4 sm:$0xff]   ;;  %v1873_v53 = vld [vmem:[%s1965_s20 + $0x384] ss:$16 sps:$4 sm:$0xff]  }
  0x44   : > { %1092 = vmatprep.subr.bf16.mxu0 %v1778_v54  ;;  %1174 = vmatprep.subr.bf16.mxu1 %v1780_v55  ;;  %v1876_v54 = vld [vmem:[%s1965_s20 + $0x38c] ss:$16 sps:$4 sm:$0xff]   ;;  %v1871_v55 = vld [vmem:[%s1965_s20 + $0x380] ss:$16 sps:$4 sm:$0xff]  }
  0x47   : > { %1093 = vmatpush1.bf16.msra.mxu0 %v1782_v56  ;;  %1175 = vmatpush1.bf16.msra.mxu1 %v1783_v57  ;;  %v1874_v56 = vld [vmem:[%s1965_s20 + $0x388] ss:$16 sps:$4 sm:$0xff]   ;;  %v1879_v57 = vld [vmem:[%s1965_s20 + $0x3a4] ss:$16 sps:$4 sm:$0xff]  }
  0x48   : > { %1094 = vmatprep.subr.bf16.mxu0 %v1784_v58  ;;  %1176 = vmatprep.subr.bf16.mxu1 %v1786_v59  ;;  %v1882_v58 = vld [vmem:[%s1965_s20 + $0x3ac] ss:$16 sps:$4 sm:$0xff]   ;;  %v1877_v59 = vld [vmem:[%s1965_s20 + $0x3a0] ss:$16 sps:$4 sm:$0xff]  }
  0x4b   : > { %1095 = vmatpush1.bf16.msra.mxu0 %v1788_v60  ;;  %1177 = vmatpush1.bf16.msra.mxu1 %v1789_v61  ;;  %v1880_v60 = vld [vmem:[%s1965_s20 + $0x3a8] ss:$16 sps:$4 sm:$0xff]   ;;  %v1885_v61 = vld [vmem:[%s1965_s20 + $0x3c4] ss:$16 sps:$4 sm:$0xff]  }
  0x4c   : > { %1096 = vmatprep.subr.bf16.mxu0 %v1790_v62  ;;  %1178 = vmatprep.subr.bf16.mxu1 %v1792_v63  ;;  %v1888_v62 = vld [vmem:[%s1965_s20 + $0x3cc] ss:$16 sps:$4 sm:$0xff]   ;;  %v1883_v63 = vld [vmem:[%s1965_s20 + $0x3c0] ss:$16 sps:$4 sm:$0xff]  }
  0x4f   : > { %1097 = vmatpush1.bf16.msra.mxu0 %v1794_v0  ;;  %1179 = vmatpush1.bf16.msra.mxu1 %v1795_v1  ;;  %v1886_v0 = vld [vmem:[%s1965_s20 + $0x3c8] ss:$16 sps:$4 sm:$0xff]   ;;  %v1891_v1 = vld [vmem:[%s1965_s20 + $0x3e4] ss:$16 sps:$4 sm:$0xff]  }
  0x50   : > { %1107 = vmatprep.subr.bf16.mxu0 %v1801_v2  ;;  %1189 = vmatprep.subr.bf16.mxu1 %v1804_v3  ;;  %v1894_v2 = vld [vmem:[%s1965_s20 + $0x3ec] ss:$16 sps:$4 sm:$0xff]   ;;  %v1889_v3 = vld [vmem:[%s1965_s20 + $0x3e0] ss:$16 sps:$4 sm:$0xff]  }
  0x52   : > { %1099 = vmatmul.mubr.bf16.vlgmr.msra.gmra.mrb[0].mxu0 %v1521_v5  ;;  %1181 = vmatmul.mubr.bf16.vlgmr.msra.gmra.mrb[0].mxu1 %v1521_v5  ;;  %v1892_v5 = vld [vmem:[%s1965_s20 + $0x3e8] ss:$16 sps:$4 sm:$0xff]  }
  0x53   : > { %1108 = vmatpush1.bf16.msra.mxu0 %v1799_v6  ;;  %1190 = vmatpush1.bf16.msra.mxu1 %v1802_v7  ;;  %v1523_v6 = vcombine.low %v2041_v4, %v2041_v4 }
  0x54   : > { %1109 = vmatprep.subr.bf16.mxu0 %v1807_v8  ;;  %1191 = vmatprep.subr.bf16.mxu1 %v1810_v9 }
  0x55   : > { %1139 = vmatprep.mubr.bf16.mxu0 %v1524_v10  ;;  %1221 = vmatprep.mubr.bf16.mxu1 %v1524_v10 }
  0x57   : > { %1110 = vmatpush1.bf16.msra.mxu0 %v1805_v11  ;;  %1192 = vmatpush1.bf16.msra.mxu1 %v1808_v12 }
  0x58   : > { %1111 = vmatprep.subr.bf16.mxu0 %v1813_v13  ;;  %1193 = vmatprep.subr.bf16.mxu1 %v1816_v14 }
  0x5b   : > { %1112 = vmatpush1.bf16.msra.mxu0 %v1811_v15  ;;  %1194 = vmatpush1.bf16.msra.mxu1 %v1814_v16 }
  0x5c   : > { %1113 = vmatprep.subr.bf16.mxu0 %v1819_v17  ;;  %1195 = vmatprep.subr.bf16.mxu1 %v1822_v18 }
  0x5f   : > { %1114 = vmatpush1.bf16.msra.mxu0 %v1817_v19  ;;  %1196 = vmatpush1.bf16.msra.mxu1 %v1820_v20 }
  0x60   : > { %1115 = vmatprep.subr.bf16.mxu0 %v1825_v21  ;;  %1197 = vmatprep.subr.bf16.mxu1 %v1828_v22 }
  0x63   : > { %1116 = vmatpush1.bf16.msra.mxu0 %v1823_v23  ;;  %1198 = vmatpush1.bf16.msra.mxu1 %v1826_v24 }
  0x64   : > { %1117 = vmatprep.subr.bf16.mxu0 %v1831_v25  ;;  %1199 = vmatprep.subr.bf16.mxu1 %v1834_v26 }
  0x67   : > { %1118 = vmatpush1.bf16.msra.mxu0 %v1829_v27  ;;  %1200 = vmatpush1.bf16.msra.mxu1 %v1832_v28 }
  0x68   : > { %1119 = vmatprep.subr.bf16.mxu0 %v1837_v29  ;;  %1201 = vmatprep.subr.bf16.mxu1 %v1840_v30 }
  0x6b   : > { %1120 = vmatpush1.bf16.msra.mxu0 %v1835_v31  ;;  %1202 = vmatpush1.bf16.msra.mxu1 %v1838_v32 }
  0x6c   : > { %1121 = vmatprep.subr.bf16.mxu0 %v1843_v33  ;;  %1203 = vmatprep.subr.bf16.mxu1 %v1846_v34 }
  0x6f   : > { %1122 = vmatpush1.bf16.msra.mxu0 %v1841_v35  ;;  %1204 = vmatpush1.bf16.msra.mxu1 %v1844_v36 }
  0x70   : > { %1123 = vmatprep.subr.bf16.mxu0 %v1849_v37  ;;  %1205 = vmatprep.subr.bf16.mxu1 %v1852_v38 }
  0x73   : > { %1124 = vmatpush1.bf16.msra.mxu0 %v1847_v39  ;;  %1206 = vmatpush1.bf16.msra.mxu1 %v1850_v40 }
  0x74   : > { %1125 = vmatprep.subr.bf16.mxu0 %v1855_v41  ;;  %1207 = vmatprep.subr.bf16.mxu1 %v1858_v42 }
  0x77   : > { %1126 = vmatpush1.bf16.msra.mxu0 %v1853_v43  ;;  %1208 = vmatpush1.bf16.msra.mxu1 %v1856_v44 }
  0x78   : > { %1127 = vmatprep.subr.bf16.mxu0 %v1861_v45  ;;  %1209 = vmatprep.subr.bf16.mxu1 %v1864_v46 }
  0x7b   : > { %1128 = vmatpush1.bf16.msra.mxu0 %v1859_v47  ;;  %1210 = vmatpush1.bf16.msra.mxu1 %v1862_v48 }
  0x7c   : > { %1129 = vmatprep.subr.bf16.mxu0 %v1867_v49  ;;  %1211 = vmatprep.subr.bf16.mxu1 %v1870_v50 }
  0x7f   : > { %1130 = vmatpush1.bf16.msra.mxu0 %v1865_v51  ;;  %1212 = vmatpush1.bf16.msra.mxu1 %v1868_v52 }
  0x80   : > { %1131 = vmatprep.subr.bf16.mxu0 %v1873_v53  ;;  %1213 = vmatprep.subr.bf16.mxu1 %v1876_v54 }
  0x83   : > { %1132 = vmatpush1.bf16.msra.mxu0 %v1871_v55  ;;  %1214 = vmatpush1.bf16.msra.mxu1 %v1874_v56 }
  0x84   : > { %1133 = vmatprep.subr.bf16.mxu0 %v1879_v57  ;;  %1215 = vmatprep.subr.bf16.mxu1 %v1882_v58 }
  0x87   : > { %1134 = vmatpush1.bf16.msra.mxu0 %v1877_v59  ;;  %1216 = vmatpush1.bf16.msra.mxu1 %v1880_v60 }
  0x88   : > { %1135 = vmatprep.subr.bf16.mxu0 %v1885_v61  ;;  %1217 = vmatprep.subr.bf16.mxu1 %v1888_v62 }
  0x8b   : > { %1136 = vmatpush1.bf16.msra.mxu0 %v1883_v63  ;;  %1218 = vmatpush1.bf16.msra.mxu1 %v1886_v0 }
  0x8c   : > { %1137 = vmatprep.subr.bf16.mxu0 %v1891_v1  ;;  %1219 = vmatprep.subr.bf16.mxu1 %v1894_v2 }
  0x8f   : > { %1138 = vmatpush1.bf16.msra.mxu0 %v1889_v3  ;;  %1220 = vmatpush1.bf16.msra.mxu1 %v1892_v5 }
  0x92   : > { %1140 = vmatmul.mubr.bf16.vlgmr.msra.gmra.mrb[0].mxu0 %v1523_v6  ;;  %1222 = vmatmul.mubr.bf16.vlgmr.msra.gmra.mrb[0].mxu1 %v1523_v6 }
 0x162   : > { %1233 = sbr.rel (%p1653_p6) target bundleno = 361 (0x169), region = 32 }
 0x165   : > { %v1141_v7 = vpop.f32.mrb[0].mxu0  ;;  %v1223_v8 = vpop.f32.mrb[0].mxu1 }
 0x166   : > { %v1143_v9 = vpop.f32.mrb[1].mxu0  ;;  %v1225_v10 = vpop.f32.mrb[1].mxu1  ;;  %1234 = vst [vmem:[#allocation2] sm:$0xff] (!%p1653_p6), %v1141_v7  ;;  %1236 = vst [vmem:[#allocation2 + $0x10] sm:$0xff] (!%p1653_p6), %v1223_v8 }
 0x167   : > { %v1145_v11 = vpop.f32.mrb[2].mxu0  ;;  %v1227_v12 = vpop.f32.mrb[2].mxu1  ;;  %1235 = vst [vmem:[#allocation2 + $0x8] sm:$0xff] (!%p1653_p6), %v1143_v9  ;;  %1237 = vst [vmem:[#allocation2 + $0x18] sm:$0xff] (!%p1653_p6), %v1225_v10 }
 0x168   : > { %v1146_v13 = vpop.f32.mrb[3].mxu0  ;;  %v1228_v14 = vpop.f32.mrb[3].mxu1 }
 0x169 PF: > { %p1654_p7 = scmp.le.s32.totalorder %s1910_s12, 0 }
 0x16b   : > { %1241 = sbr.rel (%p1654_p7) target bundleno = 370 (0x172), region = 36 }
 0x16d   : > { %v1242_v4 = vld [vmem:[#allocation2] sm:$0xff] (!%p1654_p7)  ;;  %v1244_v16 = vld [vmem:[#allocation2 + $0x10] sm:$0xff] (!%p1654_p7) }
 0x16e   : > { %v1243_v15 = vld [vmem:[#allocation2 + $0x8] sm:$0xff] (!%p1654_p7)  ;;  %v1246_v17 = vadd.f32 (!%p1654_p7), %v1242_v4, %v1141_v7  ;;  %v1248_v19 = vadd.f32 (!%p1654_p7), %v1244_v16, %v1223_v8  ;;  %v1245_v20 = vld [vmem:[#allocation2 + $0x18] sm:$0xff] (!%p1654_p7) }
 0x16f   : > { %v1247_v18 = vadd.f32 (!%p1654_p7), %v1243_v15, %v1143_v9  ;;  %v1249_v21 = vadd.f32 (!%p1654_p7), %v1245_v20, %v1225_v10 }
 0x170   : > { %1250 = vst [vmem:[#allocation2] sm:$0xff] (!%p1654_p7), %v1246_v17  ;;  %1252 = vst [vmem:[#allocation2 + $0x10] sm:$0xff] (!%p1654_p7), %v1248_v19 }
 0x171   : > { %1251 = vst [vmem:[#allocation2 + $0x8] sm:$0xff] (!%p1654_p7), %v1247_v18  ;;  %1253 = vst [vmem:[#allocation2 + $0x18] sm:$0xff] (!%p1654_p7), %v1249_v21 }
 0x172 PF: > { %p1655_p8 = scmp.ne.s32.totalorder %s1910_s12, 8 }
 0x173   : > { %v1346_v25 = vlaneseq (!%p1655_p8)  ;;  %vm1332_vm0 = vcmask (!%p1655_p8), 1040384   ;;  %v1920_v13 = vmov (!%p1655_p8), 1983009808  }
 0x174   : > { %1257 = sbr.rel (%p1655_p8) target bundleno = 401 (0x191), region = 40  ;;  %v1344_v14 = vunpack.c.l.s4 (!%p1655_p8), %v1920_v13 }
 0x175   : > { %v1347_v4 = vshrl.u32 (!%p1655_p8), %v1346_v25, 7 }
 0x176   : > { %v1345_v20 = vunpack.c.0.s8 (!%p1655_p8), %v1344_v14 }
 0x177   : > { %v1258_v22 = vld [vmem:[#allocation2] sm:$0xff] (!%p1655_p8)  ;;  %v1260_v24 = vld [vmem:[#allocation2 + $0x10] sm:$0xff] (!%p1655_p8) }
 0x178   : > { %v1259_v23 = vld [vmem:[#allocation2 + $0x8] sm:$0xff] (!%p1655_p8)  ;;  %v1280_v27 = vrot.slane (!%p1655_p8), %v1258_v22, 4  ;;  %v1304_v29 = vmul.f32 (!%p1655_p8), %v1258_v22, %v1258_v22  ;;  %v1261_v30 = vld [vmem:[#allocation2 + $0x18] sm:$0xff] (!%p1655_p8)  ;;  %v1292_v33 = vrot.slane (!%p1655_p8), %v1260_v24, 4  ;;  %v1306_v38 = vmul.f32 (!%p1655_p8), %v1260_v24, %v1260_v24 }
 0x179   : > { %v1665_v26 = vpack.c.bf16 (!%p1655_p8), %v1259_v23, %v1258_v22  ;;  %v1286_v28 = vrot.slane (!%p1655_p8), %v1259_v23, 4  ;;  %v1305_v31 = vmul.f32 (!%p1655_p8), %v1259_v23, %v1259_v23  ;;  %v1666_v32 = vpack.c.bf16 (!%p1655_p8), %v1261_v30, %v1260_v24 }
 0x17a   : > { %v1298_v34 = vrot.slane (!%p1655_p8), %v1261_v30, 4  ;;  %v1281_v35 = vadd.f32 (!%p1655_p8), %v1280_v27, %v1258_v22  ;;  %v1308_v37 = vrot.slane (!%p1655_p8), %v1304_v29, 4  ;;  %v1293_v40 = vadd.f32 (!%p1655_p8), %v1292_v33, %v1260_v24 }
 0x17b   : > { %1278 = vst [vmem:[%s2136_s2] sm:$0xff] %v1665_v26  ;;  %v1287_v36 = vadd.f32 %v1286_v28, %v1259_v23  ;;  %v1314_v39 = vrot.slane %v1305_v31, 4  ;;  %1279 = vst [vmem:[%s2136_s2 + $0x8] sm:$0xff] %v1666_v32  ;;  %v1307_v42 = vmul.f32 %v1261_v30, %v1261_v30  ;;  %v1320_v46 = vrot.slane %v1306_v38, 4 }
 0x17c   : > { %v1299_v41 = vadd.f32 %v1298_v34, %v1261_v30  ;;  %v1282_v43 = vrot.slane %v1281_v35, 2  ;;  %v1309_v45 = vadd.f32 %v1308_v37, %v1304_v29  ;;  %v1294_v48 = vrot.slane %v1293_v40, 2 }
 0x17d   : > { %v1288_v44 = vrot.slane %v1287_v36, 2  ;;  %v1315_v47 = vadd.f32 %v1314_v39, %v1305_v31  ;;  %v1326_v50 = vrot.slane %v1307_v42, 4  ;;  %v1321_v54 = vadd.f32 %v1320_v46, %v1306_v38 }
 0x17e   : > { %v1300_v49 = vrot.slane %v1299_v41, 2  ;;  %v1283_v51 = vadd.f32 %v1282_v43, %v1281_v35  ;;  %v1310_v53 = vrot.slane %v1309_v45, 2  ;;  %v1295_v56 = vadd.f32 %v1294_v48, %v1293_v40 }
 0x17f   : > { %v1289_v52 = vadd.f32 %v1288_v44, %v1287_v36  ;;  %v1316_v55 = vrot.slane %v1315_v47, 2  ;;  %v1327_v58 = vadd.f32 %v1326_v50, %v1307_v42  ;;  %v1322_v59 = vrot.slane %v1321_v54, 2 }
 0x180   : > { %v1301_v57 = vadd.f32 %v1300_v49, %v1299_v41  ;;  %v1284_v60 = vrot.slane %v1283_v51, 1  ;;  %v1311_v62 = vadd.f32 %v1310_v53, %v1309_v45  ;;  %v1296_v0 = vrot.slane %v1295_v56, 1 }
 0x181   : > { %v1290_v61 = vrot.slane %v1289_v52, 1  ;;  %v1328_v63 = vrot.slane %v1327_v58, 2  ;;  %v1317_v2 = vadd.f32 %v1316_v55, %v1315_v47  ;;  %v1323_v6 = vadd.f32 %v1322_v59, %v1321_v54 }
 0x182   : > { %v1302_v1 = vrot.slane %v1301_v57, 1  ;;  %v1285_v3 = vadd.f32 %v1284_v60, %v1283_v51  ;;  %v1312_v5 = vrot.slane %v1311_v62, 1  ;;  %v1297_v8 = vadd.f32 %v1296_v0, %v1295_v56 }
 0x183   : > { %v1291_v7 = vadd.f32 %v1290_v61, %v1289_v52  ;;  %v1318_v9 = vrot.slane %v1317_v2, 1  ;;  %v1329_v10 = vadd.f32 %v1328_v63, %v1327_v58  ;;  %v1324_v12 = vrot.slane %v1323_v6, 1 }
 0x184   : > { %v1313_v11 = vadd.f32 %v1312_v5, %v1311_v62  ;;  %v1303_v15 = vadd.f32 %v1302_v1, %v1301_v57  ;;  %v1348_v26 = vsub.s32 %v1345_v20, %v1347_v4 }
 0x185   : > { %v1319_v16 = vadd.f32 %v1318_v9, %v1317_v2  ;;  %v1330_v17 = vrot.slane %v1329_v10, 1  ;;  %v1325_v18 = vadd.f32 %v1324_v12, %v1323_v6 }
 0x186   : > { %v1333_v19 = vsel %vm1332_vm0, %v1285_v3, %v1313_v11 }
 0x187   : > { %v1331_v21 = vadd.f32 %v1330_v17, %v1329_v10  ;;  %v1334_v22 = vsel %vm1332_vm0, %v1291_v7, %v1319_v16  ;;  %v1335_v23 = vsel %vm1332_vm0, %v1297_v8, %v1325_v18 }
 0x188   : > { %v1341_v24 = vcombine.low %v1333_v19, %v1334_v22 }
 0x189   : > { %v1336_v27 = vsel %vm1332_vm0, %v1303_v15, %v1331_v21 }
 0x18a   : > { %v1342_v28 = vcombine.low %v1335_v23, %v1336_v27  ;;  %v1349_v29 = vrot.slane %v1341_v24, %v1348_v26 }
 0x18c   : > { %v1356_v30 = vrot.slane %v1342_v28, %v1348_v26 }
 0x18e   : > { %v1357_v25 = vcombine.low %v1349_v29, %v1356_v30 }
 0x190   : > { %1359 = vst [vmem:[%s2137_s3] sm:$0xff] %v1357_v25 }
 0x191 PF: > { %s14_s14 = sadd.s32 1, %s1918_s14   ;;  %s2138_s12 = smov %s1914_s13 }
 0x192   : > { %p11_p9 = scmp.ge.s32.totalorder %s14_s14, 11   ;;  %s2139_s13 = smov %s2141_s15 }
 0x194   :  { %13 = sbr.rel (!%p11_p9) target bundleno = 2 (0x2), region = 85 }

// kernel: _lambda_.52
= control target key start
LH: loop header
LB: loop body
LE: loop exit
PB: predicated region body
PF: predicated region fallthrough
CT: control target
= control target key end

     0   :  { %v143_v3 = vmov 1983009808   ;;  %v87_v5 = vlaneseq  ;;  %vm121_vm0 = vcmask 1041409   ;;  %vm123_vm1 = vcmask 1043459   ;;  %s172_s0 = inlined_call_operand.vmem [shape: bf16[2,8,512], index: 0, kind: input, shape index: {}]   ;;  %s173_s1 = inlined_call_operand.vmem [shape: f32[2,512], index: 1, kind: output, shape index: {}]  }
   0x1   :  { %v14_v0 = vld [vmem:[%s172_s0] sm:$0xff]  ;;  %v15_v1 = vld [vmem:[%s172_s0 + $0x8] sm:$0xff]  ;;  %v16_v2 = vld [vmem:[%s172_s0 + $0x10] sm:$0xff]  ;;  %v163_v4 = vunpack.c.l.s4 %v143_v3  ;;  %vm125_vm2 = vcmask 1045509   ;;  %vm127_vm3 = vcmask 1047559  }
   0x2   :  { %v17_v6 = vld [vmem:[%s172_s0 + $0x18] sm:$0xff]  ;;  %v18_v7 = vunpack.c.l.bf16 %v14_v0  ;;  %v19_v8 = vunpack.c.h.bf16 %v14_v0  ;;  %v20_v9 = vunpack.c.l.bf16 %v15_v1  ;;  %v21_v10 = vunpack.c.h.bf16 %v15_v1 }
   0x3   :  { %v22_v11 = vunpack.c.l.bf16 %v16_v2  ;;  %v23_v12 = vunpack.c.h.bf16 %v16_v2  ;;  %v24_v13 = vunpack.c.l.bf16 %v17_v6  ;;  %v25_v14 = vunpack.c.h.bf16 %v17_v6 }
   0x4   :  { %v26_v15 = vrot.slane %v18_v7, 4  ;;  %v32_v16 = vrot.slane %v19_v8, 4  ;;  %v38_v17 = vrot.slane %v20_v9, 4  ;;  %v44_v18 = vrot.slane %v21_v10, 4 }
   0x5   :  { %v50_v19 = vrot.slane %v22_v11, 4  ;;  %v56_v20 = vrot.slane %v23_v12, 4  ;;  %v62_v21 = vrot.slane %v24_v13, 4  ;;  %v68_v22 = vrot.slane %v25_v14, 4 }
   0x6   :  { %v27_v23 = vadd.f32 %v26_v15, %v18_v7  ;;  %v33_v24 = vadd.f32 %v32_v16, %v19_v8  ;;  %v39_v25 = vadd.f32 %v38_v17, %v20_v9  ;;  %v45_v26 = vadd.f32 %v44_v18, %v21_v10 }
   0x7   :  { %v51_v27 = vadd.f32 %v50_v19, %v22_v11  ;;  %v57_v28 = vadd.f32 %v56_v20, %v23_v12  ;;  %v63_v29 = vadd.f32 %v62_v21, %v24_v13  ;;  %v69_v30 = vadd.f32 %v68_v22, %v25_v14 }
   0x8   :  { %v28_v31 = vrot.slane %v27_v23, 2  ;;  %v34_v32 = vrot.slane %v33_v24, 2  ;;  %v40_v33 = vrot.slane %v39_v25, 2  ;;  %v46_v34 = vrot.slane %v45_v26, 2 }
   0x9   :  { %v52_v35 = vrot.slane %v51_v27, 2  ;;  %v58_v36 = vrot.slane %v57_v28, 2  ;;  %v64_v37 = vrot.slane %v63_v29, 2  ;;  %v70_v38 = vrot.slane %v69_v30, 2 }
   0xa   :  { %v29_v39 = vadd.f32 %v28_v31, %v27_v23  ;;  %v35_v40 = vadd.f32 %v34_v32, %v33_v24  ;;  %v41_v41 = vadd.f32 %v40_v33, %v39_v25  ;;  %v47_v42 = vadd.f32 %v46_v34, %v45_v26 }
   0xb   :  { %v53_v43 = vadd.f32 %v52_v35, %v51_v27  ;;  %v59_v44 = vadd.f32 %v58_v36, %v57_v28  ;;  %v65_v45 = vadd.f32 %v64_v37, %v63_v29  ;;  %v71_v46 = vadd.f32 %v70_v38, %v69_v30 }
   0xc   :  { %v30_v47 = vrot.slane %v29_v39, 1  ;;  %v36_v48 = vrot.slane %v35_v40, 1  ;;  %v42_v49 = vrot.slane %v41_v41, 1  ;;  %v48_v50 = vrot.slane %v47_v42, 1 }
   0xd   :  { %v54_v51 = vrot.slane %v53_v43, 1  ;;  %v60_v52 = vrot.slane %v59_v44, 1  ;;  %v66_v53 = vrot.slane %v65_v45, 1  ;;  %v72_v54 = vrot.slane %v71_v46, 1 }
   0xe   :  { %v31_v55 = vadd.f32 %v30_v47, %v29_v39  ;;  %v37_v56 = vadd.f32 %v36_v48, %v35_v40  ;;  %v43_v57 = vadd.f32 %v42_v49, %v41_v41  ;;  %v49_v58 = vadd.f32 %v48_v50, %v47_v42 }
   0xf   :  { %v55_v59 = vadd.f32 %v54_v51, %v53_v43  ;;  %v61_v60 = vadd.f32 %v60_v52, %v59_v44  ;;  %v67_v61 = vadd.f32 %v66_v53, %v65_v45  ;;  %v73_v62 = vadd.f32 %v72_v54, %v71_v46 }
  0x10   :  { %v82_v63 = vcombine.low %v31_v55, %v37_v56  ;;  %v83_v0 = vcombine.low %v43_v57, %v49_v58  ;;  %v86_v1 = vunpack.c.0.s8 %v163_v4  ;;  %v88_v2 = vshrl.u32 %v87_v5, 7 }
  0x11   :  { %v99_v3 = vcombine.low %v55_v59, %v61_v60  ;;  %v100_v6 = vcombine.low %v67_v61, %v73_v62 }
  0x12   :  { %v89_v7 = vsub.s32 %v86_v1, %v88_v2 }
  0x14   :  { %v90_v8 = vrot.slane %v82_v63, %v89_v7  ;;  %v97_v9 = vrot.slane %v83_v0, %v89_v7  ;;  %v107_v10 = vrot.slane %v99_v3, %v89_v7  ;;  %v114_v11 = vrot.slane %v100_v6, %v89_v7 }
  0x16   :  { %v98_v12 = vcombine.low %v90_v8, %v97_v9  ;;  %v115_v13 = vcombine.low %v107_v10, %v114_v11 }
  0x18   :  { %v120_v14 = vrot.slane %v115_v13, 7 }
  0x1a   :  { %v122_v15 = vsel %vm121_vm0, %v120_v14, %v98_v12 }
  0x1b   :  { %v124_v16 = vsel %vm123_vm1, %v120_v14, %v122_v15 }
  0x1c   :  { %v126_v17 = vsel %vm125_vm2, %v120_v14, %v124_v16 }
  0x1d   :  { %v128_v18 = vsel %vm127_vm3, %v120_v14, %v126_v17 }
  0x1e   :  { %136 = vst [vmem:[%s173_s1] sm:$0xff] %v128_v18 }

// kernel: _lambda_.53
= control target key start
LH: loop header
LB: loop body
LE: loop exit
PB: predicated region body
PF: predicated region fallthrough
CT: control target
= control target key end

     0   :  { %v100_v30 = vlaneseq  ;;  %v541_v34 = vmov 1966171168   ;;  %s677_s0 = inlined_call_operand.vmem [shape: bf16[2,512], index: 0, kind: input, shape index: {}]   ;;  %s678_s1 = inlined_call_operand.vmem [shape: bf16[512,10], index: 1, kind: input, shape index: {}]   ;;  %s679_s2 = inlined_call_operand.vmem [shape: f32[1,10], index: 2, kind: input, shape index: {}]   ;;  %s680_s3 = inlined_call_operand.hbm [shape: f32[2,10], index: 3, kind: output, shape index: {}]  }
   0x1   :  { %v485_v0 = vld [vmem:[%s678_s1 + $0x40] sm:$0xff]   ;;  %v489_v4 = vld [vmem:[%s678_s1 + $0x48] sm:$0xff]   ;;  %v493_v8 = vld [vmem:[%s678_s1 + $0x50] sm:$0xff]   ;;  %v98_v35 = vunpack.c.l.s4 %v541_v34 }
   0x2   :  { %v486_v1 = vld [vmem:[%s678_s1 + $0xc0] sm:$0xff]   ;;  %439 = vmatprep.subr.bf16.mxu0 %v485_v0  ;;  %v490_v5 = vld [vmem:[%s678_s1 + $0xc8] sm:$0xff]   ;;  %v494_v9 = vld [vmem:[%s678_s1 + $0xd0] sm:$0xff]   ;;  %v101_v36 = vshrl.u32 %v100_v30, 7 }
   0x3   :  { %v487_v2 = vld [vmem:[%s678_s1] sm:$0xff]   ;;  %461 = vmatprep.subr.bf16.mxu1 %v486_v1  ;;  %v491_v6 = vld [vmem:[%s678_s1 + $0x8] sm:$0xff]   ;;  %v495_v10 = vld [vmem:[%s678_s1 + $0x10] sm:$0xff]  }
   0x4   :  { %v488_v3 = vld [vmem:[%s678_s1 + $0x80] sm:$0xff]   ;;  %440 = vmatpush3.bf16.msra.mxu0 %v487_v2  ;;  %v492_v7 = vld [vmem:[%s678_s1 + $0x88] sm:$0xff]   ;;  %v496_v11 = vld [vmem:[%s678_s1 + $0x90] sm:$0xff]  }
   0x5   :  { %462 = vmatpush3.bf16.msra.mxu1 %v488_v3  ;;  %441 = vmatprep.subr.bf16.mxu0 %v489_v4  ;;  %v497_v12 = vld [vmem:[%s678_s1 + $0x58] sm:$0xff]   ;;  %v501_v16 = vld [vmem:[%s678_s1 + $0x60] sm:$0xff]   ;;  %v505_v20 = vld [vmem:[%s678_s1 + $0x68] sm:$0xff]  }
   0x6   :  { %463 = vmatprep.subr.bf16.mxu1 %v490_v5  ;;  %v498_v13 = vld [vmem:[%s678_s1 + $0xd8] sm:$0xff]   ;;  %v502_v17 = vld [vmem:[%s678_s1 + $0xe0] sm:$0xff]   ;;  %v506_v21 = vld [vmem:[%s678_s1 + $0xe8] sm:$0xff]  }
   0x7   :  { %v499_v14 = vld [vmem:[%s678_s1 + $0x18] sm:$0xff]   ;;  %v503_v18 = vld [vmem:[%s678_s1 + $0x20] sm:$0xff]   ;;  %v507_v22 = vld [vmem:[%s678_s1 + $0x28] sm:$0xff]  }
   0x8   :  { %442 = vmatpush3.bf16.msra.mxu0 %v491_v6  ;;  %v500_v15 = vld [vmem:[%s678_s1 + $0x98] sm:$0xff]   ;;  %v504_v19 = vld [vmem:[%s678_s1 + $0xa0] sm:$0xff]   ;;  %v508_v23 = vld [vmem:[%s678_s1 + $0xa8] sm:$0xff]  }
   0x9   :  { %464 = vmatpush3.bf16.msra.mxu1 %v492_v7  ;;  %443 = vmatprep.subr.bf16.mxu0 %v493_v8  ;;  %v509_v24 = vld [vmem:[%s678_s1 + $0x70] sm:$0xff]   ;;  %v513_v28 = vld [vmem:[%s678_s1 + $0x78] sm:$0xff]   ;;  %v406_v33 = vld.sshfl [vmem:[%s677_s0] sm:$0x33 pattern:$0x75316420] }
   0xa   :  { %465 = vmatprep.subr.bf16.mxu1 %v494_v9  ;;  %v510_v25 = vld [vmem:[%s678_s1 + $0xf0] sm:$0xff]   ;;  %v514_v29 = vld [vmem:[%s678_s1 + $0xf8] sm:$0xff]  }
   0xb   :  { %v511_v26 = vld [vmem:[%s678_s1 + $0x30] sm:$0xff]   ;;  %v515_v31 = vld [vmem:[%s678_s1 + $0x38] sm:$0xff]  }
   0xc   :  { %444 = vmatpush3.bf16.msra.mxu0 %v495_v10  ;;  %v512_v27 = vld [vmem:[%s678_s1 + $0xb0] sm:$0xff]   ;;  %v516_v32 = vld [vmem:[%s678_s1 + $0xb8] sm:$0xff]  }
   0xd   :  { %466 = vmatpush3.bf16.msra.mxu1 %v496_v11  ;;  %445 = vmatprep.subr.bf16.mxu0 %v497_v12 }
   0xe   :  { %467 = vmatprep.subr.bf16.mxu1 %v498_v13 }
  0x10   :  { %446 = vmatpush3.bf16.msra.mxu0 %v499_v14 }
  0x11   :  { %468 = vmatpush3.bf16.msra.mxu1 %v500_v15  ;;  %447 = vmatprep.subr.bf16.mxu0 %v501_v16 }
  0x12   :  { %469 = vmatprep.subr.bf16.mxu1 %v502_v17 }
  0x14   :  { %448 = vmatpush3.bf16.msra.mxu0 %v503_v18 }
  0x15   :  { %470 = vmatpush3.bf16.msra.mxu1 %v504_v19  ;;  %449 = vmatprep.subr.bf16.mxu0 %v505_v20 }
  0x16   :  { %471 = vmatprep.subr.bf16.mxu1 %v506_v21 }
  0x18   :  { %450 = vmatpush3.bf16.msra.mxu0 %v507_v22 }
  0x19   :  { %472 = vmatpush3.bf16.msra.mxu1 %v508_v23  ;;  %451 = vmatprep.subr.bf16.mxu0 %v509_v24 }
  0x1a   :  { %473 = vmatprep.subr.bf16.mxu1 %v510_v25 }
  0x1c   :  { %452 = vmatpush3.bf16.msra.mxu0 %v511_v26 }
  0x1d   :  { %474 = vmatpush3.bf16.msra.mxu1 %v512_v27  ;;  %453 = vmatprep.subr.bf16.mxu0 %v513_v28 }
  0x1e   :  { %475 = vmatprep.subr.bf16.mxu1 %v514_v29 }
  0x20   :  { %454 = vmatpush3.bf16.msra.mxu0 %v515_v31 }
  0x21   :  { %476 = vmatpush3.bf16.msra.mxu1 %v516_v32 }
  0x22   :  { %8 = vsyncpa [#allocation3], 0  ;;  %v96_v37 = vcombine.high %v406_v33, %v406_v33  ;;  %v99_v38 = vunpack.c.0.s8 %v98_v35  ;;  %v405_v45 = vld [vmem:[%s679_s2] ss:$0 sm:$0xff]  ;;  %s542_s0 = smov [#allocation2]   ;;  %vm389_vm0 = vcmask 74752  }
  0x23   :  { %s397_s25 = sshll.u32 %s542_s0, 4  ;;  %s398_s25 = int_to_ptr.vmem [resolvable:$true] %s397_s25 }
  0x24   :  { %v102_v39 = vsub.s32 %v99_v38, %v101_v36  ;;  %s517_s26 = scalar_lea.vmem %s398_s25, 32  ;;  %p522_p1 = scmp.lt.s32.totalorder %s398_s25, %s398_s25 }
  0x25   :  { %p518_p0 = scmp.ne.s32.totalorder %s398_s25, %s517_s26  ;;  %p523_p2 = scmp.lt.s32.totalorder %s517_s26, %s517_s26 }
  0x26   :  { %v110_v40 = vrot.slane %v96_v37, %v102_v39  ;;  %v103_v41 = vrot.slane %v406_v33, %v102_v39 }
  0x27   :  { %p524_p3 = por %p523_p2, %p522_p1 }
  0x28   :  { %341 = vmatprep.mubr.bf16.mxu0 %v110_v40  ;;  %v112_v42 = vcombine.high %v110_v40, %v110_v40  ;;  %v111_v43 = vcombine.high %v103_v41, %v103_v41 }
  0x29   :  { %342 = vmatmul.mubr.bf16.vlgmr.msra.gmra.mrb[0].mxu0 %v103_v41  ;;  %p525_p4 = pnand %p524_p3, %p518_p0 }
  0x2a   :  { %381 = vmatprep.mubr.bf16.mxu1 %v112_v42 }
  0x2b   :  { %382 = vmatmul.mubr.bf16.vlgmr.msra.gmra.mrb[0].mxu1 %v111_v43 }
  0xfc   :  { %v455_v44 = vpop.f32.mrb[0].mxu0 }
  0xfd   :  { %v456_v46 = vpop.f32.mrb[1].mxu0 }
  0xfe   :  { %v477_v47 = vpop.f32.mrb[0].mxu1  ;;  %v457_v48 = vadd.f32 %v456_v46, %v455_v44  ;;  %v458_v49 = vpop.f32.mrb[2].mxu0 }
  0xff   :  { %v478_v50 = vpop.f32.mrb[1].mxu1  ;;  %v459_v51 = vpop.f32.mrb[3].mxu0 }
 0x100   :  { %v344_v52 = vadd.f32 %v457_v48, %v405_v45  ;;  %v479_v53 = vadd.f32 %v478_v50, %v477_v47  ;;  %v480_v54 = vpop.f32.mrb[2].mxu1 }
 0x101   :  { %v481_v55 = vpop.f32.mrb[3].mxu1 }
 0x102   :  { %v384_v56 = vadd.f32 %v479_v53, %v344_v52 }
 0x104   :  { %390 = vst.msk [vmem:[#allocation2] sm:$0x3] %vm389_vm0, %v384_v56 }
 0x105   :  { %528 = shalt.err (!%p525_p4)
}
 0x106   :  { %s529_s28 = scalar_lea.hbm %s680_s3, 32 }
 0x107   :  { %p530_p5 = scmp.ne.s32.totalorder %s680_s3, %s529_s28  ;;  %p533_p6 = scmp.lt.u32.totalorder %s529_s28, %s680_s3 }
 0x109   :  { %p535_p7 = pnand %p533_p6, %p530_p5 }
 0x10b   :  { %538 = shalt.err (!%p535_p7)
}
 0x10c   :  { %400 = dma.vmem_to_hbm [thread:$0]  %s398_s25, 32, %s680_s3, [#allocation3]  }
 0x10d   :  { %539 = dma.done.wait [#allocation3], 32  }
 0x10e   :  { %540 = vsyncadd [#allocation3], 4294967264 }
 0x10f   :  { %404 = vsyncpa [#allocation3], 1 }

</bundles_post_ra>
